<compile_context>
chip_gen: v7x
topology: tpu7x:2x2x1
jax: 0.10.0
libtpu: 0.0.40
codegen_flags: <defaults>
</compile_context>

<pallas_src>
import numpy as np
import jax
import jax.numpy as jnp
from jax import lax
from jax.experimental import pallas as pl
from jax.experimental.pallas import tpu as pltpu

# ----------------------------------------------------------------------------
# Sizes (small stand-in for the 224x224 torch input; architecture widths kept)
# ----------------------------------------------------------------------------
B = 2
H = W = 16                # input spatial
CIN = 3
C = 64                    # conv channels
HIDDEN = 1000             # torch classifier hidden width
HIDDEN_PAD = 1024         # padded to a multiple of 128 (zero padding, exact)
N_CLS = 2

K1 = 3 * 3 * CIN          # 27 im2col features for conv1
K1_PAD = 32               # padded contraction dim (zeros)
M1 = B * H * W            # 512 conv1 output rows: b*H*W + h*W + w

H1 = W1 = H // 2          # 8 after pool1
CH = H1 + 2               # 10: padded image height inside the conv2 canvas
CWP = W1 + 2              # 10: padded image width  inside the conv2 canvas
CROWS = B * CH * CWP      # 200: both padded images stacked vertically (flat rows)
M2S = (B - 1) * CH * CWP + (H1 - 1) * CWP + W1   # 178: span of valid conv2 rows
P1_LEN = M1 - (W + 1)     # 495: rows of the pool1 neighbour-max array
P2_LEN = M2S - (CWP + 1)  # 167: rows of the pool2 neighbour-max array

H2 = W2 = H1 // 2         # 4 after pool2
NPOS = H2 * W2            # 16 spatial positions feeding the classifier
FLAT = NPOS * C           # 1024 classifier input features


# ----------------------------------------------------------------------------
# Fused forward kernel (single invocation, batch stacked on the row axis)
# ----------------------------------------------------------------------------
def _cnn_kernel(x_ref, w1_ref, b1_ref, sel1_ref, w2_ref, b2_ref, sel2_ref,
                fc1w_ref, fc1b_ref, fc2wt_ref, fc2b_ref, o_ref):
    f32 = jnp.float32
    bf16 = jnp.bfloat16

    # ---- conv1 (im2col done on host) + folded BN + ReLU ----------------------
    y1 = jnp.dot(x_ref[...], w1_ref[...], preferred_element_type=f32)   # (M1, C)
    y1 = jnp.maximum(y1 + b1_ref[...], 0.0)

    # ---- maxpool 2x2: neighbour maxima (slices) + one gather matmul ----------
    # The gather also embeds the pooled image into the zero-padded conv2 canvas
    # (all-zero selector rows produce the halo + inter-batch gap).
    p1 = jnp.maximum(jnp.maximum(y1[0:P1_LEN], y1[1:P1_LEN + 1]),
                     jnp.maximum(y1[W:W + P1_LEN], y1[W + 1:W + 1 + P1_LEN]))
    canvas = jnp.dot(sel1_ref[...], p1.astype(bf16),
                     preferred_element_type=f32)                         # (CROWS, C)

    # ---- conv2: 9 taps as row-shifted slices of the flat canvas --------------
    acc = None
    for dy in range(3):
        for dx in range(3):
            o = dy * CWP + dx
            t = jnp.dot(canvas[o:o + M2S, :].astype(bf16), w2_ref[dy, dx],
                        preferred_element_type=f32)
            acc = t if acc is None else acc + t
    y2 = jnp.maximum(acc + b2_ref[...], 0.0)                             # (M2S, C)

    # ---- maxpool 2x2 + flatten-order gather (rows ordered q*B + b) -----------
    p2 = jnp.maximum(jnp.maximum(y2[0:P2_LEN], y2[1:P2_LEN + 1]),
                     jnp.maximum(y2[CWP:CWP + P2_LEN],
                                 y2[CWP + 1:CWP + 1 + P2_LEN]))
    pooled = jnp.dot(sel2_ref[...], p2.astype(bf16),
                     preferred_element_type=f32)                         # (NPOS*B, C)

    # ---- classifier ----------------------------------------------------------
    # fc1: 16 position-block bf16 matmuls (M=B), 4 independent chains, tree-summed.
    # TODO(synk): a single (B,1024)x(1024,1024) matmul needs a sublane->lane
    # relayout of `pooled` that Mosaic does not reliably lower; blocked form kept.
    groups = []
    for g in range(4):
        acc_h = None
        for i in range(4):
            q = 4 * g + i
            part = jnp.dot(pooled[B * q:B * (q + 1), :].astype(bf16),
                           fc1w_ref[C * q:C * (q + 1), :],
                           preferred_element_type=f32)
            acc_h = part if acc_h is None else acc_h + part
        groups.append(acc_h)
    h = (groups[0] + groups[1]) + (groups[2] + groups[3]) + fc1b_ref[...]

    # fc2 with host-transposed weight: contract the last dims (trans_b matmul).
    out = lax.dot_general(h.astype(bf16), fc2wt_ref[...],
                          (((1,), (1,)), ((), ())),
                          preferred_element_type=f32) + fc2b_ref[...]
    o_ref[...] = out


def _forward_pallas(x_cols, w1, b1, sel1, w2, b2, sel2, fc1w, fc1b, fc2wt, fc2b):
    return pl.pallas_call(
        _cnn_kernel,
        out_shape=jax.ShapeDtypeStruct((B, N_CLS), jnp.float32),
        grid=(1,),
        in_specs=[
            pl.BlockSpec((M1, K1_PAD), lambda i: (0, 0)),
            pl.BlockSpec((K1_PAD, C), lambda i: (0, 0)),
            pl.BlockSpec((1, C), lambda i: (0, 0)),
            pl.BlockSpec((CROWS, P1_LEN), lambda i: (0, 0)),
            pl.BlockSpec((3, 3, C, C), lambda i: (0, 0, 0, 0)),
            pl.BlockSpec((1, C), lambda i: (0, 0)),
            pl.BlockSpec((NPOS * B, P2_LEN), lambda i: (0, 0)),
            pl.BlockSpec((FLAT, HIDDEN_PAD), lambda i: (0, 0)),
            pl.BlockSpec((1, HIDDEN_PAD), lambda i: (0, 0)),
            pl.BlockSpec((N_CLS, HIDDEN_PAD), lambda i: (0, 0)),
            pl.BlockSpec((1, N_CLS), lambda i: (0, 0)),
        ],
        out_specs=pl.BlockSpec((B, N_CLS), lambda i: (0, 0)),
        compiler_params=pltpu.CompilerParams(
            dimension_semantics=("arbitrary",),
        ),
    )(x_cols, w1, b1, sel1, w2, b2, sel2, fc1w, fc1b, fc2wt, fc2b)


@jax.jit
def forward(kp, x_nchw):
    # NCHW -> NHWC, zero-pad halo, host-side im2col (order: dy, dx, cin).
    x = jnp.transpose(x_nchw, (0, 2, 3, 1)).astype(jnp.float32)
    xp = jnp.pad(x, ((0, 0), (1, 1), (1, 1), (0, 0)))
    cols = jnp.concatenate(
        [xp[:, dy:dy + H, dx:dx + W, :] for dy in range(3) for dx in range(3)],
        axis=-1)                                                  # (B, H, W, 27)
    cols = cols.reshape(M1, K1)
    cols = jnp.pad(cols, ((0, 0), (0, K1_PAD - K1))).astype(jnp.bfloat16)
    return _forward_pallas(
        cols, kp["w1"], kp["b1"], kp["sel1"], kp["w2"], kp["b2"], kp["sel2"],
        kp["fc1_w"], kp["fc1_b"], kp["fc2_wt"], kp["fc2_b"])


# ----------------------------------------------------------------------------
# Parameters (torch layout / semantics) + one-time repack for the kernel
# ----------------------------------------------------------------------------
def init_params(key):
    ks = jax.random.split(key, 16)
    eps = 1e-5

    def bn_fold(kg, kb, km, kv, kcb, n):
        gamma = 1.0 + 0.1 * jax.random.normal(kg, (n,), jnp.float32)
        beta = 0.1 * jax.random.normal(kb, (n,), jnp.float32)
        mean = 0.1 * jax.random.normal(km, (n,), jnp.float32)
        var = 1.0 + 0.1 * jnp.abs(jax.random.normal(kv, (n,), jnp.float32))
        conv_b = 0.1 * jax.random.normal(kcb, (n,), jnp.float32)
        scale = gamma / jnp.sqrt(var + eps)           # inference-mode BN folded
        shift = beta + scale * (conv_b - mean)        # together with the conv bias
        return scale, shift

    p = {}
    p["w1"] = 0.05 * jax.random.normal(ks[0], (3, 3, CIN, C), jnp.float32)   # HWIO
    p["scale1"], p["shift1"] = bn_fold(ks[1], ks[2], ks[3], ks[4], ks[5], C)
    p["w2"] = 0.05 * jax.random.normal(ks[6], (3, 3, C, C), jnp.float32)
    p["scale2"], p["shift2"] = bn_fold(ks[7], ks[8], ks[9], ks[10], ks[11], C)
    # fc1 rows follow torch's x.view(B, -1) on NCHW, i.e. (c, h, w) flatten order.
    p["fc1_w"] = 0.02 * jax.random.normal(ks[12], (FLAT, HIDDEN), jnp.float32)
    p["fc1_b"] = 0.02 * jax.random.normal(ks[13], (HIDDEN,), jnp.float32)
    p["fc2_w"] = 0.02 * jax.random.normal(ks[14], (HIDDEN, N_CLS), jnp.float32)
    p["fc2_b"] = 0.02 * jax.random.normal(ks[15], (N_CLS,), jnp.float32)
    return p


def prepare_kernel_params(p):
    """One-time host repack: BN scale folded into conv weights (bf16), im2col
    weight layout, 0/1 pooling/gather selectors (bf16), fc1 rows permuted to the
    kernel's (q, c) flatten order and padded 1000->1024, fc2 transposed."""
    bf16 = jnp.bfloat16

    # conv1 weight: HWIO * scale -> (27, C) im2col rows (dy, dx, cin), pad K to 32.
    w1 = (p["w1"] * p["scale1"]).reshape(K1, C)
    w1 = jnp.pad(w1, ((0, K1_PAD - K1), (0, 0))).astype(bf16)
    # conv2 weight: HWIO * scale, bf16.
    w2 = (p["w2"] * p["scale2"]).astype(bf16)

    # pool1 selector: conv1 neighbour-max row -> zero-padded conv2 canvas row.
    sel1 = np.zeros((CROWS, P1_LEN), np.float32)
    for b in range(B):
        for h in range(H1):
            for w in range(W1):
                dst = (b * CH + 1 + h) * CWP + (1 + w)
                src = b * H * W + (2 * h) * W + (2 * w)
                sel1[dst, src] = 1.0

    # pool2 selector: conv2 neighbour-max row -> pooled row (position-major q*B+b).
    sel2 = np.zeros((NPOS * B, P2_LEN), np.float32)
    for b in range(B):
        for qh in range(H2):
            for qw in range(W2):
                dst = (qh * W2 + qw) * B + b
                src = b * CH * CWP + (2 * qh) * CWP + (2 * qw)
                sel2[dst, src] = 1.0

    # fc1: kernel feature j = q*C + c  <-  torch feature c*NPOS + q.
    perm = (np.arange(C)[None, :] * NPOS + np.arange(NPOS)[:, None]).reshape(-1)
    pad = HIDDEN_PAD - HIDDEN
    fc1_w = jnp.pad(p["fc1_w"][perm], ((0, 0), (0, pad))).astype(bf16)
    fc1_b = jnp.pad(p["fc1_b"], (0, pad)).reshape(1, HIDDEN_PAD)
    fc2_wt = jnp.pad(p["fc2_w"], ((0, pad), (0, 0))).T.astype(bf16)   # (N_CLS, 1024)

    return {
        "w1": w1, "b1": p["shift1"].reshape(1, C),
        "sel1": jnp.asarray(sel1, dtype=bf16),
        "w2": w2, "b2": p["shift2"].reshape(1, C),
        "sel2": jnp.asarray(sel2, dtype=bf16),
        "fc1_w": fc1_w, "fc1_b": fc1_b,
        "fc2_wt": fc2_wt, "fc2_b": p["fc2_b"].reshape(1, N_CLS),
    }


# ----------------------------------------------------------------------------
# Pure-JAX reference (original module semantics, f32, NCHW flatten)
# ----------------------------------------------------------------------------
@jax.jit
def forward_reference(p, x_nchw):
    x = jnp.transpose(x_nchw, (0, 2, 3, 1)).astype(jnp.float32)

    def block(x, w, scale, shift):
        y = lax.conv_general_dilated(x, w, (1, 1), "SAME",
                                     dimension_numbers=("NHWC", "HWIO", "NHWC"))
        y = jnp.maximum(y * scale + shift, 0.0)
        return lax.reduce_window(y, -jnp.inf, lax.max,
                                 (1, 2, 2, 1), (1, 2, 2, 1), "VALID")

    h = block(x, p["w1"], p["scale1"], p["shift1"])
    h = block(h, p["w2"], p["scale2"], p["shift2"])
    flat = jnp.transpose(h, (0, 3, 1, 2)).reshape(x.shape[0], -1)  # torch x.view(B,-1)
    h = flat @ p["fc1_w"] + p["fc1_b"]
    return h @ p["fc2_w"] + p["fc2_b"]


if __name__ == "__main__":
    key = jax.random.PRNGKey(0)
    kx, kp = jax.random.split(key)
    x = jax.random.normal(kx, (B, CIN, H, W), jnp.float32)        # NCHW like torch

    params = init_params(kp)
    kparams = prepare_kernel_params(params)

    out = jax.block_until_ready(forward(kparams, x))
    assert out.shape == (B, N_CLS), out.shape

    ref = jax.block_until_ready(forward_reference(params, x))
    assert jnp.allclose(out, ref, rtol=2e-2, atol=2e-2), (out, ref)

    print("KERNEL_OK")
</pallas_src>

<mosaic_0001>
module attributes {stable_mosaic.version = 11 : i64} {
  func.func @_cnn_kernel(%arg0: i32, %arg1: memref<512x32xbf16, #tpu.memory_space<vmem>>, %arg2: memref<32x64xbf16, #tpu.memory_space<vmem>>, %arg3: memref<1x64xf32, #tpu.memory_space<vmem>>, %arg4: memref<200x495xbf16, #tpu.memory_space<vmem>>, %arg5: memref<3x3x64x64xbf16, #tpu.memory_space<vmem>>, %arg6: memref<1x64xf32, #tpu.memory_space<vmem>>, %arg7: memref<32x167xbf16, #tpu.memory_space<vmem>>, %arg8: memref<1024x1024xbf16, #tpu.memory_space<vmem>>, %arg9: memref<1x1024xf32, #tpu.memory_space<vmem>>, %arg10: memref<2x1024xbf16, #tpu.memory_space<vmem>>, %arg11: memref<1x2xf32, #tpu.memory_space<vmem>>, %arg12: memref<2x2xf32, #tpu.memory_space<vmem>>) attributes {dimension_semantics = [#tpu.dimension_semantics<arbitrary>], iteration_bounds = array<i64: 1>, scalar_prefetch = 0 : i64, scratch_operands = 0 : i64, tpu.core_type = #tpu.core_type<tc>, window_params = [{pipeline_mode = #tpu.pipeline_mode<synchronous>, transform_indices = @transform_0, window_bounds = array<i64: 512, 32>}, {pipeline_mode = #tpu.pipeline_mode<synchronous>, transform_indices = @transform_1, window_bounds = array<i64: 32, 64>}, {pipeline_mode = #tpu.pipeline_mode<synchronous>, transform_indices = @transform_2, window_bounds = array<i64: 1, 64>}, {pipeline_mode = #tpu.pipeline_mode<synchronous>, transform_indices = @transform_3, window_bounds = array<i64: 200, 495>}, {pipeline_mode = #tpu.pipeline_mode<synchronous>, transform_indices = @transform_4, window_bounds = array<i64: 3, 3, 64, 64>}, {pipeline_mode = #tpu.pipeline_mode<synchronous>, transform_indices = @transform_5, window_bounds = array<i64: 1, 64>}, {pipeline_mode = #tpu.pipeline_mode<synchronous>, transform_indices = @transform_6, window_bounds = array<i64: 32, 167>}, {pipeline_mode = #tpu.pipeline_mode<synchronous>, transform_indices = @transform_7, window_bounds = array<i64: 1024, 1024>}, {pipeline_mode = #tpu.pipeline_mode<synchronous>, transform_indices = @transform_8, window_bounds = array<i64: 1, 1024>}, {pipeline_mode = #tpu.pipeline_mode<synchronous>, transform_indices = @transform_9, window_bounds = array<i64: 2, 1024>}, {pipeline_mode = #tpu.pipeline_mode<synchronous>, transform_indices = @transform_10, window_bounds = array<i64: 1, 2>}, {pipeline_mode = #tpu.pipeline_mode<synchronous>, transform_indices = @transform_11, window_bounds = array<i64: 2, 2>}]} {
    %c0 = arith.constant 0 : index
    %c0_0 = arith.constant 0 : index
    %0 = vector.load %arg1[%c0, %c0_0] : memref<512x32xbf16, #tpu.memory_space<vmem>>, vector<512x32xbf16>
    %c0_1 = arith.constant 0 : index
    %c0_2 = arith.constant 0 : index
    %1 = vector.load %arg2[%c0_1, %c0_2] : memref<32x64xbf16, #tpu.memory_space<vmem>>, vector<32x64xbf16>
    %cst = arith.constant dense<0.000000e+00> : vector<512x64xf32>
    %2 = tpu.matmul %0, %1, %cst {dimension_numbers = #tpu.dot_dimension_numbers<[1], [0], [0], [1], [0, 0, 1, 1], [], []>} : vector<512x32xbf16>, vector<32x64xbf16>, vector<512x64xf32> -> vector<512x64xf32>
    %c0_3 = arith.constant 0 : index
    %c0_4 = arith.constant 0 : index
    %3 = vector.load %arg3[%c0_3, %c0_4] : memref<1x64xf32, #tpu.memory_space<vmem>>, vector<1x64xf32>
    %4 = vector.broadcast %3 : vector<1x64xf32> to vector<512x64xf32>
    %5 = arith.addf %2, %4 : vector<512x64xf32>
    %cst_5 = arith.constant 0.000000e+00 : f32
    %6 = vector.broadcast %cst_5 : f32 to vector<512x64xf32>
    %7 = arith.maximumf %5, %6 : vector<512x64xf32>
    %8 = vector.extract_strided_slice %7 {offsets = [0, 0], sizes = [495, 64], strides = [1, 1]} : vector<512x64xf32> to vector<495x64xf32>
    %9 = vector.extract_strided_slice %7 {offsets = [1, 0], sizes = [495, 64], strides = [1, 1]} : vector<512x64xf32> to vector<495x64xf32>
    %10 = arith.maximumf %8, %9 : vector<495x64xf32>
    %11 = vector.extract_strided_slice %7 {offsets = [16, 0], sizes = [495, 64], strides = [1, 1]} : vector<512x64xf32> to vector<495x64xf32>
    %12 = vector.extract_strided_slice %7 {offsets = [17, 0], sizes = [495, 64], strides = [1, 1]} : vector<512x64xf32> to vector<495x64xf32>
    %13 = arith.maximumf %11, %12 : vector<495x64xf32>
    %14 = arith.maximumf %10, %13 : vector<495x64xf32>
    %c0_6 = arith.constant 0 : index
    %c0_7 = arith.constant 0 : index
    %15 = vector.load %arg4[%c0_6, %c0_7] : memref<200x495xbf16, #tpu.memory_space<vmem>>, vector<200x495xbf16>
    %16 = arith.truncf %14 : vector<495x64xf32> to vector<495x64xbf16>
    %cst_8 = arith.constant dense<0.000000e+00> : vector<200x64xf32>
    %17 = tpu.matmul %15, %16, %cst_8 {dimension_numbers = #tpu.dot_dimension_numbers<[1], [0], [0], [1], [0, 0, 1, 1], [], []>} : vector<200x495xbf16>, vector<495x64xbf16>, vector<200x64xf32> -> vector<200x64xf32>
    %18 = vector.extract_strided_slice %17 {offsets = [0, 0], sizes = [178, 64], strides = [1, 1]} : vector<200x64xf32> to vector<178x64xf32>
    %19 = arith.truncf %18 : vector<178x64xf32> to vector<178x64xbf16>
    %c0_9 = arith.constant 0 : index
    %c0_10 = arith.constant 0 : index
    %c0_11 = arith.constant 0 : index
    %c0_12 = arith.constant 0 : index
    %20 = vector.load %arg5[%c0_9, %c0_10, %c0_11, %c0_12] : memref<3x3x64x64xbf16, #tpu.memory_space<vmem>>, vector<1x1x64x64xbf16>
    %21 = vector.shape_cast %20 : vector<1x1x64x64xbf16> to vector<64x64xbf16>
    %cst_13 = arith.constant dense<0.000000e+00> : vector<178x64xf32>
    %22 = tpu.matmul %19, %21, %cst_13 {dimension_numbers = #tpu.dot_dimension_numbers<[1], [0], [0], [1], [0, 0, 1, 1], [], []>} : vector<178x64xbf16>, vector<64x64xbf16>, vector<178x64xf32> -> vector<178x64xf32>
    %23 = vector.extract_strided_slice %17 {offsets = [1, 0], sizes = [178, 64], strides = [1, 1]} : vector<200x64xf32> to vector<178x64xf32>
    %24 = arith.truncf %23 : vector<178x64xf32> to vector<178x64xbf16>
    %c0_14 = arith.constant 0 : index
    %c1 = arith.constant 1 : index
    %c0_15 = arith.constant 0 : index
    %c0_16 = arith.constant 0 : index
    %25 = vector.load %arg5[%c0_14, %c1, %c0_15, %c0_16] : memref<3x3x64x64xbf16, #tpu.memory_space<vmem>>, vector<1x1x64x64xbf16>
    %26 = vector.shape_cast %25 : vector<1x1x64x64xbf16> to vector<64x64xbf16>
    %cst_17 = arith.constant dense<0.000000e+00> : vector<178x64xf32>
    %27 = tpu.matmul %24, %26, %cst_17 {dimension_numbers = #tpu.dot_dimension_numbers<[1], [0], [0], [1], [0, 0, 1, 1], [], []>} : vector<178x64xbf16>, vector<64x64xbf16>, vector<178x64xf32> -> vector<178x64xf32>
    %28 = arith.addf %22, %27 : vector<178x64xf32>
    %29 = vector.extract_strided_slice %17 {offsets = [2, 0], sizes = [178, 64], strides = [1, 1]} : vector<200x64xf32> to vector<178x64xf32>
    %30 = arith.truncf %29 : vector<178x64xf32> to vector<178x64xbf16>
    %c0_18 = arith.constant 0 : index
    %c2 = arith.constant 2 : index
    %c0_19 = arith.constant 0 : index
    %c0_20 = arith.constant 0 : index
    %31 = vector.load %arg5[%c0_18, %c2, %c0_19, %c0_20] : memref<3x3x64x64xbf16, #tpu.memory_space<vmem>>, vector<1x1x64x64xbf16>
    %32 = vector.shape_cast %31 : vector<1x1x64x64xbf16> to vector<64x64xbf16>
    %cst_21 = arith.constant dense<0.000000e+00> : vector<178x64xf32>
    %33 = tpu.matmul %30, %32, %cst_21 {dimension_numbers = #tpu.dot_dimension_numbers<[1], [0], [0], [1], [0, 0, 1, 1], [], []>} : vector<178x64xbf16>, vector<64x64xbf16>, vector<178x64xf32> -> vector<178x64xf32>
    %34 = arith.addf %28, %33 : vector<178x64xf32>
    %35 = vector.extract_strided_slice %17 {offsets = [10, 0], sizes = [178, 64], strides = [1, 1]} : vector<200x64xf32> to vector<178x64xf32>
    %36 = arith.truncf %35 : vector<178x64xf32> to vector<178x64xbf16>
    %c1_22 = arith.constant 1 : index
    %c0_23 = arith.constant 0 : index
    %c0_24 = arith.constant 0 : index
    %c0_25 = arith.constant 0 : index
    %37 = vector.load %arg5[%c1_22, %c0_23, %c0_24, %c0_25] : memref<3x3x64x64xbf16, #tpu.memory_space<vmem>>, vector<1x1x64x64xbf16>
    %38 = vector.shape_cast %37 : vector<1x1x64x64xbf16> to vector<64x64xbf16>
    %cst_26 = arith.constant dense<0.000000e+00> : vector<178x64xf32>
    %39 = tpu.matmul %36, %38, %cst_26 {dimension_numbers = #tpu.dot_dimension_numbers<[1], [0], [0], [1], [0, 0, 1, 1], [], []>} : vector<178x64xbf16>, vector<64x64xbf16>, vector<178x64xf32> -> vector<178x64xf32>
    %40 = arith.addf %34, %39 : vector<178x64xf32>
    %41 = vector.extract_strided_slice %17 {offsets = [11, 0], sizes = [178, 64], strides = [1, 1]} : vector<200x64xf32> to vector<178x64xf32>
    %42 = arith.truncf %41 : vector<178x64xf32> to vector<178x64xbf16>
    %c1_27 = arith.constant 1 : index
    %c1_28 = arith.constant 1 : index
    %c0_29 = arith.constant 0 : index
    %c0_30 = arith.constant 0 : index
    %43 = vector.load %arg5[%c1_27, %c1_28, %c0_29, %c0_30] : memref<3x3x64x64xbf16, #tpu.memory_space<vmem>>, vector<1x1x64x64xbf16>
    %44 = vector.shape_cast %43 : vector<1x1x64x64xbf16> to vector<64x64xbf16>
    %cst_31 = arith.constant dense<0.000000e+00> : vector<178x64xf32>
    %45 = tpu.matmul %42, %44, %cst_31 {dimension_numbers = #tpu.dot_dimension_numbers<[1], [0], [0], [1], [0, 0, 1, 1], [], []>} : vector<178x64xbf16>, vector<64x64xbf16>, vector<178x64xf32> -> vector<178x64xf32>
    %46 = arith.addf %40, %45 : vector<178x64xf32>
    %47 = vector.extract_strided_slice %17 {offsets = [12, 0], sizes = [178, 64], strides = [1, 1]} : vector<200x64xf32> to vector<178x64xf32>
    %48 = arith.truncf %47 : vector<178x64xf32> to vector<178x64xbf16>
    %c1_32 = arith.constant 1 : index
    %c2_33 = arith.constant 2 : index
    %c0_34 = arith.constant 0 : index
    %c0_35 = arith.constant 0 : index
    %49 = vector.load %arg5[%c1_32, %c2_33, %c0_34, %c0_35] : memref<3x3x64x64xbf16, #tpu.memory_space<vmem>>, vector<1x1x64x64xbf16>
    %50 = vector.shape_cast %49 : vector<1x1x64x64xbf16> to vector<64x64xbf16>
    %cst_36 = arith.constant dense<0.000000e+00> : vector<178x64xf32>
    %51 = tpu.matmul %48, %50, %cst_36 {dimension_numbers = #tpu.dot_dimension_numbers<[1], [0], [0], [1], [0, 0, 1, 1], [], []>} : vector<178x64xbf16>, vector<64x64xbf16>, vector<178x64xf32> -> vector<178x64xf32>
    %52 = arith.addf %46, %51 : vector<178x64xf32>
    %53 = vector.extract_strided_slice %17 {offsets = [20, 0], sizes = [178, 64], strides = [1, 1]} : vector<200x64xf32> to vector<178x64xf32>
    %54 = arith.truncf %53 : vector<178x64xf32> to vector<178x64xbf16>
    %c2_37 = arith.constant 2 : index
    %c0_38 = arith.constant 0 : index
    %c0_39 = arith.constant 0 : index
    %c0_40 = arith.constant 0 : index
    %55 = vector.load %arg5[%c2_37, %c0_38, %c0_39, %c0_40] : memref<3x3x64x64xbf16, #tpu.memory_space<vmem>>, vector<1x1x64x64xbf16>
    %56 = vector.shape_cast %55 : vector<1x1x64x64xbf16> to vector<64x64xbf16>
    %cst_41 = arith.constant dense<0.000000e+00> : vector<178x64xf32>
    %57 = tpu.matmul %54, %56, %cst_41 {dimension_numbers = #tpu.dot_dimension_numbers<[1], [0], [0], [1], [0, 0, 1, 1], [], []>} : vector<178x64xbf16>, vector<64x64xbf16>, vector<178x64xf32> -> vector<178x64xf32>
    %58 = arith.addf %52, %57 : vector<178x64xf32>
    %59 = vector.extract_strided_slice %17 {offsets = [21, 0], sizes = [178, 64], strides = [1, 1]} : vector<200x64xf32> to vector<178x64xf32>
    %60 = arith.truncf %59 : vector<178x64xf32> to vector<178x64xbf16>
    %c2_42 = arith.constant 2 : index
    %c1_43 = arith.constant 1 : index
    %c0_44 = arith.constant 0 : index
    %c0_45 = arith.constant 0 : index
    %61 = vector.load %arg5[%c2_42, %c1_43, %c0_44, %c0_45] : memref<3x3x64x64xbf16, #tpu.memory_space<vmem>>, vector<1x1x64x64xbf16>
    %62 = vector.shape_cast %61 : vector<1x1x64x64xbf16> to vector<64x64xbf16>
    %cst_46 = arith.constant dense<0.000000e+00> : vector<178x64xf32>
    %63 = tpu.matmul %60, %62, %cst_46 {dimension_numbers = #tpu.dot_dimension_numbers<[1], [0], [0], [1], [0, 0, 1, 1], [], []>} : vector<178x64xbf16>, vector<64x64xbf16>, vector<178x64xf32> -> vector<178x64xf32>
    %64 = arith.addf %58, %63 : vector<178x64xf32>
    %65 = vector.extract_strided_slice %17 {offsets = [22, 0], sizes = [178, 64], strides = [1, 1]} : vector<200x64xf32> to vector<178x64xf32>
    %66 = arith.truncf %65 : vector<178x64xf32> to vector<178x64xbf16>
    %c2_47 = arith.constant 2 : index
    %c2_48 = arith.constant 2 : index
    %c0_49 = arith.constant 0 : index
    %c0_50 = arith.constant 0 : index
    %67 = vector.load %arg5[%c2_47, %c2_48, %c0_49, %c0_50] : memref<3x3x64x64xbf16, #tpu.memory_space<vmem>>, vector<1x1x64x64xbf16>
    %68 = vector.shape_cast %67 : vector<1x1x64x64xbf16> to vector<64x64xbf16>
    %cst_51 = arith.constant dense<0.000000e+00> : vector<178x64xf32>
    %69 = tpu.matmul %66, %68, %cst_51 {dimension_numbers = #tpu.dot_dimension_numbers<[1], [0], [0], [1], [0, 0, 1, 1], [], []>} : vector<178x64xbf16>, vector<64x64xbf16>, vector<178x64xf32> -> vector<178x64xf32>
    %70 = arith.addf %64, %69 : vector<178x64xf32>
    %c0_52 = arith.constant 0 : index
    %c0_53 = arith.constant 0 : index
    %71 = vector.load %arg6[%c0_52, %c0_53] : memref<1x64xf32, #tpu.memory_space<vmem>>, vector<1x64xf32>
    %72 = vector.broadcast %71 : vector<1x64xf32> to vector<178x64xf32>
    %73 = arith.addf %70, %72 : vector<178x64xf32>
    %cst_54 = arith.constant 0.000000e+00 : f32
    %74 = vector.broadcast %cst_54 : f32 to vector<178x64xf32>
    %75 = arith.maximumf %73, %74 : vector<178x64xf32>
    %76 = vector.extract_strided_slice %75 {offsets = [0, 0], sizes = [167, 64], strides = [1, 1]} : vector<178x64xf32> to vector<167x64xf32>
    %77 = vector.extract_strided_slice %75 {offsets = [1, 0], sizes = [167, 64], strides = [1, 1]} : vector<178x64xf32> to vector<167x64xf32>
    %78 = arith.maximumf %76, %77 : vector<167x64xf32>
    %79 = vector.extract_strided_slice %75 {offsets = [10, 0], sizes = [167, 64], strides = [1, 1]} : vector<178x64xf32> to vector<167x64xf32>
    %80 = vector.extract_strided_slice %75 {offsets = [11, 0], sizes = [167, 64], strides = [1, 1]} : vector<178x64xf32> to vector<167x64xf32>
    %81 = arith.maximumf %79, %80 : vector<167x64xf32>
    %82 = arith.maximumf %78, %81 : vector<167x64xf32>
    %c0_55 = arith.constant 0 : index
    %c0_56 = arith.constant 0 : index
    %83 = vector.load %arg7[%c0_55, %c0_56] : memref<32x167xbf16, #tpu.memory_space<vmem>>, vector<32x167xbf16>
    %84 = arith.truncf %82 : vector<167x64xf32> to vector<167x64xbf16>
    %cst_57 = arith.constant dense<0.000000e+00> : vector<32x64xf32>
    %85 = tpu.matmul %83, %84, %cst_57 {dimension_numbers = #tpu.dot_dimension_numbers<[1], [0], [0], [1], [0, 0, 1, 1], [], []>} : vector<32x167xbf16>, vector<167x64xbf16>, vector<32x64xf32> -> vector<32x64xf32>
    %86 = vector.extract_strided_slice %85 {offsets = [0, 0], sizes = [2, 64], strides = [1, 1]} : vector<32x64xf32> to vector<2x64xf32>
    %87 = arith.truncf %86 : vector<2x64xf32> to vector<2x64xbf16>
    %c0_58 = arith.constant 0 : index
    %c0_59 = arith.constant 0 : index
    %88 = vector.load %arg8[%c0_58, %c0_59] : memref<1024x1024xbf16, #tpu.memory_space<vmem>>, vector<64x1024xbf16>
    %cst_60 = arith.constant dense<0.000000e+00> : vector<2x1024xf32>
    %89 = tpu.matmul %87, %88, %cst_60 {dimension_numbers = #tpu.dot_dimension_numbers<[1], [0], [0], [1], [0, 0, 1, 1], [], []>} : vector<2x64xbf16>, vector<64x1024xbf16>, vector<2x1024xf32> -> vector<2x1024xf32>
    %90 = vector.extract_strided_slice %85 {offsets = [2, 0], sizes = [2, 64], strides = [1, 1]} : vector<32x64xf32> to vector<2x64xf32>
    %91 = arith.truncf %90 : vector<2x64xf32> to vector<2x64xbf16>
    %c64 = arith.constant 64 : index
    %c0_61 = arith.constant 0 : index
    %92 = vector.load %arg8[%c64, %c0_61] : memref<1024x1024xbf16, #tpu.memory_space<vmem>>, vector<64x1024xbf16>
    %cst_62 = arith.constant dense<0.000000e+00> : vector<2x1024xf32>
    %93 = tpu.matmul %91, %92, %cst_62 {dimension_numbers = #tpu.dot_dimension_numbers<[1], [0], [0], [1], [0, 0, 1, 1], [], []>} : vector<2x64xbf16>, vector<64x1024xbf16>, vector<2x1024xf32> -> vector<2x1024xf32>
    %94 = arith.addf %89, %93 : vector<2x1024xf32>
    %95 = vector.extract_strided_slice %85 {offsets = [4, 0], sizes = [2, 64], strides = [1, 1]} : vector<32x64xf32> to vector<2x64xf32>
    %96 = arith.truncf %95 : vector<2x64xf32> to vector<2x64xbf16>
    %c128 = arith.constant 128 : index
    %c0_63 = arith.constant 0 : index
    %97 = vector.load %arg8[%c128, %c0_63] : memref<1024x1024xbf16, #tpu.memory_space<vmem>>, vector<64x1024xbf16>
    %cst_64 = arith.constant dense<0.000000e+00> : vector<2x1024xf32>
    %98 = tpu.matmul %96, %97, %cst_64 {dimension_numbers = #tpu.dot_dimension_numbers<[1], [0], [0], [1], [0, 0, 1, 1], [], []>} : vector<2x64xbf16>, vector<64x1024xbf16>, vector<2x1024xf32> -> vector<2x1024xf32>
    %99 = arith.addf %94, %98 : vector<2x1024xf32>
    %100 = vector.extract_strided_slice %85 {offsets = [6, 0], sizes = [2, 64], strides = [1, 1]} : vector<32x64xf32> to vector<2x64xf32>
    %101 = arith.truncf %100 : vector<2x64xf32> to vector<2x64xbf16>
    %c192 = arith.constant 192 : index
    %c0_65 = arith.constant 0 : index
    %102 = vector.load %arg8[%c192, %c0_65] : memref<1024x1024xbf16, #tpu.memory_space<vmem>>, vector<64x1024xbf16>
    %cst_66 = arith.constant dense<0.000000e+00> : vector<2x1024xf32>
    %103 = tpu.matmul %101, %102, %cst_66 {dimension_numbers = #tpu.dot_dimension_numbers<[1], [0], [0], [1], [0, 0, 1, 1], [], []>} : vector<2x64xbf16>, vector<64x1024xbf16>, vector<2x1024xf32> -> vector<2x1024xf32>
    %104 = arith.addf %99, %103 : vector<2x1024xf32>
    %105 = vector.extract_strided_slice %85 {offsets = [8, 0], sizes = [2, 64], strides = [1, 1]} : vector<32x64xf32> to vector<2x64xf32>
    %106 = arith.truncf %105 : vector<2x64xf32> to vector<2x64xbf16>
    %c256 = arith.constant 256 : index
    %c0_67 = arith.constant 0 : index
    %107 = vector.load %arg8[%c256, %c0_67] : memref<1024x1024xbf16, #tpu.memory_space<vmem>>, vector<64x1024xbf16>
    %cst_68 = arith.constant dense<0.000000e+00> : vector<2x1024xf32>
    %108 = tpu.matmul %106, %107, %cst_68 {dimension_numbers = #tpu.dot_dimension_numbers<[1], [0], [0], [1], [0, 0, 1, 1], [], []>} : vector<2x64xbf16>, vector<64x1024xbf16>, vector<2x1024xf32> -> vector<2x1024xf32>
    %109 = vector.extract_strided_slice %85 {offsets = [10, 0], sizes = [2, 64], strides = [1, 1]} : vector<32x64xf32> to vector<2x64xf32>
    %110 = arith.truncf %109 : vector<2x64xf32> to vector<2x64xbf16>
    %c320 = arith.constant 320 : index
    %c0_69 = arith.constant 0 : index
    %111 = vector.load %arg8[%c320, %c0_69] : memref<1024x1024xbf16, #tpu.memory_space<vmem>>, vector<64x1024xbf16>
    %cst_70 = arith.constant dense<0.000000e+00> : vector<2x1024xf32>
    %112 = tpu.matmul %110, %111, %cst_70 {dimension_numbers = #tpu.dot_dimension_numbers<[1], [0], [0], [1], [0, 0, 1, 1], [], []>} : vector<2x64xbf16>, vector<64x1024xbf16>, vector<2x1024xf32> -> vector<2x1024xf32>
    %113 = arith.addf %108, %112 : vector<2x1024xf32>
    %114 = vector.extract_strided_slice %85 {offsets = [12, 0], sizes = [2, 64], strides = [1, 1]} : vector<32x64xf32> to vector<2x64xf32>
    %115 = arith.truncf %114 : vector<2x64xf32> to vector<2x64xbf16>
    %c384 = arith.constant 384 : index
    %c0_71 = arith.constant 0 : index
    %116 = vector.load %arg8[%c384, %c0_71] : memref<1024x1024xbf16, #tpu.memory_space<vmem>>, vector<64x1024xbf16>
    %cst_72 = arith.constant dense<0.000000e+00> : vector<2x1024xf32>
    %117 = tpu.matmul %115, %116, %cst_72 {dimension_numbers = #tpu.dot_dimension_numbers<[1], [0], [0], [1], [0, 0, 1, 1], [], []>} : vector<2x64xbf16>, vector<64x1024xbf16>, vector<2x1024xf32> -> vector<2x1024xf32>
    %118 = arith.addf %113, %117 : vector<2x1024xf32>
    %119 = vector.extract_strided_slice %85 {offsets = [14, 0], sizes = [2, 64], strides = [1, 1]} : vector<32x64xf32> to vector<2x64xf32>
    %120 = arith.truncf %119 : vector<2x64xf32> to vector<2x64xbf16>
    %c448 = arith.constant 448 : index
    %c0_73 = arith.constant 0 : index
    %121 = vector.load %arg8[%c448, %c0_73] : memref<1024x1024xbf16, #tpu.memory_space<vmem>>, vector<64x1024xbf16>
    %cst_74 = arith.constant dense<0.000000e+00> : vector<2x1024xf32>
    %122 = tpu.matmul %120, %121, %cst_74 {dimension_numbers = #tpu.dot_dimension_numbers<[1], [0], [0], [1], [0, 0, 1, 1], [], []>} : vector<2x64xbf16>, vector<64x1024xbf16>, vector<2x1024xf32> -> vector<2x1024xf32>
    %123 = arith.addf %118, %122 : vector<2x1024xf32>
    %124 = vector.extract_strided_slice %85 {offsets = [16, 0], sizes = [2, 64], strides = [1, 1]} : vector<32x64xf32> to vector<2x64xf32>
    %125 = arith.truncf %124 : vector<2x64xf32> to vector<2x64xbf16>
    %c512 = arith.constant 512 : index
    %c0_75 = arith.constant 0 : index
    %126 = vector.load %arg8[%c512, %c0_75] : memref<1024x1024xbf16, #tpu.memory_space<vmem>>, vector<64x1024xbf16>
    %cst_76 = arith.constant dense<0.000000e+00> : vector<2x1024xf32>
    %127 = tpu.matmul %125, %126, %cst_76 {dimension_numbers = #tpu.dot_dimension_numbers<[1], [0], [0], [1], [0, 0, 1, 1], [], []>} : vector<2x64xbf16>, vector<64x1024xbf16>, vector<2x1024xf32> -> vector<2x1024xf32>
    %128 = vector.extract_strided_slice %85 {offsets = [18, 0], sizes = [2, 64], strides = [1, 1]} : vector<32x64xf32> to vector<2x64xf32>
    %129 = arith.truncf %128 : vector<2x64xf32> to vector<2x64xbf16>
    %c576 = arith.constant 576 : index
    %c0_77 = arith.constant 0 : index
    %130 = vector.load %arg8[%c576, %c0_77] : memref<1024x1024xbf16, #tpu.memory_space<vmem>>, vector<64x1024xbf16>
    %cst_78 = arith.constant dense<0.000000e+00> : vector<2x1024xf32>
    %131 = tpu.matmul %129, %130, %cst_78 {dimension_numbers = #tpu.dot_dimension_numbers<[1], [0], [0], [1], [0, 0, 1, 1], [], []>} : vector<2x64xbf16>, vector<64x1024xbf16>, vector<2x1024xf32> -> vector<2x1024xf32>
    %132 = arith.addf %127, %131 : vector<2x1024xf32>
    %133 = vector.extract_strided_slice %85 {offsets = [20, 0], sizes = [2, 64], strides = [1, 1]} : vector<32x64xf32> to vector<2x64xf32>
    %134 = arith.truncf %133 : vector<2x64xf32> to vector<2x64xbf16>
    %c640 = arith.constant 640 : index
    %c0_79 = arith.constant 0 : index
    %135 = vector.load %arg8[%c640, %c0_79] : memref<1024x1024xbf16, #tpu.memory_space<vmem>>, vector<64x1024xbf16>
    %cst_80 = arith.constant dense<0.000000e+00> : vector<2x1024xf32>
    %136 = tpu.matmul %134, %135, %cst_80 {dimension_numbers = #tpu.dot_dimension_numbers<[1], [0], [0], [1], [0, 0, 1, 1], [], []>} : vector<2x64xbf16>, vector<64x1024xbf16>, vector<2x1024xf32> -> vector<2x1024xf32>
    %137 = arith.addf %132, %136 : vector<2x1024xf32>
    %138 = vector.extract_strided_slice %85 {offsets = [22, 0], sizes = [2, 64], strides = [1, 1]} : vector<32x64xf32> to vector<2x64xf32>
    %139 = arith.truncf %138 : vector<2x64xf32> to vector<2x64xbf16>
    %c704 = arith.constant 704 : index
    %c0_81 = arith.constant 0 : index
    %140 = vector.load %arg8[%c704, %c0_81] : memref<1024x1024xbf16, #tpu.memory_space<vmem>>, vector<64x1024xbf16>
    %cst_82 = arith.constant dense<0.000000e+00> : vector<2x1024xf32>
    %141 = tpu.matmul %139, %140, %cst_82 {dimension_numbers = #tpu.dot_dimension_numbers<[1], [0], [0], [1], [0, 0, 1, 1], [], []>} : vector<2x64xbf16>, vector<64x1024xbf16>, vector<2x1024xf32> -> vector<2x1024xf32>
    %142 = arith.addf %137, %141 : vector<2x1024xf32>
    %143 = vector.extract_strided_slice %85 {offsets = [24, 0], sizes = [2, 64], strides = [1, 1]} : vector<32x64xf32> to vector<2x64xf32>
    %144 = arith.truncf %143 : vector<2x64xf32> to vector<2x64xbf16>
    %c768 = arith.constant 768 : index
    %c0_83 = arith.constant 0 : index
    %145 = vector.load %arg8[%c768, %c0_83] : memref<1024x1024xbf16, #tpu.memory_space<vmem>>, vector<64x1024xbf16>
    %cst_84 = arith.constant dense<0.000000e+00> : vector<2x1024xf32>
    %146 = tpu.matmul %144, %145, %cst_84 {dimension_numbers = #tpu.dot_dimension_numbers<[1], [0], [0], [1], [0, 0, 1, 1], [], []>} : vector<2x64xbf16>, vector<64x1024xbf16>, vector<2x1024xf32> -> vector<2x1024xf32>
    %147 = vector.extract_strided_slice %85 {offsets = [26, 0], sizes = [2, 64], strides = [1, 1]} : vector<32x64xf32> to vector<2x64xf32>
    %148 = arith.truncf %147 : vector<2x64xf32> to vector<2x64xbf16>
    %c832 = arith.constant 832 : index
    %c0_85 = arith.constant 0 : index
    %149 = vector.load %arg8[%c832, %c0_85] : memref<1024x1024xbf16, #tpu.memory_space<vmem>>, vector<64x1024xbf16>
    %cst_86 = arith.constant dense<0.000000e+00> : vector<2x1024xf32>
    %150 = tpu.matmul %148, %149, %cst_86 {dimension_numbers = #tpu.dot_dimension_numbers<[1], [0], [0], [1], [0, 0, 1, 1], [], []>} : vector<2x64xbf16>, vector<64x1024xbf16>, vector<2x1024xf32> -> vector<2x1024xf32>
    %151 = arith.addf %146, %150 : vector<2x1024xf32>
    %152 = vector.extract_strided_slice %85 {offsets = [28, 0], sizes = [2, 64], strides = [1, 1]} : vector<32x64xf32> to vector<2x64xf32>
    %153 = arith.truncf %152 : vector<2x64xf32> to vector<2x64xbf16>
    %c896 = arith.constant 896 : index
    %c0_87 = arith.constant 0 : index
    %154 = vector.load %arg8[%c896, %c0_87] : memref<1024x1024xbf16, #tpu.memory_space<vmem>>, vector<64x1024xbf16>
    %cst_88 = arith.constant dense<0.000000e+00> : vector<2x1024xf32>
    %155 = tpu.matmul %153, %154, %cst_88 {dimension_numbers = #tpu.dot_dimension_numbers<[1], [0], [0], [1], [0, 0, 1, 1], [], []>} : vector<2x64xbf16>, vector<64x1024xbf16>, vector<2x1024xf32> -> vector<2x1024xf32>
    %156 = arith.addf %151, %155 : vector<2x1024xf32>
    %157 = vector.extract_strided_slice %85 {offsets = [30, 0], sizes = [2, 64], strides = [1, 1]} : vector<32x64xf32> to vector<2x64xf32>
    %158 = arith.truncf %157 : vector<2x64xf32> to vector<2x64xbf16>
    %c960 = arith.constant 960 : index
    %c0_89 = arith.constant 0 : index
    %159 = vector.load %arg8[%c960, %c0_89] : memref<1024x1024xbf16, #tpu.memory_space<vmem>>, vector<64x1024xbf16>
    %cst_90 = arith.constant dense<0.000000e+00> : vector<2x1024xf32>
    %160 = tpu.matmul %158, %159, %cst_90 {dimension_numbers = #tpu.dot_dimension_numbers<[1], [0], [0], [1], [0, 0, 1, 1], [], []>} : vector<2x64xbf16>, vector<64x1024xbf16>, vector<2x1024xf32> -> vector<2x1024xf32>
    %161 = arith.addf %156, %160 : vector<2x1024xf32>
    %162 = arith.addf %104, %123 : vector<2x1024xf32>
    %163 = arith.addf %142, %161 : vector<2x1024xf32>
    %164 = arith.addf %162, %163 : vector<2x1024xf32>
    %c0_91 = arith.constant 0 : index
    %c0_92 = arith.constant 0 : index
    %165 = vector.load %arg9[%c0_91, %c0_92] : memref<1x1024xf32, #tpu.memory_space<vmem>>, vector<1x1024xf32>
    %166 = vector.broadcast %165 : vector<1x1024xf32> to vector<2x1024xf32>
    %167 = arith.addf %164, %166 : vector<2x1024xf32>
    %168 = arith.truncf %167 : vector<2x1024xf32> to vector<2x1024xbf16>
    %c0_93 = arith.constant 0 : index
    %c0_94 = arith.constant 0 : index
    %169 = vector.load %arg10[%c0_93, %c0_94] : memref<2x1024xbf16, #tpu.memory_space<vmem>>, vector<2x1024xbf16>
    %cst_95 = arith.constant dense<0.000000e+00> : vector<2x2xf32>
    %170 = tpu.matmul %168, %169, %cst_95 {dimension_numbers = #tpu.dot_dimension_numbers<[1], [1], [0], [0], [0, 0, 1, 0], [], []>} : vector<2x1024xbf16>, vector<2x1024xbf16>, vector<2x2xf32> -> vector<2x2xf32>
    %c0_96 = arith.constant 0 : index
    %c0_97 = arith.constant 0 : index
    %171 = vector.load %arg11[%c0_96, %c0_97] : memref<1x2xf32, #tpu.memory_space<vmem>>, vector<1x2xf32>
    %172 = vector.broadcast %171 : vector<1x2xf32> to vector<2x2xf32>
    %173 = arith.addf %170, %172 : vector<2x2xf32>
    %c0_98 = arith.constant 0 : index
    %c0_99 = arith.constant 0 : index
    %174 = vector.load %arg12[%c0_98, %c0_99] : memref<2x2xf32, #tpu.memory_space<vmem>>, vector<2x2xf32>
    tpu.vector_store %arg12[%c0_98, %c0_99], %173 {strides = array<i32>} : memref<2x2xf32, #tpu.memory_space<vmem>>, vector<2x2xf32>,
    return
  }
  func.func @transform_0(%arg0: i32) -> (i32, i32) {
    %c0_i32 = arith.constant 0 : i32
    %c0_i32_0 = arith.constant 0 : i32
    %c0_i32_1 = arith.constant 0 : i32
    return %c0_i32, %c0_i32_0 : i32, i32
  }
  func.func @transform_1(%arg0: i32) -> (i32, i32) {
    %c0_i32 = arith.constant 0 : i32
    %c0_i32_0 = arith.constant 0 : i32
    %c0_i32_1 = arith.constant 0 : i32
    return %c0_i32, %c0_i32_0 : i32, i32
  }
  func.func @transform_2(%arg0: i32) -> (i32, i32) {
    %c0_i32 = arith.constant 0 : i32
    %c0_i32_0 = arith.constant 0 : i32
    %c0_i32_1 = arith.constant 0 : i32
    return %c0_i32, %c0_i32_0 : i32, i32
  }
  func.func @transform_3(%arg0: i32) -> (i32, i32) {
    %c0_i32 = arith.constant 0 : i32
    %c0_i32_0 = arith.constant 0 : i32
    %c0_i32_1 = arith.constant 0 : i32
    return %c0_i32, %c0_i32_0 : i32, i32
  }
  func.func @transform_4(%arg0: i32) -> (i32, i32, i32, i32) {
    %c0_i32 = arith.constant 0 : i32
    %c0_i32_0 = arith.constant 0 : i32
    %c0_i32_1 = arith.constant 0 : i32
    %c0_i32_2 = arith.constant 0 : i32
    %c0_i32_3 = arith.constant 0 : i32
    return %c0_i32, %c0_i32_0, %c0_i32_1, %c0_i32_2 : i32, i32, i32, i32
  }
  func.func @transform_5(%arg0: i32) -> (i32, i32) {
    %c0_i32 = arith.constant 0 : i32
    %c0_i32_0 = arith.constant 0 : i32
    %c0_i32_1 = arith.constant 0 : i32
    return %c0_i32, %c0_i32_0 : i32, i32
  }
  func.func @transform_6(%arg0: i32) -> (i32, i32) {
    %c0_i32 = arith.constant 0 : i32
    %c0_i32_0 = arith.constant 0 : i32
    %c0_i32_1 = arith.constant 0 : i32
    return %c0_i32, %c0_i32_0 : i32, i32
  }
  func.func @transform_7(%arg0: i32) -> (i32, i32) {
    %c0_i32 = arith.constant 0 : i32
    %c0_i32_0 = arith.constant 0 : i32
    %c0_i32_1 = arith.constant 0 : i32
    return %c0_i32, %c0_i32_0 : i32, i32
  }
  func.func @transform_8(%arg0: i32) -> (i32, i32) {
    %c0_i32 = arith.constant 0 : i32
    %c0_i32_0 = arith.constant 0 : i32
    %c0_i32_1 = arith.constant 0 : i32
    return %c0_i32, %c0_i32_0 : i32, i32
  }
  func.func @transform_9(%arg0: i32) -> (i32, i32) {
    %c0_i32 = arith.constant 0 : i32
    %c0_i32_0 = arith.constant 0 : i32
    %c0_i32_1 = arith.constant 0 : i32
    return %c0_i32, %c0_i32_0 : i32, i32
  }
  func.func @transform_10(%arg0: i32) -> (i32, i32) {
    %c0_i32 = arith.constant 0 : i32
    %c0_i32_0 = arith.constant 0 : i32
    %c0_i32_1 = arith.constant 0 : i32
    return %c0_i32, %c0_i32_0 : i32, i32
  }
  func.func @transform_11(%arg0: i32) -> (i32, i32) {
    %c0_i32 = arith.constant 0 : i32
    %c0_i32_0 = arith.constant 0 : i32
    %c0_i32_1 = arith.constant 0 : i32
    return %c0_i32, %c0_i32_0 : i32, i32
  }
}

</mosaic_0001>

<bundles_post_ra>
// kernel: forward.1
= control target key start
LH: loop header
LB: loop body
LE: loop exit
PB: predicated region body
PF: predicated region fallthrough
CT: control target
= control target key end

     0   :  { %16 = vsyncpa [#allocation3], 0  ;;  %s14748_s0 = inlined_call_operand.vmem [shape: bf16[512,32], index: 0, kind: input, shape index: {}]   ;;  %s14749_s1 = inlined_call_operand.hbm [shape: bf16[32,64], index: 1, kind: input, shape index: {}]   ;;  %s14750_s2 = inlined_call_operand.hbm [shape: f32[1,64], index: 2, kind: input, shape index: {}]   ;;  %s14751_s3 = inlined_call_operand.hbm [shape: bf16[200,495], index: 3, kind: input, shape index: {}]   ;;  %s14752_s4 = inlined_call_operand.hbm [shape: bf16[3,3,64,64], index: 4, kind: input, shape index: {}]   ;;  %s14753_s5 = inlined_call_operand.hbm [shape: f32[1,64], index: 5, kind: input, shape index: {}]   ;;  %s14754_s6 = inlined_call_operand.hbm [shape: bf16[32,167], index: 6, kind: input, shape index: {}]   ;;  %s14755_s7 = inlined_call_operand.hbm [shape: bf16[1024,1024], index: 7, kind: input, shape index: {}]   ;;  %s14756_s8 = inlined_call_operand.hbm [shape: f32[1,1024], index: 8, kind: input, shape index: {}]   ;;  %s14757_s9 = inlined_call_operand.hbm [shape: bf16[2,1024], index: 9, kind: input, shape index: {}]   ;;  %s14758_s10 = inlined_call_operand.hbm [shape: f32[1,2], index: 10, kind: input, shape index: {}]   ;;  %s14759_s11 = inlined_call_operand.hbm [shape: f32[2,2], index: 11, kind: output, shape index: {}]  }
   0x1   :  { %17 = vsyncpa [#allocation6], 0 }
   0x2   :  { %18 = vsyncpa [#allocation9], 0 }
   0x3   :  { %19 = vsyncpa [#allocation12], 0 }
   0x4   :  { %20 = vsyncpa [#allocation15], 0 }
   0x5   :  { %21 = vsyncpa [#allocation18], 0 }
   0x6   :  { %22 = vsyncpa [#allocation4], 0  ;;  %s12866_s17 = smov [#allocation5]   ;;  %s12610_s21 = scalar_lea.hbm %s14750_s2, 16 }
   0x7   :  { %s43_s18 = sshll.u32 %s12866_s17, 4  ;;  %p12611_p0 = scmp.ne.s32.totalorder %s14750_s2, %s12610_s21  ;;  %s44_s18 = int_to_ptr.vmem [resolvable:$true] %s43_s18 }
   0x8   :  { %p12614_p1 = scmp.lt.u32.totalorder %s12610_s21, %s14750_s2 }
   0xa   :  { %p12616_p2 = pnand %p12614_p1, %p12611_p0 }
   0xc   :  { %12619 = shalt.err (!%p12616_p2)
}
   0xd   :  { %s12620_s26 = scalar_lea.vmem %s44_s18, 16  ;;  %s12624_s27 = scalar_lea.vmem %s44_s18, 32 }
   0xe   :  { %p12621_p3 = scmp.ne.s32.totalorder %s44_s18, %s12620_s26  ;;  %p12625_p4 = scmp.lt.s32.totalorder %s44_s18, %s44_s18 }
   0xf   :  { %p12626_p5 = scmp.lt.s32.totalorder %s12624_s27, %s12620_s26 }
  0x11   :  { %p12627_p6 = por %p12626_p5, %p12625_p4 }
  0x13   :  { %p12628_p7 = pnand %p12627_p6, %p12621_p3 }
  0x15   :  { %12631 = shalt.err (!%p12628_p7)
}
  0x16   :  { %46 = dma.hbm_to_vmem [thread:$0]  %s14750_s2, 16, %s44_s18, [#allocation6]  }
  0x17   :  { %s12867_s30 = smov [#allocation8]   ;;  %s12868_s13 = smov [#allocation11]  }
  0x18   :  { %s64_s12 = sshll.u32 %s12867_s30, 4  ;;  %s86_s14 = sshll.u32 %s12868_s13, 4  ;;  %s65_s12 = int_to_ptr.vmem [resolvable:$true] %s64_s12  ;;  %s87_s14 = int_to_ptr.vmem [resolvable:$true] %s86_s14 }
  0x19   :  { %s12632_s17 = scalar_lea.hbm %s14752_s4, 4608 }
  0x1a   :  { %p12633_p8 = scmp.ne.s32.totalorder %s14752_s4, %s12632_s17  ;;  %p12636_p9 = scmp.lt.u32.totalorder %s12632_s17, %s14752_s4 }
  0x1c   :  { %p12638_p10 = pnand %p12636_p9, %p12633_p8 }
  0x1e   :  { %12641 = shalt.err (!%p12638_p10)
}
  0x1f   :  { %s12642_s2 = scalar_lea.vmem %s65_s12, 4608  ;;  %p12647_p12 = scmp.lt.s32.totalorder %s65_s12, %s65_s12 }
  0x20   :  { %p12643_p11 = scmp.ne.s32.totalorder %s65_s12, %s12642_s2  ;;  %p12648_p13 = scmp.lt.s32.totalorder %s12642_s2, %s12642_s2 }
  0x22   :  { %p12649_p0 = por %p12648_p13, %p12647_p12 }
  0x24   :  { %p12650_p1 = pnand %p12649_p0, %p12643_p11 }
  0x26   :  { %12653 = shalt.err (!%p12650_p1)
}
  0x27   :  { %s12869_s18 = smov 64   ;;  %s12870_s23 = smov 4  }
  0x28   :  { %70 = dma.hbm_to_vmem [thread:$0]  %s14752_s4, 4608, %s65_s12, [#allocation9], %s12869_s18, %s12869_s18, %s12870_s23  }
  0x29   :  { %s12654_s28 = scalar_lea.hbm %s14754_s6, 512 }
  0x2a   :  { %p12655_p2 = scmp.ne.s32.totalorder %s14754_s6, %s12654_s28  ;;  %p12658_p3 = scmp.lt.u32.totalorder %s12654_s28, %s14754_s6 }
  0x2c   :  { %p12660_p4 = pnand %p12658_p3, %p12655_p2 }
  0x2e   :  { %12663 = shalt.err (!%p12660_p4)
}
  0x2f   :  { %s12664_s16 = scalar_lea.vmem %s87_s14, 512  ;;  %p12669_p6 = scmp.lt.s32.totalorder %s87_s14, %s87_s14 }
  0x30   :  { %p12665_p5 = scmp.ne.s32.totalorder %s87_s14, %s12664_s16  ;;  %p12670_p7 = scmp.lt.s32.totalorder %s12664_s16, %s12664_s16 }
  0x32   :  { %p12671_p8 = por %p12670_p7, %p12669_p6 }
  0x34   :  { %p12672_p9 = pnand %p12671_p8, %p12665_p5 }
  0x36   :  { %12675 = shalt.err (!%p12672_p9)
}
  0x37   :  { %s12871_s4 = smov 128   ;;  %s12872_s12 = smov 8  }
  0x38   :  { %92 = dma.hbm_to_vmem [thread:$0]  %s14754_s6, 512, %s87_s14, [#allocation12], %s12871_s4, %s12871_s4, %s12872_s12  }
  0x39   :  { %s12873_s20 = smov [#allocation14]   ;;  %s12874_s22 = smov [#allocation2]  }
  0x3a   :  { %s111_s21 = sshll.u32 %s12873_s20, 4  ;;  %s30_s2 = sshll.u32 %s12874_s22, 4  ;;  %s112_s21 = int_to_ptr.vmem [resolvable:$true] %s111_s21  ;;  %s31_s2 = int_to_ptr.vmem [resolvable:$true] %s30_s2 }
  0x3b   :  { %s12676_s26 = scalar_lea.hbm %s14756_s8, 128 }
  0x3c   :  { %p12677_p10 = scmp.ne.s32.totalorder %s14756_s8, %s12676_s26  ;;  %p12680_p11 = scmp.lt.u32.totalorder %s12676_s26, %s14756_s8 }
  0x3e   :  { %p12682_p12 = pnand %p12680_p11, %p12677_p10 }
  0x40   :  { %12685 = shalt.err (!%p12682_p12)
}
  0x41   :  { %s12686_s6 = scalar_lea.vmem %s112_s21, 128  ;;  %p12691_p0 = scmp.lt.s32.totalorder %s112_s21, %s112_s21 }
  0x42   :  { %p12687_p13 = scmp.ne.s32.totalorder %s112_s21, %s12686_s6  ;;  %p12692_p1 = scmp.lt.s32.totalorder %s12686_s6, %s12686_s6 }
  0x44   :  { %p12693_p2 = por %p12692_p1, %p12691_p0 }
  0x46   :  { %p12694_p3 = pnand %p12693_p2, %p12687_p13 }
  0x48   :  { %12697 = shalt.err (!%p12694_p3)
}
  0x49   :  { %114 = dma.hbm_to_vmem [thread:$0]  %s14756_s8, 128, %s112_s21, [#allocation15]  }
  0x4a   :  { %s12698_s4 = scalar_lea.hbm %s14749_s1, 256 }
  0x4b   :  { %p12699_p4 = scmp.ne.s32.totalorder %s14749_s1, %s12698_s4  ;;  %p12702_p5 = scmp.lt.u32.totalorder %s12698_s4, %s14749_s1 }
  0x4d   :  { %p12704_p6 = pnand %p12702_p5, %p12699_p4 }
  0x4f   :  { %12707 = shalt.err (!%p12704_p6)
}
  0x50   :  { %s12708_s22 = scalar_lea.vmem %s31_s2, 256  ;;  %p12713_p8 = scmp.lt.s32.totalorder %s31_s2, %s31_s2 }
  0x51   :  { %p12709_p7 = scmp.ne.s32.totalorder %s31_s2, %s12708_s22  ;;  %p12714_p9 = scmp.lt.s32.totalorder %s12708_s22, %s12708_s22 }
  0x53   :  { %p12715_p10 = por %p12714_p9, %p12713_p8 }
  0x55   :  { %p12716_p11 = pnand %p12715_p10, %p12709_p7 }
  0x57   :  { %12719 = shalt.err (!%p12716_p11)
}
  0x58   :  { %36 = dma.hbm_to_vmem [thread:$0]  %s14749_s1, 256, %s31_s2, [#allocation3], %s12869_s18, %s12869_s18, %s12870_s23  }
  0x59   :  { %s12875_s24 = smov [#allocation7]   ;;  %s12720_s28 = scalar_lea.hbm %s14751_s3, 6400 }
  0x5a   :  { %s52_s25 = sshll.u32 %s12875_s24, 4  ;;  %p12721_p12 = scmp.ne.s32.totalorder %s14751_s3, %s12720_s28  ;;  %s53_s25 = int_to_ptr.vmem [resolvable:$true] %s52_s25 }
  0x5b   :  { %p12724_p13 = scmp.lt.u32.totalorder %s12720_s28, %s14751_s3 }
  0x5d   :  { %p12726_p0 = pnand %p12724_p13, %p12721_p12 }
  0x5f   :  { %12729 = shalt.err (!%p12726_p0)
}
  0x60   :  { %s12730_s13 = scalar_lea.vmem %s53_s25, 6400  ;;  %p12735_p2 = scmp.lt.s32.totalorder %s53_s25, %s53_s25 }
  0x61   :  { %p12731_p1 = scmp.ne.s32.totalorder %s53_s25, %s12730_s13  ;;  %p12736_p3 = scmp.lt.s32.totalorder %s12730_s13, %s12730_s13 }
  0x63   :  { %p12737_p4 = por %p12736_p3, %p12735_p2 }
  0x65   :  { %p12738_p5 = pnand %p12737_p4, %p12731_p1 }
  0x67   :  { %12741 = shalt.err (!%p12738_p5)
}
  0x68   :  { %s12876_s1 = smov 256   ;;  %s12877_s18 = smov 16  }
  0x69   :  { %58 = dma.hbm_to_vmem [thread:$0]  %s14751_s3, 6400, %s53_s25, [#allocation6], %s12876_s1, %s12876_s1, %s12877_s18  }
  0x6a   :  { %s12878_s15 = smov [#allocation10]   ;;  %s12879_s4 = smov [#allocation13]  }
  0x6b   :  { %s77_s16 = sshll.u32 %s12878_s15, 4  ;;  %s98_s12 = sshll.u32 %s12879_s4, 4  ;;  %s78_s16 = int_to_ptr.vmem [resolvable:$true] %s77_s16  ;;  %s13026_s12 = int_to_ptr.vmem [resolvable:$true] %s98_s12 }
  0x6c   :  { %s12742_s20 = scalar_lea.hbm %s14753_s5, 16 }
  0x6d   :  { %p12743_p6 = scmp.ne.s32.totalorder %s14753_s5, %s12742_s20  ;;  %p12746_p7 = scmp.lt.u32.totalorder %s12742_s20, %s14753_s5 }
  0x6f   :  { %p12748_p8 = pnand %p12746_p7, %p12743_p6 }
  0x71   :  { %12751 = shalt.err (!%p12748_p8)
}
  0x72   :  { %s12752_s3 = scalar_lea.vmem %s78_s16, 16  ;;  %s12756_s25 = scalar_lea.vmem %s78_s16, 32 }
  0x73   :  { %p12753_p9 = scmp.ne.s32.totalorder %s78_s16, %s12752_s3  ;;  %p12757_p10 = scmp.lt.s32.totalorder %s78_s16, %s78_s16 }
  0x74   :  { %p12758_p11 = scmp.lt.s32.totalorder %s12756_s25, %s12752_s3 }
  0x76   :  { %p12759_p12 = por %p12758_p11, %p12757_p10 }
  0x78   :  { %p12760_p13 = pnand %p12759_p12, %p12753_p9 }
  0x7a   :  { %12763 = shalt.err (!%p12760_p13)
}
  0x7b   :  { %80 = dma.hbm_to_vmem [thread:$0]  %s14753_s5, 16, %s78_s16, [#allocation9]  }
  0x7c   :  { %s12764_s30 = scalar_lea.hbm %s14755_s7, 65536 }
  0x7d   :  { %p12765_p0 = scmp.ne.s32.totalorder %s14755_s7, %s12764_s30  ;;  %p12768_p1 = scmp.lt.u32.totalorder %s12764_s30, %s14755_s7 }
  0x7f   :  { %p12770_p2 = pnand %p12768_p1, %p12765_p0 }
  0x81   :  { %12773 = shalt.err (!%p12770_p2)
}
  0x82   :  { %s12774_s18 = scalar_lea.vmem %s13026_s12, 65536  ;;  %p12779_p4 = scmp.lt.s32.totalorder %s13026_s12, %s13026_s12 }
  0x83   :  { %p12775_p3 = scmp.ne.s32.totalorder %s13026_s12, %s12774_s18  ;;  %p12780_p5 = scmp.lt.s32.totalorder %s12774_s18, %s12774_s18 }
  0x85   :  { %p12781_p6 = por %p12780_p5, %p12779_p4 }
  0x87   :  { %p12782_p7 = pnand %p12781_p6, %p12775_p3 }
  0x89   :  { %12785 = shalt.err (!%p12782_p7)
}
  0x8a   :  { %s12880_s5 = smov 512   ;;  %s12881_s23 = smov 32  }
  0x8b   :  { %104 = dma.hbm_to_vmem [thread:$0]  %s14755_s7, 65536, %s13026_s12, [#allocation12], %s12880_s5, %s12880_s5, %s12881_s23  }
  0x8c   :  { %s12882_s16 = smov [#allocation16]   ;;  %s12883_s17 = smov [#allocation17]  }
  0x8d   :  { %s121_s4 = sshll.u32 %s12882_s16, 4  ;;  %s131_s19 = sshll.u32 %s12883_s17, 4  ;;  %s122_s4 = int_to_ptr.vmem [resolvable:$true] %s121_s4  ;;  %s132_s19 = int_to_ptr.vmem [resolvable:$true] %s131_s19 }
  0x8e   :  { %s12786_s8 = scalar_lea.hbm %s14757_s9, 128 }
  0x8f   :  { %p12787_p8 = scmp.ne.s32.totalorder %s14757_s9, %s12786_s8  ;;  %p12790_p9 = scmp.lt.u32.totalorder %s12786_s8, %s14757_s9 }
  0x91   :  { %p12792_p10 = pnand %p12790_p9, %p12787_p8 }
  0x93   :  { %12795 = shalt.err (!%p12792_p10)
}
  0x94   :  { %s12796_s7 = scalar_lea.vmem %s122_s4, 128  ;;  %p12801_p12 = scmp.lt.s32.totalorder %s122_s4, %s122_s4 }
  0x95   :  { %p12797_p11 = scmp.ne.s32.totalorder %s122_s4, %s12796_s7  ;;  %p12802_p13 = scmp.lt.s32.totalorder %s12796_s7, %s12796_s7 }
  0x97   :  { %p12803_p0 = por %p12802_p13, %p12801_p12 }
  0x99   :  { %p12804_p1 = pnand %p12803_p0, %p12797_p11 }
  0x9b   :  { %12807 = shalt.err (!%p12804_p1)
}
  0x9c   :  { %124 = dma.hbm_to_vmem [thread:$0]  %s14757_s9, 128, %s122_s4, [#allocation15]  }
  0x9d   :  { %s12808_s29 = scalar_lea.hbm %s14758_s10, 16 }
  0x9e   :  { %p12809_p2 = scmp.ne.s32.totalorder %s14758_s10, %s12808_s29  ;;  %p12812_p3 = scmp.lt.u32.totalorder %s12808_s29, %s14758_s10 }
  0xa0   :  { %p12814_p4 = pnand %p12812_p3, %p12809_p2 }
  0xa2   :  { %12817 = shalt.err (!%p12814_p4)
}
  0xa3   :  { %s12818_s1 = scalar_lea.vmem %s132_s19, 16  ;;  %s12822_s18 = scalar_lea.vmem %s132_s19, 32 }
  0xa4   :  { %p12819_p5 = scmp.ne.s32.totalorder %s132_s19, %s12818_s1  ;;  %p12823_p6 = scmp.lt.s32.totalorder %s132_s19, %s132_s19 }
  0xa5   :  { %p12824_p7 = scmp.lt.s32.totalorder %s12822_s18, %s12818_s1 }
  0xa7   :  { %p12825_p8 = por %p12824_p7, %p12823_p6 }
  0xa9   :  { %p12826_p9 = pnand %p12825_p8, %p12819_p5 }
  0xab   :  { %12829 = shalt.err (!%p12826_p9)
}
  0xac   :  { %134 = dma.hbm_to_vmem [thread:$0]  %s14758_s10, 16, %s132_s19, [#allocation18]  }
  0xad   :  { %12852 = dma.done.wait [#allocation3], 256  }
  0xae   :  { %12853 = vsyncadd [#allocation3], 4294967040 }
  0xaf   :  { %12854 = dma.done.wait [#allocation6], 6416  }
  0xb0   :  { %12855 = vsyncadd [#allocation6], 4294960880 }
  0xb1   :  { %12856 = dma.done.wait [#allocation9], 4624  }
  0xb2   :  { %12857 = vsyncadd [#allocation9], 4294962672 }
  0xb3   :  { %12858 = dma.done.wait [#allocation12], 66048  }
  0xb4   :  { %12859 = vsyncadd [#allocation12], 4294901248 }
  0xb5   :  { %12860 = dma.done.wait [#allocation15], 256  }
  0xb6   :  { %12861 = vsyncadd [#allocation15], 4294967040 }
  0xb7   :  { %12862 = dma.done.wait [#allocation18], 16  }
  0xb8   :  { %12863 = vsyncadd [#allocation18], 4294967280  ;;  %v12455_v0 = vld [vmem:[#allocation2] sm:$0xff]   ;;  %v12456_v1 = vld [vmem:[#allocation2 + $0x8] sm:$0xff]   ;;  %vm413_vm0 = vcmask 261120   ;;  %v14761_v34 = vmov 0  }
  0xb9   :  { %11904 = vmatprep.subr.bf16.mxu0 %v12455_v0  ;;  %v12457_v2 = vld [vmem:[%s14748_s0] sm:$0xff]   ;;  %v12458_v3 = vld [vmem:[%s14748_s0 + $0x8] sm:$0xff]   ;;  %v12459_v4 = vld [vmem:[%s14748_s0 + $0x10] sm:$0xff]   ;;  %vm925_vm1 = vcmask 1046528   ;;  %vm1569_vm2 = vcmask 908288   ;;  %vm1609_vm3 = vcmask 1047552  }
  0xba   :  { %11905 = vmatpush3.bf16.msra.mxu0 %v12455_v0  ;;  %11908 = vmatprep.mubr.msk.bf16.mxu0 %vm413_vm0, %v12457_v2  ;;  %v12460_v5 = vld [vmem:[%s14748_s0 + $0x18] sm:$0xff]   ;;  %v12461_v6 = vld [vmem:[%s14748_s0 + $0x20] sm:$0xff]   ;;  %v12462_v7 = vld [vmem:[%s14748_s0 + $0x28] sm:$0xff]   ;;  %vm1916_vm4 = vsmask.f32 7424  ;;  %vm2036_vm5 = vcmask 523264  }
  0xbb   :  { %11906 = vmatprep.subr.bf16.mxu0 %v12456_v1  ;;  %v12463_v8 = vld [vmem:[%s14748_s0 + $0x30] sm:$0xff]   ;;  %v12464_v9 = vld [vmem:[%s14748_s0 + $0x38] sm:$0xff]   ;;  %v12465_v10 = vld [vmem:[%s14748_s0 + $0x40] sm:$0xff]   ;;  %vm3237_vm6 = vcmask 1045504   ;;  %vm2909_vm7 = vsmask.f32 6400 }
  0xbc   :  { %v12466_v11 = vld [vmem:[%s14748_s0 + $0x48] sm:$0xff]   ;;  %v12467_v12 = vld [vmem:[%s14748_s0 + $0x50] sm:$0xff]   ;;  %v12468_v13 = vld [vmem:[%s14748_s0 + $0x58] sm:$0xff]   ;;  %vm3728_vm8 = vsmask.f32 5376  ;;  %vm4006_vm9 = vcmask 1044480  }
  0xbd   :  { %v12469_v14 = vld [vmem:[%s14748_s0 + $0x60] sm:$0xff]   ;;  %v12470_v15 = vld [vmem:[%s14748_s0 + $0x68] sm:$0xff]   ;;  %v12471_v16 = vld [vmem:[%s14748_s0 + $0x70] sm:$0xff]   ;;  %vm4551_vm10 = vcmask 318464   ;;  %vm4558_vm11 = vcmask 1042432   ;;  %vm4559_vm12 = vcmask 1043456  }
  0xbe   :  { %11907 = vmatpush3.bf16.msra.mxu0 %v12456_v1  ;;  %v12472_v17 = vld [vmem:[%s14748_s0 + $0x78] sm:$0xff]   ;;  %v12473_v18 = vld [vmem:[%s14748_s0 + $0x80] sm:$0xff]   ;;  %v12474_v19 = vld [vmem:[%s14748_s0 + $0x88] sm:$0xff]   ;;  %vm10750_vm13 = vcmask 9216  }
  0xbf   :  { %v12475_v20 = vld [vmem:[%s14748_s0 + $0x90] sm:$0xff]   ;;  %v12476_v21 = vld [vmem:[%s14748_s0 + $0x98] sm:$0xff]   ;;  %v12477_v22 = vld [vmem:[%s14748_s0 + $0xa0] sm:$0xff]   ;;  %1751 = vmatprep.subr.bf16.mxu0 %v14761_v34 }
  0xc0   :  { %v12478_v23 = vld [vmem:[%s14748_s0 + $0xa8] sm:$0xff]   ;;  %v12479_v24 = vld [vmem:[%s14748_s0 + $0xb0] sm:$0xff]   ;;  %v12480_v25 = vld [vmem:[%s14748_s0 + $0xb8] sm:$0xff]  }
  0xc1   :  { %11909 = vmatmul.mubr.msk.bf16.vlgmr.msra.gmra.mrb[0].mxu0 %vm413_vm0, %v12458_v3  ;;  %v12481_v26 = vld [vmem:[%s14748_s0 + $0xc0] sm:$0xff]   ;;  %v12482_v27 = vld [vmem:[%s14748_s0 + $0xc8] sm:$0xff]   ;;  %v12483_v28 = vld [vmem:[%s14748_s0 + $0xd0] sm:$0xff]  }
  0xc2   :  { %11912 = vmatprep.mubr.msk.bf16.mxu0 %vm413_vm0, %v12459_v4  ;;  %v12484_v29 = vld [vmem:[%s14748_s0 + $0xd8] sm:$0xff]   ;;  %v12485_v30 = vld [vmem:[%s14748_s0 + $0xe0] sm:$0xff]   ;;  %v12486_v31 = vld [vmem:[%s14748_s0 + $0xe8] sm:$0xff]  }
  0xc3   :  { %v12487_v32 = vld [vmem:[%s14748_s0 + $0xf0] sm:$0xff]   ;;  %v12488_v33 = vld [vmem:[%s14748_s0 + $0xf8] sm:$0xff]   ;;  %s12887_s0 = smov [#allocation19]  }
  0xc4   :  { %v13210_v35 = vld [vmem:[#allocation5] ss:$0 sm:$0xff]  ;;  %v12491_v61 = vld [vmem:[#allocation7 + $0x4] ss:$16 sps:$4 sm:$0xff]   ;;  %s10758_s17 = sshll.u32 %s12887_s0, 4  ;;  %s10759_s17 = int_to_ptr.vmem [resolvable:$true] %s10758_s17 }
  0xc5   :  { %1647 = vmatprep.mubr.bf16.mxu1 %v12491_v61  ;;  %s12830_s19 = scalar_lea.vmem %s10759_s17, 32  ;;  %p12835_p11 = scmp.lt.s32.totalorder %s10759_s17, %s10759_s17 }
  0xc6   :  { %p12831_p10 = scmp.ne.s32.totalorder %s10759_s17, %s12830_s19  ;;  %p12836_p12 = scmp.lt.s32.totalorder %s12830_s19, %s12830_s19 }
  0xc8   :  { %p12837_p13 = por %p12836_p12, %p12835_p11 }
  0xc9   :  { %11913 = vmatmul.mubr.msk.bf16.gmra.mrb[4].mxu0 %vm413_vm0, %v12460_v5 }
  0xca   :  { %11916 = vmatprep.mubr.msk.bf16.mxu0 %vm413_vm0, %v12461_v6  ;;  %p12838_p0 = pnand %p12837_p13, %p12831_p10 }
  0xd1   :  { %11917 = vmatmul.mubr.msk.bf16.gmra.mrb[8].mxu0 %vm413_vm0, %v12462_v7 }
  0xd2   :  { %11920 = vmatprep.mubr.msk.bf16.mxu0 %vm413_vm0, %v12463_v8 }
  0xd9   :  { %11921 = vmatmul.mubr.msk.bf16.gmra.mrb[12].mxu0 %vm413_vm0, %v12464_v9 }
  0xda   :  { %11924 = vmatprep.mubr.msk.bf16.mxu0 %vm413_vm0, %v12465_v10 }
  0xe1   :  { %11925 = vmatmul.mubr.msk.bf16.gmra.mrb[16].mxu0 %vm413_vm0, %v12466_v11  ;;  %v12494_v11 = vld [vmem:[#allocation7 + $0xc] ss:$16 sps:$4 sm:$0xff]  }
  0xe2   :  { %11928 = vmatprep.mubr.msk.bf16.mxu0 %vm413_vm0, %v12467_v12 }
  0xe9   :  { %11929 = vmatmul.mubr.msk.bf16.gmra.mrb[20].mxu0 %vm413_vm0, %v12468_v13 }
  0xea   :  { %11932 = vmatprep.mubr.msk.bf16.mxu0 %vm413_vm0, %v12469_v14 }
  0xf1   :  { %11933 = vmatmul.mubr.msk.bf16.gmra.mrb[24].mxu0 %vm413_vm0, %v12470_v15 }
  0xf2   :  { %11936 = vmatprep.mubr.msk.bf16.mxu0 %vm413_vm0, %v12471_v16 }
  0xf9   :  { %11937 = vmatmul.mubr.msk.bf16.gmra.mrb[28].mxu0 %vm413_vm0, %v12472_v17 }
  0xfa   :  { %11940 = vmatprep.mubr.msk.bf16.mxu0 %vm413_vm0, %v12473_v18 }
 0x101   :  { %11941 = vmatmul.mubr.msk.bf16.gmra.mrb[32].mxu0 %vm413_vm0, %v12474_v19 }
 0x102   :  { %11944 = vmatprep.mubr.msk.bf16.mxu0 %vm413_vm0, %v12475_v20 }
 0x109   :  { %11945 = vmatmul.mubr.msk.bf16.gmra.mrb[36].mxu0 %vm413_vm0, %v12476_v21 }
 0x10a   :  { %11948 = vmatprep.mubr.msk.bf16.mxu0 %vm413_vm0, %v12477_v22 }
 0x111   :  { %11949 = vmatmul.mubr.msk.bf16.gmra.mrb[40].mxu0 %vm413_vm0, %v12478_v23 }
 0x112   :  { %11952 = vmatprep.mubr.msk.bf16.mxu0 %vm413_vm0, %v12479_v24 }
 0x119   :  { %11953 = vmatmul.mubr.msk.bf16.gmra.mrb[44].mxu0 %vm413_vm0, %v12480_v25 }
 0x11a   :  { %11956 = vmatprep.mubr.msk.bf16.mxu0 %vm413_vm0, %v12481_v26 }
 0x121   :  { %11957 = vmatmul.mubr.msk.bf16.gmra.mrb[48].mxu0 %vm413_vm0, %v12482_v27 }
 0x122   :  { %11960 = vmatprep.mubr.msk.bf16.mxu0 %vm413_vm0, %v12483_v28 }
 0x129   :  { %11961 = vmatmul.mubr.msk.bf16.gmra.mrb[52].mxu0 %vm413_vm0, %v12484_v29 }
 0x12a   :  { %11964 = vmatprep.mubr.msk.bf16.mxu0 %vm413_vm0, %v12485_v30 }
 0x131   :  { %11965 = vmatmul.mubr.msk.bf16.gmra.mrb[56].mxu0 %vm413_vm0, %v12486_v31 }
 0x132   :  { %11968 = vmatprep.mubr.msk.bf16.mxu0 %vm413_vm0, %v12487_v32 }
 0x139   :  { %11969 = vmatmul.mubr.msk.bf16.gmra.mrb[60].mxu0 %vm413_vm0, %v12488_v33 }
 0x13a   :  { %10891 = vmatprep.mubr.msk.bf16.mxu0 %vm1569_vm2, %v12494_v11 }
 0x194   :  { %v11910_v36 = vpop.f32.mrb[0].mxu0 }
 0x195   :  { %v553_v37 = vadd.f32 %v11910_v36, %v13210_v35  ;;  %v544_v38 = vpop.f32.mrb[1].mxu0 }
 0x196   :  { %v545_v39 = vadd.f32 %v13210_v35, %v544_v38  ;;  %v11911_v40 = vpop.f32.mrb[2].mxu0 }
 0x197   :  { %v801_v41 = vmax.f32 %v553_v37, 0.0  ;;  %v556_v42 = vadd.f32 %v11911_v40, %v13210_v35  ;;  %v547_v43 = vpop.f32.mrb[3].mxu0 }
 0x198   :  { %v799_v44 = vmax.f32 %v545_v39, 0.0  ;;  %v548_v45 = vadd.f32 %v13210_v35, %v547_v43 }
 0x199   :  { %v802_v46 = vmax.f32 %v556_v42, 0.0  ;;  %v929_v48 = vrot.slane %v801_v41, 1 }
 0x19a   :  { %v800_v47 = vmax.f32 %v548_v45, 0.0  ;;  %v926_v50 = vrot.slane %v799_v44, 1 }
 0x19b   :  { %v931_v49 = vrot.slane %v802_v46, 1 }
 0x19c   :  { %v927_v51 = vrot.slane %v800_v47, 1  ;;  %v11914_v52 = vpop.f32.mrb[4].mxu0 }
 0x19d   :  { %v569_v53 = vadd.f32 %v11914_v52, %v13210_v35  ;;  %v560_v54 = vpop.f32.mrb[5].mxu0  ;;  %v932_v55 = vsel %vm925_vm1, %v929_v48, %v931_v49 }
 0x19e   :  { %v561_v56 = vadd.f32 %v13210_v35, %v560_v54  ;;  %v11915_v57 = vpop.f32.mrb[6].mxu0  ;;  %v928_v58 = vsel %vm925_vm1, %v926_v50, %v927_v51  ;;  %v930_v59 = vsel %vm925_vm1, %v927_v51, %v929_v48  ;;  %v1113_v60 = vmax.f32 %v801_v41, %v932_v55 }
 0x19f   :  { %v805_v62 = vmax.f32 %v569_v53, 0.0  ;;  %v572_v63 = vadd.f32 %v11915_v57, %v13210_v35  ;;  %v563_v0 = vpop.f32.mrb[7].mxu0  ;;  %v1111_v1 = vmax.f32 %v799_v44, %v928_v58  ;;  %v1112_v2 = vmax.f32 %v800_v47, %v930_v59 }
 0x1a0   :  { %v803_v3 = vmax.f32 %v561_v56, 0.0  ;;  %v564_v4 = vadd.f32 %v13210_v35, %v563_v0 }
 0x1a1   :  { %v806_v5 = vmax.f32 %v572_v63, 0.0  ;;  %v1185_v6 = vmax.f32 %v1111_v1, %v1113_v60  ;;  %v937_v9 = vrot.slane %v805_v62, 1 }
 0x1a2   :  { %v933_v7 = vrot.slane %v803_v3, 1  ;;  %v804_v8 = vmax.f32 %v564_v4, 0.0 }
 0x1a3   :  { %v939_v10 = vrot.slane %v806_v5, 1 }
 0x1a4   :  { %v935_v12 = vrot.slane %v804_v8, 1  ;;  %v11918_v13 = vpop.f32.mrb[8].mxu0  ;;  %v934_v14 = vsel %vm925_vm1, %v931_v49, %v933_v7 }
 0x1a5   :  { %v585_v15 = vadd.f32 %v11918_v13, %v13210_v35  ;;  %v576_v16 = vpop.f32.mrb[9].mxu0  ;;  %v1114_v17 = vmax.f32 %v802_v46, %v934_v14  ;;  %v940_v18 = vsel %vm925_vm1, %v937_v9, %v939_v10 }
 0x1a6   :  { %v938_v19 = vsel %vm925_vm1, %v935_v12, %v937_v9  ;;  %v577_v20 = vadd.f32 %v13210_v35, %v576_v16  ;;  %v11919_v21 = vpop.f32.mrb[10].mxu0  ;;  %v936_v22 = vsel %vm925_vm1, %v933_v7, %v935_v12  ;;  %v1117_v23 = vmax.f32 %v805_v62, %v940_v18 }
 0x1a7   :  { %v1116_v24 = vmax.f32 %v804_v8, %v938_v19  ;;  %v809_v25 = vmax.f32 %v585_v15, 0.0  ;;  %v588_v26 = vadd.f32 %v11919_v21, %v13210_v35  ;;  %v579_v27 = vpop.f32.mrb[11].mxu0  ;;  %v1186_v28 = vmax.f32 %v1112_v2, %v1114_v17 }
 0x1a8   :  { %v807_v29 = vmax.f32 %v577_v20, 0.0  ;;  %v580_v30 = vadd.f32 %v13210_v35, %v579_v27  ;;  %v1115_v31 = vmax.f32 %v803_v3, %v936_v22 }
 0x1a9   :  { %v810_v32 = vmax.f32 %v588_v26, 0.0  ;;  %v13232_v33 = vpack.c.bf16 %v1186_v28, %v1185_v6  ;;  %v1188_v36 = vmax.f32 %v1114_v17, %v1116_v24  ;;  %v945_v41 = vrot.slane %v809_v25, 1 }
 0x1aa   :  { %v941_v37 = vrot.slane %v807_v29, 1  ;;  %v808_v38 = vmax.f32 %v580_v30, 0.0  ;;  %v1187_v39 = vmax.f32 %v1113_v60, %v1115_v31  ;;  %v1189_v40 = vmax.f32 %v1115_v31, %v1117_v23 }
 0x1ab   :  { %v947_v42 = vrot.slane %v810_v32, 1 }
 0x1ac   :  { %v943_v43 = vrot.slane %v808_v38, 1  ;;  %v11922_v44 = vpop.f32.mrb[12].mxu0  ;;  %v13234_v45 = vpack.c.bf16 %v1188_v36, %v1187_v39  ;;  %v942_v46 = vsel %vm925_vm1, %v939_v10, %v941_v37 }
 0x1ad   :  { %v601_v47 = vadd.f32 %v11922_v44, %v13210_v35  ;;  %v592_v48 = vpop.f32.mrb[13].mxu0  ;;  %v1118_v49 = vmax.f32 %v806_v5, %v942_v46  ;;  %v948_v50 = vsel %vm925_vm1, %v945_v41, %v947_v42 }
 0x1ae   :  { %v946_v51 = vsel %vm925_vm1, %v943_v43, %v945_v41  ;;  %v593_v52 = vadd.f32 %v13210_v35, %v592_v48  ;;  %v11923_v53 = vpop.f32.mrb[14].mxu0  ;;  %v944_v54 = vsel %vm925_vm1, %v941_v37, %v943_v43  ;;  %v1121_v55 = vmax.f32 %v809_v25, %v948_v50 }
 0x1af   :  { %v1120_v56 = vmax.f32 %v808_v38, %v946_v51  ;;  %v813_v57 = vmax.f32 %v601_v47, 0.0  ;;  %v604_v58 = vadd.f32 %v11923_v53, %v13210_v35  ;;  %v595_v59 = vpop.f32.mrb[15].mxu0  ;;  %v1190_v60 = vmax.f32 %v1116_v24, %v1118_v49 }
 0x1b0   :  { %v811_v61 = vmax.f32 %v593_v52, 0.0  ;;  %v596_v62 = vadd.f32 %v13210_v35, %v595_v59  ;;  %v1119_v63 = vmax.f32 %v807_v29, %v944_v54 }
 0x1b1   :  { %v814_v0 = vmax.f32 %v604_v58, 0.0  ;;  %v13244_v1 = vpack.c.bf16 %v1190_v60, %v1189_v40  ;;  %v1192_v2 = vmax.f32 %v1118_v49, %v1120_v56  ;;  %v953_v7 = vrot.slane %v813_v57, 1 }
 0x1b2   :  { %v949_v3 = vrot.slane %v811_v61, 1  ;;  %v812_v4 = vmax.f32 %v596_v62, 0.0  ;;  %v1191_v5 = vmax.f32 %v1117_v23, %v1119_v63  ;;  %v1193_v6 = vmax.f32 %v1119_v63, %v1121_v55 }
 0x1b3   :  { %v955_v8 = vrot.slane %v814_v0, 1 }
 0x1b4   :  { %v951_v9 = vrot.slane %v812_v4, 1  ;;  %v11926_v10 = vpop.f32.mrb[16].mxu0  ;;  %v13246_v11 = vpack.c.bf16 %v1192_v2, %v1191_v5  ;;  %v950_v12 = vsel %vm925_vm1, %v947_v42, %v949_v3 }
 0x1b5   :  { %v617_v13 = vadd.f32 %v11926_v10, %v13210_v35  ;;  %v608_v14 = vpop.f32.mrb[17].mxu0  ;;  %v1122_v15 = vmax.f32 %v810_v32, %v950_v12  ;;  %v956_v16 = vsel %vm925_vm1, %v953_v7, %v955_v8 }
 0x1b6   :  { %v954_v17 = vsel %vm925_vm1, %v951_v9, %v953_v7  ;;  %v609_v18 = vadd.f32 %v13210_v35, %v608_v14  ;;  %v11927_v19 = vpop.f32.mrb[18].mxu0  ;;  %v952_v20 = vsel %vm925_vm1, %v949_v3, %v951_v9  ;;  %v1125_v21 = vmax.f32 %v813_v57, %v956_v16 }
 0x1b7   :  { %v1124_v22 = vmax.f32 %v812_v4, %v954_v17  ;;  %v817_v23 = vmax.f32 %v617_v13, 0.0  ;;  %v620_v24 = vadd.f32 %v11927_v19, %v13210_v35  ;;  %v611_v25 = vpop.f32.mrb[19].mxu0  ;;  %v1194_v26 = vmax.f32 %v1120_v56, %v1122_v15 }
 0x1b8   :  { %v815_v27 = vmax.f32 %v609_v18, 0.0  ;;  %v612_v28 = vadd.f32 %v13210_v35, %v611_v25  ;;  %v1123_v29 = vmax.f32 %v811_v61, %v952_v20 }
 0x1b9   :  { %v818_v30 = vmax.f32 %v620_v24, 0.0  ;;  %v13256_v31 = vpack.c.bf16 %v1194_v26, %v1193_v6  ;;  %v1196_v32 = vmax.f32 %v1122_v15, %v1124_v22  ;;  %v961_v40 = vrot.slane %v817_v23, 1 }
 0x1ba   :  { %v957_v36 = vrot.slane %v815_v27, 1  ;;  %v816_v37 = vmax.f32 %v612_v28, 0.0  ;;  %v1195_v38 = vmax.f32 %v1121_v55, %v1123_v29  ;;  %v1197_v39 = vmax.f32 %v1123_v29, %v1125_v21 }
 0x1bb   :  { %v963_v41 = vrot.slane %v818_v30, 1 }
 0x1bc   :  { %v959_v42 = vrot.slane %v816_v37, 1  ;;  %v11930_v43 = vpop.f32.mrb[20].mxu0  ;;  %v13258_v44 = vpack.c.bf16 %v1196_v32, %v1195_v38  ;;  %v958_v46 = vsel %vm925_vm1, %v955_v8, %v957_v36 }
 0x1bd   :  { %v633_v47 = vadd.f32 %v11930_v43, %v13210_v35  ;;  %v624_v48 = vpop.f32.mrb[21].mxu0  ;;  %v964_v49 = vsel %vm925_vm1, %v961_v40, %v963_v41  ;;  %v1126_v50 = vmax.f32 %v814_v0, %v958_v46 }
 0x1be   :  { %v625_v51 = vadd.f32 %v13210_v35, %v624_v48  ;;  %v11931_v52 = vpop.f32.mrb[22].mxu0  ;;  %v960_v53 = vsel %vm925_vm1, %v957_v36, %v959_v42  ;;  %v962_v54 = vsel %vm925_vm1, %v959_v42, %v961_v40  ;;  %v1129_v55 = vmax.f32 %v817_v23, %v964_v49 }
 0x1bf   :  { %v821_v56 = vmax.f32 %v633_v47, 0.0  ;;  %v636_v57 = vadd.f32 %v11931_v52, %v13210_v35  ;;  %v627_v58 = vpop.f32.mrb[23].mxu0  ;;  %v1127_v59 = vmax.f32 %v815_v27, %v960_v53  ;;  %v1128_v60 = vmax.f32 %v816_v37, %v962_v54 }
 0x1c0   :  { %v819_v61 = vmax.f32 %v625_v51, 0.0  ;;  %v628_v62 = vadd.f32 %v13210_v35, %v627_v58  ;;  %v1198_v63 = vmax.f32 %v1124_v22, %v1126_v50 }
 0x1c1   :  { %v822_v2 = vmax.f32 %v636_v57, 0.0  ;;  %v1201_v0 = vmax.f32 %v1127_v59, %v1129_v55  ;;  %v1199_v3 = vmax.f32 %v1125_v21, %v1127_v59  ;;  %v1200_v7 = vmax.f32 %v1126_v50, %v1128_v60 }
 0x1c2   :  { %v965_v4 = vrot.slane %v819_v61, 1  ;;  %v820_v5 = vmax.f32 %v628_v62, 0.0  ;;  %v13268_v6 = vpack.c.bf16 %v1198_v63, %v1197_v39  ;;  %v969_v8 = vrot.slane %v821_v56, 1 }
 0x1c3   :  { %v971_v9 = vrot.slane %v822_v2, 1  ;;  %v13271_v14 = vpack.c.bf16 %v1200_v7, %v1199_v3 }
 0x1c4   :  { %v967_v10 = vrot.slane %v820_v5, 1  ;;  %v11934_v12 = vpop.f32.mrb[24].mxu0  ;;  %v966_v13 = vsel %vm925_vm1, %v963_v41, %v965_v4 }
 0x1c5   :  { %v649_v15 = vadd.f32 %v11934_v12, %v13210_v35  ;;  %v640_v16 = vpop.f32.mrb[25].mxu0  ;;  %v1130_v17 = vmax.f32 %v818_v30, %v966_v13  ;;  %v972_v18 = vsel %vm925_vm1, %v969_v8, %v971_v9 }
 0x1c6   :  { %v970_v19 = vsel %vm925_vm1, %v967_v10, %v969_v8  ;;  %v641_v20 = vadd.f32 %v13210_v35, %v640_v16  ;;  %v11935_v21 = vpop.f32.mrb[26].mxu0  ;;  %v968_v22 = vsel %vm925_vm1, %v965_v4, %v967_v10  ;;  %v1133_v23 = vmax.f32 %v821_v56, %v972_v18 }
 0x1c7   :  { %v1132_v24 = vmax.f32 %v820_v5, %v970_v19  ;;  %v825_v25 = vmax.f32 %v649_v15, 0.0  ;;  %v652_v26 = vadd.f32 %v11935_v21, %v13210_v35  ;;  %v643_v27 = vpop.f32.mrb[27].mxu0  ;;  %v1202_v28 = vmax.f32 %v1128_v60, %v1130_v17 }
 0x1c8   :  { %v823_v29 = vmax.f32 %v641_v20, 0.0  ;;  %v644_v32 = vadd.f32 %v13210_v35, %v643_v27  ;;  %v1131_v30 = vmax.f32 %v819_v61, %v968_v22 }
 0x1c9   :  { %v826_v36 = vmax.f32 %v652_v26, 0.0  ;;  %v1305_v37 = vpack.c.bf16 %v1202_v28, %v1201_v0  ;;  %v1204_v38 = vmax.f32 %v1130_v17, %v1132_v24  ;;  %v977_v43 = vrot.slane %v825_v25, 1 }
 0x1ca   :  { %v973_v39 = vrot.slane %v823_v29, 1  ;;  %v824_v40 = vmax.f32 %v644_v32, 0.0  ;;  %v1203_v41 = vmax.f32 %v1129_v55, %v1131_v30  ;;  %v1205_v42 = vmax.f32 %v1131_v30, %v1133_v23 }
 0x1cb   :  { %v979_v46 = vrot.slane %v826_v36, 1  ;;  %11666 = vmatprep.subr.bf16.mxu1 %v1305_v37 }
 0x1cc   :  { %v975_v47 = vrot.slane %v824_v40, 1  ;;  %v11938_v48 = vpop.f32.mrb[28].mxu0  ;;  %11667 = vmatpush3.bf16.msra.mxu1 %v13232_v33  ;;  %v1306_v49 = vpack.c.bf16 %v1204_v38, %v1203_v41  ;;  %v974_v50 = vsel %vm925_vm1, %v971_v9, %v973_v39 }
 0x1cd   :  { %v665_v51 = vadd.f32 %v11938_v48, %v13210_v35  ;;  %v656_v52 = vpop.f32.mrb[29].mxu0  ;;  %v1134_v53 = vmax.f32 %v822_v2, %v974_v50  ;;  %v980_v54 = vsel %vm925_vm1, %v977_v43, %v979_v46 }
 0x1ce   :  { %v978_v56 = vsel %vm925_vm1, %v975_v47, %v977_v43  ;;  %v657_v55 = vadd.f32 %v13210_v35, %v656_v52  ;;  %11668 = vmatprep.subr.bf16.mxu1 %v1306_v49  ;;  %v11939_v57 = vpop.f32.mrb[30].mxu0  ;;  %v976_v58 = vsel %vm925_vm1, %v973_v39, %v975_v47  ;;  %v1137_v59 = vmax.f32 %v825_v25, %v980_v54 }
 0x1cf   :  { %v1136_v60 = vmax.f32 %v824_v40, %v978_v56  ;;  %v829_v33 = vmax.f32 %v665_v51, 0.0  ;;  %v668_v61 = vadd.f32 %v11939_v57, %v13210_v35  ;;  %v659_v62 = vpop.f32.mrb[31].mxu0  ;;  %v1206_v63 = vmax.f32 %v1132_v24, %v1134_v53 }
 0x1d0   :  { %v827_v0 = vmax.f32 %v657_v55, 0.0  ;;  %v660_v2 = vadd.f32 %v13210_v35, %v659_v62  ;;  %11669 = vmatpush3.bf16.msra.mxu1 %v13234_v45  ;;  %v1135_v3 = vmax.f32 %v823_v29, %v976_v58 }
 0x1d1   :  { %v830_v4 = vmax.f32 %v668_v61, 0.0  ;;  %v1307_v5 = vpack.c.bf16 %v1206_v63, %v1205_v42  ;;  %v1208_v7 = vmax.f32 %v1134_v53, %v1136_v60  ;;  %v985_v13 = vrot.slane %v829_v33, 1 }
 0x1d2   :  { %v981_v8 = vrot.slane %v827_v0, 1  ;;  %v828_v9 = vmax.f32 %v660_v2, 0.0  ;;  %v1207_v10 = vmax.f32 %v1133_v23, %v1135_v3  ;;  %v1209_v12 = vmax.f32 %v1135_v3, %v1137_v59 }
 0x1d3   :  { %v987_v15 = vrot.slane %v830_v4, 1  ;;  %11670 = vmatprep.subr.bf16.mxu1 %v1307_v5 }
 0x1d4   :  { %v983_v16 = vrot.slane %v828_v9, 1  ;;  %v11942_v17 = vpop.f32.mrb[32].mxu0  ;;  %11671 = vmatpush3.bf16.msra.mxu1 %v13244_v1  ;;  %v1308_v18 = vpack.c.bf16 %v1208_v7, %v1207_v10  ;;  %v982_v19 = vsel %vm925_vm1, %v979_v46, %v981_v8 }
 0x1d5   :  { %v681_v45 = vadd.f32 %v11942_v17, %v13210_v35  ;;  %v672_v20 = vpop.f32.mrb[33].mxu0  ;;  %v1138_v21 = vmax.f32 %v826_v36, %v982_v19  ;;  %v988_v22 = vsel %vm925_vm1, %v985_v13, %v987_v15 }
 0x1d6   :  { %v986_v24 = vsel %vm925_vm1, %v983_v16, %v985_v13  ;;  %v673_v23 = vadd.f32 %v13210_v35, %v672_v20  ;;  %11672 = vmatprep.subr.bf16.mxu1 %v1308_v18  ;;  %v11943_v25 = vpop.f32.mrb[34].mxu0  ;;  %v984_v26 = vsel %vm925_vm1, %v981_v8, %v983_v16  ;;  %v1141_v27 = vmax.f32 %v829_v33, %v988_v22 }
 0x1d7   :  { %v1140_v28 = vmax.f32 %v828_v9, %v986_v24  ;;  %v833_v1 = vmax.f32 %v681_v45, 0.0  ;;  %v684_v29 = vadd.f32 %v11943_v25, %v13210_v35  ;;  %v675_v32 = vpop.f32.mrb[35].mxu0  ;;  %v1210_v30 = vmax.f32 %v1136_v60, %v1138_v21 }
 0x1d8   :  { %v831_v37 = vmax.f32 %v673_v23, 0.0  ;;  %v676_v36 = vadd.f32 %v13210_v35, %v675_v32  ;;  %11673 = vmatpush3.bf16.msra.mxu1 %v13246_v11  ;;  %v1139_v38 = vmax.f32 %v827_v0, %v984_v26 }
 0x1d9   :  { %v834_v39 = vmax.f32 %v684_v29, 0.0  ;;  %v1309_v40 = vpack.c.bf16 %v1210_v30, %v1209_v12  ;;  %v1212_v41 = vmax.f32 %v1138_v21, %v1140_v28  ;;  %v993_v48 = vrot.slane %v833_v1, 1  ;;  %v12489_v30 = vld [vmem:[#allocation7] ss:$16 sps:$4 sm:$0xff]  }
 0x1da   :  { %v989_v42 = vrot.slane %v831_v37, 1  ;;  %v832_v43 = vmax.f32 %v676_v36, 0.0  ;;  %v1211_v46 = vmax.f32 %v1137_v59, %v1139_v38  ;;  %v1213_v47 = vmax.f32 %v1139_v38, %v1141_v27 }
 0x1db   :  { %v995_v49 = vrot.slane %v834_v39, 1  ;;  %11674 = vmatprep.subr.bf16.mxu1 %v1309_v40 }
 0x1dc   :  { %v991_v50 = vrot.slane %v832_v43, 1  ;;  %v11946_v51 = vpop.f32.mrb[36].mxu0  ;;  %11675 = vmatpush3.bf16.msra.mxu1 %v13256_v31  ;;  %v1310_v52 = vpack.c.bf16 %v1212_v41, %v1211_v46  ;;  %v990_v53 = vsel %vm925_vm1, %v987_v15, %v989_v42 }
 0x1dd   :  { %v996_v11 = vsel %vm925_vm1, %v993_v48, %v995_v49  ;;  %v697_v54 = vadd.f32 %v11946_v51, %v13210_v35  ;;  %v688_v56 = vpop.f32.mrb[37].mxu0  ;;  %v1142_v55 = vmax.f32 %v830_v4, %v990_v53 }
 0x1de   :  { %v994_v57 = vsel %vm925_vm1, %v991_v50, %v993_v48  ;;  %v689_v58 = vadd.f32 %v13210_v35, %v688_v56  ;;  %11676 = vmatprep.subr.bf16.mxu1 %v1310_v52  ;;  %v11947_v59 = vpop.f32.mrb[38].mxu0  ;;  %v992_v60 = vsel %vm925_vm1, %v989_v42, %v991_v50  ;;  %v1145_v33 = vmax.f32 %v833_v1, %v996_v11 }
 0x1df   :  { %v1144_v61 = vmax.f32 %v832_v43, %v994_v57  ;;  %v837_v31 = vmax.f32 %v697_v54, 0.0  ;;  %v700_v62 = vadd.f32 %v11947_v59, %v13210_v35  ;;  %v691_v63 = vpop.f32.mrb[39].mxu0  ;;  %v1214_v0 = vmax.f32 %v1140_v28, %v1142_v55 }
 0x1e0   :  { %v835_v2 = vmax.f32 %v689_v58, 0.0  ;;  %v692_v3 = vadd.f32 %v13210_v35, %v691_v63  ;;  %11677 = vmatpush3.bf16.msra.mxu1 %v13258_v44  ;;  %v1143_v4 = vmax.f32 %v831_v37, %v992_v60 }
 0x1e1   :  { %v838_v5 = vmax.f32 %v700_v62, 0.0  ;;  %v1311_v7 = vpack.c.bf16 %v1214_v0, %v1213_v47  ;;  %v1216_v8 = vmax.f32 %v1142_v55, %v1144_v61  ;;  %v1001_v15 = vrot.slane %v837_v31, 1  ;;  %v12497_v0 = vld [vmem:[#allocation7 + $0x20] ss:$16 sps:$4 sm:$0xff]  }
 0x1e2   :  { %v997_v9 = vrot.slane %v835_v2, 1  ;;  %v836_v10 = vmax.f32 %v692_v3, 0.0  ;;  %v1215_v12 = vmax.f32 %v1141_v27, %v1143_v4  ;;  %v1217_v13 = vmax.f32 %v1143_v4, %v1145_v33 }
 0x1e3   :  { %v1003_v16 = vrot.slane %v838_v5, 1  ;;  %11678 = vmatprep.subr.bf16.mxu1 %v1311_v7  ;;  %v12501_v7 = vld [vmem:[#allocation7 + $0x44] ss:$16 sps:$4 sm:$0xff]  }
 0x1e4   :  { %v998_v17 = vsel %vm925_vm1, %v995_v49, %v997_v9  ;;  %v999_v18 = vrot.slane %v836_v10, 1  ;;  %v11950_v19 = vpop.f32.mrb[40].mxu0  ;;  %11679 = vmatpush3.bf16.msra.mxu1 %v13268_v6  ;;  %v1312_v45 = vpack.c.bf16 %v1216_v8, %v1215_v12 }
 0x1e5   :  { %v1004_v44 = vsel %vm925_vm1, %v1001_v15, %v1003_v16  ;;  %v1146_v20 = vmax.f32 %v834_v39, %v998_v17  ;;  %v713_v21 = vadd.f32 %v11950_v19, %v13210_v35  ;;  %v704_v22 = vpop.f32.mrb[41].mxu0  ;;  %v12495_v39 = vld [vmem:[#allocation7 + $0x24] ss:$16 sps:$4 sm:$0xff]  }
 0x1e6   :  { %v1000_v24 = vsel %vm925_vm1, %v997_v9, %v999_v18  ;;  %v1002_v23 = vsel %vm925_vm1, %v999_v18, %v1001_v15  ;;  %v705_v25 = vadd.f32 %v13210_v35, %v704_v22  ;;  %11680 = vmatprep.subr.bf16.mxu1 %v1312_v45  ;;  %v11951_v26 = vpop.f32.mrb[42].mxu0  ;;  %v1149_v27 = vmax.f32 %v837_v31, %v1004_v44 }
 0x1e7   :  { %v1148_v28 = vmax.f32 %v836_v10, %v1002_v23  ;;  %v841_v1 = vmax.f32 %v713_v21, 0.0  ;;  %v13318_v6 = vadd.f32 %v11951_v26, %v13210_v35  ;;  %v707_v29 = vpop.f32.mrb[43].mxu0  ;;  %v1218_v32 = vmax.f32 %v1144_v61, %v1146_v20 }
 0x1e8   :  { %v839_v37 = vmax.f32 %v705_v25, 0.0  ;;  %v708_v36 = vadd.f32 %v13210_v35, %v707_v29  ;;  %11681 = vmatpush3.bf16.msra.mxu1 %v13271_v14  ;;  %v1147_v38 = vmax.f32 %v835_v2, %v1000_v24 }
 0x1e9   :  { %v1220_v40 = vmax.f32 %v1146_v20, %v1148_v28  ;;  %v842_v41 = vmax.f32 %v13318_v6, 0.0  ;;  %v1313_v42 = vpack.c.bf16 %v1218_v32, %v1217_v13  ;;  %v1009_v49 = vrot.slane %v841_v1, 1 }
 0x1ea   :  { %v1005_v43 = vrot.slane %v839_v37, 1  ;;  %v840_v46 = vmax.f32 %v708_v36, 0.0  ;;  %v1219_v47 = vmax.f32 %v1145_v33, %v1147_v38  ;;  %v1221_v48 = vmax.f32 %v1147_v38, %v1149_v27 }
 0x1eb   :  { %v1011_v50 = vrot.slane %v842_v41, 1  ;;  %1752 = vmatpush1.bf16.msra.mxu0 %v1313_v42  ;;  %1648 = vmatmul.mubr.bf16.vlgmr.msra.gmra.mrb[0].mxu1 %v12489_v30 }
 0x1ec   :  { %v1006_v51 = vsel %vm925_vm1, %v1003_v16, %v1005_v43  ;;  %v1007_v52 = vrot.slane %v840_v46, 1  ;;  %v11954_v53 = vpop.f32.mrb[44].mxu0  ;;  %1753 = vmatprep.subr.bf16.mxu0 %v14761_v34  ;;  %v1314_v14 = vpack.c.bf16 %v1220_v40, %v1219_v47  ;;  %1655 = vmatprep.mubr.bf16.mxu1 %v12495_v39 }
 0x1ed   :  { %v1012_v11 = vsel %vm925_vm1, %v1009_v49, %v1011_v50  ;;  %v1150_v54 = vmax.f32 %v838_v5, %v1006_v51  ;;  %v729_v56 = vadd.f32 %v11954_v53, %v13210_v35  ;;  %v720_v55 = vpop.f32.mrb[45].mxu0 }
 0x1ee   :  { %v13327_v57 = vmax.f32 %v841_v1, %v1012_v11  ;;  %v1008_v58 = vsel %vm925_vm1, %v1005_v43, %v1007_v52  ;;  %v1010_v59 = vsel %vm925_vm1, %v1007_v52, %v1009_v49  ;;  %v721_v60 = vadd.f32 %v13210_v35, %v720_v55  ;;  %v11955_v33 = vpop.f32.mrb[46].mxu0 }
 0x1ef   :  { %v1151_v61 = vmax.f32 %v839_v37, %v1008_v58  ;;  %v1152_v31 = vmax.f32 %v840_v46, %v1010_v59  ;;  %v1222_v62 = vmax.f32 %v1148_v28, %v1150_v54  ;;  %v723_v63 = vpop.f32.mrb[47].mxu0  ;;  %1754 = vmatpush1.bf16.msra.mxu0 %v1314_v14  ;;  %v845_v2 = vmax.f32 %v729_v56, 0.0  ;;  %v12503_v37 = vld [vmem:[#allocation7 + $0x40] ss:$16 sps:$4 sm:$0xff]  }
 0x1f0   :  { %v843_v3 = vmax.f32 %v721_v60, 0.0  ;;  %v732_v4 = vadd.f32 %v11955_v33, %v13210_v35  ;;  %v724_v5 = vadd.f32 %v13210_v35, %v723_v63  ;;  %1755 = vmatprep.subr.bf16.mxu0 %v14761_v34 }
 0x1f1   :  { %v1223_v8 = vmax.f32 %v1149_v27, %v1151_v61  ;;  %v1224_v9 = vmax.f32 %v1150_v54, %v1152_v31  ;;  %v1315_v10 = vpack.c.bf16 %v1222_v62, %v1221_v48  ;;  %v1225_v16 = vmax.f32 %v1151_v61, %v13327_v57 }
 0x1f2   :  { %v1013_v12 = vrot.slane %v843_v3, 1  ;;  %v846_v13 = vmax.f32 %v732_v4, 0.0  ;;  %v844_v15 = vmax.f32 %v724_v5, 0.0  ;;  %v1017_v18 = vrot.slane %v845_v2, 1 }
 0x1f3   :  { %v1316_v17 = vpack.c.bf16 %v1224_v9, %v1223_v8  ;;  %1756 = vmatpush1.bf16.msra.mxu0 %v1315_v10  ;;  %1656 = vmatmul.mubr.bf16.gmra.mrb[4].mxu1 %v12497_v0  ;;  %v12513_v9 = vld [vmem:[#allocation7 + $0x84] ss:$16 sps:$4 sm:$0xff]  }
 0x1f4   :  { %v1014_v19 = vsel %vm925_vm1, %v1011_v50, %v1013_v12  ;;  %v1019_v45 = vrot.slane %v846_v13, 1  ;;  %v1015_v44 = vrot.slane %v844_v15, 1  ;;  %v11958_v20 = vpop.f32.mrb[48].mxu0  ;;  %1757 = vmatprep.subr.bf16.mxu0 %v14761_v34  ;;  %1663 = vmatprep.mubr.bf16.mxu1 %v12501_v7 }
 0x1f5   :  { %v1154_v21 = vmax.f32 %v842_v41, %v1014_v19  ;;  %v745_v22 = vadd.f32 %v11958_v20, %v13210_v35  ;;  %v736_v24 = vpop.f32.mrb[49].mxu0  ;;  %v12507_v41 = vld [vmem:[#allocation7 + $0x64] ss:$16 sps:$4 sm:$0xff]  }
 0x1f6   :  { %v1020_v23 = vsel %vm925_vm1, %v1017_v18, %v1019_v45  ;;  %v1016_v25 = vsel %vm925_vm1, %v1013_v12, %v1015_v44  ;;  %v1018_v26 = vsel %vm925_vm1, %v1015_v44, %v1017_v18  ;;  %v737_v27 = vadd.f32 %v13210_v35, %v736_v24  ;;  %v11959_v28 = vpop.f32.mrb[50].mxu0 }
 0x1f7   :  { %v1157_v1 = vmax.f32 %v845_v2, %v1020_v23  ;;  %v1155_v6 = vmax.f32 %v843_v3, %v1016_v25  ;;  %v1156_v29 = vmax.f32 %v844_v15, %v1018_v26  ;;  %v1226_v32 = vmax.f32 %v1152_v31, %v1154_v21  ;;  %v739_v30 = vpop.f32.mrb[51].mxu0  ;;  %1758 = vmatpush1.bf16.msra.mxu0 %v1316_v17  ;;  %v12509_v3 = vld [vmem:[#allocation7 + $0x60] ss:$16 sps:$4 sm:$0xff]  }
 0x1f8   :  { %v849_v36 = vmax.f32 %v745_v22, 0.0  ;;  %v847_v38 = vmax.f32 %v737_v27, 0.0  ;;  %v748_v39 = vadd.f32 %v11959_v28, %v13210_v35  ;;  %v740_v40 = vadd.f32 %v13210_v35, %v739_v30  ;;  %1759 = vmatprep.subr.bf16.mxu0 %v14761_v34 }
 0x1f9   :  { %v1227_v42 = vmax.f32 %v13327_v57, %v1155_v6  ;;  %v1228_v43 = vmax.f32 %v1154_v21, %v1156_v29  ;;  %v1317_v46 = vpack.c.bf16 %v1226_v32, %v1225_v16  ;;  %v1229_v47 = vmax.f32 %v1155_v6, %v1157_v1 }
 0x1fa   :  { %v1021_v48 = vrot.slane %v847_v38, 1  ;;  %v850_v49 = vmax.f32 %v748_v39, 0.0  ;;  %v848_v50 = vmax.f32 %v740_v40, 0.0  ;;  %v1025_v52 = vrot.slane %v849_v36, 1 }
 0x1fb   :  { %v1318_v51 = vpack.c.bf16 %v1228_v43, %v1227_v42  ;;  %1760 = vmatpush1.bf16.msra.mxu0 %v1317_v46  ;;  %1664 = vmatmul.mubr.bf16.gmra.mrb[8].mxu1 %v12503_v37  ;;  %v12519_v43 = vld [vmem:[#allocation7 + $0xa4] ss:$16 sps:$4 sm:$0xff]  }
 0x1fc   :  { %v1022_v53 = vsel %vm925_vm1, %v1019_v45, %v1021_v48  ;;  %v1027_v14 = vrot.slane %v850_v49, 1  ;;  %v1023_v11 = vrot.slane %v848_v50, 1  ;;  %v11962_v54 = vpop.f32.mrb[52].mxu0  ;;  %1761 = vmatprep.subr.bf16.mxu0 %v14761_v34  ;;  %1671 = vmatprep.mubr.bf16.mxu1 %v12507_v41 }
 0x1fd   :  { %v1158_v56 = vmax.f32 %v846_v13, %v1022_v53  ;;  %v761_v55 = vadd.f32 %v11962_v54, %v13210_v35  ;;  %v752_v57 = vpop.f32.mrb[53].mxu0 }
 0x1fe   :  { %v1028_v58 = vsel %vm925_vm1, %v1025_v52, %v1027_v14  ;;  %v1024_v59 = vsel %vm925_vm1, %v1021_v48, %v1023_v11  ;;  %v1026_v60 = vsel %vm925_vm1, %v1023_v11, %v1025_v52  ;;  %v753_v33 = vadd.f32 %v13210_v35, %v752_v57  ;;  %v11963_v61 = vpop.f32.mrb[54].mxu0 }
 0x1ff   :  { %v1161_v31 = vmax.f32 %v849_v36, %v1028_v58  ;;  %v1159_v62 = vmax.f32 %v847_v38, %v1024_v59  ;;  %v1160_v63 = vmax.f32 %v848_v50, %v1026_v60  ;;  %v1230_v0 = vmax.f32 %v1156_v29, %v1158_v56  ;;  %v755_v2 = vpop.f32.mrb[55].mxu0  ;;  %1762 = vmatpush1.bf16.msra.mxu0 %v1318_v51  ;;  %v12515_v38 = vld [vmem:[#allocation7 + $0x80] ss:$16 sps:$4 sm:$0xff]  }
 0x200   :  { %v853_v4 = vmax.f32 %v761_v55, 0.0  ;;  %v851_v5 = vmax.f32 %v753_v33, 0.0  ;;  %v764_v7 = vadd.f32 %v11963_v61, %v13210_v35  ;;  %v756_v8 = vadd.f32 %v13210_v35, %v755_v2  ;;  %1763 = vmatprep.subr.bf16.mxu0 %v14761_v34 }
 0x201   :  { %v1231_v10 = vmax.f32 %v1157_v1, %v1159_v62  ;;  %v1232_v12 = vmax.f32 %v1158_v56, %v1160_v63  ;;  %v1319_v13 = vpack.c.bf16 %v1230_v0, %v1229_v47  ;;  %v1233_v15 = vmax.f32 %v1159_v62, %v1161_v31 }
 0x202   :  { %v1029_v16 = vrot.slane %v851_v5, 1  ;;  %v854_v17 = vmax.f32 %v764_v7, 0.0  ;;  %v852_v18 = vmax.f32 %v756_v8, 0.0  ;;  %v1033_v45 = vrot.slane %v853_v4, 1 }
 0x203   :  { %v1320_v19 = vpack.c.bf16 %v1232_v12, %v1231_v10  ;;  %1764 = vmatpush1.bf16.msra.mxu0 %v1319_v13  ;;  %1672 = vmatmul.mubr.bf16.gmra.mrb[12].mxu1 %v12509_v3  ;;  %v12525_v12 = vld [vmem:[#allocation7 + $0xc4] ss:$16 sps:$4 sm:$0xff]  }
 0x204   :  { %v1030_v44 = vsel %vm925_vm1, %v1027_v14, %v1029_v16  ;;  %v1035_v20 = vrot.slane %v854_v17, 1  ;;  %v1031_v21 = vrot.slane %v852_v18, 1  ;;  %v11966_v22 = vpop.f32.mrb[56].mxu0  ;;  %1765 = vmatprep.subr.bf16.mxu0 %v14761_v34  ;;  %1679 = vmatprep.mubr.bf16.mxu1 %v12513_v9 }
 0x205   :  { %v1162_v24 = vmax.f32 %v850_v49, %v1030_v44  ;;  %v777_v23 = vadd.f32 %v11966_v22, %v13210_v35  ;;  %v768_v25 = vpop.f32.mrb[57].mxu0 }
 0x206   :  { %v1036_v26 = vsel %vm925_vm1, %v1033_v45, %v1035_v20  ;;  %v1032_v27 = vsel %vm925_vm1, %v1029_v16, %v1031_v21  ;;  %v1034_v28 = vsel %vm925_vm1, %v1031_v21, %v1033_v45  ;;  %v769_v1 = vadd.f32 %v13210_v35, %v768_v25  ;;  %v11967_v6 = vpop.f32.mrb[58].mxu0 }
 0x207   :  { %v1165_v29 = vmax.f32 %v853_v4, %v1036_v26  ;;  %v1163_v32 = vmax.f32 %v851_v5, %v1032_v27  ;;  %v1164_v30 = vmax.f32 %v852_v18, %v1034_v28  ;;  %v1234_v37 = vmax.f32 %v1160_v63, %v1162_v24  ;;  %v771_v36 = vpop.f32.mrb[59].mxu0  ;;  %1766 = vmatpush1.bf16.msra.mxu0 %v1320_v19  ;;  %v12521_v5 = vld [vmem:[#allocation7 + $0xa0] ss:$16 sps:$4 sm:$0xff]  }
 0x208   :  { %v857_v39 = vmax.f32 %v777_v23, 0.0  ;;  %v855_v40 = vmax.f32 %v769_v1, 0.0  ;;  %v780_v41 = vadd.f32 %v11967_v6, %v13210_v35  ;;  %v772_v42 = vadd.f32 %v13210_v35, %v771_v36  ;;  %1767 = vmatprep.subr.bf16.mxu0 %v14761_v34  ;;  %v12531_v36 = vld [vmem:[#allocation7 + $0xe4] ss:$16 sps:$4 sm:$0xff]  }
 0x209   :  { %v1235_v46 = vmax.f32 %v1161_v31, %v1163_v32  ;;  %v1236_v47 = vmax.f32 %v1162_v24, %v1164_v30  ;;  %v1321_v48 = vpack.c.bf16 %v1234_v37, %v1233_v15  ;;  %v1237_v49 = vmax.f32 %v1163_v32, %v1165_v29  ;;  %v12527_v32 = vld [vmem:[#allocation7 + $0xc0] ss:$16 sps:$4 sm:$0xff]  }
 0x20a   :  { %v1037_v50 = vrot.slane %v855_v40, 1  ;;  %v858_v51 = vmax.f32 %v780_v41, 0.0  ;;  %v856_v52 = vmax.f32 %v772_v42, 0.0  ;;  %v1041_v14 = vrot.slane %v857_v39, 1 }
 0x20b   :  { %v1322_v53 = vpack.c.bf16 %v1236_v47, %v1235_v46  ;;  %1768 = vmatpush1.bf16.msra.mxu0 %v1321_v48  ;;  %1680 = vmatmul.mubr.bf16.gmra.mrb[16].mxu1 %v12515_v38 }
 0x20c   :  { %v1038_v11 = vsel %vm925_vm1, %v1035_v20, %v1037_v50  ;;  %v1043_v54 = vrot.slane %v858_v51, 1  ;;  %v1039_v56 = vrot.slane %v856_v52, 1  ;;  %v11970_v55 = vpop.f32.mrb[60].mxu0  ;;  %1769 = vmatprep.subr.bf16.mxu0 %v14761_v34  ;;  %1687 = vmatprep.mubr.bf16.mxu1 %v12519_v43  ;;  %v14760_v43 = vmov 65535  }
 0x20d   :  { %v1166_v57 = vmax.f32 %v854_v17, %v1038_v11  ;;  %v793_v58 = vadd.f32 %v11970_v55, %v13210_v35  ;;  %v784_v59 = vpop.f32.mrb[61].mxu0  ;;  %v1610_v46 = vsel %vm925_vm1, 4294967295, %v14760_v43  ;;  %v12543_v11 = vld [vmem:[#allocation7 + $0x124] ss:$16 sps:$4 sm:$0xff]   ;;  %v12545_v55 = vld [vmem:[#allocation7 + $0x120] ss:$16 sps:$4 sm:$0xff]  }
 0x20e   :  { %v1044_v60 = vsel %vm925_vm1, %v1041_v14, %v1043_v54  ;;  %v1040_v33 = vsel %vm925_vm1, %v1037_v50, %v1039_v56  ;;  %v1042_v61 = vsel %vm925_vm1, %v1039_v56, %v1041_v14  ;;  %v785_v31 = vadd.f32 %v13210_v35, %v784_v59  ;;  %v11971_v62 = vpop.f32.mrb[62].mxu0  ;;  %v12537_v50 = vld [vmem:[#allocation7 + $0x104] ss:$16 sps:$4 sm:$0xff]   ;;  %v12539_v14 = vld [vmem:[#allocation7 + $0x100] ss:$16 sps:$4 sm:$0xff]  }
 0x20f   :  { %v1169_v63 = vmax.f32 %v857_v39, %v1044_v60  ;;  %v1167_v0 = vmax.f32 %v855_v40, %v1040_v33  ;;  %v1168_v2 = vmax.f32 %v856_v52, %v1042_v61  ;;  %v1238_v3 = vmax.f32 %v1164_v30, %v1166_v57  ;;  %v787_v4 = vpop.f32.mrb[63].mxu0  ;;  %1770 = vmatpush1.bf16.msra.mxu0 %v1322_v53  ;;  %v12492_v52 = vld [vmem:[#allocation7 + $0x8] ss:$16 sps:$4 sm:$0xff]   ;;  %v12498_v53 = vld [vmem:[#allocation7 + $0x2c] ss:$16 sps:$4 sm:$0xff]  }
 0x210   :  { %v861_v7 = vmax.f32 %v793_v58, 0.0  ;;  %v859_v8 = vmax.f32 %v785_v31, 0.0  ;;  %v796_v9 = vadd.f32 %v11971_v62, %v13210_v35  ;;  %v788_v10 = vadd.f32 %v13210_v35, %v787_v4  ;;  %1771 = vmatprep.subr.bf16.mxu0 %v14761_v34  ;;  %v12504_v56 = vld [vmem:[#allocation7 + $0x4c] ss:$16 sps:$4 sm:$0xff]   ;;  %v12506_v58 = vld [vmem:[#allocation7 + $0x48] ss:$16 sps:$4 sm:$0xff]  }
 0x211   :  { %v1239_v13 = vmax.f32 %v1165_v29, %v1167_v0  ;;  %v1240_v15 = vmax.f32 %v1166_v57, %v1168_v2  ;;  %v1323_v16 = vpack.c.bf16 %v1238_v3, %v1237_v49  ;;  %v1241_v17 = vmax.f32 %v1167_v0, %v1169_v63  ;;  %v12533_v49 = vld [vmem:[#allocation7 + $0xe0] ss:$16 sps:$4 sm:$0xff]   ;;  %v12549_v57 = vld [vmem:[#allocation7 + $0x144] ss:$16 sps:$4 sm:$0xff]   ;;  %v12510_v59 = vld [vmem:[#allocation7 + $0x6c] ss:$16 sps:$4 sm:$0xff]  }
 0x212   :  { %v1045_v18 = vrot.slane %v859_v8, 1  ;;  %v862_v19 = vmax.f32 %v796_v9, 0.0  ;;  %v860_v45 = vmax.f32 %v788_v10, 0.0  ;;  %v1175_v20 = vrot.slane %v861_v7, 1  ;;  %v12551_v60 = vld [vmem:[#allocation7 + $0x140] ss:$16 sps:$4 sm:$0xff]  }
 0x213   :  { %v1324_v44 = vpack.c.bf16 %v1240_v15, %v1239_v13  ;;  %1772 = vmatpush1.bf16.msra.mxu0 %v1323_v16  ;;  %1688 = vmatmul.mubr.bf16.gmra.mrb[20].mxu1 %v12521_v5  ;;  %v1611_v48 = vsel %vm1609_vm3, %v1610_v46, 0  ;;  %v12555_v33 = vld [vmem:[#allocation7 + $0x164] ss:$16 sps:$4 sm:$0xff]   ;;  %v12512_v61 = vld [vmem:[#allocation7 + $0x68] ss:$16 sps:$4 sm:$0xff]  }
 0x214   :  { %v1046_v21 = vsel %vm925_vm1, %v1043_v54, %v1045_v18  ;;  %v1177_v22 = vrot.slane %v862_v19, 1  ;;  %v1047_v24 = vrot.slane %v860_v45, 1  ;;  %1773 = vmatprep.subr.bf16.mxu0 %v14761_v34  ;;  %1695 = vmatprep.mubr.bf16.mxu1 %v12525_v12  ;;  %v12500_v54 = vld [vmem:[#allocation7 + $0x28] ss:$16 sps:$4 sm:$0xff]   ;;  %v12516_v31 = vld [vmem:[#allocation7 + $0x8c] ss:$16 sps:$4 sm:$0xff]  }
 0x215   :  { %v1170_v35 = vmax.f32 %v858_v51, %v1046_v21  ;;  %v1295_v62 = vld [vmem:[#allocation7 + $0x180] sm:$0xff]  ;;  %v12522_v3 = vld [vmem:[#allocation7 + $0xac] ss:$16 sps:$4 sm:$0xff]   ;;  %v12524_v5 = vld [vmem:[#allocation7 + $0xa8] ss:$16 sps:$4 sm:$0xff]  }
 0x216   :  { %v1178_v23 = vsel %vm925_vm1, %v1175_v20, %v1177_v22  ;;  %v1184_v25 = vmax.f32 %v862_v19, %v1177_v22  ;;  %v1048_v26 = vsel %vm925_vm1, %v1045_v18, %v1047_v24  ;;  %v1172_v27 = vmax.f32 %v860_v45, %v1047_v24  ;;  %v12534_v9 = vld [vmem:[#allocation7 + $0xec] ss:$16 sps:$4 sm:$0xff]   ;;  %v12536_v10 = vld [vmem:[#allocation7 + $0xe8] ss:$16 sps:$4 sm:$0xff]   ;;  %v12565_v22 = vld [vmem:[#allocation8 + $0x20] sm:$0xff]  }
 0x217   :  { %v1183_v28 = vmax.f32 %v861_v7, %v1178_v23  ;;  %v1171_v1 = vmax.f32 %v859_v8, %v1048_v26  ;;  %v1176_v6 = vsel %vm925_vm1, %v1047_v24, %v1175_v20  ;;  %1774 = vmatpush1.bf16.msra.mxu0 %v1324_v44  ;;  %v1242_v29 = vmax.f32 %v1168_v2, %v1170_v35  ;;  %v12518_v2 = vld [vmem:[#allocation7 + $0x88] ss:$16 sps:$4 sm:$0xff]   ;;  %v12528_v7 = vld [vmem:[#allocation7 + $0xcc] ss:$16 sps:$4 sm:$0xff]  }
 0x218   :  { %v1182_v30 = vmax.f32 %v860_v45, %v1176_v6  ;;  %v1246_v37 = vmax.f32 %v1172_v27, %v1184_v25  ;;  %1775 = vmatprep.subr.bf16.mxu0 %v14761_v34  ;;  %v10888_v0 = vcombine.high %v1295_v62, %v1295_v62  ;;  %v10887_v4 = vcombine.low %v1295_v62, %v1295_v62  ;;  %v12530_v8 = vld [vmem:[#allocation7 + $0xc8] ss:$16 sps:$4 sm:$0xff]   ;;  %v12540_v12 = vld [vmem:[#allocation7 + $0x10c] ss:$16 sps:$4 sm:$0xff]  }
 0x219   :  { %v1325_v38 = vpack.c.bf16 %v1242_v29, %v1241_v17  ;;  %v1243_v39 = vmax.f32 %v1169_v63, %v1171_v1  ;;  %v1245_v40 = vmax.f32 %v1171_v1, %v1183_v28  ;;  %v12557_v63 = vld [vmem:[#allocation7 + $0x160] ss:$16 sps:$4 sm:$0xff]   ;;  %v12542_v13 = vld [vmem:[#allocation7 + $0x108] ss:$16 sps:$4 sm:$0xff]   ;;  %v12546_v15 = vld [vmem:[#allocation7 + $0x12c] ss:$16 sps:$4 sm:$0xff]   ;;  %11972 = vmatprep.subr.bf16.mxu1 %v12565_v22 }
 0x21a   :  { %v1244_v41 = vmax.f32 %v1170_v35, %v1182_v30  ;;  %v12548_v16 = vld [vmem:[#allocation7 + $0x128] ss:$16 sps:$4 sm:$0xff]   ;;  %v12552_v17 = vld [vmem:[#allocation7 + $0x14c] ss:$16 sps:$4 sm:$0xff]   ;;  %11973 = vmatpush3.bf16.msra.mxu1 %v12565_v22  ;;  %v12567_v35 = vld [vmem:[#allocation8 + $0x30] sm:$0xff]  }
 0x21b   :  { %1776 = vmatpush1.bf16.msra.mxu0 %v1325_v38  ;;  %v1327_v42 = vpack.c.bf16 %v1246_v37, %v1245_v40  ;;  %1696 = vmatmul.mubr.bf16.gmra.mrb[24].mxu1 %v12527_v32  ;;  %v12554_v18 = vld [vmem:[#allocation7 + $0x148] ss:$16 sps:$4 sm:$0xff]   ;;  %v12558_v19 = vld [vmem:[#allocation7 + $0x16c] ss:$16 sps:$4 sm:$0xff]  }
 0x21c   :  { %1777 = vmatprep.subr.bf16.mxu0 %v14761_v34  ;;  %v1326_v47 = vpack.c.bf16 %v1244_v41, %v1243_v39  ;;  %1703 = vmatprep.mubr.bf16.mxu1 %v12531_v36  ;;  %v1296_v45 = vld [vmem:[#allocation7 + $0x188] sm:$0xff]  ;;  %v12566_v24 = vld [vmem:[#allocation8 + $0x28] sm:$0xff]  }
 0x21d   :  { %v1613_v51 = vand.u32 %v1611_v48, %v1327_v42  ;;  %v12560_v44 = vld [vmem:[#allocation7 + $0x168] ss:$16 sps:$4 sm:$0xff]   ;;  %v10890_v20 = vcombine.high %v1296_v45, %v1296_v45  ;;  %v10889_v21 = vcombine.low %v1296_v45, %v1296_v45  ;;  %11974 = vmatprep.subr.bf16.mxu1 %v12566_v24  ;;  %v13404_v48 = vld [vmem:[#allocation8] sm:$0xff]  }
 0x21e   :  { %11975 = vmatpush3.bf16.msra.mxu1 %v12566_v24  ;;  %v12568_v23 = vld [vmem:[#allocation8 + $0x38] sm:$0xff]  }
 0x21f   :  { %1778 = vmatpush1.bf16.msra.mxu0 %v1326_v47  ;;  %11976 = vmatprep.subr.bf16.mxu1 %v12567_v35 }
 0x220   :  { %1779 = vmatprep.subr.bf16.mxu0 %v14761_v34 }
 0x222   :  { %11977 = vmatpush3.bf16.msra.mxu1 %v12567_v35 }
 0x223   :  { %1780 = vmatpush1.bf16.msra.mxu0 %v1613_v51  ;;  %1704 = vmatmul.mubr.bf16.gmra.mrb[28].mxu1 %v12533_v49 }
 0x224   :  { %1711 = vmatprep.mubr.bf16.mxu1 %v12537_v50  ;;  %4565 = vmatprep.subr.bf16.mxu0 %v14761_v34 }
 0x225   :  { %11978 = vmatprep.subr.bf16.mxu1 %v12568_v23 }
 0x226   :  { %1784 = vmatmul.mubr.bf16.vlgmr.msra.gmra.mrb[64].mxu0 %v12492_v52  ;;  %11979 = vmatpush3.bf16.msra.mxu1 %v12568_v23 }
 0x227   :  { %10892 = vmatprep.mubr.msk.bf16.mxu0 %vm1569_vm2, %v12498_v53  ;;  %12004 = vmatprep.subr.bf16.mxu1 %v13404_v48 }
 0x22b   :  { %1712 = vmatmul.mubr.bf16.gmra.mrb[32].mxu1 %v12539_v14 }
 0x22c   :  { %1719 = vmatprep.mubr.bf16.mxu1 %v12543_v11 }
 0x22e   :  { %1792 = vmatmul.mubr.bf16.gmra.mrb[68].mxu0 %v12500_v54 }
 0x22f   :  { %10893 = vmatprep.mubr.msk.bf16.mxu0 %vm1569_vm2, %v12504_v56 }
 0x233   :  { %1720 = vmatmul.mubr.bf16.gmra.mrb[36].mxu1 %v12545_v55 }
 0x234   :  { %1727 = vmatprep.mubr.bf16.mxu1 %v12549_v57 }
 0x236   :  { %1800 = vmatmul.mubr.bf16.gmra.mrb[72].mxu0 %v12506_v58 }
 0x237   :  { %10894 = vmatprep.mubr.msk.bf16.mxu0 %vm1569_vm2, %v12510_v59 }
 0x23b   :  { %1728 = vmatmul.mubr.bf16.gmra.mrb[40].mxu1 %v12551_v60 }
 0x23c   :  { %1735 = vmatprep.mubr.bf16.mxu1 %v12555_v33 }
 0x23e   :  { %1808 = vmatmul.mubr.bf16.gmra.mrb[76].mxu0 %v12512_v61 }
 0x23f   :  { %10895 = vmatprep.mubr.msk.bf16.mxu0 %vm1569_vm2, %v12516_v31 }
 0x243   :  { %1736 = vmatmul.mubr.bf16.gmra.mrb[44].mxu1 %v12557_v63 }
 0x244   :  { %1743 = vmatprep.mubr.bf16.mxu1 %v10888_v0 }
 0x246   :  { %1816 = vmatmul.mubr.bf16.gmra.mrb[80].mxu0 %v12518_v2 }
 0x247   :  { %10896 = vmatprep.mubr.msk.bf16.mxu0 %vm1569_vm2, %v12522_v3 }
 0x24b   :  { %1744 = vmatmul.mubr.bf16.gmra.mrb[48].mxu1 %v10887_v4 }
 0x24e   :  { %1824 = vmatmul.mubr.bf16.gmra.mrb[84].mxu0 %v12524_v5 }
 0x24f   :  { %10897 = vmatprep.mubr.msk.bf16.mxu0 %vm1569_vm2, %v12528_v7 }
 0x256   :  { %1832 = vmatmul.mubr.bf16.gmra.mrb[88].mxu0 %v12530_v8 }
 0x257   :  { %10898 = vmatprep.mubr.msk.bf16.mxu0 %vm1569_vm2, %v12534_v9 }
 0x25e   :  { %1840 = vmatmul.mubr.bf16.gmra.mrb[92].mxu0 %v12536_v10 }
 0x25f   :  { %10899 = vmatprep.mubr.msk.bf16.mxu0 %vm1569_vm2, %v12540_v12 }
 0x266   :  { %1848 = vmatmul.mubr.bf16.gmra.mrb[96].mxu0 %v12542_v13 }
 0x267   :  { %10900 = vmatprep.mubr.msk.bf16.mxu0 %vm1569_vm2, %v12546_v15 }
 0x26e   :  { %1856 = vmatmul.mubr.bf16.gmra.mrb[100].mxu0 %v12548_v16 }
 0x26f   :  { %10901 = vmatprep.mubr.msk.bf16.mxu0 %vm1569_vm2, %v12552_v17 }
 0x276   :  { %1864 = vmatmul.mubr.bf16.gmra.mrb[104].mxu0 %v12554_v18 }
 0x277   :  { %10902 = vmatprep.mubr.msk.bf16.mxu0 %vm1569_vm2, %v12558_v19 }
 0x27e   :  { %1872 = vmatmul.mubr.bf16.gmra.mrb[108].mxu0 %v12560_v44 }
 0x27f   :  { %10903 = vmatprep.mubr.msk.bf16.mxu0 %vm1569_vm2, %v10890_v20 }
 0x286   :  { %1880 = vmatmul.mubr.bf16.gmra.mrb[112].mxu0 %v10889_v21 }
 0x2be   :  { %v11682_v25 = vpop.f32.mrb[0].mxu1 }
 0x2bf   :  { %v11683_v26 = vpop.f32.mrb[1].mxu1 }
 0x2c0   :  { %v11684_v27 = vadd.f32 %v11683_v26, %v11682_v25  ;;  %v11685_v28 = vpop.f32.mrb[2].mxu1 }
 0x2c1   :  { %v11686_v1 = vpop.f32.mrb[3].mxu1 }
 0x2c2   :  { %v11687_v6 = vadd.f32 %v11686_v1, %v11685_v28 }
 0x2c6   :  { %v11688_v29 = vpop.f32.mrb[4].mxu1 }
 0x2c7   :  { %v11689_v32 = vpop.f32.mrb[5].mxu1 }
 0x2c8   :  { %v11690_v30 = vadd.f32 %v11689_v32, %v11688_v29  ;;  %v11691_v37 = vpop.f32.mrb[6].mxu1 }
 0x2c9   :  { %v11692_v36 = vpop.f32.mrb[7].mxu1 }
 0x2ca   :  { %v11693_v38 = vadd.f32 %v11692_v36, %v11691_v37 }
 0x2ce   :  { %v11694_v39 = vpop.f32.mrb[8].mxu1 }
 0x2cf   :  { %v11695_v40 = vpop.f32.mrb[9].mxu1 }
 0x2d0   :  { %v13400_v41 = vadd.f32 %v11695_v40, %v11694_v39  ;;  %v11697_v42 = vpop.f32.mrb[10].mxu1 }
 0x2d1   :  { %v11698_v46 = vpop.f32.mrb[11].mxu1 }
 0x2d2   :  { %v13402_v47 = vadd.f32 %v11698_v46, %v11697_v42 }
 0x2d6   :  { %v11700_v49 = vpop.f32.mrb[12].mxu1 }
 0x2d7   :  { %v11701_v50 = vpop.f32.mrb[13].mxu1 }
 0x2d8   :  { %v13407_v51 = vadd.f32 %v11701_v50, %v11700_v49  ;;  %v11703_v52 = vpop.f32.mrb[14].mxu1 }
 0x2d9   :  { %v11704_v53 = vpop.f32.mrb[15].mxu1 }
 0x2da   :  { %v13409_v14 = vadd.f32 %v11704_v53, %v11703_v52 }
 0x2de   :  { %v11706_v11 = vpop.f32.mrb[16].mxu1 }
 0x2df   :  { %v11707_v54 = vpop.f32.mrb[17].mxu1 }
 0x2e0   :  { %v13411_v56 = vadd.f32 %v11707_v54, %v11706_v11  ;;  %v11709_v55 = vpop.f32.mrb[18].mxu1 }
 0x2e1   :  { %v11710_v57 = vpop.f32.mrb[19].mxu1 }
 0x2e2   :  { %v13413_v58 = vadd.f32 %v11710_v57, %v11709_v55 }
 0x2e6   :  { %v11712_v59 = vpop.f32.mrb[20].mxu1 }
 0x2e7   :  { %v11713_v60 = vpop.f32.mrb[21].mxu1 }
 0x2e8   :  { %v13415_v33 = vadd.f32 %v11713_v60, %v11712_v59  ;;  %v11715_v61 = vpop.f32.mrb[22].mxu1 }
 0x2e9   :  { %v11716_v31 = vpop.f32.mrb[23].mxu1 }
 0x2ea   :  { %v13417_v62 = vadd.f32 %v11716_v31, %v11715_v61 }
 0x2ee   :  { %v11718_v63 = vpop.f32.mrb[24].mxu1 }
 0x2ef   :  { %v11719_v0 = vpop.f32.mrb[25].mxu1 }
 0x2f0   :  { %v13419_v2 = vadd.f32 %v11719_v0, %v11718_v63  ;;  %v11721_v3 = vpop.f32.mrb[26].mxu1 }
 0x2f1   :  { %v11722_v4 = vpop.f32.mrb[27].mxu1 }
 0x2f2   :  { %v13421_v5 = vadd.f32 %v11722_v4, %v11721_v3 }
 0x2f6   :  { %v11724_v7 = vpop.f32.mrb[28].mxu1 }
 0x2f7   :  { %v11725_v8 = vpop.f32.mrb[29].mxu1 }
 0x2f8   :  { %v13423_v9 = vadd.f32 %v11725_v8, %v11724_v7  ;;  %v11727_v10 = vpop.f32.mrb[30].mxu1 }
 0x2f9   :  { %v1785_v12 = vpop.f32.mrb[64].mxu0  ;;  %v11728_v13 = vpop.f32.mrb[31].mxu1 }
 0x2fa   :  { %v1786_v15 = vadd.f32 %v11684_v27, %v1785_v12  ;;  %v1787_v16 = vpop.f32.mrb[65].mxu0  ;;  %v13425_v17 = vadd.f32 %v11728_v13, %v11727_v10 }
 0x2fb   :  { %v1788_v18 = vpop.f32.mrb[66].mxu0 }
 0x2fc   :  { %v1789_v19 = vadd.f32 %v11687_v6, %v1788_v18  ;;  %v1790_v45 = vpop.f32.mrb[67].mxu0 }
 0x2fe   :  { %v13427_v44 = vpack.c.bf16 %v1789_v19, %v1786_v15  ;;  %v11730_v20 = vpop.f32.mrb[32].mxu1 }
 0x2ff   :  { %v11731_v21 = vpop.f32.mrb[33].mxu1 }
 0x300   :  { %v13429_v22 = vadd.f32 %v11731_v21, %v11730_v20  ;;  %v11733_v24 = vpop.f32.mrb[34].mxu1  ;;  %v1920_v28 = vshll.u32 %v13427_v44, 16  ;;  %v1918_v42 = vshrl.u32 %v13427_v44, 16 }
 0x301   :  { %v1793_v35 = vpop.f32.mrb[68].mxu0  ;;  %v11734_v23 = vpop.f32.mrb[35].mxu1 }
 0x302   :  { %v1794_v25 = vadd.f32 %v11690_v30, %v1793_v35  ;;  %v1795_v26 = vpop.f32.mrb[69].mxu0  ;;  %v13432_v27 = vadd.f32 %v11734_v23, %v11733_v24  ;;  %v1922_v36 = vrot.slane %v1920_v28, 1 }
 0x303   :  { %v1796_v1 = vpop.f32.mrb[70].mxu0 }
 0x304   :  { %v2633_v29 = vpack.c.bf16 %v1794_v25, %v1789_v19  ;;  %v1797_v32 = vadd.f32 %v11693_v38, %v1796_v1  ;;  %v1798_v6 = vpop.f32.mrb[71].mxu0  ;;  %v1923_v54 = vor.u32 %v1922_v36, %v1918_v42 }
 0x306   :  { %v13434_v37 = vpack.c.bf16 %v1797_v32, %v1794_v25  ;;  %v11736_v39 = vpop.f32.mrb[36].mxu1  ;;  %v2911_v60 = vshrl.u32 %v2633_v29, 16  ;;  %v2914_v61 = vshll.u32 %v2633_v29, 16  ;;  %v3238_v45 = vrot.slane %v2633_v29, 2 }
 0x307   :  { %v11737_v40 = vpop.f32.mrb[37].mxu1 }
 0x308   :  { %v1925_v46 = vshll.u32 %v13434_v37, 16  ;;  %v1929_v30 = vshrl.u32 %v13434_v37, 16  ;;  %v13439_v49 = vadd.f32 %v11737_v40, %v11736_v39  ;;  %v11739_v50 = vpop.f32.mrb[38].mxu1  ;;  %v2913_v19 = vrot.slane %v2911_v60, 1 }
 0x309   :  { %v1801_v52 = vpop.f32.mrb[72].mxu0  ;;  %v11740_v53 = vpop.f32.mrb[39].mxu1 }
 0x30a   :  { %v1802_v38 = vadd.f32 %v13400_v41, %v1801_v52  ;;  %v1803_v11 = vpop.f32.mrb[73].mxu0  ;;  %v1927_v55 = vrot.slane %v1925_v46, 1  ;;  %v13442_v57 = vadd.f32 %v11740_v53, %v11739_v50  ;;  %v3729_v31 = vrot.slane %v1929_v30, 2  ;;  %v12570_v50 = vld [vmem:[#allocation8 + $0x8] sm:$0xff]  }
 0x30b   :  { %v1804_v59 = vpop.f32.mrb[74].mxu0  ;;  %v3730_v63 = vrot.slane %v1925_v46, 3  ;;  %v2666_v41 = vrot.slane %v2633_v29, 1 }
 0x30c   :  { %v13444_v0 = vpack.c.bf16 %v1802_v38, %v1797_v32  ;;  %v1805_v3 = vadd.f32 %v13402_v47, %v1804_v59  ;;  %v1928_v4 = vsel %vm1916_vm4, %v1923_v54, %v1927_v55  ;;  %v1806_v7 = vpop.f32.mrb[75].mxu0  ;;  %v2916_v47 = vrot.slane %v2914_v61, 2 }
 0x30d   :  { %11980 = vmatprep.mubr.msk.bf16.mxu1 %vm2036_vm5, %v1928_v4  ;;  %v3731_v8 = vor.u32 %v3730_v63, %v3729_v31  ;;  %v1931_v29 = vor.u32 %v1929_v30, %v1927_v55  ;;  %v12571_v7 = vld [vmem:[#allocation8 + $0x10] sm:$0xff]  }
 0x30e   :  { %v13449_v10 = vpack.c.bf16 %v1805_v3, %v1802_v38  ;;  %v11742_v12 = vpop.f32.mrb[40].mxu1  ;;  %v2667_v13 = vrot.slane %v13444_v0, 1  ;;  %v2919_v15 = vshrl.u32 %v13444_v0, 16  ;;  %v2922_v16 = vshll.u32 %v13444_v0, 16 }
 0x30f   :  { %v11743_v18 = vpop.f32.mrb[41].mxu1  ;;  %v3239_v20 = vrot.slane %v13444_v0, 2  ;;  %v2917_v52 = vor.u32 %v2916_v47, %v2913_v19 }
 0x310   :  { %v1933_v21 = vshll.u32 %v13449_v10, 16  ;;  %v1937_v24 = vshrl.u32 %v13449_v10, 16  ;;  %v13457_v35 = vadd.f32 %v11743_v18, %v11742_v12  ;;  %v11745_v23 = vpop.f32.mrb[42].mxu1  ;;  %v13460_v28 = vsel %vm925_vm1, %v2666_v41, %v2667_v13 }
 0x311   :  { %v1809_v25 = vpop.f32.mrb[76].mxu0  ;;  %v11746_v26 = vpop.f32.mrb[43].mxu1  ;;  %v2921_v1 = vrot.slane %v2919_v15, 1  ;;  %v2924_v32 = vrot.slane %v2922_v16, 2  ;;  %v13463_v6 = vsel %vm3237_vm6, %v3238_v45, %v3239_v20 }
 0x312   :  { %14768 = vst [vmem:[#allocation27_spill] sm:$0xff] %v13463_v6  ;;  %v1810_v36 = vadd.f32 %v13407_v51, %v1809_v25  ;;  %v1811_v39 = vpop.f32.mrb[77].mxu0  ;;  %v1935_v40 = vrot.slane %v1933_v21, 1  ;;  %v13466_v42 = vadd.f32 %v11746_v26, %v11745_v23  ;;  %v3732_v38 = vrot.slane %v1937_v24, 2 }
 0x313   :  { %v1812_v46 = vpop.f32.mrb[78].mxu0  ;;  %v2925_v53 = vor.u32 %v2924_v32, %v2921_v1  ;;  %v3733_v11 = vrot.slane %v1933_v21, 3 }
 0x314   :  { %v13468_v54 = vpack.c.bf16 %v1810_v36, %v1805_v3  ;;  %v1813_v59 = vadd.f32 %v13409_v14, %v1812_v46  ;;  %v1936_v60 = vsel %vm1916_vm4, %v1931_v29, %v1935_v40  ;;  %v1814_v61 = vpop.f32.mrb[79].mxu0  ;;  %v1939_v29 = vor.u32 %v1937_v24, %v1935_v40  ;;  %v12572_v46 = vld [vmem:[#allocation8 + $0x18] sm:$0xff]  }
 0x315   :  { %11981 = vmatmul.mubr.msk.bf16.vlgmr.msra.gmra.mrb[52].mxu1 %vm2036_vm5, %v1936_v60  ;;  %v13474_v51 = vsel %vm2909_vm7, %v2917_v52, %v2925_v53  ;;  %v3734_v30 = vor.u32 %v3733_v11, %v3732_v38 }
 0x316   :  { %v2669_v55 = vrot.slane %v13468_v54, 1  ;;  %v2928_v31 = vshrl.u32 %v13468_v54, 16  ;;  %v2931_v63 = vshll.u32 %v13468_v54, 16  ;;  %v3241_v0 = vrot.slane %v13468_v54, 2  ;;  %v11748_v3 = vpop.f32.mrb[44].mxu1  ;;  %12005 = vmatpush3.bf16.msra.mxu1 %v13404_v48 }
 0x317   :  { %v13481_v14 = vpack.c.bf16 %v1813_v59, %v1810_v36  ;;  %v11749_v4 = vpop.f32.mrb[45].mxu1  ;;  %12006 = vmatprep.subr.bf16.mxu1 %v12570_v50  ;;  %v13484_v41 = vsel %vm3728_vm8, %v3731_v8, %v3734_v30 }
 0x318   :  { %14769 = vst [vmem:[#allocation28_spill] sm:$0xff] %v13484_v41  ;;  %v2930_v12 = vrot.slane %v2928_v31, 1  ;;  %v2933_v15 = vrot.slane %v2931_v63, 2  ;;  %v13486_v16 = vadd.f32 %v11749_v4, %v11748_v3  ;;  %v11751_v18 = vpop.f32.mrb[46].mxu1  ;;  %v13489_v19 = vsel %vm925_vm1, %v2667_v13, %v2669_v55 }
 0x319   :  { %v1817_v47 = vpop.f32.mrb[80].mxu0  ;;  %v1941_v45 = vshll.u32 %v13481_v14, 16  ;;  %v1945_v48 = vshrl.u32 %v13481_v14, 16  ;;  %v11752_v21 = vpop.f32.mrb[47].mxu1  ;;  %v13494_v23 = vsel %vm3237_vm6, %v3239_v20, %v3241_v0 }
 0x31a   :  { %14770 = vst [vmem:[#allocation29_spill] sm:$0xff] %v13494_v23  ;;  %v1818_v8 = vadd.f32 %v13411_v56, %v1817_v47  ;;  %v1819_v25 = vpop.f32.mrb[81].mxu0  ;;  %v13497_v26 = vadd.f32 %v11752_v21, %v11751_v18  ;;  %12007 = vmatpush3.bf16.msra.mxu1 %v12570_v50  ;;  %v2934_v1 = vor.u32 %v2933_v15, %v2930_v12 }
 0x31b   :  { %v1820_v32 = vpop.f32.mrb[82].mxu0  ;;  %v1943_v13 = vrot.slane %v1941_v45, 1  ;;  %v3737_v36 = vrot.slane %v1941_v45, 3  ;;  %v3736_v39 = vrot.slane %v1945_v48, 2  ;;  %12008 = vmatprep.subr.bf16.mxu1 %v12571_v7 }
 0x31c   :  { %v2636_v52 = vpack.c.bf16 %v1818_v8, %v1813_v59  ;;  %v1821_v38 = vadd.f32 %v13413_v58, %v1820_v32  ;;  %v1822_v11 = vpop.f32.mrb[83].mxu0  ;;  %v13501_v20 = vsel %vm2909_vm7, %v2925_v53, %v2934_v1  ;;  %v13507_v59 = vld [vmem:[#allocation8 + $0x40] sm:$0xff]  }
 0x31d   :  { %v1944_v56 = vsel %vm1916_vm4, %v1939_v29, %v1943_v13  ;;  %v3738_v54 = vor.u32 %v3737_v36, %v3736_v39  ;;  %v1947_v25 = vor.u32 %v1945_v48, %v1943_v13 }
 0x31e   :  { %v13504_v60 = vpack.c.bf16 %v1821_v38, %v1818_v8  ;;  %11984 = vmatprep.mubr.msk.bf16.mxu1 %vm2036_vm5, %v1944_v56  ;;  %v11754_v24 = vpop.f32.mrb[48].mxu1  ;;  %12009 = vmatpush3.bf16.msra.mxu1 %v12571_v7  ;;  %v2671_v40 = vrot.slane %v2636_v52, 1  ;;  %v2937_v50 = vshrl.u32 %v2636_v52, 16  ;;  %v2940_v61 = vshll.u32 %v2636_v52, 16 }
 0x31f   :  { %v11755_v31 = vpop.f32.mrb[49].mxu1  ;;  %12010 = vmatprep.subr.bf16.mxu1 %v12572_v46  ;;  %v3243_v58 = vrot.slane %v2636_v52, 2  ;;  %v13510_v53 = vsel %vm3728_vm8, %v3734_v30, %v3738_v54 }
 0x320   :  { %14771 = vst [vmem:[#allocation30_spill] sm:$0xff] %v13510_v53  ;;  %v1949_v63 = vshll.u32 %v13504_v60, 16  ;;  %v1953_v3 = vshrl.u32 %v13504_v60, 16  ;;  %v13514_v4 = vadd.f32 %v11755_v31, %v11754_v24  ;;  %v11757_v12 = vpop.f32.mrb[50].mxu1  ;;  %v13517_v7 = vsel %vm925_vm1, %v2669_v55, %v2671_v40 }
 0x321   :  { %v1825_v15 = vpop.f32.mrb[84].mxu0  ;;  %v2939_v18 = vrot.slane %v2937_v50, 1  ;;  %v2942_v47 = vrot.slane %v2940_v61, 2  ;;  %v11758_v45 = vpop.f32.mrb[51].mxu1  ;;  %v13520_v21 = vsel %vm3237_vm6, %v3241_v0, %v3243_v58 }
 0x322   :  { %14772 = vst [vmem:[#allocation31_spill] sm:$0xff] %v13520_v21  ;;  %v1826_v30 = vadd.f32 %v13415_v33, %v1825_v15  ;;  %v1827_v8 = vpop.f32.mrb[85].mxu0  ;;  %v1951_v32 = vrot.slane %v1949_v63, 1  ;;  %12011 = vmatpush3.bf16.msra.mxu1 %v12572_v46  ;;  %v3740_v39 = vrot.slane %v1953_v3, 2  ;;  %v3741_v52 = vrot.slane %v1949_v63, 3 }
 0x323   :  { %v1828_v29 = vpop.f32.mrb[86].mxu0  ;;  %12036 = vmatprep.subr.bf16.mxu1 %v13507_v59  ;;  %v2943_v36 = vor.u32 %v2942_v47, %v2939_v18 }
 0x324   :  { %v2637_v55 = vpack.c.bf16 %v1826_v30, %v1821_v38  ;;  %v1829_v11 = vadd.f32 %v13417_v62, %v1828_v29  ;;  %v1952_v56 = vsel %vm1916_vm4, %v1947_v25, %v1951_v32  ;;  %v1830_v24 = vpop.f32.mrb[87].mxu0  ;;  %v3742_v0 = vor.u32 %v3741_v52, %v3740_v39 }
 0x325   :  { %11985 = vmatmul.mubr.msk.bf16.gmra.mrb[56].mxu1 %vm2036_vm5, %v1952_v56  ;;  %v13528_v33 = vsel %vm2909_vm7, %v2934_v1, %v2943_v36 }
 0x326   :  { %v13530_v48 = vpack.c.bf16 %v1829_v11, %v1826_v30  ;;  %v2673_v13 = vrot.slane %v2637_v55, 1  ;;  %v2946_v46 = vshrl.u32 %v2637_v55, 16  ;;  %v2949_v50 = vshll.u32 %v2637_v55, 16 }
 0x327   :  { %v3245_v61 = vrot.slane %v2637_v55, 2  ;;  %v13533_v31 = vsel %vm3728_vm8, %v3738_v54, %v3742_v0  ;;  %v1955_v30 = vor.u32 %v1953_v3, %v1951_v32 }
 0x328   :  { %14773 = vst [vmem:[#allocation32_spill] sm:$0xff] %v13533_v31  ;;  %v1957_v62 = vshll.u32 %v13530_v48, 16  ;;  %v1961_v38 = vshrl.u32 %v13530_v48, 16  ;;  %v13538_v63 = vsel %vm925_vm1, %v2671_v40, %v2673_v13  ;;  %v2948_v1 = vrot.slane %v2946_v46, 1 }
 0x329   :  { %v1833_v12 = vpop.f32.mrb[88].mxu0  ;;  %v2951_v15 = vrot.slane %v2949_v50, 2  ;;  %v13541_v18 = vsel %vm3237_vm6, %v3243_v58, %v3245_v61 }
 0x32a   :  { %14774 = vst [vmem:[#allocation33_spill] sm:$0xff] %v13541_v18  ;;  %v1834_v47 = vadd.f32 %v13419_v2, %v1833_v12  ;;  %v1835_v45 = vpop.f32.mrb[89].mxu0  ;;  %v1959_v8 = vrot.slane %v1957_v62, 1  ;;  %v3744_v54 = vrot.slane %v1961_v38, 2  ;;  %v3745_v39 = vrot.slane %v1957_v62, 3 }
 0x32b   :  { %v1836_v25 = vpop.f32.mrb[90].mxu0  ;;  %v2952_v29 = vor.u32 %v2951_v15, %v2948_v1 }
 0x32c   :  { %v2638_v52 = vpack.c.bf16 %v1834_v47, %v1829_v11  ;;  %v1837_v55 = vadd.f32 %v13421_v5, %v1836_v25  ;;  %v1960_v40 = vsel %vm1916_vm4, %v1955_v30, %v1959_v8  ;;  %v1838_v56 = vpop.f32.mrb[91].mxu0  ;;  %v3746_v24 = vor.u32 %v3745_v39, %v3744_v54 }
 0x32d   :  { %11988 = vmatprep.mubr.msk.bf16.mxu1 %vm2036_vm5, %v1960_v40  ;;  %v13548_v58 = vsel %vm2909_vm7, %v2943_v36, %v2952_v29  ;;  %v1963_v54 = vor.u32 %v1961_v38, %v1959_v8 }
 0x32e   :  { %v13550_v2 = vpack.c.bf16 %v1837_v55, %v1834_v47  ;;  %v2675_v3 = vrot.slane %v2638_v52, 1  ;;  %v2955_v32 = vshrl.u32 %v2638_v52, 16  ;;  %v2958_v46 = vshll.u32 %v2638_v52, 16 }
 0x32f   :  { %v3247_v50 = vrot.slane %v2638_v52, 2  ;;  %v13553_v62 = vsel %vm3728_vm8, %v3742_v0, %v3746_v24 }
 0x330   :  { %14775 = vst [vmem:[#allocation34_spill] sm:$0xff] %v13553_v62  ;;  %v1965_v5 = vshll.u32 %v13550_v2, 16  ;;  %v1969_v11 = vshrl.u32 %v13550_v2, 16  ;;  %v13558_v12 = vsel %vm925_vm1, %v2673_v13, %v2675_v3  ;;  %v2957_v36 = vrot.slane %v2955_v32, 1 }
 0x331   :  { %v1841_v1 = vpop.f32.mrb[92].mxu0  ;;  %v2960_v15 = vrot.slane %v2958_v46, 2  ;;  %v13561_v47 = vsel %vm3237_vm6, %v3245_v61, %v3247_v50 }
 0x332   :  { %14776 = vst [vmem:[#allocation35_spill] sm:$0xff] %v13561_v47  ;;  %v1842_v45 = vadd.f32 %v13423_v9, %v1841_v1  ;;  %v1843_v30 = vpop.f32.mrb[93].mxu0  ;;  %v1967_v25 = vrot.slane %v1965_v5, 1  ;;  %v3748_v0 = vrot.slane %v1969_v11, 2  ;;  %v3749_v40 = vrot.slane %v1965_v5, 3 }
 0x333   :  { %v1844_v39 = vpop.f32.mrb[94].mxu0  ;;  %v2961_v52 = vor.u32 %v2960_v15, %v2957_v36 }
 0x334   :  { %v2639_v56 = vpack.c.bf16 %v1842_v45, %v1837_v55  ;;  %v1845_v43 = vadd.f32 %v13425_v17, %v1844_v39  ;;  %v1968_v13 = vsel %vm1916_vm4, %v1963_v54, %v1967_v25  ;;  %v1846_v34 = vpop.f32.mrb[95].mxu0  ;;  %v3750_v32 = vor.u32 %v3749_v40, %v3748_v0 }
 0x335   :  { %11989 = vmatmul.mubr.msk.bf16.gmra.mrb[60].mxu1 %vm2036_vm5, %v1968_v13  ;;  %v13568_v61 = vsel %vm2909_vm7, %v2952_v29, %v2961_v52  ;;  %v1971_v0 = vor.u32 %v1969_v11, %v1967_v25 }
 0x336   :  { %v13570_v9 = vpack.c.bf16 %v1845_v43, %v1842_v45  ;;  %v2677_v38 = vrot.slane %v2639_v56, 1  ;;  %v2964_v8 = vshrl.u32 %v2639_v56, 16  ;;  %v2967_v46 = vshll.u32 %v2639_v56, 16 }
 0x337   :  { %v3249_v1 = vrot.slane %v2639_v56, 2  ;;  %v13573_v5 = vsel %vm3728_vm8, %v3746_v24, %v3750_v32 }
 0x338   :  { %14777 = vst [vmem:[#allocation36_spill] sm:$0xff] %v13573_v5  ;;  %v1973_v17 = vshll.u32 %v13570_v9, 16  ;;  %v1977_v55 = vshrl.u32 %v13570_v9, 16  ;;  %v13578_v34 = vsel %vm925_vm1, %v2675_v3, %v2677_v38  ;;  %v2966_v29 = vrot.slane %v2964_v8, 1 }
 0x339   :  { %v1849_v36 = vpop.f32.mrb[96].mxu0  ;;  %v2969_v15 = vrot.slane %v2967_v46, 2  ;;  %v13581_v45 = vsel %vm3237_vm6, %v3247_v50, %v3249_v1 }
 0x33a   :  { %14778 = vst [vmem:[#allocation37_spill] sm:$0xff] %v13581_v45  ;;  %v1850_v30 = vadd.f32 %v13429_v22, %v1849_v36  ;;  %v1851_v54 = vpop.f32.mrb[97].mxu0  ;;  %v1975_v39 = vrot.slane %v1973_v17, 1  ;;  %v3752_v24 = vrot.slane %v1977_v55, 2  ;;  %v3753_v13 = vrot.slane %v1973_v17, 3 }
 0x33b   :  { %v1852_v40 = vpop.f32.mrb[98].mxu0  ;;  %v2970_v56 = vor.u32 %v2969_v15, %v2966_v29 }
 0x33c   :  { %v2640_v5 = vpack.c.bf16 %v1850_v30, %v1845_v43  ;;  %v1853_v62 = vadd.f32 %v13432_v27, %v1852_v40  ;;  %v1976_v3 = vsel %vm1916_vm4, %v1971_v0, %v1975_v39  ;;  %v1854_v31 = vpop.f32.mrb[99].mxu0  ;;  %v3754_v8 = vor.u32 %v3753_v13, %v3752_v24 }
 0x33d   :  { %11992 = vmatprep.mubr.msk.bf16.mxu1 %vm2036_vm5, %v1976_v3  ;;  %v13588_v50 = vsel %vm2909_vm7, %v2961_v52, %v2970_v56 }
 0x33e   :  { %v13590_v22 = vpack.c.bf16 %v1853_v62, %v1850_v30  ;;  %v2679_v11 = vrot.slane %v2640_v5, 1  ;;  %v2973_v25 = vshrl.u32 %v2640_v5, 16  ;;  %v2976_v46 = vshll.u32 %v2640_v5, 16 }
 0x33f   :  { %v3251_v36 = vrot.slane %v2640_v5, 2  ;;  %v13593_v17 = vsel %vm3728_vm8, %v3750_v32, %v3754_v8  ;;  %v1979_v5 = vor.u32 %v1977_v55, %v1975_v39 }
 0x340   :  { %14779 = vst [vmem:[#allocation38_spill] sm:$0xff] %v13593_v17  ;;  %v1981_v43 = vshll.u32 %v13590_v22, 16  ;;  %v1985_v27 = vshrl.u32 %v13590_v22, 16  ;;  %v13598_v31 = vsel %vm925_vm1, %v2677_v38, %v2679_v11  ;;  %v2975_v52 = vrot.slane %v2973_v25, 1 }
 0x341   :  { %v1857_v29 = vpop.f32.mrb[100].mxu0  ;;  %v2978_v15 = vrot.slane %v2976_v46, 2  ;;  %v13601_v30 = vsel %vm3237_vm6, %v3249_v1, %v3251_v36  ;;  %v14763_v1 = vrot.slane %v13590_v22, 1 }
 0x342   :  { %14780 = vst [vmem:[#allocation39_spill] sm:$0xff] %v13601_v30  ;;  %v1858_v54 = vadd.f32 %v13439_v49, %v1857_v29  ;;  %v1859_v0 = vpop.f32.mrb[101].mxu0  ;;  %v1983_v24 = vrot.slane %v1981_v43, 1  ;;  %v3756_v32 = vrot.slane %v1985_v27, 2  ;;  %v3757_v3 = vrot.slane %v1981_v43, 3 }
 0x343   :  { %v1860_v40 = vpop.f32.mrb[102].mxu0  ;;  %v2979_v13 = vor.u32 %v2978_v15, %v2975_v52 }
 0x344   :  { %v2641_v17 = vpack.c.bf16 %v1858_v54, %v1853_v62  ;;  %v1861_v53 = vadd.f32 %v13442_v57, %v1860_v40  ;;  %v1984_v38 = vsel %vm1916_vm4, %v1979_v5, %v1983_v24  ;;  %v1862_v41 = vpop.f32.mrb[103].mxu0  ;;  %v3758_v55 = vor.u32 %v3757_v3, %v3756_v32 }
 0x345   :  { %11993 = vmatmul.mubr.msk.bf16.gmra.mrb[64].mxu1 %vm2036_vm5, %v1984_v38  ;;  %v13609_v25 = vsel %vm2909_vm7, %v2970_v56, %v2979_v13  ;;  %v1987_v29 = vor.u32 %v1985_v27, %v1983_v24 }
 0x346   :  { %v13612_v39 = vpack.c.bf16 %v1861_v53, %v1858_v54  ;;  %v2681_v46 = vrot.slane %v2641_v17, 1  ;;  %v2982_v43 = vshrl.u32 %v2641_v17, 16  ;;  %v2985_v62 = vshll.u32 %v2641_v17, 16 }
 0x347   :  { %v3253_v57 = vrot.slane %v2641_v17, 2  ;;  %v13615_v52 = vsel %vm3728_vm8, %v3754_v8, %v3758_v55 }
 0x348   :  { %14781 = vst [vmem:[#allocation40_spill] sm:$0xff] %v13615_v52  ;;  %v1989_v15 = vshll.u32 %v13612_v39, 16  ;;  %v1993_v56 = vshrl.u32 %v13612_v39, 16  ;;  %v2416_v0 = vrot.slane %v13612_v39, 1  ;;  %v13622_v5 = vsel %vm925_vm1, %v2679_v11, %v2681_v46 }
 0x349   :  { %v1865_v54 = vpop.f32.mrb[104].mxu0  ;;  %v2984_v32 = vrot.slane %v2982_v43, 1  ;;  %v2987_v40 = vrot.slane %v2985_v62, 2  ;;  %v13625_v27 = vsel %vm3237_vm6, %v3251_v36, %v3253_v57  ;;  %v3500_v8 = vrot.slane %v13612_v39, 2 }
 0x34a   :  { %14782 = vst [vmem:[#allocation41_spill] sm:$0xff] %v13625_v27  ;;  %v1866_v17 = vadd.f32 %v13457_v35, %v1865_v54  ;;  %v1867_v24 = vpop.f32.mrb[105].mxu0  ;;  %v1991_v3 = vrot.slane %v1989_v15, 1  ;;  %v13632_v38 = vsel %vm925_vm1, %v14763_v1, %v2416_v0  ;;  %v3760_v41 = vrot.slane %v1993_v56, 2 }
 0x34b   :  { %v1868_v11 = vpop.f32.mrb[106].mxu0  ;;  %v2988_v49 = vor.u32 %v2987_v40, %v2984_v32  ;;  %v14783_v43 = vrot.slane %v13590_v22, 2  ;;  %v3761_v36 = vrot.slane %v1989_v15, 3  ;;  %v4022_v52 = vrot.slane %v13612_v39, 3 }
 0x34c   :  { %v13640_v27 = vpack.c.bf16 %v1866_v17, %v1861_v53  ;;  %v1869_v35 = vadd.f32 %v13466_v42, %v1868_v11  ;;  %v1992_v54 = vsel %vm1916_vm4, %v1987_v29, %v1991_v3  ;;  %v1870_v24 = vpop.f32.mrb[107].mxu0 }
 0x34d   :  { %v13637_v62 = vsel %vm3237_vm6, %v14783_v43, %v3500_v8  ;;  %11996 = vmatprep.mubr.msk.bf16.mxu1 %vm2036_vm5, %v1992_v54  ;;  %v13646_v32 = vsel %vm2909_vm7, %v2979_v13, %v2988_v49  ;;  %v13648_v40 = vor.u32 %v3761_v36, %v3760_v41  ;;  %v14785_v43 = vrot.slane %v13590_v22, 3 }
 0x34e   :  { %14784 = vst [vmem:[#allocation42_spill] sm:$0xff] %v13637_v62  ;;  %v13655_v53 = vpack.c.bf16 %v1869_v35, %v1866_v17  ;;  %v2683_v42 = vrot.slane %v13640_v27, 1  ;;  %v2991_v29 = vshrl.u32 %v13640_v27, 16  ;;  %v2994_v11 = vshll.u32 %v13640_v27, 16 }
 0x34f   :  { %v13653_v15 = vsel %vm4006_vm9, %v14785_v43, %v4022_v52  ;;  %v1995_v24 = vor.u32 %v1993_v56, %v1991_v3  ;;  %v14764_v54 = vrot.slane %v13640_v27, 2  ;;  %v13663_v13 = vsel %vm3728_vm8, %v3758_v55, %v13648_v40 }
 0x350   :  { %14786 = vst [vmem:[#allocation43_spill] sm:$0xff] %v13653_v15  ;;  %14787 = vst [vmem:[#allocation44_spill] sm:$0xff] %v13663_v13  ;;  %v1997_v41 = vshll.u32 %v13655_v53, 16  ;;  %v2001_v36 = vshrl.u32 %v13655_v53, 16  ;;  %v2418_v17 = vrot.slane %v13655_v53, 1  ;;  %v13669_v43 = vsel %vm925_vm1, %v2681_v46, %v2683_v42 }
 0x351   :  { %v1873_v1 = vpop.f32.mrb[108].mxu0  ;;  %v2993_v15 = vrot.slane %v2991_v29, 1  ;;  %v2996_v62 = vrot.slane %v2994_v11, 2  ;;  %v13674_v56 = vsel %vm3237_vm6, %v3253_v57, %v14764_v54  ;;  %v14766_v55 = vrot.slane %v13655_v53, 2 }
 0x352   :  { %14788 = vst [vmem:[#allocation45_spill] sm:$0xff] %v13674_v56  ;;  %v1874_v3 = vadd.f32 %v13486_v16, %v1873_v1  ;;  %v1875_v13 = vpop.f32.mrb[109].mxu0  ;;  %v1999_v30 = vrot.slane %v1997_v41, 1  ;;  %v13679_v45 = vsel %vm925_vm1, %v2416_v0, %v2418_v17  ;;  %v3764_v47 = vrot.slane %v2001_v36, 2 }
 0x353   :  { %v1876_v46 = vpop.f32.mrb[110].mxu0  ;;  %v2997_v18 = vor.u32 %v2996_v62, %v2993_v15  ;;  %v13684_v29 = vsel %vm3237_vm6, %v3500_v8, %v14766_v55  ;;  %v3765_v11 = vrot.slane %v1997_v41, 3  ;;  %v14765_v57 = vrot.slane %v13655_v53, 3 }
 0x354   :  { %14789 = vst [vmem:[#allocation46_spill] sm:$0xff] %v13684_v29  ;;  %v13687_v54 = vpack.c.bf16 %v1874_v3, %v1874_v3  ;;  %v2643_v56 = vpack.c.bf16 %v1874_v3, %v1869_v35  ;;  %v1877_v16 = vadd.f32 %v13497_v26, %v1876_v46  ;;  %v2000_v1 = vsel %vm1916_vm4, %v1995_v24, %v1999_v30  ;;  %v1878_v0 = vpop.f32.mrb[111].mxu0 }
 0x355   :  { %11997 = vmatmul.mubr.msk.bf16.gmra.mrb[68].mxu1 %vm2036_vm5, %v2000_v1  ;;  %v2003_v13 = vor.u32 %v2001_v36, %v1999_v30  ;;  %v13693_v62 = vsel %vm2909_vm7, %v2988_v49, %v2997_v18  ;;  %v3766_v15 = vor.u32 %v3765_v11, %v3764_v47  ;;  %v13698_v8 = vsel %vm4006_vm9, %v4022_v52, %v14765_v57 }
 0x356   :  { %14790 = vst [vmem:[#allocation47_spill] sm:$0xff] %v13693_v62  ;;  %14791 = vst [vmem:[#allocation48_spill] sm:$0xff] %v13698_v8  ;;  %v13700_v41 = vpack.c.bf16 %v1877_v16, %v1877_v16  ;;  %v3472_v35 = vpack.c.bf16 %v1877_v16, %v1874_v3  ;;  %v2005_v26 = vshll.u32 %v13687_v54, 16  ;;  %v2009_v24 = vshrl.u32 %v13687_v54, 16 }
 0x357   :  { %v14767_v46 = vrot.slane %v13687_v54, 1  ;;  %v2685_v1 = vrot.slane %v2643_v56, 1  ;;  %v3000_v30 = vshrl.u32 %v2643_v56, 16  ;;  %v3003_v36 = vshll.u32 %v2643_v56, 16 }
 0x358   :  { %v2007_v49 = vrot.slane %v2005_v26, 1  ;;  %v3009_v11 = vshrl.u32 %v13700_v41, 16  ;;  %v3012_v52 = vshll.u32 %v13700_v41, 16  ;;  %v14792_v29 = vrot.slane %v13700_v41, 1 }
 0x359   :  { %v1881_v0 = vpop.f32.mrb[112].mxu0  ;;  %v13711_v3 = vsel %vm925_vm1, %v2418_v17, %v14767_v46  ;;  %v13714_v16 = vsel %vm925_vm1, %v2683_v42, %v2685_v1  ;;  %v3002_v57 = vrot.slane %v3000_v30, 1  ;;  %v3005_v55 = vrot.slane %v3003_v36, 2 }
 0x35a   :  { %v1882_v8 = vadd.f32 %v13514_v4, %v1881_v0  ;;  %v2008_v26 = vsel %vm1916_vm4, %v2003_v13, %v2007_v49  ;;  %v2011_v47 = vor.u32 %v2009_v24, %v2007_v49  ;;  %v13721_v21 = vsel %vm925_vm1, %v2685_v1, %v14792_v29  ;;  %v1883_v23 = vpop.f32.mrb[113].mxu0 }
 0x35b   :  { %12000 = vmatprep.mubr.msk.bf16.mxu1 %vm2036_vm5, %v2008_v26  ;;  %v3006_v17 = vor.u32 %v3005_v55, %v3002_v57  ;;  %v3011_v46 = vrot.slane %v3009_v11, 1  ;;  %v3014_v6 = vrot.slane %v3012_v52, 2  ;;  %v3257_v42 = vrot.slane %v2643_v56, 2  ;;  %v1884_v62 = vpop.f32.mrb[114].mxu0 }
 0x35c   :  { %v13724_v30 = vpack.c.bf16 %v1882_v8, %v1882_v8  ;;  %v3259_v4 = vrot.slane %v13700_v41, 2  ;;  %v3504_v36 = vrot.slane %v3472_v35, 2  ;;  %v1885_v13 = vpop.f32.mrb[115].mxu0  ;;  %v13729_v24 = vsel %vm3728_vm8, %v13648_v40, %v3766_v15 }
 0x35d   :  { %12001 = vmatmul.mubr.msk.bf16.gmra.mrb[72].mxu1 %vm2036_vm5, %v2011_v47  ;;  %v13733_v23 = vsel %vm2909_vm7, %v2997_v18, %v3006_v17  ;;  %v13735_v55 = vor.u32 %v3014_v6, %v3011_v46  ;;  %v14793_v56 = vrot.slane %v13640_v27, 2  ;;  %v3769_v57 = vshrl.u32 %v3472_v35, 16 }
 0x35e   :  { %v3778_v62 = vshrl.u32 %v13724_v30, 16  ;;  %v3781_v8 = vshll.u32 %v13724_v30, 16  ;;  %12012 = vmatprep.mubr.msk.bf16.mxu1 %vm2036_vm5, %v13427_v44  ;;  %v13749_v18 = vsel %vm3237_vm6, %v3257_v42, %v3259_v4  ;;  %v14794_v6 = vrot.slane %v13655_v53, 2 }
 0x35f   :  { %v13740_v29 = vsel %vm3237_vm6, %v14793_v56, %v3257_v42  ;;  %v13758_v40 = vsel %vm2909_vm7, %v3006_v17, %v13735_v55  ;;  %v3506_v46 = vrot.slane %v13724_v30, 2  ;;  %v3771_v1 = vrot.slane %v3769_v57, 2 }
 0x360   :  { %v13754_v27 = vsel %vm3237_vm6, %v14794_v6, %v3504_v36  ;;  %v3772_v49 = vshll.u32 %v3472_v35, 16  ;;  %v3780_v47 = vrot.slane %v3778_v62, 2  ;;  %v3783_v11 = vrot.slane %v3781_v8, 3  ;;  %v12575_v6 = vld [vmem:[#allocation8 + $0x50] sm:$0xff]  }
 0x361   :  { %v4026_v52 = vrot.slane %v3472_v35, 3  ;;  %v4028_v0 = vrot.slane %v13724_v30, 3  ;;  %v13765_v26 = vsel %vm3237_vm6, %v3504_v36, %v3506_v46  ;;  %v14795_v17 = vrot.slane %v13655_v53, 3  ;;  %v12574_v35 = vld [vmem:[#allocation8 + $0x48] sm:$0xff]  }
 0x362   :  { %v3774_v42 = vrot.slane %v3772_v49, 3  ;;  %v13767_v13 = vor.u32 %v3783_v11, %v3780_v47  ;;  %v2399_v49 = vrot.slane %v13427_v44, 1  ;;  %v2402_v11 = vrot.slane %v13449_v10, 1  ;;  %v12579_v44 = vld [vmem:[#allocation8 + $0x70] sm:$0xff]  }
 0x363   :  { %v13772_v56 = vsel %vm4006_vm9, %v14795_v17, %v4026_v52  ;;  %v13777_v57 = vsel %vm4006_vm9, %v4026_v52, %v4028_v0  ;;  %v2404_v52 = vrot.slane %v13481_v14, 1  ;;  %v2406_v17 = vrot.slane %v13504_v60, 1 }
 0x364   :  { %v3775_v62 = vor.u32 %v3774_v42, %v3771_v1  ;;  %v12576_v1 = vld [vmem:[#allocation8 + $0x58] sm:$0xff]   ;;  %v12578_v42 = vld [vmem:[#allocation8 + $0x68] sm:$0xff]  }
 0x365   :  { %12013 = vmatmul.mubr.msk.bf16.vlgmr.msra.gmra.mrb[52].mxu1 %vm2036_vm5, %v13434_v37 }
 0x366   :  { %v13782_v36 = vsel %vm3728_vm8, %v3766_v15, %v3775_v62  ;;  %v13786_v8 = vsel %vm3728_vm8, %v3775_v62, %v13767_v13  ;;  %12016 = vmatprep.mubr.msk.bf16.mxu1 %vm2036_vm5, %v13449_v10  ;;  %12037 = vmatpush3.bf16.msra.mxu1 %v13507_v59  ;;  %v12577_v15 = vld [vmem:[#allocation8 + $0x60] sm:$0xff]   ;;  %v2400_v59 = vrot.slane %v13434_v37, 1  ;;  %v12580_v62 = vld [vmem:[#allocation8 + $0x78] sm:$0xff]  }
 0x367   :  { %12038 = vmatprep.subr.bf16.mxu1 %v12574_v35 }
 0x368   :  { %v2401_v47 = vsel %vm925_vm1, %v2399_v49, %v2400_v59  ;;  %v2412_v49 = vrot.slane %v13570_v9, 1 }
 0x36a   :  { %12039 = vmatpush3.bf16.msra.mxu1 %v12574_v35  ;;  %v2408_v35 = vrot.slane %v13530_v48, 1 }
 0x36b   :  { %12040 = vmatprep.subr.bf16.mxu1 %v12575_v6 }
 0x36d   :  { %12017 = vmatmul.mubr.msk.bf16.gmra.mrb[56].mxu1 %vm2036_vm5, %v13481_v14 }
 0x36e   :  { %12020 = vmatprep.mubr.msk.bf16.mxu1 %vm2036_vm5, %v13504_v60  ;;  %12041 = vmatpush3.bf16.msra.mxu1 %v12575_v6  ;;  %v2407_v6 = vsel %vm925_vm1, %v2404_v52, %v2406_v17 }
 0x36f   :  { %12042 = vmatprep.subr.bf16.mxu1 %v12576_v1 }
 0x372   :  { %12043 = vmatpush3.bf16.msra.mxu1 %v12576_v1  ;;  %v2409_v1 = vsel %vm925_vm1, %v2406_v17, %v2408_v35  ;;  %v3485_v17 = vrot.slane %v13434_v37, 2 }
 0x373   :  { %12068 = vmatprep.subr.bf16.mxu1 %v12577_v15 }
 0x375   :  { %12021 = vmatmul.mubr.msk.bf16.gmra.mrb[60].mxu1 %vm2036_vm5, %v13530_v48 }
 0x376   :  { %12024 = vmatprep.mubr.msk.bf16.mxu1 %vm2036_vm5, %v13550_v2 }
 0x37d   :  { %12025 = vmatmul.mubr.msk.bf16.gmra.mrb[64].mxu1 %vm2036_vm5, %v13570_v9 }
 0x37e   :  { %12028 = vmatprep.mubr.msk.bf16.mxu1 %vm2036_vm5, %v13590_v22 }
 0x385   :  { %12029 = vmatmul.mubr.msk.bf16.gmra.mrb[68].mxu1 %vm2036_vm5, %v13612_v39  ;;  %v2403_v39 = vsel %vm925_vm1, %v2400_v59, %v2402_v11  ;;  %v2410_v59 = vrot.slane %v13550_v2, 1 }
 0x386   :  { %12032 = vmatprep.mubr.msk.bf16.mxu1 %vm2036_vm5, %v13655_v53  ;;  %v2405_v53 = vsel %vm925_vm1, %v2402_v11, %v2404_v52  ;;  %v14796_v52 = vrot.slane %v13590_v22, 1 }
 0x387   :  { %v2413_v11 = vsel %vm925_vm1, %v2410_v59, %v2412_v49 }
 0x38d   :  { %12033 = vmatmul.mubr.msk.bf16.gmra.mrb[76].mxu1 %vm2036_vm5, %v13687_v54 }
 0x38e   :  { %12044 = vmatprep.mubr.msk.bf16.mxu1 %vm2036_vm5, %v2401_v47  ;;  %v2411_v47 = vsel %vm925_vm1, %v2408_v35, %v2410_v59  ;;  %v12596_v59 = vld [vmem:[#allocation8 + $0xf8] sm:$0xff]  }
 0x395   :  { %12045 = vmatmul.mubr.msk.bf16.vlgmr.msra.gmra.mrb[52].mxu1 %vm2036_vm5, %v2403_v39  ;;  %v14797_v39 = vrot.slane %v13687_v54, 1 }
 0x396   :  { %12048 = vmatprep.mubr.msk.bf16.mxu1 %vm2036_vm5, %v2405_v53  ;;  %12069 = vmatpush3.bf16.msra.mxu1 %v12577_v15  ;;  %v12581_v15 = vld [vmem:[#allocation8 + $0x80] sm:$0xff]   ;;  %v12582_v53 = vld [vmem:[#allocation8 + $0x88] sm:$0xff]  }
 0x397   :  { %12070 = vmatprep.subr.bf16.mxu1 %v12578_v42 }
 0x39a   :  { %12071 = vmatpush3.bf16.msra.mxu1 %v12578_v42  ;;  %v2415_v42 = vsel %vm925_vm1, %v2412_v49, %v14796_v52 }
 0x39b   :  { %12072 = vmatprep.subr.bf16.mxu1 %v12579_v44 }
 0x39d   :  { %12049 = vmatmul.mubr.msk.bf16.gmra.mrb[56].mxu1 %vm2036_vm5, %v2407_v6  ;;  %v3490_v6 = vrot.slane %v13504_v60, 2 }
 0x39e   :  { %12052 = vmatprep.mubr.msk.bf16.mxu1 %vm2036_vm5, %v2409_v1  ;;  %12073 = vmatpush3.bf16.msra.mxu1 %v12579_v44  ;;  %v3486_v44 = vrot.slane %v13449_v10, 2 }
 0x39f   :  { %12074 = vmatprep.subr.bf16.mxu1 %v12580_v62 }
 0x3a0   :  { %v3487_v35 = vsel %vm3237_vm6, %v3485_v17, %v3486_v44  ;;  %v4010_v17 = vrot.slane %v13481_v14, 3 }
 0x3a2   :  { %12075 = vmatpush3.bf16.msra.mxu1 %v12580_v62  ;;  %v3488_v62 = vrot.slane %v13481_v14, 2 }
 0x3a3   :  { %12100 = vmatprep.subr.bf16.mxu1 %v12581_v15 }
 0x3a4   :  { %v3489_v1 = vsel %vm3237_vm6, %v3486_v44, %v3488_v62 }
 0x3a5   :  { %12053 = vmatmul.mubr.msk.bf16.gmra.mrb[60].mxu1 %vm2036_vm5, %v2411_v47 }
 0x3a6   :  { %12056 = vmatprep.mubr.msk.bf16.mxu1 %vm2036_vm5, %v2413_v11  ;;  %v12597_v11 = vld [vmem:[#allocation8 + $0x100] sm:$0xff]  }
 0x3ad   :  { %12057 = vmatmul.mubr.msk.bf16.gmra.mrb[64].mxu1 %vm2036_vm5, %v2415_v42  ;;  %v3496_v42 = vrot.slane %v13570_v9, 2 }
 0x3ae   :  { %12060 = vmatprep.mubr.msk.bf16.mxu1 %vm2036_vm5, %v13632_v38  ;;  %v12584_v38 = vld [vmem:[#allocation8 + $0x98] sm:$0xff]  }
 0x3b5   :  { %12061 = vmatmul.mubr.msk.bf16.gmra.mrb[68].mxu1 %vm2036_vm5, %v13679_v45  ;;  %v12583_v45 = vld [vmem:[#allocation8 + $0x90] sm:$0xff]  }
 0x3b6   :  { %12064 = vmatprep.mubr.msk.bf16.mxu1 %vm2036_vm5, %v13711_v3 }
 0x3bd   :  { %12065 = vmatmul.mubr.msk.bf16.gmra.mrb[80].mxu1 %vm2036_vm5, %v14797_v39 }
 0x3be   :  { %12076 = vmatprep.mubr.msk.bf16.mxu1 %vm2036_vm5, %v13460_v28  ;;  %v12585_v28 = vld [vmem:[#allocation8 + $0xa0] sm:$0xff]  }
 0x3c5   :  { %12077 = vmatmul.mubr.msk.bf16.vlgmr.msra.gmra.mrb[52].mxu1 %vm2036_vm5, %v13489_v19  ;;  %v14798_v19 = vrot.slane %v13700_v41, 1  ;;  %v12595_v41 = vld [vmem:[#allocation8 + $0xf0] sm:$0xff]  }
 0x3c6   :  { %12080 = vmatprep.mubr.msk.bf16.mxu1 %vm2036_vm5, %v13517_v7  ;;  %12101 = vmatpush3.bf16.msra.mxu1 %v12581_v15  ;;  %v12586_v7 = vld [vmem:[#allocation8 + $0xa8] sm:$0xff]   ;;  %v3494_v15 = vrot.slane %v13550_v2, 2 }
 0x3c7   :  { %12102 = vmatprep.subr.bf16.mxu1 %v12582_v53 }
 0x3ca   :  { %12103 = vmatpush3.bf16.msra.mxu1 %v12582_v53 }
 0x3cb   :  { %12104 = vmatprep.subr.bf16.mxu1 %v12583_v45 }
 0x3cd   :  { %12081 = vmatmul.mubr.msk.bf16.gmra.mrb[56].mxu1 %vm2036_vm5, %v13538_v63  ;;  %v12587_v63 = vld [vmem:[#allocation8 + $0xb0] sm:$0xff]  }
 0x3ce   :  { %12084 = vmatprep.mubr.msk.bf16.mxu1 %vm2036_vm5, %v13558_v12  ;;  %12105 = vmatpush3.bf16.msra.mxu1 %v12583_v45  ;;  %v14801_v12 = vld [vmem:[#allocation29_spill] sm:$0xff] }
 0x3cf   :  { %12106 = vmatprep.subr.bf16.mxu1 %v12584_v38 }
 0x3d2   :  { %12107 = vmatpush3.bf16.msra.mxu1 %v12584_v38 }
 0x3d3   :  { %12132 = vmatprep.subr.bf16.mxu1 %v12585_v28 }
 0x3d5   :  { %12085 = vmatmul.mubr.msk.bf16.gmra.mrb[60].mxu1 %vm2036_vm5, %v13578_v34  ;;  %v12591_v34 = vld [vmem:[#allocation8 + $0xd0] sm:$0xff]  }
 0x3d6   :  { %12088 = vmatprep.mubr.msk.bf16.mxu1 %vm2036_vm5, %v13598_v31  ;;  %v14803_v31 = vld [vmem:[#allocation33_spill] sm:$0xff] }
 0x3dd   :  { %12089 = vmatmul.mubr.msk.bf16.gmra.mrb[64].mxu1 %vm2036_vm5, %v13622_v5  ;;  %v12593_v5 = vld [vmem:[#allocation8 + $0xe0] sm:$0xff]  }
 0x3de   :  { %12092 = vmatprep.mubr.msk.bf16.mxu1 %vm2036_vm5, %v13669_v43 }
 0x3e5   :  { %12093 = vmatmul.mubr.msk.bf16.gmra.mrb[68].mxu1 %vm2036_vm5, %v13714_v16  ;;  %v14805_v16 = vld [vmem:[#allocation37_spill] sm:$0xff] }
 0x3e6   :  { %12096 = vmatprep.mubr.msk.bf16.mxu1 %vm2036_vm5, %v13721_v21  ;;  %v12588_v21 = vld [vmem:[#allocation8 + $0xb8] sm:$0xff]  }
 0x3ed   :  { %12097 = vmatmul.mubr.msk.bf16.gmra.mrb[84].mxu1 %vm2036_vm5, %v14798_v19 }
 0x3ee   :  { %12108 = vmatprep.mubr.msk.bf16.mxu1 %vm2036_vm5, %v13474_v51  ;;  %v12589_v51 = vld [vmem:[#allocation8 + $0xc0] sm:$0xff]  }
 0x3f5   :  { %12109 = vmatmul.mubr.msk.bf16.vlgmr.msra.gmra.mrb[52].mxu1 %vm2036_vm5, %v13501_v20  ;;  %v14799_v20 = vld [vmem:[#allocation47_spill] sm:$0xff] }
 0x3f6   :  { %12112 = vmatprep.mubr.msk.bf16.mxu1 %vm2036_vm5, %v13528_v33  ;;  %12133 = vmatpush3.bf16.msra.mxu1 %v12585_v28  ;;  %v14800_v33 = vld [vmem:[#allocation27_spill] sm:$0xff] }
 0x3f7   :  { %12134 = vmatprep.subr.bf16.mxu1 %v12586_v7 }
 0x3fa   :  { %12135 = vmatpush3.bf16.msra.mxu1 %v12586_v7  ;;  %v3497_v7 = vsel %vm3237_vm6, %v3494_v15, %v3496_v42 }
 0x3fb   :  { %12136 = vmatprep.subr.bf16.mxu1 %v12587_v63 }
 0x3fd   :  { %12113 = vmatmul.mubr.msk.bf16.gmra.mrb[56].mxu1 %vm2036_vm5, %v13548_v58  ;;  %v12590_v58 = vld [vmem:[#allocation8 + $0xc8] sm:$0xff]  }
 0x3fe   :  { %12116 = vmatprep.mubr.msk.bf16.mxu1 %vm2036_vm5, %v13568_v61  ;;  %12137 = vmatpush3.bf16.msra.mxu1 %v12587_v63  ;;  %v14802_v61 = vld [vmem:[#allocation31_spill] sm:$0xff]  ;;  %v14809_v63 = vrot.slane %v13590_v22, 2 }
 0x3ff   :  { %12138 = vmatprep.subr.bf16.mxu1 %v12588_v21 }
 0x402   :  { %12139 = vmatpush3.bf16.msra.mxu1 %v12588_v21  ;;  %v3499_v21 = vsel %vm3237_vm6, %v3496_v42, %v14809_v63 }
 0x403   :  { %12164 = vmatprep.subr.bf16.mxu1 %v12589_v51 }
 0x405   :  { %12117 = vmatmul.mubr.msk.bf16.gmra.mrb[60].mxu1 %vm2036_vm5, %v13588_v50  ;;  %v12592_v50 = vld [vmem:[#allocation8 + $0xd8] sm:$0xff]  }
 0x406   :  { %12120 = vmatprep.mubr.msk.bf16.mxu1 %vm2036_vm5, %v13609_v25  ;;  %v14804_v25 = vld [vmem:[#allocation35_spill] sm:$0xff] }
 0x40d   :  { %12121 = vmatmul.mubr.msk.bf16.gmra.mrb[64].mxu1 %vm2036_vm5, %v13646_v32 }
 0x40e   :  { %12124 = vmatprep.mubr.msk.bf16.mxu1 %vm2036_vm5, %v14799_v20  ;;  %v14811_v20 = vld [vmem:[#allocation46_spill] sm:$0xff] }
 0x415   :  { %12125 = vmatmul.mubr.msk.bf16.gmra.mrb[68].mxu1 %vm2036_vm5, %v13733_v23  ;;  %v14806_v23 = vld [vmem:[#allocation39_spill] sm:$0xff] }
 0x416   :  { %12128 = vmatprep.mubr.msk.bf16.mxu1 %vm2036_vm5, %v13758_v40  ;;  %v14808_v40 = vld [vmem:[#allocation45_spill] sm:$0xff] }
 0x41d   :  { %12129 = vmatmul.mubr.msk.bf16.gmra.mrb[88].mxu1 %vm2036_vm5, %v13735_v55  ;;  %v14807_v55 = vld [vmem:[#allocation41_spill] sm:$0xff] }
 0x41e   :  { %12140 = vmatprep.mubr.msk.bf16.mxu1 %vm2036_vm5, %v14800_v33  ;;  %v14812_v33 = vld [vmem:[#allocation28_spill] sm:$0xff] }
 0x425   :  { %12141 = vmatmul.mubr.msk.bf16.vlgmr.msra.gmra.mrb[52].mxu1 %vm2036_vm5, %v14801_v12  ;;  %v14813_v12 = vld [vmem:[#allocation30_spill] sm:$0xff] }
 0x426   :  { %12144 = vmatprep.mubr.msk.bf16.mxu1 %vm2036_vm5, %v14802_v61  ;;  %12165 = vmatpush3.bf16.msra.mxu1 %v12589_v51  ;;  %v14810_v51 = vld [vmem:[#allocation42_spill] sm:$0xff]  ;;  %v14814_v61 = vld [vmem:[#allocation32_spill] sm:$0xff] }
 0x427   :  { %12166 = vmatprep.subr.bf16.mxu1 %v12590_v58 }
 0x42a   :  { %12167 = vmatpush3.bf16.msra.mxu1 %v12590_v58  ;;  %v12598_v58 = vld [vmem:[#allocation8 + $0x108] sm:$0xff]  }
 0x42b   :  { %12168 = vmatprep.subr.bf16.mxu1 %v12591_v34 }
 0x42d   :  { %12145 = vmatmul.mubr.msk.bf16.gmra.mrb[56].mxu1 %vm2036_vm5, %v14803_v31 }
 0x42e   :  { %12148 = vmatprep.mubr.msk.bf16.mxu1 %vm2036_vm5, %v14804_v25  ;;  %12169 = vmatpush3.bf16.msra.mxu1 %v12591_v34  ;;  %v14815_v34 = vld [vmem:[#allocation34_spill] sm:$0xff] }
 0x42f   :  { %12170 = vmatprep.subr.bf16.mxu1 %v12592_v50 }
 0x430   :  { %v12002_v32 = vpop.f32.mrb[72].mxu1 }
 0x431   :  { %v2187_v54 = vpop.f32.mrb[73].mxu1 }
 0x432   :  { %v12003_v43 = vpop.f32.mrb[74].mxu1  ;;  %12171 = vmatpush3.bf16.msra.mxu1 %v12592_v50 }
 0x433   :  { %v2190_v3 = vpop.f32.mrb[75].mxu1  ;;  %12196 = vmatprep.subr.bf16.mxu1 %v12593_v5 }
 0x435   :  { %12149 = vmatmul.mubr.msk.bf16.gmra.mrb[60].mxu1 %vm2036_vm5, %v14805_v16  ;;  %v14818_v16 = vld [vmem:[#allocation40_spill] sm:$0xff] }
 0x436   :  { %12152 = vmatprep.mubr.msk.bf16.mxu1 %vm2036_vm5, %v14806_v23  ;;  %v14819_v23 = vld [vmem:[#allocation44_spill] sm:$0xff] }
 0x43d   :  { %12153 = vmatmul.mubr.msk.bf16.gmra.mrb[64].mxu1 %vm2036_vm5, %v14807_v55  ;;  %v4008_v55 = vrot.slane %v13449_v10, 3  ;;  %v4016_v10 = vrot.slane %v13550_v2, 3  ;;  %v14820_v2 = vrot.slane %v13590_v22, 3  ;;  %v14823_v22 = vmov 0  }
 0x43e   :  { %12156 = vmatprep.mubr.msk.bf16.mxu1 %vm2036_vm5, %v14808_v40  ;;  %v4007_v40 = vrot.slane %v13434_v37, 3  ;;  %v4014_v37 = vrot.slane %v13530_v48, 3 }
 0x440   :  { %v4009_v44 = vsel %vm4006_vm9, %v4007_v40, %v4008_v55  ;;  %v4017_v14 = vsel %vm4006_vm9, %v4014_v37, %v4016_v10 }
 0x445   :  { %12157 = vmatmul.mubr.msk.bf16.gmra.mrb[68].mxu1 %vm2036_vm5, %v13740_v29  ;;  %v12594_v29 = vld [vmem:[#allocation8 + $0xe8] sm:$0xff]  }
 0x446   :  { %12160 = vmatprep.mubr.msk.bf16.mxu1 %vm2036_vm5, %v13749_v18  ;;  %v3491_v18 = vsel %vm3237_vm6, %v3488_v62, %v3490_v6 }
 0x44d   :  { %12161 = vmatmul.mubr.msk.bf16.gmra.mrb[92].mxu1 %vm2036_vm5, %v3259_v4  ;;  %v3492_v4 = vrot.slane %v13530_v48, 2 }
 0x44e   :  { %12172 = vmatprep.mubr.msk.bf16.mxu1 %vm2036_vm5, %v3487_v35  ;;  %v4018_v35 = vrot.slane %v13570_v9, 3  ;;  %v14822_v9 = vld [vmem:[#allocation48_spill] sm:$0xff] }
 0x44f   :  { %v3493_v49 = vsel %vm3237_vm6, %v3490_v6, %v3492_v4  ;;  %v3495_v47 = vsel %vm3237_vm6, %v3492_v4, %v3494_v15  ;;  %v14821_v15 = vld [vmem:[#allocation43_spill] sm:$0xff] }
 0x450   :  { %v4019_v48 = vsel %vm4006_vm9, %v4016_v10, %v4018_v35  ;;  %v4021_v4 = vsel %vm4006_vm9, %v4018_v35, %v14820_v2 }
 0x455   :  { %12173 = vmatmul.mubr.msk.bf16.vlgmr.msra.gmra.mrb[52].mxu1 %vm2036_vm5, %v3489_v1 }
 0x456   :  { %12176 = vmatprep.mubr.msk.bf16.mxu1 %vm2036_vm5, %v3491_v18  ;;  %12197 = vmatpush3.bf16.msra.mxu1 %v12593_v5 }
 0x457   :  { %12198 = vmatprep.subr.bf16.mxu1 %v12594_v29 }
 0x45a   :  { %12199 = vmatpush3.bf16.msra.mxu1 %v12594_v29 }
 0x45b   :  { %12200 = vmatprep.subr.bf16.mxu1 %v12595_v41 }
 0x45d   :  { %12177 = vmatmul.mubr.msk.bf16.gmra.mrb[56].mxu1 %vm2036_vm5, %v3493_v49 }
 0x45e   :  { %12180 = vmatprep.mubr.msk.bf16.mxu1 %vm2036_vm5, %v3495_v47  ;;  %12201 = vmatpush3.bf16.msra.mxu1 %v12595_v41 }
 0x45f   :  { %12202 = vmatprep.subr.bf16.mxu1 %v12596_v59 }
 0x460   :  { %v12034_v52 = vpop.f32.mrb[76].mxu1 }
 0x461   :  { %v2372_v39 = vadd.f32 %v12034_v52, %v12002_v32  ;;  %v2363_v53 = vpop.f32.mrb[77].mxu1 }
 0x462   :  { %v2364_v45 = vadd.f32 %v2363_v53, %v2187_v54  ;;  %v12035_v38 = vpop.f32.mrb[78].mxu1  ;;  %12203 = vmatpush3.bf16.msra.mxu1 %v12596_v59 }
 0x463   :  { %v2366_v28 = vpop.f32.mrb[79].mxu1  ;;  %12228 = vmatprep.subr.bf16.mxu1 %v12597_v11 }
 0x464   :  { %v2367_v19 = vadd.f32 %v2366_v28, %v2190_v3  ;;  %v14817_v3 = vld [vmem:[#allocation38_spill] sm:$0xff] }
 0x465   :  { %12181 = vmatmul.mubr.msk.bf16.gmra.mrb[60].mxu1 %vm2036_vm5, %v3497_v7  ;;  %v12603_v7 = vld [vmem:[#allocation11 + $0x4] ss:$8 sps:$4 sm:$0xff]  }
 0x466   :  { %12184 = vmatprep.mubr.msk.bf16.mxu1 %vm2036_vm5, %v3499_v21  ;;  %11053 = vmatprep.mubr.msk.bf16.mxu0 %vm4551_vm10, %v12603_v7 }
 0x46d   :  { %12185 = vmatmul.mubr.msk.bf16.gmra.mrb[64].mxu1 %vm2036_vm5, %v14810_v51 }
 0x46e   :  { %12188 = vmatprep.mubr.msk.bf16.mxu1 %vm2036_vm5, %v14811_v20 }
 0x475   :  { %12189 = vmatmul.mubr.msk.bf16.gmra.mrb[68].mxu1 %vm2036_vm5, %v13754_v27  ;;  %v12599_v27 = vld [vmem:[#allocation8 + $0x110] sm:$0xff]  }
 0x476   :  { %12192 = vmatprep.mubr.msk.bf16.mxu1 %vm2036_vm5, %v13765_v26  ;;  %v12600_v26 = vld [vmem:[#allocation8 + $0x118] sm:$0xff]  }
 0x47d   :  { %12193 = vmatmul.mubr.msk.bf16.gmra.mrb[96].mxu1 %vm2036_vm5, %v3506_v46  ;;  %v14816_v46 = vld [vmem:[#allocation36_spill] sm:$0xff] }
 0x47e   :  { %12204 = vmatprep.mubr.msk.bf16.mxu1 %vm2036_vm5, %v14812_v33 }
 0x485   :  { %12205 = vmatmul.mubr.msk.bf16.vlgmr.msra.gmra.mrb[52].mxu1 %vm2036_vm5, %v14813_v12  ;;  %v6078_v12 = vld [vmem:[#allocation13 + $0x430] sm:$0xff] }
 0x486   :  { %12208 = vmatprep.mubr.msk.bf16.mxu1 %vm2036_vm5, %v14814_v61  ;;  %12229 = vmatpush3.bf16.msra.mxu1 %v12597_v11 }
 0x487   :  { %12230 = vmatprep.subr.bf16.mxu1 %v12598_v58 }
 0x48a   :  { %12231 = vmatpush3.bf16.msra.mxu1 %v12598_v58  ;;  %v6074_v58 = vld [vmem:[#allocation13 + $0x410] sm:$0xff] }
 0x48b   :  { %12232 = vmatprep.subr.bf16.mxu1 %v12599_v27  ;;  %v11239_v61 = vcombine.low %v6074_v58, %v6078_v12 }
 0x48d   :  { %12209 = vmatmul.mubr.msk.bf16.gmra.mrb[56].mxu1 %vm2036_vm5, %v14815_v34  ;;  %v6086_v34 = vld [vmem:[#allocation13 + $0x470] sm:$0xff] }
 0x48e   :  { %12212 = vmatprep.mubr.msk.bf16.mxu1 %vm2036_vm5, %v14816_v46  ;;  %12233 = vmatpush3.bf16.msra.mxu1 %v12599_v27  ;;  %v11240_v27 = vcombine.high %v6074_v58, %v6078_v12 }
 0x48f   :  { %12234 = vmatprep.subr.bf16.mxu1 %v12600_v26 }
 0x490   :  { %v12066_v50 = vpop.f32.mrb[80].mxu1 }
 0x491   :  { %v2632_v31 = vadd.f32 %v12066_v50, %v2372_v39  ;;  %v2596_v25 = vpop.f32.mrb[81].mxu1  ;;  %v6090_v50 = vld [vmem:[#allocation13 + $0x490] sm:$0xff] }
 0x492   :  { %v2630_v5 = vadd.f32 %v2596_v25, %v2364_v45  ;;  %v12067_v32 = vpop.f32.mrb[82].mxu1  ;;  %12235 = vmatpush3.bf16.msra.mxu1 %v12600_v26  ;;  %v6082_v26 = vld [vmem:[#allocation13 + $0x450] sm:$0xff] }
 0x493   :  { %v2599_v54 = vpop.f32.mrb[83].mxu1  ;;  %v11248_v46 = vcombine.high %v6082_v26, %v6086_v34  ;;  %6710 = vmatprep.subr.bf16.mxu1 %v11240_v27  ;;  %v11247_v25 = vcombine.low %v6082_v26, %v6086_v34 }
 0x494   :  { %v2631_v43 = vadd.f32 %v2599_v54, %v2367_v19 }
 0x495   :  { %12213 = vmatmul.mubr.msk.bf16.gmra.mrb[60].mxu1 %vm2036_vm5, %v14817_v3 }
 0x496   :  { %12216 = vmatprep.mubr.msk.bf16.mxu1 %vm2036_vm5, %v14818_v16 }
 0x49d   :  { %12217 = vmatmul.mubr.msk.bf16.gmra.mrb[64].mxu1 %vm2036_vm5, %v14819_v23 }
 0x49e   :  { %12220 = vmatprep.mubr.msk.bf16.mxu1 %vm2036_vm5, %v13729_v24  ;;  %v4012_v24 = vrot.slane %v13504_v60, 3 }
 0x4a5   :  { %12221 = vmatmul.mubr.msk.bf16.gmra.mrb[68].mxu1 %vm2036_vm5, %v13782_v36  ;;  %v4011_v36 = vsel %vm4006_vm9, %v4008_v55, %v4010_v17 }
 0x4a6   :  { %12224 = vmatprep.mubr.msk.bf16.mxu1 %vm2036_vm5, %v13786_v8  ;;  %v4013_v8 = vsel %vm4006_vm9, %v4010_v17, %v4012_v24 }
 0x4ad   :  { %12225 = vmatmul.mubr.msk.bf16.gmra.mrb[100].mxu1 %vm2036_vm5, %v13767_v13  ;;  %v4015_v13 = vsel %vm4006_vm9, %v4012_v24, %v4014_v37 }
 0x4ae   :  { %12236 = vmatprep.mubr.msk.bf16.mxu1 %vm2036_vm5, %v4009_v44  ;;  %v14018_v44 = vld [vmem:[#allocation10] ss:$0 sm:$0xff] }
 0x4b5   :  { %12237 = vmatmul.mubr.msk.bf16.vlgmr.msra.gmra.mrb[52].mxu1 %vm2036_vm5, %v4011_v36 }
 0x4b6   :  { %12240 = vmatprep.mubr.msk.bf16.mxu1 %vm2036_vm5, %v4013_v8  ;;  %6711 = vmatpush1.bf16.msra.mxu1 %v11239_v61 }
 0x4b7   :  { %6712 = vmatprep.subr.bf16.mxu1 %v11248_v46 }
 0x4ba   :  { %6713 = vmatpush1.bf16.msra.mxu1 %v11247_v25 }
 0x4bd   :  { %12241 = vmatmul.mubr.msk.bf16.gmra.mrb[56].mxu1 %vm2036_vm5, %v4015_v13 }
 0x4be   :  { %12244 = vmatprep.mubr.msk.bf16.mxu1 %vm2036_vm5, %v4017_v14 }
 0x4c0   :  { %v12098_v60 = vpop.f32.mrb[84].mxu1 }
 0x4c1   :  { %v2899_v62 = vadd.f32 %v12098_v60, %v2632_v31  ;;  %v2863_v6 = vpop.f32.mrb[85].mxu1  ;;  %v6094_v31 = vld [vmem:[#allocation13 + $0x4b0] sm:$0xff] }
 0x4c2   :  { %v2897_v29 = vadd.f32 %v2863_v6, %v2630_v5  ;;  %v12099_v1 = vpop.f32.mrb[86].mxu1  ;;  %v11256_v5 = vcombine.high %v6090_v50, %v6094_v31  ;;  %v11255_v32 = vcombine.low %v6090_v50, %v6094_v31 }
 0x4c3   :  { %v2866_v18 = vpop.f32.mrb[87].mxu1 }
 0x4c4   :  { %v2898_v41 = vadd.f32 %v2866_v18, %v2631_v43  ;;  %6714 = vmatprep.subr.bf16.mxu1 %v11256_v5 }
 0x4c5   :  { %12245 = vmatmul.mubr.msk.bf16.gmra.mrb[60].mxu1 %vm2036_vm5, %v4019_v48 }
 0x4c6   :  { %12248 = vmatprep.mubr.msk.bf16.mxu1 %vm2036_vm5, %v4021_v4  ;;  %6715 = vmatpush1.bf16.msra.mxu1 %v11255_v32 }
 0x4cd   :  { %12249 = vmatmul.mubr.msk.bf16.gmra.mrb[64].mxu1 %vm2036_vm5, %v14821_v15 }
 0x4ce   :  { %12252 = vmatprep.mubr.msk.bf16.mxu1 %vm2036_vm5, %v14822_v9 }
 0x4d5   :  { %12253 = vmatmul.mubr.msk.bf16.gmra.mrb[68].mxu1 %vm2036_vm5, %v13772_v56 }
 0x4d6   :  { %12256 = vmatprep.mubr.msk.bf16.mxu1 %vm2036_vm5, %v13777_v57 }
 0x4dd   :  { %12257 = vmatmul.mubr.msk.bf16.gmra.mrb[104].mxu1 %vm2036_vm5, %v4028_v0 }
 0x4de   :  { %6742 = vmatprep.mubr.bf16.mxu1 %v14823_v22 }
 0x4f0   :  { %v12130_v59 = vpop.f32.mrb[88].mxu1 }
 0x4f1   :  { %v3227_v49 = vadd.f32 %v12130_v59, %v2899_v62  ;;  %v3191_v47 = vpop.f32.mrb[89].mxu1 }
 0x4f2   :  { %v3225_v11 = vadd.f32 %v3191_v47, %v2897_v29  ;;  %v12131_v52 = vpop.f32.mrb[90].mxu1 }
 0x4f3   :  { %v3194_v42 = vpop.f32.mrb[91].mxu1 }
 0x4f4   :  { %v3226_v39 = vadd.f32 %v3194_v42, %v2898_v41 }
 0x520   :  { %v12162_v53 = vpop.f32.mrb[92].mxu1 }
 0x521   :  { %v3471_v45 = vadd.f32 %v12162_v53, %v3227_v49  ;;  %v3435_v38 = vpop.f32.mrb[93].mxu1 }
 0x522   :  { %v3469_v56 = vadd.f32 %v3435_v38, %v3225_v11  ;;  %v12163_v28 = vpop.f32.mrb[94].mxu1 }
 0x523   :  { %v3438_v19 = vpop.f32.mrb[95].mxu1 }
 0x524   :  { %v3470_v57 = vadd.f32 %v3438_v19, %v3226_v39 }
 0x550   :  { %v12194_v30 = vpop.f32.mrb[96].mxu1 }
 0x551   :  { %v3718_v0 = vadd.f32 %v12194_v30, %v3471_v45  ;;  %v3682_v63 = vpop.f32.mrb[97].mxu1 }
 0x552   :  { %v3716_v21 = vadd.f32 %v3682_v63, %v3469_v56  ;;  %v12195_v51 = vpop.f32.mrb[98].mxu1 }
 0x553   :  { %v3685_v20 = vpop.f32.mrb[99].mxu1 }
 0x554   :  { %v3717_v33 = vadd.f32 %v3685_v20, %v3470_v57 }
 0x580   :  { %v12226_v54 = vpop.f32.mrb[100].mxu1 }
 0x581   :  { %v14012_v43 = vadd.f32 %v12226_v54, %v3718_v0  ;;  %v3960_v3 = vpop.f32.mrb[101].mxu1 }
 0x582   :  { %v14014_v16 = vadd.f32 %v3960_v3, %v3716_v21  ;;  %v12227_v23 = vpop.f32.mrb[102].mxu1 }
 0x583   :  { %v3963_v55 = vpop.f32.mrb[103].mxu1 }
 0x584   :  { %v14016_v40 = vadd.f32 %v3963_v55, %v3717_v33 }
 0x588   :  { %v12238_v17 = vpop.f32.mrb[52].mxu1 }
 0x589   :  { %v4250_v24 = vadd.f32 %v12238_v17, %v14018_v44  ;;  %v4124_v36 = vpop.f32.mrb[53].mxu1 }
 0x58a   :  { %v4248_v8 = vadd.f32 %v14018_v44, %v4124_v36  ;;  %v12239_v37 = vpop.f32.mrb[54].mxu1 }
 0x58b   :  { %v4273_v10 = vmax.f32 %v4250_v24, 0.0  ;;  %v4251_v13 = vadd.f32 %v12239_v37, %v14018_v44  ;;  %v4127_v14 = vpop.f32.mrb[55].mxu1 }
 0x58c   :  { %v4271_v60 = vmax.f32 %v4248_v8, 0.0  ;;  %v4249_v35 = vadd.f32 %v14018_v44, %v4127_v14 }
 0x58d   :  { %v4274_v62 = vmax.f32 %v4251_v13, 0.0  ;;  %v4318_v29 = vrot.slane %v4273_v10, 1 }
 0x58e   :  { %v4272_v6 = vmax.f32 %v4249_v35, 0.0  ;;  %v4315_v18 = vrot.slane %v4271_v60, 1 }
 0x58f   :  { %v4320_v1 = vrot.slane %v4274_v62, 1 }
 0x590   :  { %v4316_v41 = vrot.slane %v4272_v6, 1  ;;  %v12242_v48 = vpop.f32.mrb[56].mxu1 }
 0x591   :  { %v4321_v2 = vsel %vm925_vm1, %v4318_v29, %v4320_v1  ;;  %v4254_v4 = vadd.f32 %v12242_v48, %v14018_v44  ;;  %v4140_v15 = vpop.f32.mrb[57].mxu1 }
 0x592   :  { %v14026_v9 = vmax.f32 %v4273_v10, %v4321_v2  ;;  %v4317_v59 = vsel %vm925_vm1, %v4315_v18, %v4316_v41  ;;  %v4319_v49 = vsel %vm925_vm1, %v4316_v41, %v4318_v29  ;;  %v4252_v47 = vadd.f32 %v14018_v44, %v4140_v15  ;;  %v12243_v11 = vpop.f32.mrb[58].mxu1 }
 0x593   :  { %v4377_v52 = vmax.f32 %v4271_v60, %v4317_v59  ;;  %v4378_v42 = vmax.f32 %v4272_v6, %v4319_v49  ;;  %v4277_v39 = vmax.f32 %v4254_v4, 0.0  ;;  %v4255_v53 = vadd.f32 %v12243_v11, %v14018_v44  ;;  %v4143_v45 = vpop.f32.mrb[59].mxu1 }
 0x594   :  { %v4434_v38 = vrot.slane %v14026_v9, 2  ;;  %v4275_v56 = vmax.f32 %v4252_v47, 0.0  ;;  %v4253_v28 = vadd.f32 %v14018_v44, %v4143_v45 }
 0x595   :  { %v4433_v19 = vrot.slane %v4378_v42, 2  ;;  %v4278_v57 = vmax.f32 %v4255_v53, 0.0  ;;  %v4326_v63 = vrot.slane %v4277_v39, 1 }
 0x596   :  { %v4322_v7 = vrot.slane %v4275_v56, 1  ;;  %v4276_v30 = vmax.f32 %v4253_v28, 0.0 }
 0x597   :  { %v4435_v0 = vsel %vm3237_vm6, %v4433_v19, %v4434_v38  ;;  %v4328_v21 = vrot.slane %v4278_v57, 1 }
 0x598   :  { %v4323_v51 = vsel %vm925_vm1, %v4320_v1, %v4322_v7  ;;  %v4324_v20 = vrot.slane %v4276_v30, 1  ;;  %v12246_v33 = vpop.f32.mrb[60].mxu1  ;;  %v4497_v58 = vmax.f32 %v4377_v52, %v4435_v0 }
 0x599   :  { %v4380_v12 = vmax.f32 %v4274_v62, %v4323_v51  ;;  %v4329_v61 = vsel %vm925_vm1, %v4326_v63, %v4328_v21  ;;  %v4258_v27 = vadd.f32 %v12246_v33, %v14018_v44  ;;  %v4156_v26 = vpop.f32.mrb[61].mxu1 }
 0x59a   :  { %v14038_v34 = vmax.f32 %v4277_v39, %v4329_v61  ;;  %v4325_v46 = vsel %vm925_vm1, %v4322_v7, %v4324_v20  ;;  %v4327_v50 = vsel %vm925_vm1, %v4324_v20, %v4326_v63  ;;  %v4256_v31 = vadd.f32 %v14018_v44, %v4156_v26  ;;  %v12247_v25 = vpop.f32.mrb[62].mxu1 }
 0x59b   :  { %v4436_v5 = vrot.slane %v4380_v12, 2  ;;  %v14043_v32 = vmax.f32 %v4275_v56, %v4325_v46  ;;  %v14045_v54 = vmax.f32 %v4276_v30, %v4327_v50  ;;  %v4281_v3 = vmax.f32 %v4258_v27, 0.0  ;;  %v4159_v23 = vpop.f32.mrb[63].mxu1 }
 0x59c   :  { %v4442_v55 = vrot.slane %v14038_v34, 2  ;;  %v4279_v17 = vmax.f32 %v4256_v31, 0.0  ;;  %v4259_v24 = vadd.f32 %v12247_v25, %v14018_v44  ;;  %v4257_v36 = vadd.f32 %v14018_v44, %v4159_v23 }
 0x59d   :  { %v4438_v8 = vrot.slane %v14043_v32, 2  ;;  %v4440_v37 = vrot.slane %v14045_v54, 2  ;;  %v4437_v10 = vsel %vm3237_vm6, %v4434_v38, %v4436_v5  ;;  %v4334_v29 = vrot.slane %v4281_v3, 1 }
 0x59e   :  { %v4330_v13 = vrot.slane %v4279_v17, 1  ;;  %v4282_v14 = vmax.f32 %v4259_v24, 0.0  ;;  %v4280_v60 = vmax.f32 %v4257_v36, 0.0  ;;  %v4498_v35 = vmax.f32 %v4378_v42, %v4437_v10 }
 0x59f   :  { %v4441_v62 = vsel %vm3237_vm6, %v4438_v8, %v4440_v37  ;;  %v14055_v6 = vsel %vm3237_vm6, %v4440_v37, %v4442_v55  ;;  %v4439_v1 = vsel %vm3237_vm6, %v4436_v5, %v4438_v8 }
 0x5a0   :  { %v4331_v18 = vsel %vm925_vm1, %v4328_v21, %v4330_v13  ;;  %v4336_v41 = vrot.slane %v4282_v14, 1  ;;  %v4332_v48 = vrot.slane %v4280_v60, 1  ;;  %v12250_v2 = vpop.f32.mrb[64].mxu1  ;;  %v4522_v4 = vpack.c.bf16 %v4498_v35, %v4497_v58 }
 0x5a1   :  { %v14059_v15 = vmax.f32 %v4278_v57, %v4331_v18  ;;  %v4262_v59 = vadd.f32 %v12250_v2, %v14018_v44  ;;  %v4172_v49 = vpop.f32.mrb[65].mxu1  ;;  %v4499_v47 = vmax.f32 %v14026_v9, %v4439_v1  ;;  %v4500_v11 = vmax.f32 %v4380_v12, %v4441_v62 }
 0x5a2   :  { %v4337_v52 = vsel %vm925_vm1, %v4334_v29, %v4336_v41  ;;  %v4333_v42 = vsel %vm925_vm1, %v4330_v13, %v4332_v48  ;;  %v4335_v39 = vsel %vm925_vm1, %v4332_v48, %v4334_v29  ;;  %v4260_v53 = vadd.f32 %v14018_v44, %v4172_v49  ;;  %v12251_v45 = vpop.f32.mrb[66].mxu1  ;;  %4566 = vmatpush1.bf16.msra.mxu0 %v4522_v4 }
 0x5a3   :  { %v4444_v38 = vrot.slane %v14059_v15, 2  ;;  %v14068_v56 = vmax.f32 %v4281_v3, %v4337_v52  ;;  %v14070_v28 = vmax.f32 %v4279_v17, %v4333_v42  ;;  %v14072_v19 = vmax.f32 %v4280_v60, %v4335_v39  ;;  %v4175_v9 = vpop.f32.mrb[67].mxu1  ;;  %4567 = vmatprep.subr.bf16.mxu0 %v14823_v22 }
 0x5a4   :  { %v4285_v57 = vmax.f32 %v4262_v59, 0.0  ;;  %v4283_v7 = vmax.f32 %v4260_v53, 0.0  ;;  %v4263_v30 = vadd.f32 %v12251_v45, %v14018_v44  ;;  %v4261_v0 = vadd.f32 %v14018_v44, %v4175_v9 }
 0x5a5   :  { %v4450_v63 = vrot.slane %v14068_v56, 2  ;;  %v4446_v21 = vrot.slane %v14070_v28, 2  ;;  %v4448_v51 = vrot.slane %v14072_v19, 2  ;;  %v4523_v20 = vpack.c.bf16 %v4500_v11, %v4499_v47 }
 0x5a6   :  { %v4342_v33 = vrot.slane %v4285_v57, 1  ;;  %v4338_v58 = vrot.slane %v4283_v7, 1  ;;  %v4286_v12 = vmax.f32 %v4263_v30, 0.0  ;;  %v4284_v61 = vmax.f32 %v4261_v0, 0.0 }
 0x5a7   :  { %v4449_v27 = vsel %vm3237_vm6, %v4446_v21, %v4448_v51  ;;  %v14082_v26 = vsel %vm3237_vm6, %v4448_v51, %v4450_v63  ;;  %4568 = vmatpush1.bf16.msra.mxu0 %v4523_v20  ;;  %v4445_v46 = vsel %vm3237_vm6, %v4442_v55, %v4444_v38  ;;  %v4501_v50 = vmax.f32 %v14043_v32, %v14055_v6 }
 0x5a8   :  { %v4339_v31 = vsel %vm925_vm1, %v4336_v41, %v4338_v58  ;;  %v4344_v25 = vrot.slane %v4286_v12, 1  ;;  %v4340_v5 = vrot.slane %v4284_v61, 1  ;;  %v12254_v3 = vpop.f32.mrb[68].mxu1  ;;  %4569 = vmatprep.subr.bf16.mxu0 %v14823_v22  ;;  %v4502_v23 = vmax.f32 %v14045_v54, %v4445_v46 }
 0x5a9   :  { %v14090_v17 = vmax.f32 %v4282_v14, %v4339_v31  ;;  %v4266_v24 = vadd.f32 %v12254_v3, %v14018_v44  ;;  %v4188_v36 = vpop.f32.mrb[69].mxu1  ;;  %v4447_v8 = vsel %vm3237_vm6, %v4444_v38, %v4446_v21  ;;  %v4504_v55 = vmax.f32 %v14059_v15, %v4449_v27 }
 0x5aa   :  { %v4345_v32 = vsel %vm925_vm1, %v4342_v33, %v4344_v25  ;;  %v4341_v37 = vsel %vm925_vm1, %v4338_v58, %v4340_v5  ;;  %v4343_v10 = vsel %vm925_vm1, %v4340_v5, %v4342_v33  ;;  %v4264_v13 = vadd.f32 %v14018_v44, %v4188_v36  ;;  %v12255_v60 = vpop.f32.mrb[70].mxu1 }
 0x5ab   :  { %v4452_v54 = vrot.slane %v14090_v17, 2  ;;  %v14100_v14 = vmax.f32 %v4285_v57, %v4345_v32  ;;  %v14102_v35 = vmax.f32 %v4283_v7, %v4341_v37  ;;  %v14104_v62 = vmax.f32 %v4284_v61, %v4343_v10  ;;  %v4191_v6 = vpop.f32.mrb[71].mxu1 }
 0x5ac   :  { %v4289_v29 = vmax.f32 %v4266_v24, 0.0  ;;  %v4287_v1 = vmax.f32 %v4264_v13, 0.0  ;;  %v14107_v18 = vadd.f32 %v12255_v60, %v14018_v44  ;;  %v4524_v41 = vpack.c.bf16 %v4502_v23, %v4501_v50 }
 0x5ad   :  { %v4458_v48 = vrot.slane %v14100_v14, 2  ;;  %v4454_v2 = vrot.slane %v14102_v35, 2  ;;  %v4456_v4 = vrot.slane %v14104_v62, 2  ;;  %v4265_v15 = vadd.f32 %v14018_v44, %v4191_v6 }
 0x5ae   :  { %v4350_v59 = vrot.slane %v4289_v29, 1  ;;  %v4346_v49 = vrot.slane %v4287_v1, 1  ;;  %v4290_v47 = vmax.f32 %v14107_v18, 0.0  ;;  %4570 = vmatpush1.bf16.msra.mxu0 %v4524_v41  ;;  %v4503_v11 = vmax.f32 %v14038_v34, %v4447_v8 }
 0x5af   :  { %v4457_v52 = vsel %vm3237_vm6, %v4454_v2, %v4456_v4  ;;  %v4459_v42 = vsel %vm3237_vm6, %v4456_v4, %v4458_v48  ;;  %v4288_v39 = vmax.f32 %v4265_v15, 0.0  ;;  %4571 = vmatprep.subr.bf16.mxu0 %v14823_v22  ;;  %v4453_v53 = vsel %vm3237_vm6, %v4450_v63, %v4452_v54 }
 0x5b0   :  { %v4347_v45 = vsel %vm925_vm1, %v4344_v25, %v4346_v49  ;;  %v4352_v38 = vrot.slane %v4290_v47, 1  ;;  %v4525_v9 = vpack.c.bf16 %v4504_v55, %v4503_v11  ;;  %v12258_v57 = vpop.f32.mrb[104].mxu1  ;;  %v4505_v7 = vmax.f32 %v14070_v28, %v14082_v26 }
 0x5b1   :  { %v4392_v30 = vmax.f32 %v4286_v12, %v4347_v45  ;;  %v4348_v0 = vrot.slane %v4288_v39, 1  ;;  %v4240_v34 = vadd.f32 %v12258_v57, %v14012_v43  ;;  %v4204_v21 = vpop.f32.mrb[105].mxu1  ;;  %v4506_v51 = vmax.f32 %v14072_v19, %v4453_v53 }
 0x5b2   :  { %v4353_v20 = vsel %vm925_vm1, %v4350_v59, %v4352_v38  ;;  %4572 = vmatpush1.bf16.msra.mxu0 %v4525_v9  ;;  %v4238_v63 = vadd.f32 %v4204_v21, %v14014_v16  ;;  %v12259_v33 = vpop.f32.mrb[106].mxu1  ;;  %v4455_v58 = vsel %vm3237_vm6, %v4452_v54, %v4454_v2  ;;  %v4508_v61 = vmax.f32 %v14090_v17, %v4457_v52 }
 0x5b3   :  { %v4460_v27 = vrot.slane %v4392_v30, 2  ;;  %v14128_v46 = vmax.f32 %v4289_v29, %v4353_v20  ;;  %v4349_v28 = vsel %vm925_vm1, %v4346_v49, %v4348_v0  ;;  %v4351_v43 = vsel %vm925_vm1, %v4348_v0, %v4350_v59  ;;  %4573 = vmatprep.subr.bf16.mxu0 %v14823_v22  ;;  %v4207_v19 = vpop.f32.mrb[107].mxu1  ;;  %v4651_v33 = vld [vmem:[#allocation13 + $0x120] sm:$0xff] }
 0x5b4   :  { %v4393_v12 = vmax.f32 %v4287_v1, %v4349_v28  ;;  %v4394_v26 = vmax.f32 %v4288_v39, %v4351_v43  ;;  %v4270_v50 = vadd.f32 %v14018_v44, %v4240_v34  ;;  %v4268_v16 = vadd.f32 %v14018_v44, %v4238_v63  ;;  %v4647_v63 = vld [vmem:[#allocation13 + $0x100] sm:$0xff] }
 0x5b5   :  { %v4466_v31 = vrot.slane %v14128_v46, 2  ;;  %v4526_v25 = vpack.c.bf16 %v4506_v51, %v4505_v7  ;;  %v4239_v5 = vadd.f32 %v4207_v19, %v14016_v40  ;;  %v4507_v3 = vmax.f32 %v14068_v56, %v4455_v58  ;;  %v4659_v28 = vld [vmem:[#allocation13 + $0x160] sm:$0xff]  ;;  %v12604_v19 = vld [vmem:[#allocation11 + $0x14] ss:$8 sps:$4 sm:$0xff]  }
 0x5b6   :  { %v4462_v23 = vrot.slane %v4393_v12, 2  ;;  %v4464_v17 = vrot.slane %v4394_v26, 2  ;;  %v4293_v24 = vmax.f32 %v4270_v50, 0.0  ;;  %v4291_v36 = vmax.f32 %v4268_v16, 0.0  ;;  %v12601_v43 = vld [vmem:[#allocation11] ss:$8 sps:$4 sm:$0xff]  }
 0x5b7   :  { %4574 = vmatpush1.bf16.msra.mxu0 %v4526_v25  ;;  %v4269_v8 = vadd.f32 %v14018_v44, %v4239_v5  ;;  %v4527_v55 = vpack.c.bf16 %v4508_v61, %v4507_v3  ;;  %v4461_v32 = vsel %vm3237_vm6, %v4458_v48, %v4460_v27  ;;  %v4509_v37 = vmax.f32 %v14102_v35, %v4459_v42  ;;  %v4663_v50 = vld [vmem:[#allocation13 + $0x180] sm:$0xff]  ;;  %v12606_v5 = vld [vmem:[#allocation11 + $0x10] ss:$8 sps:$4 sm:$0xff]  }
 0x5b8   :  { %v4465_v10 = vsel %vm3237_vm6, %v4462_v23, %v4464_v17  ;;  %v4467_v13 = vsel %vm3237_vm6, %v4464_v17, %v4466_v31  ;;  %v4402_v60 = vrot.slane %v4293_v24, 1  ;;  %v4354_v40 = vrot.slane %v4291_v36, 1  ;;  %4575 = vmatprep.subr.bf16.mxu0 %v14823_v22  ;;  %v4667_v16 = vld [vmem:[#allocation13 + $0x1a0] sm:$0xff] }
 0x5b9   :  { %v4292_v56 = vmax.f32 %v4269_v8, 0.0  ;;  %v4510_v54 = vmax.f32 %v14104_v62, %v4461_v32  ;;  %v4463_v6 = vsel %vm3237_vm6, %v4460_v27, %v4462_v23  ;;  %v4512_v29 = vmax.f32 %v4392_v30, %v4465_v10  ;;  %v4671_v23 = vld [vmem:[#allocation13 + $0x1c0] sm:$0xff]  ;;  %v4648_v10 = vld [vmem:[#allocation13 + $0x108] sm:$0xff] }
 0x5ba   :  { %v4355_v44 = vsel %vm925_vm1, %v4352_v38, %v4354_v40  ;;  %v4511_v1 = vmax.f32 %v14100_v14, %v4463_v6  ;;  %v4513_v48 = vmax.f32 %v4393_v12, %v4467_v13  ;;  %v4409_v2 = vmax.f32 %v4293_v24, %v4402_v60  ;;  %v4675_v17 = vld [vmem:[#allocation13 + $0x1e0] sm:$0xff]  ;;  %v6098_v24 = vld [vmem:[#allocation13 + $0x4d0] sm:$0xff]  ;;  %v4652_v13 = vld [vmem:[#allocation13 + $0x128] sm:$0xff] }
 0x5bb   :  { %v4396_v18 = vmax.f32 %v4290_v47, %v4355_v44  ;;  %v4400_v35 = vrot.slane %v4292_v56, 1  ;;  %4576 = vmatpush1.bf16.msra.mxu0 %v4527_v55  ;;  %v4528_v41 = vpack.c.bf16 %v4510_v54, %v4509_v37  ;;  %v4397_v53 = vmax.f32 %v4291_v36, %v4354_v40  ;;  %v6102_v55 = vld [vmem:[#allocation13 + $0x4f0] sm:$0xff]  ;;  %v6796_v54 = vld [vmem:[#allocation13 + $0x620] sm:$0xff]  ;;  %v4656_v44 = vld [vmem:[#allocation13 + $0x148] sm:$0xff] }
 0x5bc   :  { %4577 = vmatprep.subr.bf16.mxu0 %v14823_v22  ;;  %v4529_v4 = vpack.c.bf16 %v4512_v29, %v4511_v1  ;;  %v4474_v14 = vrot.slane %v4409_v2, 2  ;;  %v14824_v21 = vmov 65535   ;;  %v11056_v61 = vcombine.high %v4647_v63, %v4651_v33 }
 0x5bd   :  { %v4401_v15 = vsel %vm925_vm1, %v4354_v40, %v4400_v35  ;;  %v4403_v62 = vsel %vm925_vm1, %v4400_v35, %v4402_v60  ;;  %v4468_v59 = vrot.slane %v4396_v18, 2  ;;  %v4560_v51 = vsel %vm4558_vm11, 4294967295, %v14824_v21  ;;  %v6792_v60 = vld [vmem:[#allocation13 + $0x600] sm:$0xff] }
 0x5be   :  { %v4407_v49 = vmax.f32 %v4291_v36, %v4401_v15  ;;  %v4408_v11 = vmax.f32 %v4292_v56, %v4403_v62  ;;  %v4561_v58 = vsel %vm4559_vm12, %v4560_v51, 0  ;;  %v11055_v12 = vcombine.low %v4647_v63, %v4651_v33  ;;  %v6800_v35 = vld [vmem:[#allocation13 + $0x640] sm:$0xff]  ;;  %v4649_v33 = vld [vmem:[#allocation13 + $0x110] sm:$0xff] }
 0x5bf   :  { %4578 = vmatpush1.bf16.msra.mxu0 %v4528_v41  ;;  %v4469_v52 = vsel %vm3237_vm6, %v4466_v31, %v4468_v59  ;;  %v11072_v25 = vcombine.high %v4663_v50, %v4667_v16  ;;  %v11071_v3 = vcombine.low %v4663_v50, %v4667_v16  ;;  %v11079_v36 = vcombine.low %v4671_v23, %v4675_v17  ;;  %v6804_v41 = vld [vmem:[#allocation13 + $0x660] sm:$0xff]  ;;  %v6802_v50 = vld [vmem:[#allocation13 + $0x650] sm:$0xff] }
 0x5c0   :  { %v4470_v47 = vrot.slane %v4407_v49, 2  ;;  %v4472_v42 = vrot.slane %v4408_v11, 2  ;;  %4579 = vmatprep.subr.bf16.mxu0 %v14823_v22  ;;  %v4514_v39 = vmax.f32 %v4394_v26, %v4469_v52  ;;  %v11080_v8 = vcombine.high %v4671_v23, %v4675_v17  ;;  %v4664_v11 = vld [vmem:[#allocation13 + $0x188] sm:$0xff]  ;;  %v6806_v16 = vld [vmem:[#allocation13 + $0x670] sm:$0xff] }
 0x5c1   :  { %v11263_v32 = vcombine.low %v6098_v24, %v6102_v55  ;;  %v11264_v37 = vcombine.high %v6098_v24, %v6102_v55  ;;  %v11057_v40 = vcombine.low %v4648_v10, %v4652_v13  ;;  %v11058_v56 = vcombine.high %v4648_v10, %v4652_v13  ;;  %v4665_v17 = vld [vmem:[#allocation13 + $0x190] sm:$0xff] }
 0x5c2   :  { %v4473_v45 = vsel %vm3237_vm6, %v4470_v47, %v4472_v42  ;;  %v4475_v38 = vsel %vm3237_vm6, %v4472_v42, %v4474_v14  ;;  %v4530_v9 = vpack.c.bf16 %v4514_v39, %v4513_v48  ;;  %v4471_v57 = vsel %vm3237_vm6, %v4468_v59, %v4470_v47  ;;  %v4668_v14 = vld [vmem:[#allocation13 + $0x1a8] sm:$0xff]  ;;  %v6808_v47 = vld [vmem:[#allocation13 + $0x680] sm:$0xff]  ;;  %v4669_v24 = vld [vmem:[#allocation13 + $0x1b0] sm:$0xff] }
 0x5c3   :  { %4580 = vmatpush1.bf16.msra.mxu0 %v4529_v4  ;;  %v4515_v7 = vmax.f32 %v14128_v46, %v4471_v57  ;;  %v4516_v30 = vmax.f32 %v4396_v18, %v4473_v45  ;;  %v4517_v0 = vmax.f32 %v4397_v53, %v4475_v38  ;;  %v4655_v46 = vld [vmem:[#allocation13 + $0x140] sm:$0xff]  ;;  %6716 = vmatprep.subr.bf16.mxu1 %v11264_v37  ;;  %v4660_v18 = vld [vmem:[#allocation13 + $0x168] sm:$0xff]  ;;  %v4673_v13 = vld [vmem:[#allocation13 + $0x1d0] sm:$0xff] }
 0x5c4   :  { %4581 = vmatprep.subr.bf16.mxu0 %v14823_v22  ;;  %v11064_v26 = vcombine.high %v4655_v46, %v4659_v28  ;;  %v11063_v31 = vcombine.low %v4655_v46, %v4659_v28  ;;  %v11271_v6 = vcombine.low %v6792_v60, %v6796_v54  ;;  %v11272_v29 = vcombine.high %v6792_v60, %v6796_v54  ;;  %v6812_v42 = vld [vmem:[#allocation13 + $0x6a0] sm:$0xff]  ;;  %v4676_v57 = vld [vmem:[#allocation13 + $0x1e8] sm:$0xff]  ;;  %v4677_v60 = vld [vmem:[#allocation13 + $0x1f0] sm:$0xff] }
 0x5c5   :  { %v4531_v34 = vpack.c.bf16 %v4516_v30, %v4515_v7  ;;  %v4532_v20 = vpack.c.bf16 %v4517_v0, %v4517_v0  ;;  %6717 = vmatpush1.bf16.msra.mxu1 %v11263_v32  ;;  %v11066_v59 = vcombine.high %v4656_v44, %v4660_v18  ;;  %v11280_v49 = vcombine.high %v6800_v35, %v6804_v41  ;;  %v6816_v7 = vld [vmem:[#allocation13 + $0x6c0] sm:$0xff] }
 0x5c6   :  { %6988 = vmatprep.subr.bf16.mxu1 %v11272_v29  ;;  %v11065_v39 = vcombine.low %v4656_v44, %v4660_v18  ;;  %v11279_v53 = vcombine.low %v6800_v35, %v6804_v41  ;;  %v11074_v45 = vcombine.high %v4664_v11, %v4668_v14  ;;  %v11288_v38 = vcombine.high %v6808_v47, %v6812_v42  ;;  %v6820_v30 = vld [vmem:[#allocation13 + $0x6e0] sm:$0xff]  ;;  %v4654_v18 = vld [vmem:[#allocation13 + $0x138] sm:$0xff] }
 0x5c7   :  { %4582 = vmatpush1.bf16.msra.mxu0 %v4530_v9  ;;  %v4563_v27 = vand.u32 %v4561_v58, %v4532_v20  ;;  %v4672_v9 = vld [vmem:[#allocation13 + $0x1c8] sm:$0xff]  ;;  %v11073_v21 = vcombine.low %v4664_v11, %v4668_v14  ;;  %v11287_v51 = vcombine.low %v6808_v47, %v6812_v42  ;;  %v11296_v63 = vcombine.high %v6816_v7, %v6820_v30  ;;  %v4653_v58 = vld [vmem:[#allocation13 + $0x130] sm:$0xff]  ;;  %v7160_v35 = vld [vmem:[#allocation13 + $0x700] sm:$0xff] }
 0x5c8   :  { %4583 = vmatprep.subr.bf16.mxu0 %v14823_v22  ;;  %v11082_v20 = vcombine.high %v4672_v9, %v4676_v57  ;;  %v11081_v46 = vcombine.low %v4672_v9, %v4676_v57  ;;  %v11295_v28 = vcombine.low %v6816_v7, %v6820_v30  ;;  %v11284_v23 = vcombine.high %v6802_v50, %v6806_v16  ;;  %v7164_v41 = vld [vmem:[#allocation13 + $0x720] sm:$0xff]  ;;  %v4658_v11 = vld [vmem:[#allocation13 + $0x158] sm:$0xff] }
 0x5c9   :  { %v11283_v32 = vcombine.low %v6802_v50, %v6806_v16  ;;  %v11076_v37 = vcombine.high %v4665_v17, %v4669_v24  ;;  %v11075_v54 = vcombine.low %v4665_v17, %v4669_v24  ;;  %v11084_v29 = vcombine.high %v4673_v13, %v4677_v60  ;;  %v7168_v14 = vld [vmem:[#allocation13 + $0x740] sm:$0xff]  ;;  %v4670_v9 = vld [vmem:[#allocation13 + $0x1b8] sm:$0xff]  ;;  %v7170_v17 = vld [vmem:[#allocation13 + $0x750] sm:$0xff] }
 0x5ca   :  { %v7172_v47 = vld [vmem:[#allocation13 + $0x760] sm:$0xff]  ;;  %v7174_v24 = vld [vmem:[#allocation13 + $0x770] sm:$0xff] }
 0x5cb   :  { %4584 = vmatpush1.bf16.msra.mxu0 %v4531_v34  ;;  %v7176_v57 = vld [vmem:[#allocation13 + $0x780] sm:$0xff] }
 0x5cc   :  { %4585 = vmatprep.subr.bf16.mxu0 %v14823_v22  ;;  %v7180_v7 = vld [vmem:[#allocation13 + $0x7a0] sm:$0xff] }
 0x5cf   :  { %4586 = vmatpush1.bf16.msra.mxu0 %v4563_v27  ;;  %v6798_v27 = vld [vmem:[#allocation13 + $0x630] sm:$0xff] }
 0x5d0   :  { %4844 = vmatprep.subr.bf16.mxu0 %v11056_v61  ;;  %v6794_v61 = vld [vmem:[#allocation13 + $0x610] sm:$0xff] }
 0x5d2   :  { %4598 = vmatmul.mubr.bf16.vlgmr.msra.gmra.mrb[116].mxu0 %v12601_v43  ;;  %v11060_v43 = vcombine.high %v4649_v33, %v4653_v58 }
 0x5d3   :  { %11054 = vmatprep.mubr.msk.bf16.mxu0 %vm4551_vm10, %v12604_v19  ;;  %4845 = vmatpush1.bf16.msra.mxu0 %v11055_v12  ;;  %v11276_v19 = vcombine.high %v6794_v61, %v6798_v27  ;;  %v4657_v12 = vld [vmem:[#allocation13 + $0x150] sm:$0xff] }
 0x5d4   :  { %4846 = vmatprep.subr.bf16.mxu0 %v11064_v26  ;;  %v4661_v26 = vld [vmem:[#allocation13 + $0x170] sm:$0xff] }
 0x5d5   :  { %v11067_v55 = vcombine.low %v4657_v12, %v4661_v26 }
 0x5d7   :  { %4847 = vmatpush1.bf16.msra.mxu0 %v11063_v31  ;;  %v11059_v31 = vcombine.low %v4649_v33, %v4653_v58  ;;  %v7184_v33 = vld [vmem:[#allocation13 + $0x7c0] sm:$0xff] }
 0x5d8   :  { %4848 = vmatprep.subr.bf16.mxu0 %v11072_v25  ;;  %v11275_v25 = vcombine.low %v6794_v61, %v6798_v27  ;;  %v7188_v58 = vld [vmem:[#allocation13 + $0x7e0] sm:$0xff]  ;;  %v11323_v27 = vcombine.low %v7176_v57, %v7180_v7 }
 0x5d9   :  { %v11331_v16 = vcombine.low %v7184_v33, %v7188_v58 }
 0x5da   :  { %4606 = vmatmul.mubr.bf16.gmra.mrb[120].mxu0 %v12606_v5 }
 0x5db   :  { %4849 = vmatpush1.bf16.msra.mxu0 %v11071_v3  ;;  %4876 = vmatprep.mubr.bf16.mxu0 %v14823_v22  ;;  %v11068_v3 = vcombine.high %v4657_v12, %v4661_v26  ;;  %v7162_v12 = vld [vmem:[#allocation13 + $0x710] sm:$0xff] }
 0x5dc   :  { %4850 = vmatprep.subr.bf16.mxu0 %v11080_v8  ;;  %v6814_v8 = vld [vmem:[#allocation13 + $0x6b0] sm:$0xff] }
 0x5dd   :  { %v7166_v26 = vld [vmem:[#allocation13 + $0x730] sm:$0xff] }
 0x5df   :  { %4851 = vmatpush1.bf16.msra.mxu0 %v11079_v36  ;;  %v6810_v36 = vld [vmem:[#allocation13 + $0x690] sm:$0xff] }
 0x5e0   :  { %4885 = vmatprep.subr.bf16.mxu0 %v11058_v56  ;;  %v11292_v10 = vcombine.high %v6810_v36, %v6814_v8  ;;  %v6822_v56 = vld [vmem:[#allocation13 + $0x6f0] sm:$0xff] }
 0x6a5   :  { %v4599_v1 = vpop.f32.mrb[116].mxu0 }
 0x6a6   :  { %v14163_v48 = vpack.c.bf16 %v4599_v1, %v4599_v1  ;;  %v4601_v2 = vpop.f32.mrb[117].mxu0  ;;  %v4650_v1 = vld [vmem:[#allocation13 + $0x118] sm:$0xff] }
 0x6a7   :  { %v4602_v4 = vpop.f32.mrb[118].mxu0  ;;  %v11083_v2 = vcombine.low %v4673_v13, %v4677_v60  ;;  %v11061_v42 = vcombine.low %v4650_v1, %v4654_v18  ;;  %v4635_v13 = vld [vmem:[#allocation13 + $0xa0] sm:$0xff]  ;;  %v7178_v60 = vld [vmem:[#allocation13 + $0x790] sm:$0xff] }
 0x6a8   :  { %v14165_v15 = vpack.c.bf16 %v4602_v4, %v4602_v4  ;;  %v14168_v62 = vrot.slane %v14163_v48, 1  ;;  %v4604_v52 = vpop.f32.mrb[119].mxu0 }
 0x6a9   :  { %v4662_v52 = vld [vmem:[#allocation13 + $0x178] sm:$0xff] }
 0x6aa   :  { %11087 = vmatmul.mubr.msk.bf16.vlgmr.msra.gmra.mrb[124].mxu0 %vm2036_vm5, %v14168_v62  ;;  %11269 = vmatmul.mubr.msk.bf16.vlgmr.msra.gmra.mrb[108].mxu1 %vm2036_vm5, %v14165_v15  ;;  %v14179_v5 = vrot.slane %v14165_v15, 2  ;;  %v11069_v30 = vcombine.low %v4658_v11, %v4662_v52 }
 0x6ab   :  { %4886 = vmatpush1.bf16.msra.mxu0 %v11057_v40  ;;  %6989 = vmatpush1.bf16.msra.mxu1 %v11271_v6  ;;  %v6818_v40 = vld [vmem:[#allocation13 + $0x6d0] sm:$0xff]  ;;  %v11291_v6 = vcombine.low %v6810_v36, %v6814_v8  ;;  %v11311_v8 = vcombine.low %v7162_v12, %v7166_v26 }
 0x6ac   :  { %4887 = vmatprep.subr.bf16.mxu0 %v11066_v59  ;;  %6990 = vmatprep.subr.bf16.mxu1 %v11280_v49  ;;  %v11300_v44 = vcombine.high %v6818_v40, %v6822_v56  ;;  %v11299_v4 = vcombine.low %v6818_v40, %v6822_v56  ;;  %v11062_v59 = vcombine.high %v4650_v1, %v4654_v18  ;;  %v7182_v40 = vld [vmem:[#allocation13 + $0x7b0] sm:$0xff]  ;;  %v4643_v1 = vld [vmem:[#allocation13 + $0xe0] sm:$0xff] }
 0x6ad   :  { %4917 = vmatprep.mubr.bf16.mxu0 %v14823_v22  ;;  %7020 = vmatprep.mubr.bf16.mxu1 %v14823_v22  ;;  %v14176_v0 = vpop.f32.mrb[120].mxu0  ;;  %v11308_v49 = vcombine.high %v7160_v35, %v7164_v41  ;;  %v7186_v18 = vld [vmem:[#allocation13 + $0x7d0] sm:$0xff] }
 0x6ae   :  { %v4609_v34 = vpop.f32.mrb[121].mxu0 }
 0x6af   :  { %4888 = vmatpush1.bf16.msra.mxu0 %v11065_v39  ;;  %6991 = vmatpush1.bf16.msra.mxu1 %v11279_v53  ;;  %v11307_v39 = vcombine.low %v7160_v35, %v7164_v41  ;;  %v11070_v53 = vcombine.high %v4658_v11, %v4662_v52  ;;  %v11315_v34 = vcombine.low %v7168_v14, %v7172_v47  ;;  %v7190_v35 = vld [vmem:[#allocation13 + $0x7f0] sm:$0xff]  ;;  %v7561_v11 = vld [vmem:[#allocation13 + $0x900] sm:$0xff] }
 0x6b0   :  { %4889 = vmatprep.subr.bf16.mxu0 %v11074_v45  ;;  %6992 = vmatprep.subr.bf16.mxu1 %v11288_v38  ;;  %v11316_v45 = vcombine.high %v7168_v14, %v7172_v47  ;;  %v4666_v38 = vld [vmem:[#allocation13 + $0x198] sm:$0xff]  ;;  %v11327_v41 = vcombine.low %v7178_v60, %v7182_v40  ;;  %v7565_v52 = vld [vmem:[#allocation13 + $0x920] sm:$0xff]  ;;  %v11335_v47 = vcombine.low %v7186_v18, %v7190_v35 }
 0x6b1   :  { %v11077_v61 = vcombine.low %v4666_v38, %v4670_v9 }
 0x6b3   :  { %4890 = vmatpush1.bf16.msra.mxu0 %v11073_v21  ;;  %6993 = vmatpush1.bf16.msra.mxu1 %v11287_v51  ;;  %v11078_v21 = vcombine.high %v4666_v38, %v4670_v9  ;;  %v11324_v51 = vcombine.high %v7176_v57, %v7180_v7  ;;  %v7569_v38 = vld [vmem:[#allocation13 + $0x940] sm:$0xff]  ;;  %v11343_v7 = vcombine.low %v7561_v11, %v7565_v52 }
 0x6b4   :  { %4891 = vmatprep.subr.bf16.mxu0 %v11082_v20  ;;  %6994 = vmatprep.subr.bf16.mxu1 %v11296_v63  ;;  %v4674_v20 = vld [vmem:[#allocation13 + $0x1d8] sm:$0xff]  ;;  %v7573_v9 = vld [vmem:[#allocation13 + $0x960] sm:$0xff] }
 0x6b5   :  { %v4678_v63 = vld [vmem:[#allocation13 + $0x1f8] sm:$0xff] }
 0x6b6   :  { %v11085_v50 = vcombine.low %v4674_v20, %v4678_v63 }
 0x6b7   :  { %4892 = vmatpush1.bf16.msra.mxu0 %v11081_v46  ;;  %6995 = vmatpush1.bf16.msra.mxu1 %v11295_v28  ;;  %v11086_v46 = vcombine.high %v4674_v20, %v4678_v63  ;;  %v11332_v28 = vcombine.high %v7184_v33, %v7188_v58  ;;  %v7577_v20 = vld [vmem:[#allocation13 + $0x980] sm:$0xff]  ;;  %v11351_v58 = vcombine.low %v7569_v38, %v7573_v9 }
 0x6b8   :  { %4926 = vmatprep.subr.bf16.mxu0 %v11060_v43  ;;  %7070 = vmatprep.subr.bf16.mxu1 %v11276_v19  ;;  %v4615_v43 = vld [vmem:[#allocation13] sm:$0xff] }
 0x6b9   :  { %v4619_v19 = vld [vmem:[#allocation13 + $0x20] sm:$0xff] }
 0x6ba   :  { %11088 = vmatmul.mubr.msk.bf16.vlgmr.msra.gmra.mrb[128].mxu0 %vm2036_vm5, %v14168_v62  ;;  %11303 = vmatmul.mubr.msk.bf16.vlgmr.msra.gmra.mrb[112].mxu1 %vm2036_vm5, %v14179_v5  ;;  %v11091_v36 = vcombine.low %v4615_v43, %v4619_v19  ;;  %v7581_v63 = vld [vmem:[#allocation13 + $0x9a0] sm:$0xff] }
 0x6bb   :  { %4927 = vmatpush1.bf16.msra.mxu0 %v11059_v31  ;;  %7071 = vmatpush1.bf16.msra.mxu1 %v11275_v25  ;;  %v11092_v31 = vcombine.high %v4615_v43, %v4619_v19  ;;  %v11312_v25 = vcombine.high %v7162_v12, %v7166_v26  ;;  %v7585_v43 = vld [vmem:[#allocation13 + $0x9c0] sm:$0xff]  ;;  %v11359_v26 = vcombine.low %v7577_v20, %v7581_v63 }
 0x6bc   :  { %4928 = vmatprep.subr.bf16.mxu0 %v11068_v3  ;;  %7072 = vmatprep.subr.bf16.mxu1 %v11284_v23  ;;  %v4623_v3 = vld [vmem:[#allocation13 + $0x40] sm:$0xff] }
 0x6bd   :  { %4958 = vmatprep.mubr.bf16.mxu0 %v14823_v22  ;;  %7102 = vmatprep.mubr.bf16.mxu1 %v14823_v22  ;;  %v4627_v23 = vld [vmem:[#allocation13 + $0x60] sm:$0xff] }
 0x6be   :  { %v11099_v56 = vcombine.low %v4623_v3, %v4627_v23  ;;  %v7589_v19 = vld [vmem:[#allocation13 + $0x9e0] sm:$0xff] }
 0x6bf   :  { %4929 = vmatpush1.bf16.msra.mxu0 %v11067_v55  ;;  %7073 = vmatpush1.bf16.msra.mxu1 %v11283_v32  ;;  %v14194_v55 = vrot.slane %v14165_v15, 3  ;;  %v11100_v32 = vcombine.high %v4623_v3, %v4627_v23  ;;  %v7563_v3 = vld [vmem:[#allocation13 + $0x910] sm:$0xff] }
 0x6c0   :  { %4930 = vmatprep.subr.bf16.mxu0 %v11076_v37  ;;  %7074 = vmatprep.subr.bf16.mxu1 %v11292_v10  ;;  %v11320_v37 = vcombine.high %v7170_v17, %v7174_v24  ;;  %v4631_v10 = vld [vmem:[#allocation13 + $0x80] sm:$0xff]  ;;  %v7567_v23 = vld [vmem:[#allocation13 + $0x930] sm:$0xff] }
 0x6c3   :  { %4931 = vmatpush1.bf16.msra.mxu0 %v11075_v54  ;;  %7075 = vmatpush1.bf16.msra.mxu1 %v11291_v6  ;;  %v11319_v54 = vcombine.low %v7170_v17, %v7174_v24  ;;  %v11108_v6 = vcombine.high %v4631_v10, %v4635_v13  ;;  %v14210_v17 = vpack.c.bf16 %v14176_v0, %v14176_v0 }
 0x6c4   :  { %4932 = vmatprep.subr.bf16.mxu0 %v11084_v29  ;;  %7076 = vmatprep.subr.bf16.mxu1 %v11300_v44  ;;  %v11328_v29 = vcombine.high %v7178_v60, %v7182_v40  ;;  %v4639_v44 = vld [vmem:[#allocation13 + $0xc0] sm:$0xff]  ;;  %v4629_v60 = vld [vmem:[#allocation13 + $0x70] sm:$0xff] }
 0x6c5   :  { %v11115_v14 = vcombine.low %v4639_v44, %v4643_v1  ;;  %v7571_v40 = vld [vmem:[#allocation13 + $0x950] sm:$0xff] }
 0x6c7   :  { %4933 = vmatpush1.bf16.msra.mxu0 %v11083_v2  ;;  %7077 = vmatpush1.bf16.msra.mxu1 %v11299_v4  ;;  %v11116_v2 = vcombine.high %v4639_v44, %v4643_v1  ;;  %v11336_v4 = vcombine.high %v7186_v18, %v7190_v35  ;;  %v4633_v1 = vld [vmem:[#allocation13 + $0x90] sm:$0xff] }
 0x6c8   :  { %4967 = vmatprep.subr.bf16.mxu0 %v11062_v59  ;;  %7356 = vmatprep.subr.bf16.mxu1 %v11308_v49  ;;  %v4616_v59 = vld [vmem:[#allocation13 + $0x8] sm:$0xff]  ;;  %v4637_v18 = vld [vmem:[#allocation13 + $0xb0] sm:$0xff] }
 0x6c9   :  { %v4620_v49 = vld [vmem:[#allocation13 + $0x28] sm:$0xff]  ;;  %v7579_v35 = vld [vmem:[#allocation13 + $0x990] sm:$0xff] }
 0x6ca   :  { %11089 = vmatmul.mubr.msk.bf16.vlgmr.msra.gmra.mrb[132].mxu0 %vm2036_vm5, %v14168_v62  ;;  %11305 = vmatmul.mubr.msk.bf16.vlgmr.msra.gmra.mrb[116].mxu1 %vm2036_vm5, %v14179_v5  ;;  %v11093_v57 = vcombine.low %v4616_v59, %v4620_v49 }
 0x6cb   :  { %4968 = vmatpush1.bf16.msra.mxu0 %v11061_v42  ;;  %7357 = vmatpush1.bf16.msra.mxu1 %v11307_v39  ;;  %v11094_v42 = vcombine.high %v4616_v59, %v4620_v49  ;;  %v11344_v39 = vcombine.high %v7561_v11, %v7565_v52  ;;  %v4641_v49 = vld [vmem:[#allocation13 + $0xd0] sm:$0xff] }
 0x6cc   :  { %4969 = vmatprep.subr.bf16.mxu0 %v11070_v53  ;;  %7358 = vmatprep.subr.bf16.mxu1 %v11316_v45  ;;  %v4624_v53 = vld [vmem:[#allocation13 + $0x48] sm:$0xff]  ;;  %v4645_v11 = vld [vmem:[#allocation13 + $0xf0] sm:$0xff] }
 0x6cd   :  { %4999 = vmatprep.mubr.bf16.mxu0 %v14823_v22  ;;  %7388 = vmatprep.mubr.bf16.mxu1 %v14823_v22  ;;  %v4628_v45 = vld [vmem:[#allocation13 + $0x68] sm:$0xff]  ;;  %v7587_v52 = vld [vmem:[#allocation13 + $0x9d0] sm:$0xff] }
 0x6ce   :  { %v11101_v33 = vcombine.low %v4624_v53, %v4628_v45 }
 0x6cf   :  { %4970 = vmatpush1.bf16.msra.mxu0 %v11069_v30  ;;  %7359 = vmatpush1.bf16.msra.mxu1 %v11315_v34  ;;  %v11102_v30 = vcombine.high %v4624_v53, %v4628_v45  ;;  %v11352_v34 = vcombine.high %v7569_v38, %v7573_v9  ;;  %v4618_v45 = vld [vmem:[#allocation13 + $0x18] sm:$0xff]  ;;  %v7529_v9 = vld [vmem:[#allocation13 + $0x800] sm:$0xff] }
 0x6d0   :  { %4971 = vmatprep.subr.bf16.mxu0 %v11078_v21  ;;  %7360 = vmatprep.subr.bf16.mxu1 %v11324_v51  ;;  %v4632_v21 = vld [vmem:[#allocation13 + $0x88] sm:$0xff]  ;;  %v4622_v38 = vld [vmem:[#allocation13 + $0x38] sm:$0xff] }
 0x6d1   :  { %v4636_v51 = vld [vmem:[#allocation13 + $0xa8] sm:$0xff] }
 0x6d2   :  { %v11109_v12 = vcombine.low %v4632_v21, %v4636_v51 }
 0x6d3   :  { %4972 = vmatpush1.bf16.msra.mxu0 %v11077_v61  ;;  %7361 = vmatpush1.bf16.msra.mxu1 %v11323_v27  ;;  %v11110_v61 = vcombine.high %v4632_v21, %v4636_v51  ;;  %v11360_v27 = vcombine.high %v7577_v20, %v7581_v63  ;;  %v4626_v51 = vld [vmem:[#allocation13 + $0x58] sm:$0xff]  ;;  %v7537_v63 = vld [vmem:[#allocation13 + $0x840] sm:$0xff] }
 0x6d4   :  { %4973 = vmatprep.subr.bf16.mxu0 %v11086_v46  ;;  %7362 = vmatprep.subr.bf16.mxu1 %v11332_v28  ;;  %v4640_v46 = vld [vmem:[#allocation13 + $0xc8] sm:$0xff]  ;;  %v4630_v20 = vld [vmem:[#allocation13 + $0x78] sm:$0xff] }
 0x6d5   :  { %v4644_v28 = vld [vmem:[#allocation13 + $0xe8] sm:$0xff] }
 0x6d6   :  { %v11117_v24 = vcombine.low %v4640_v46, %v4644_v28 }
 0x6d7   :  { %4974 = vmatpush1.bf16.msra.mxu0 %v11085_v50  ;;  %7363 = vmatpush1.bf16.msra.mxu1 %v11331_v16  ;;  %v11118_v50 = vcombine.high %v4640_v46, %v4644_v28  ;;  %v11368_v16 = vcombine.high %v7585_v43, %v7589_v19  ;;  %v4634_v28 = vld [vmem:[#allocation13 + $0x98] sm:$0xff] }
 0x6d8   :  { %5171 = vmatprep.subr.bf16.mxu0 %v11092_v31  ;;  %7438 = vmatprep.subr.bf16.mxu1 %v11312_v25  ;;  %v4617_v31 = vld [vmem:[#allocation13 + $0x10] sm:$0xff] }
 0x6d9   :  { %v4621_v25 = vld [vmem:[#allocation13 + $0x30] sm:$0xff] }
 0x6da   :  { %11090 = vmatmul.mubr.msk.bf16.vlgmr.msra.gmra.mrb[136].mxu0 %vm2036_vm5, %v14168_v62  ;;  %11339 = vmatmul.mubr.msk.bf16.vlgmr.msra.gmra.mrb[120].mxu1 %vm2036_vm5, %v14194_v55  ;;  %v11107_v62 = vcombine.low %v4631_v10, %v4635_v13  ;;  %v4625_v10 = vld [vmem:[#allocation13 + $0x50] sm:$0xff]  ;;  %v11095_v0 = vcombine.low %v4617_v31, %v4621_v25 }
 0x6db   :  { %5172 = vmatpush1.bf16.msra.mxu0 %v11091_v36  ;;  %7439 = vmatpush1.bf16.msra.mxu1 %v11311_v8  ;;  %v11367_v36 = vcombine.low %v7585_v43, %v7589_v19  ;;  %v14212_v8 = vpop.f32.mrb[122].mxu0  ;;  %v4638_v43 = vld [vmem:[#allocation13 + $0xb8] sm:$0xff]  ;;  %v7545_v19 = vld [vmem:[#allocation13 + $0x880] sm:$0xff] }
 0x6dc   :  { %5173 = vmatprep.subr.bf16.mxu0 %v11100_v32  ;;  %7440 = vmatprep.subr.bf16.mxu1 %v11320_v37  ;;  %v11096_v32 = vcombine.high %v4617_v31, %v4621_v25  ;;  %v11348_v37 = vcombine.high %v7563_v3, %v7567_v23  ;;  %v4612_v13 = vpop.f32.mrb[123].mxu0  ;;  %v4642_v25 = vld [vmem:[#allocation13 + $0xd8] sm:$0xff] }
 0x6dd   :  { %5203 = vmatprep.mubr.bf16.mxu0 %v14823_v22  ;;  %7470 = vmatprep.mubr.bf16.mxu1 %v14823_v22  ;;  %v5335_v13 = vld [vmem:[#allocation13 + $0x200] sm:$0xff] }
 0x6df   :  { %5174 = vmatpush1.bf16.msra.mxu0 %v11099_v56  ;;  %7441 = vmatpush1.bf16.msra.mxu1 %v11319_v54  ;;  %v7575_v56 = vld [vmem:[#allocation13 + $0x970] sm:$0xff]  ;;  %v14215_v54 = vrot.slane %v14210_v17, 1 }
 0x6e0   :  { %5175 = vmatprep.subr.bf16.mxu0 %v11108_v6  ;;  %7442 = vmatprep.subr.bf16.mxu1 %v11328_v29  ;;  %v11347_v6 = vcombine.low %v7563_v3, %v7567_v23  ;;  %v11104_v29 = vcombine.high %v4625_v10, %v4629_v60  ;;  %v11356_v44 = vcombine.high %v7571_v40, %v7575_v56  ;;  %v4646_v3 = vld [vmem:[#allocation13 + $0xf8] sm:$0xff]  ;;  %v7553_v23 = vld [vmem:[#allocation13 + $0x8c0] sm:$0xff] }
 0x6e3   :  { %5176 = vmatpush1.bf16.msra.mxu0 %v11107_v62  ;;  %7443 = vmatpush1.bf16.msra.mxu1 %v11327_v41  ;;  %v7583_v62 = vld [vmem:[#allocation13 + $0x9b0] sm:$0xff]  ;;  %v11103_v41 = vcombine.low %v4625_v10, %v4629_v60  ;;  %v5339_v60 = vld [vmem:[#allocation13 + $0x220] sm:$0xff] }
 0x6e4   :  { %5177 = vmatprep.subr.bf16.mxu0 %v11116_v2  ;;  %7444 = vmatprep.subr.bf16.mxu1 %v11336_v4  ;;  %v11355_v2 = vcombine.low %v7571_v40, %v7575_v56  ;;  %v11112_v4 = vcombine.high %v4633_v1, %v4637_v18  ;;  %v11364_v59 = vcombine.high %v7579_v35, %v7583_v62  ;;  %v7531_v40 = vld [vmem:[#allocation13 + $0x810] sm:$0xff] }
 0x6e5   :  { %v7535_v56 = vld [vmem:[#allocation13 + $0x830] sm:$0xff] }
 0x6e7   :  { %5178 = vmatpush1.bf16.msra.mxu0 %v11115_v14  ;;  %7445 = vmatpush1.bf16.msra.mxu1 %v11335_v47  ;;  %v7591_v14 = vld [vmem:[#allocation13 + $0x9f0] sm:$0xff]  ;;  %v11111_v47 = vcombine.low %v4633_v1, %v4637_v18  ;;  %v5343_v1 = vld [vmem:[#allocation13 + $0x240] sm:$0xff] }
 0x6e8   :  { %5212 = vmatprep.subr.bf16.mxu0 %v11094_v42  ;;  %7758 = vmatprep.subr.bf16.mxu1 %v11344_v39  ;;  %v11363_v42 = vcombine.low %v7579_v35, %v7583_v62  ;;  %v11120_v39 = vcombine.high %v4641_v49, %v4645_v11  ;;  %v11372_v53 = vcombine.high %v7587_v52, %v7591_v14  ;;  %v5347_v18 = vld [vmem:[#allocation13 + $0x260] sm:$0xff]  ;;  %v7539_v35 = vld [vmem:[#allocation13 + $0x850] sm:$0xff] }
 0x6e9   :  { %v7543_v62 = vld [vmem:[#allocation13 + $0x870] sm:$0xff] }
 0x6ea   :  { %11123 = vmatmul.mubr.msk.bf16.vlgmr.msra.gmra.mrb[140].mxu0 %vm2036_vm5, %v14163_v48  ;;  %11341 = vmatmul.mubr.msk.bf16.vlgmr.msra.gmra.mrb[124].mxu1 %vm2036_vm5, %v14194_v55 }
 0x6eb   :  { %5213 = vmatpush1.bf16.msra.mxu0 %v11093_v57  ;;  %7759 = vmatpush1.bf16.msra.mxu1 %v11343_v7  ;;  %v7533_v57 = vld [vmem:[#allocation13 + $0x820] sm:$0xff]  ;;  %v11119_v7 = vcombine.low %v4641_v49, %v4645_v11 }
 0x6ec   :  { %5214 = vmatprep.subr.bf16.mxu0 %v11102_v30  ;;  %7760 = vmatprep.subr.bf16.mxu1 %v11352_v34  ;;  %v11371_v30 = vcombine.low %v7587_v52, %v7591_v14  ;;  %v11098_v34 = vcombine.high %v4618_v45, %v4622_v38  ;;  %v11380_v21 = vcombine.high %v7529_v9, %v7533_v57  ;;  %v5351_v49 = vld [vmem:[#allocation13 + $0x280] sm:$0xff]  ;;  %v7547_v52 = vld [vmem:[#allocation13 + $0x890] sm:$0xff] }
 0x6ed   :  { %5244 = vmatprep.mubr.bf16.mxu0 %v14823_v22  ;;  %7790 = vmatprep.mubr.bf16.mxu1 %v14823_v22  ;;  %v5355_v11 = vld [vmem:[#allocation13 + $0x2a0] sm:$0xff]  ;;  %v7551_v14 = vld [vmem:[#allocation13 + $0x8b0] sm:$0xff] }
 0x6ef   :  { %5215 = vmatpush1.bf16.msra.mxu0 %v11101_v33  ;;  %7761 = vmatpush1.bf16.msra.mxu1 %v11351_v58  ;;  %v7541_v33 = vld [vmem:[#allocation13 + $0x860] sm:$0xff]  ;;  %v11097_v58 = vcombine.low %v4618_v45, %v4622_v38 }
 0x6f0   :  { %5216 = vmatprep.subr.bf16.mxu0 %v11110_v61  ;;  %7762 = vmatprep.subr.bf16.mxu1 %v11360_v27  ;;  %v11379_v61 = vcombine.low %v7529_v9, %v7533_v57  ;;  %v11106_v27 = vcombine.high %v4626_v51, %v4630_v20  ;;  %v11388_v46 = vcombine.high %v7537_v63, %v7541_v33  ;;  %v5359_v45 = vld [vmem:[#allocation13 + $0x2c0] sm:$0xff]  ;;  %v7555_v9 = vld [vmem:[#allocation13 + $0x8d0] sm:$0xff] }
 0x6f1   :  { %v5363_v38 = vld [vmem:[#allocation13 + $0x2e0] sm:$0xff]  ;;  %v7559_v57 = vld [vmem:[#allocation13 + $0x8f0] sm:$0xff] }
 0x6f3   :  { %5217 = vmatpush1.bf16.msra.mxu0 %v11109_v12  ;;  %7763 = vmatpush1.bf16.msra.mxu1 %v11359_v26  ;;  %v7549_v12 = vld [vmem:[#allocation13 + $0x8a0] sm:$0xff]  ;;  %v11105_v26 = vcombine.low %v4626_v51, %v4630_v20  ;;  %v5336_v51 = vld [vmem:[#allocation13 + $0x208] sm:$0xff] }
 0x6f4   :  { %5218 = vmatprep.subr.bf16.mxu0 %v11118_v50  ;;  %7764 = vmatprep.subr.bf16.mxu1 %v11368_v16  ;;  %v11387_v50 = vcombine.low %v7537_v63, %v7541_v33  ;;  %v11114_v16 = vcombine.high %v4634_v28, %v4638_v43  ;;  %v11396_v31 = vcombine.high %v7545_v19, %v7549_v12  ;;  %v5340_v20 = vld [vmem:[#allocation13 + $0x228] sm:$0xff]  ;;  %v8249_v63 = vld [vmem:[#allocation13 + $0xa00] sm:$0xff] }
 0x6f5   :  { %v8253_v33 = vld [vmem:[#allocation13 + $0xa20] sm:$0xff] }
 0x6f7   :  { %5219 = vmatpush1.bf16.msra.mxu0 %v11117_v24  ;;  %7765 = vmatpush1.bf16.msra.mxu1 %v11367_v36  ;;  %v7557_v24 = vld [vmem:[#allocation13 + $0x8e0] sm:$0xff]  ;;  %v11113_v36 = vcombine.low %v4634_v28, %v4638_v43  ;;  %v5344_v28 = vld [vmem:[#allocation13 + $0x248] sm:$0xff] }
 0x6f8   :  { %5253 = vmatprep.subr.bf16.mxu0 %v11096_v32  ;;  %7840 = vmatprep.subr.bf16.mxu1 %v11348_v37  ;;  %v11395_v32 = vcombine.low %v7545_v19, %v7549_v12  ;;  %v11122_v37 = vcombine.high %v4642_v25, %v4646_v3  ;;  %v11404_v10 = vcombine.high %v7553_v23, %v7557_v24  ;;  %v5348_v43 = vld [vmem:[#allocation13 + $0x268] sm:$0xff]  ;;  %v8257_v19 = vld [vmem:[#allocation13 + $0xa40] sm:$0xff] }
 0x6f9   :  { %v8261_v12 = vld [vmem:[#allocation13 + $0xa60] sm:$0xff] }
 0x6fa   :  { %11124 = vmatmul.mubr.msk.bf16.vlgmr.msra.gmra.mrb[144].mxu0 %vm2036_vm5, %v14163_v48  ;;  %11375 = vmatmul.mubr.msk.bf16.vlgmr.msra.gmra.mrb[128].mxu1 %vm2036_vm5, %v14215_v54 }
 0x6fb   :  { %5254 = vmatpush1.bf16.msra.mxu0 %v11095_v0  ;;  %7841 = vmatpush1.bf16.msra.mxu1 %v11347_v6  ;;  %v11121_v0 = vcombine.low %v4642_v25, %v4646_v3  ;;  %v11403_v6 = vcombine.low %v7553_v23, %v7557_v24  ;;  %v11424_v25 = vcombine.high %v8257_v19, %v8261_v12  ;;  %v5352_v3 = vld [vmem:[#allocation13 + $0x288] sm:$0xff]  ;;  %v8265_v24 = vld [vmem:[#allocation13 + $0xa80] sm:$0xff] }
 0x6fc   :  { %5255 = vmatprep.subr.bf16.mxu0 %v11104_v29  ;;  %7842 = vmatprep.subr.bf16.mxu1 %v11356_v44  ;;  %v11128_v29 = vcombine.high %v5335_v13, %v5339_v60  ;;  %v11384_v44 = vcombine.high %v7531_v40, %v7535_v56  ;;  %v5356_v23 = vld [vmem:[#allocation13 + $0x2a8] sm:$0xff] }
 0x6fd   :  { %5285 = vmatprep.mubr.bf16.mxu0 %v14823_v22  ;;  %7872 = vmatprep.mubr.bf16.mxu1 %v14823_v22 }
 0x6ff   :  { %5256 = vmatpush1.bf16.msra.mxu0 %v11103_v41  ;;  %7843 = vmatpush1.bf16.msra.mxu1 %v11355_v2  ;;  %v11127_v41 = vcombine.low %v5335_v13, %v5339_v60  ;;  %v11383_v2 = vcombine.low %v7531_v40, %v7535_v56  ;;  %v5360_v60 = vld [vmem:[#allocation13 + $0x2c8] sm:$0xff]  ;;  %v8273_v56 = vld [vmem:[#allocation13 + $0xac0] sm:$0xff] }
 0x700   :  { %5257 = vmatprep.subr.bf16.mxu0 %v11112_v4  ;;  %7844 = vmatprep.subr.bf16.mxu1 %v11364_v59  ;;  %v11136_v4 = vcombine.high %v5343_v1, %v5347_v18  ;;  %v11392_v59 = vcombine.high %v7539_v35, %v7543_v62  ;;  %v5364_v40 = vld [vmem:[#allocation13 + $0x2e8] sm:$0xff] }
 0x703   :  { %5258 = vmatpush1.bf16.msra.mxu0 %v11111_v47  ;;  %7845 = vmatpush1.bf16.msra.mxu1 %v11363_v42  ;;  %v11135_v47 = vcombine.low %v5343_v1, %v5347_v18  ;;  %v11391_v42 = vcombine.low %v7539_v35, %v7543_v62  ;;  %v5337_v18 = vld [vmem:[#allocation13 + $0x210] sm:$0xff] }
 0x704   :  { %5259 = vmatprep.subr.bf16.mxu0 %v11120_v39  ;;  %7846 = vmatprep.subr.bf16.mxu1 %v11372_v53  ;;  %v11144_v39 = vcombine.high %v5351_v49, %v5355_v11  ;;  %v11400_v53 = vcombine.high %v7547_v52, %v7551_v14  ;;  %v5341_v35 = vld [vmem:[#allocation13 + $0x230] sm:$0xff] }
 0x705   :  { %v8251_v62 = vld [vmem:[#allocation13 + $0xa10] sm:$0xff] }
 0x707   :  { %5260 = vmatpush1.bf16.msra.mxu0 %v11119_v7  ;;  %7847 = vmatpush1.bf16.msra.mxu1 %v11371_v30  ;;  %v11143_v7 = vcombine.low %v5351_v49, %v5355_v11  ;;  %v11399_v30 = vcombine.low %v7547_v52, %v7551_v14  ;;  %v5345_v11 = vld [vmem:[#allocation13 + $0x250] sm:$0xff] }
 0x708   :  { %5294 = vmatprep.subr.bf16.mxu0 %v11098_v34  ;;  %8085 = vmatprep.subr.bf16.mxu1 %v11380_v21  ;;  %v11152_v34 = vcombine.high %v5359_v45, %v5363_v38  ;;  %v11408_v21 = vcombine.high %v7555_v9, %v7559_v57  ;;  %v5349_v52 = vld [vmem:[#allocation13 + $0x270] sm:$0xff] }
 0x709   :  { %v8259_v14 = vld [vmem:[#allocation13 + $0xa50] sm:$0xff] }
 0x70a   :  { %11125 = vmatmul.mubr.msk.bf16.vlgmr.msra.gmra.mrb[148].mxu0 %vm2036_vm5, %v14163_v48  ;;  %11377 = vmatmul.mubr.msk.bf16.vlgmr.msra.gmra.mrb[132].mxu1 %vm2036_vm5, %v14215_v54 }
 0x70b   :  { %5295 = vmatpush1.bf16.msra.mxu0 %v11097_v58  ;;  %8086 = vmatpush1.bf16.msra.mxu1 %v11379_v61  ;;  %v11151_v58 = vcombine.low %v5359_v45, %v5363_v38  ;;  %v11407_v61 = vcombine.low %v7555_v9, %v7559_v57  ;;  %v11140_v45 = vcombine.high %v5345_v11, %v5349_v52  ;;  %v5353_v9 = vld [vmem:[#allocation13 + $0x290] sm:$0xff] }
 0x70c   :  { %5296 = vmatprep.subr.bf16.mxu0 %v11106_v27  ;;  %8087 = vmatprep.subr.bf16.mxu1 %v11388_v46  ;;  %v11130_v27 = vcombine.high %v5336_v51, %v5340_v20  ;;  %v11416_v46 = vcombine.high %v8249_v63, %v8253_v33  ;;  %v5357_v57 = vld [vmem:[#allocation13 + $0x2b0] sm:$0xff] }
 0x70d   :  { %5326 = vmatprep.mubr.bf16.mxu0 %v14823_v22  ;;  %8117 = vmatprep.mubr.bf16.mxu1 %v14823_v22 }
 0x70f   :  { %5297 = vmatpush1.bf16.msra.mxu0 %v11105_v26  ;;  %8088 = vmatpush1.bf16.msra.mxu1 %v11387_v50  ;;  %v11129_v26 = vcombine.low %v5336_v51, %v5340_v20  ;;  %v11415_v50 = vcombine.low %v8249_v63, %v8253_v33  ;;  %v11148_v51 = vcombine.high %v5353_v9, %v5357_v57  ;;  %v5361_v63 = vld [vmem:[#allocation13 + $0x2d0] sm:$0xff] }
 0x710   :  { %5298 = vmatprep.subr.bf16.mxu0 %v11114_v16  ;;  %8089 = vmatprep.subr.bf16.mxu1 %v11396_v31  ;;  %v14236_v16 = vrot.slane %v14163_v48, 2  ;;  %v11138_v31 = vcombine.high %v5344_v28, %v5348_v43  ;;  %v5365_v33 = vld [vmem:[#allocation13 + $0x2f0] sm:$0xff] }
 0x713   :  { %5299 = vmatpush1.bf16.msra.mxu0 %v11113_v36  ;;  %8090 = vmatpush1.bf16.msra.mxu1 %v11395_v32  ;;  %v8269_v36 = vld [vmem:[#allocation13 + $0xaa0] sm:$0xff]  ;;  %v11137_v32 = vcombine.low %v5344_v28, %v5348_v43  ;;  %v11156_v28 = vcombine.high %v5361_v63, %v5365_v33 }
 0x714   :  { %5300 = vmatprep.subr.bf16.mxu0 %v11122_v37  ;;  %8091 = vmatprep.subr.bf16.mxu1 %v11404_v10  ;;  %v11423_v37 = vcombine.low %v8257_v19, %v8261_v12  ;;  %v11146_v10 = vcombine.high %v5352_v3, %v5356_v23  ;;  %v11432_v13 = vcombine.high %v8265_v24, %v8269_v36  ;;  %v5338_v19 = vld [vmem:[#allocation13 + $0x218] sm:$0xff] }
 0x715   :  { %v5342_v12 = vld [vmem:[#allocation13 + $0x238] sm:$0xff] }
 0x717   :  { %5301 = vmatpush1.bf16.msra.mxu0 %v11121_v0  ;;  %8092 = vmatpush1.bf16.msra.mxu1 %v11403_v6  ;;  %v8277_v0 = vld [vmem:[#allocation13 + $0xae0] sm:$0xff]  ;;  %v11145_v6 = vcombine.low %v5352_v3, %v5356_v23  ;;  %v11134_v3 = vcombine.high %v5338_v19, %v5342_v12 }
 0x718   :  { %5531 = vmatprep.subr.bf16.mxu0 %v11128_v29  ;;  %8167 = vmatprep.subr.bf16.mxu1 %v11384_v44  ;;  %v11431_v29 = vcombine.low %v8265_v24, %v8269_v36  ;;  %v11154_v44 = vcombine.high %v5360_v60, %v5364_v40  ;;  %v11440_v1 = vcombine.high %v8273_v56, %v8277_v0  ;;  %v5346_v24 = vld [vmem:[#allocation13 + $0x258] sm:$0xff] }
 0x719   :  { %v5350_v36 = vld [vmem:[#allocation13 + $0x278] sm:$0xff] }
 0x71a   :  { %11126 = vmatmul.mubr.msk.bf16.vlgmr.msra.gmra.mrb[152].mxu0 %vm2036_vm5, %v14163_v48  ;;  %11411 = vmatmul.mubr.msk.bf16.vlgmr.msra.gmra.mrb[136].mxu1 %vm2036_vm5, %v14210_v17 }
 0x71b   :  { %5532 = vmatpush1.bf16.msra.mxu0 %v11127_v41  ;;  %8168 = vmatpush1.bf16.msra.mxu1 %v11383_v2  ;;  %v8255_v41 = vld [vmem:[#allocation13 + $0xa30] sm:$0xff]  ;;  %v11153_v2 = vcombine.low %v5360_v60, %v5364_v40  ;;  %v11142_v60 = vcombine.high %v5346_v24, %v5350_v36 }
 0x71c   :  { %5533 = vmatprep.subr.bf16.mxu0 %v11136_v4  ;;  %8169 = vmatprep.subr.bf16.mxu1 %v11392_v59  ;;  %v11439_v4 = vcombine.low %v8273_v56, %v8277_v0  ;;  %v11132_v59 = vcombine.high %v5337_v18, %v5341_v35  ;;  %v11420_v49 = vcombine.high %v8251_v62, %v8255_v41  ;;  %v5354_v56 = vld [vmem:[#allocation13 + $0x298] sm:$0xff] }
 0x71d   :  { %5563 = vmatprep.mubr.bf16.mxu0 %v14823_v22  ;;  %8199 = vmatprep.mubr.bf16.mxu1 %v14823_v22  ;;  %v5358_v0 = vld [vmem:[#allocation13 + $0x2b8] sm:$0xff] }
 0x71f   :  { %5534 = vmatpush1.bf16.msra.mxu0 %v11135_v47  ;;  %8170 = vmatpush1.bf16.msra.mxu1 %v11391_v42  ;;  %v8263_v47 = vld [vmem:[#allocation13 + $0xa70] sm:$0xff]  ;;  %v14245_v42 = vrot.slane %v14210_v17, 2 }
 0x720   :  { %5535 = vmatprep.subr.bf16.mxu0 %v11144_v39  ;;  %8171 = vmatprep.subr.bf16.mxu1 %v11400_v53  ;;  %v11131_v39 = vcombine.low %v5337_v18, %v5341_v35  ;;  %v11419_v53 = vcombine.low %v8251_v62, %v8255_v41  ;;  %v11428_v38 = vcombine.high %v8259_v14, %v8263_v47  ;;  %v5362_v62 = vld [vmem:[#allocation13 + $0x2d8] sm:$0xff] }
 0x721   :  { %v11150_v18 = vcombine.high %v5354_v56, %v5358_v0  ;;  %v5366_v41 = vld [vmem:[#allocation13 + $0x2f8] sm:$0xff] }
 0x723   :  { %5536 = vmatpush1.bf16.msra.mxu0 %v11143_v7  ;;  %8172 = vmatpush1.bf16.msra.mxu1 %v11399_v30  ;;  %v8267_v7 = vld [vmem:[#allocation13 + $0xa90] sm:$0xff] }
 0x724   :  { %5537 = vmatprep.subr.bf16.mxu0 %v11152_v34  ;;  %8173 = vmatprep.subr.bf16.mxu1 %v11408_v21  ;;  %v8271_v30 = vld [vmem:[#allocation13 + $0xab0] sm:$0xff]  ;;  %v11139_v34 = vcombine.low %v5345_v11, %v5349_v52  ;;  %v11427_v21 = vcombine.low %v8259_v14, %v8263_v47  ;;  %v11158_v11 = vcombine.high %v5362_v62, %v5366_v41  ;;  %v5703_v14 = vld [vmem:[#allocation13 + $0x300] sm:$0xff] }
 0x725   :  { %v11436_v20 = vcombine.high %v8267_v7, %v8271_v30  ;;  %v5707_v47 = vld [vmem:[#allocation13 + $0x320] sm:$0xff] }
 0x727   :  { %5538 = vmatpush1.bf16.msra.mxu0 %v11151_v58  ;;  %8174 = vmatpush1.bf16.msra.mxu1 %v11407_v61  ;;  %v8275_v58 = vld [vmem:[#allocation13 + $0xad0] sm:$0xff] }
 0x728   :  { %5572 = vmatprep.subr.bf16.mxu0 %v11130_v27  ;;  %8445 = vmatprep.subr.bf16.mxu1 %v11416_v46  ;;  %v8279_v61 = vld [vmem:[#allocation13 + $0xaf0] sm:$0xff]  ;;  %v11147_v27 = vcombine.low %v5353_v9, %v5357_v57  ;;  %v11435_v46 = vcombine.low %v8267_v7, %v8271_v30  ;;  %v11164_v9 = vcombine.high %v5703_v14, %v5707_v47  ;;  %v5711_v7 = vld [vmem:[#allocation13 + $0x340] sm:$0xff] }
 0x729   :  { %v11444_v43 = vcombine.high %v8275_v58, %v8279_v61  ;;  %v5715_v30 = vld [vmem:[#allocation13 + $0x360] sm:$0xff] }
 0x72a   :  { %11159 = vmatmul.mubr.msk.bf16.vlgmr.msra.gmra.mrb[156].mxu0 %vm2036_vm5, %v14236_v16  ;;  %11413 = vmatmul.mubr.msk.bf16.vlgmr.msra.gmra.mrb[140].mxu1 %vm2036_vm5, %v14210_v17 }
 0x72b   :  { %5573 = vmatpush1.bf16.msra.mxu0 %v11129_v26  ;;  %8446 = vmatpush1.bf16.msra.mxu1 %v11415_v50  ;;  %v8617_v26 = vld [vmem:[#allocation13 + $0xb00] sm:$0xff] }
 0x72c   :  { %5574 = vmatprep.subr.bf16.mxu0 %v11138_v31  ;;  %8447 = vmatprep.subr.bf16.mxu1 %v11424_v25  ;;  %v8621_v50 = vld [vmem:[#allocation13 + $0xb20] sm:$0xff]  ;;  %v11155_v31 = vcombine.low %v5361_v63, %v5365_v33  ;;  %v11443_v25 = vcombine.low %v8275_v58, %v8279_v61  ;;  %v11172_v33 = vcombine.high %v5711_v7, %v5715_v30 }
 0x72d   :  { %5604 = vmatprep.mubr.bf16.mxu0 %v14823_v22  ;;  %8477 = vmatprep.mubr.bf16.mxu1 %v14823_v22  ;;  %v11452_v23 = vcombine.high %v8617_v26, %v8621_v50  ;;  %v5719_v61 = vld [vmem:[#allocation13 + $0x380] sm:$0xff] }
 0x72f   :  { %5575 = vmatpush1.bf16.msra.mxu0 %v11137_v32  ;;  %8448 = vmatpush1.bf16.msra.mxu1 %v11423_v37  ;;  %v8625_v32 = vld [vmem:[#allocation13 + $0xb40] sm:$0xff] }
 0x730   :  { %5576 = vmatprep.subr.bf16.mxu0 %v11146_v10  ;;  %8449 = vmatprep.subr.bf16.mxu1 %v11432_v13  ;;  %v8629_v37 = vld [vmem:[#allocation13 + $0xb60] sm:$0xff]  ;;  %v11133_v10 = vcombine.low %v5338_v19, %v5342_v12  ;;  %v11451_v13 = vcombine.low %v8617_v26, %v8621_v50 }
 0x731   :  { %v11460_v40 = vcombine.high %v8625_v32, %v8629_v37  ;;  %v5727_v50 = vld [vmem:[#allocation13 + $0x3c0] sm:$0xff] }
 0x733   :  { %5577 = vmatpush1.bf16.msra.mxu0 %v11145_v6  ;;  %8450 = vmatpush1.bf16.msra.mxu1 %v11431_v29  ;;  %v8633_v6 = vld [vmem:[#allocation13 + $0xb80] sm:$0xff] }
 0x734   :  { %5578 = vmatprep.subr.bf16.mxu0 %v11154_v44  ;;  %8451 = vmatprep.subr.bf16.mxu1 %v11440_v1  ;;  %v8637_v29 = vld [vmem:[#allocation13 + $0xba0] sm:$0xff]  ;;  %v11141_v44 = vcombine.low %v5346_v24, %v5350_v36  ;;  %v11459_v1 = vcombine.low %v8625_v32, %v8629_v37  ;;  %v5704_v32 = vld [vmem:[#allocation13 + $0x308] sm:$0xff] }
 0x735   :  { %v11468_v35 = vcombine.high %v8633_v6, %v8637_v29  ;;  %v5708_v37 = vld [vmem:[#allocation13 + $0x328] sm:$0xff] }
 0x737   :  { %5579 = vmatpush1.bf16.msra.mxu0 %v11153_v2  ;;  %8452 = vmatpush1.bf16.msra.mxu1 %v11439_v4  ;;  %v8641_v2 = vld [vmem:[#allocation13 + $0xbc0] sm:$0xff] }
 0x738   :  { %5613 = vmatprep.subr.bf16.mxu0 %v11132_v59  ;;  %8527 = vmatprep.subr.bf16.mxu1 %v11420_v49  ;;  %v8645_v4 = vld [vmem:[#allocation13 + $0xbe0] sm:$0xff]  ;;  %v11149_v59 = vcombine.low %v5354_v56, %v5358_v0  ;;  %v11467_v49 = vcombine.low %v8633_v6, %v8637_v29  ;;  %v11166_v56 = vcombine.high %v5704_v32, %v5708_v37  ;;  %v5712_v6 = vld [vmem:[#allocation13 + $0x348] sm:$0xff] }
 0x739   :  { %v11476_v52 = vcombine.high %v8641_v2, %v8645_v4  ;;  %v5716_v29 = vld [vmem:[#allocation13 + $0x368] sm:$0xff] }
 0x73a   :  { %11160 = vmatmul.mubr.msk.bf16.vlgmr.msra.gmra.mrb[160].mxu0 %vm2036_vm5, %v14236_v16  ;;  %11447 = vmatmul.mubr.msk.bf16.vlgmr.msra.gmra.mrb[144].mxu1 %vm2036_vm5, %v14245_v42 }
 0x73b   :  { %5614 = vmatpush1.bf16.msra.mxu0 %v11131_v39  ;;  %8528 = vmatpush1.bf16.msra.mxu1 %v11419_v53  ;;  %v8619_v39 = vld [vmem:[#allocation13 + $0xb10] sm:$0xff] }
 0x73c   :  { %5615 = vmatprep.subr.bf16.mxu0 %v11140_v45  ;;  %8529 = vmatprep.subr.bf16.mxu1 %v11428_v38  ;;  %v8623_v53 = vld [vmem:[#allocation13 + $0xb30] sm:$0xff]  ;;  %v11157_v45 = vcombine.low %v5362_v62, %v5366_v41  ;;  %v11475_v38 = vcombine.low %v8641_v2, %v8645_v4  ;;  %v14269_v62 = vrot.slane %v14163_v48, 3  ;;  %v11174_v41 = vcombine.high %v5712_v6, %v5716_v29  ;;  %v5720_v4 = vld [vmem:[#allocation13 + $0x388] sm:$0xff] }
 0x73d   :  { %5645 = vmatprep.mubr.bf16.mxu0 %v14823_v22  ;;  %8559 = vmatprep.mubr.bf16.mxu1 %v14823_v22  ;;  %v11456_v57 = vcombine.high %v8619_v39, %v8623_v53  ;;  %v11455_v63 = vcombine.low %v8619_v39, %v8623_v53  ;;  %v5728_v39 = vld [vmem:[#allocation13 + $0x3c8] sm:$0xff] }
 0x73e   :  { %v5732_v53 = vld [vmem:[#allocation13 + $0x3e8] sm:$0xff] }
 0x73f   :  { %5616 = vmatpush1.bf16.msra.mxu0 %v11139_v34  ;;  %8530 = vmatpush1.bf16.msra.mxu1 %v11427_v21  ;;  %v8627_v34 = vld [vmem:[#allocation13 + $0xb50] sm:$0xff] }
 0x740   :  { %5617 = vmatprep.subr.bf16.mxu0 %v11148_v51  ;;  %8531 = vmatprep.subr.bf16.mxu1 %v11436_v20  ;;  %v8631_v21 = vld [vmem:[#allocation13 + $0xb70] sm:$0xff]  ;;  %v14260_v51 = vrot.slane %v14210_v17, 3  ;;  %v11163_v20 = vcombine.low %v5703_v14, %v5707_v47 }
 0x741   :  { %v11464_v58 = vcombine.high %v8627_v34, %v8631_v21  ;;  %v11463_v19 = vcombine.low %v8627_v34, %v8631_v21  ;;  %v5705_v34 = vld [vmem:[#allocation13 + $0x310] sm:$0xff] }
 0x742   :  { %v5709_v21 = vld [vmem:[#allocation13 + $0x330] sm:$0xff] }
 0x743   :  { %5618 = vmatpush1.bf16.msra.mxu0 %v11147_v27  ;;  %8532 = vmatpush1.bf16.msra.mxu1 %v11435_v46  ;;  %v5723_v27 = vld [vmem:[#allocation13 + $0x3a0] sm:$0xff]  ;;  %v8635_v46 = vld [vmem:[#allocation13 + $0xb90] sm:$0xff] }
 0x744   :  { %5619 = vmatprep.subr.bf16.mxu0 %v11156_v28  ;;  %8533 = vmatprep.subr.bf16.mxu1 %v11444_v43  ;;  %v8639_v28 = vld [vmem:[#allocation13 + $0xbb0] sm:$0xff]  ;;  %v11171_v43 = vcombine.low %v5711_v7, %v5715_v30  ;;  %v11180_v12 = vcombine.high %v5719_v61, %v5723_v27  ;;  %v11190_v7 = vcombine.high %v5728_v39, %v5732_v53 }
 0x745   :  { %v11472_v26 = vcombine.high %v8635_v46, %v8639_v28 }
 0x747   :  { %5620 = vmatpush1.bf16.msra.mxu0 %v11155_v31  ;;  %8534 = vmatpush1.bf16.msra.mxu1 %v11443_v25  ;;  %v5731_v31 = vld [vmem:[#allocation13 + $0x3e0] sm:$0xff]  ;;  %v8643_v25 = vld [vmem:[#allocation13 + $0xbd0] sm:$0xff] }
 0x748   :  { %5654 = vmatprep.subr.bf16.mxu0 %v11134_v3  ;;  %8813 = vmatprep.subr.bf16.mxu1 %v11452_v23  ;;  %v8647_v3 = vld [vmem:[#allocation13 + $0xbf0] sm:$0xff]  ;;  %v11471_v23 = vcombine.low %v8635_v46, %v8639_v28  ;;  %v11188_v24 = vcombine.high %v5727_v50, %v5731_v31 }
 0x749   :  { %v11480_v36 = vcombine.high %v8643_v25, %v8647_v3  ;;  %v5713_v28 = vld [vmem:[#allocation13 + $0x350] sm:$0xff] }
 0x74a   :  { %11161 = vmatmul.mubr.msk.bf16.vlgmr.msra.gmra.mrb[164].mxu0 %vm2036_vm5, %v14236_v16  ;;  %11449 = vmatmul.mubr.msk.bf16.vlgmr.msra.gmra.mrb[148].mxu1 %vm2036_vm5, %v14245_v42 }
 0x74b   :  { %5655 = vmatpush1.bf16.msra.mxu0 %v11133_v10  ;;  %8814 = vmatpush1.bf16.msra.mxu1 %v11451_v13  ;;  %v9018_v10 = vld [vmem:[#allocation13 + $0xd00] sm:$0xff] }
 0x74c   :  { %5656 = vmatprep.subr.bf16.mxu0 %v11142_v60  ;;  %8815 = vmatprep.subr.bf16.mxu1 %v11460_v40  ;;  %v9022_v13 = vld [vmem:[#allocation13 + $0xd20] sm:$0xff]  ;;  %v11187_v60 = vcombine.low %v5727_v50, %v5731_v31  ;;  %v11479_v40 = vcombine.low %v8643_v25, %v8647_v3  ;;  %v11167_v50 = vcombine.low %v5705_v34, %v5709_v21  ;;  %v5721_v3 = vld [vmem:[#allocation13 + $0x390] sm:$0xff] }
 0x74d   :  { %5686 = vmatprep.mubr.bf16.mxu0 %v14823_v22  ;;  %8845 = vmatprep.mubr.bf16.mxu1 %v14823_v22  ;;  %v11488_v0 = vcombine.high %v9018_v10, %v9022_v13 }
 0x74f   :  { %5657 = vmatpush1.bf16.msra.mxu0 %v11141_v44  ;;  %8816 = vmatpush1.bf16.msra.mxu1 %v11459_v1  ;;  %v9026_v44 = vld [vmem:[#allocation13 + $0xd40] sm:$0xff] }
 0x750   :  { %5658 = vmatprep.subr.bf16.mxu0 %v11150_v18  ;;  %8817 = vmatprep.subr.bf16.mxu1 %v11468_v35  ;;  %v9030_v1 = vld [vmem:[#allocation13 + $0xd60] sm:$0xff]  ;;  %v11165_v18 = vcombine.low %v5704_v32, %v5708_v37  ;;  %v11487_v35 = vcombine.low %v9018_v10, %v9022_v13  ;;  %v5729_v13 = vld [vmem:[#allocation13 + $0x3d0] sm:$0xff] }
 0x751   :  { %v11496_v2 = vcombine.high %v9026_v44, %v9030_v1  ;;  %v11495_v14 = vcombine.low %v9026_v44, %v9030_v1 }
 0x753   :  { %5659 = vmatpush1.bf16.msra.mxu0 %v11149_v59  ;;  %8818 = vmatpush1.bf16.msra.mxu1 %v11467_v49  ;;  %v5724_v59 = vld [vmem:[#allocation13 + $0x3a8] sm:$0xff]  ;;  %v9034_v49 = vld [vmem:[#allocation13 + $0xd80] sm:$0xff] }
 0x754   :  { %5660 = vmatprep.subr.bf16.mxu0 %v11158_v11  ;;  %8819 = vmatprep.subr.bf16.mxu1 %v11476_v52  ;;  %v9038_v11 = vld [vmem:[#allocation13 + $0xda0] sm:$0xff]  ;;  %v11173_v52 = vcombine.low %v5712_v6, %v5716_v29  ;;  %v11182_v48 = vcombine.high %v5720_v4, %v5724_v59 }
 0x755   :  { %v11504_v47 = vcombine.high %v9034_v49, %v9038_v11 }
 0x757   :  { %5661 = vmatpush1.bf16.msra.mxu0 %v11157_v45  ;;  %8820 = vmatpush1.bf16.msra.mxu1 %v11475_v38  ;;  %v9042_v45 = vld [vmem:[#allocation13 + $0xdc0] sm:$0xff] }
 0x758   :  { %5899 = vmatprep.subr.bf16.mxu0 %v11164_v9  ;;  %8895 = vmatprep.subr.bf16.mxu1 %v11456_v57  ;;  %v9046_v38 = vld [vmem:[#allocation13 + $0xde0] sm:$0xff]  ;;  %v11181_v9 = vcombine.low %v5720_v4, %v5724_v59  ;;  %v11503_v57 = vcombine.low %v9034_v49, %v9038_v11  ;;  %v5706_v59 = vld [vmem:[#allocation13 + $0x318] sm:$0xff] }
 0x759   :  { %v11512_v30 = vcombine.high %v9042_v45, %v9046_v38 }
 0x75a   :  { %11162 = vmatmul.mubr.msk.bf16.vlgmr.msra.gmra.mrb[168].mxu0 %vm2036_vm5, %v14236_v16  ;;  %11483 = vmatmul.mubr.msk.bf16.vlgmr.msra.gmra.mrb[152].mxu1 %vm2036_vm5, %v14260_v51  ;;  %v11179_v16 = vcombine.low %v5719_v61, %v5723_v27  ;;  %v11511_v61 = vcombine.low %v9042_v45, %v9046_v38  ;;  %v11168_v27 = vcombine.high %v5705_v34, %v5709_v21  ;;  %v5714_v38 = vld [vmem:[#allocation13 + $0x358] sm:$0xff] }
 0x75b   :  { %5900 = vmatpush1.bf16.msra.mxu0 %v11163_v20  ;;  %8896 = vmatpush1.bf16.msra.mxu1 %v11455_v63  ;;  %v9020_v20 = vld [vmem:[#allocation13 + $0xd10] sm:$0xff] }
 0x75c   :  { %5901 = vmatprep.subr.bf16.mxu0 %v11172_v33  ;;  %8897 = vmatprep.subr.bf16.mxu1 %v11464_v58  ;;  %v9024_v63 = vld [vmem:[#allocation13 + $0xd30] sm:$0xff]  ;;  %v14279_v33 = vpack.c.bf16 %v14212_v8, %v14212_v8  ;;  %v11189_v58 = vcombine.low %v5728_v39, %v5732_v53 }
 0x75d   :  { %5931 = vmatprep.mubr.bf16.mxu0 %v14823_v22  ;;  %8927 = vmatprep.mubr.bf16.mxu1 %v14823_v22  ;;  %v11492_v46 = vcombine.high %v9020_v20, %v9024_v63  ;;  %v11491_v8 = vcombine.low %v9020_v20, %v9024_v63  ;;  %v5722_v63 = vld [vmem:[#allocation13 + $0x398] sm:$0xff] }
 0x75f   :  { %5902 = vmatpush1.bf16.msra.mxu0 %v11171_v43  ;;  %8898 = vmatpush1.bf16.msra.mxu1 %v11463_v19  ;;  %v5717_v43 = vld [vmem:[#allocation13 + $0x370] sm:$0xff] }
 0x760   :  { %5903 = vmatprep.subr.bf16.mxu0 %v11180_v12  ;;  %8899 = vmatprep.subr.bf16.mxu1 %v11472_v26  ;;  %v9028_v19 = vld [vmem:[#allocation13 + $0xd50] sm:$0xff]  ;;  %v14282_v26 = vrot.slane %v14279_v33, 1  ;;  %v11176_v31 = vcombine.high %v5713_v28, %v5717_v43 }
 0x761   :  { %v9032_v12 = vld [vmem:[#allocation13 + $0xd70] sm:$0xff] }
 0x762   :  { %v11500_v25 = vcombine.high %v9028_v19, %v9032_v12  ;;  %v11499_v32 = vcombine.low %v9028_v19, %v9032_v12  ;;  %v5730_v12 = vld [vmem:[#allocation13 + $0x3d8] sm:$0xff] }
 0x763   :  { %5904 = vmatpush1.bf16.msra.mxu0 %v11179_v16  ;;  %8900 = vmatpush1.bf16.msra.mxu1 %v11471_v23  ;;  %v5725_v16 = vld [vmem:[#allocation13 + $0x3b0] sm:$0xff] }
 0x764   :  { %5905 = vmatprep.subr.bf16.mxu0 %v11188_v24  ;;  %8901 = vmatprep.subr.bf16.mxu1 %v11480_v36  ;;  %v9036_v23 = vld [vmem:[#allocation13 + $0xd90] sm:$0xff]  ;;  %v11175_v36 = vcombine.low %v5713_v28, %v5717_v43  ;;  %v11184_v37 = vcombine.high %v5721_v3, %v5725_v16  ;;  %v11183_v1 = vcombine.low %v5721_v3, %v5725_v16 }
 0x765   :  { %v9040_v24 = vld [vmem:[#allocation13 + $0xdb0] sm:$0xff] }
 0x766   :  { %v11508_v10 = vcombine.high %v9036_v23, %v9040_v24 }
 0x767   :  { %5906 = vmatpush1.bf16.msra.mxu0 %v11187_v60  ;;  %8902 = vmatpush1.bf16.msra.mxu1 %v11479_v40  ;;  %v5733_v60 = vld [vmem:[#allocation13 + $0x3f0] sm:$0xff] }
 0x768   :  { %5940 = vmatprep.subr.bf16.mxu0 %v11166_v56  ;;  %9215 = vmatprep.subr.bf16.mxu1 %v11488_v0  ;;  %v9044_v40 = vld [vmem:[#allocation13 + $0xdd0] sm:$0xff] }
 0x769   :  { %v9048_v56 = vld [vmem:[#allocation13 + $0xdf0] sm:$0xff] }
 0x76a   :  { %11195 = vmatmul.mubr.msk.bf16.vlgmr.msra.gmra.mrb[172].mxu0 %vm2036_vm5, %v14269_v62  ;;  %11485 = vmatmul.mubr.msk.bf16.vlgmr.msra.gmra.mrb[156].mxu1 %vm2036_vm5, %v14260_v51  ;;  %v11516_v4 = vcombine.high %v9044_v40, %v9048_v56  ;;  %v11515_v39 = vcombine.low %v9044_v40, %v9048_v56 }
 0x76b   :  { %5941 = vmatpush1.bf16.msra.mxu0 %v11165_v18  ;;  %9216 = vmatpush1.bf16.msra.mxu1 %v11487_v35  ;;  %v11507_v18 = vcombine.low %v9036_v23, %v9040_v24 }
 0x76c   :  { %5942 = vmatprep.subr.bf16.mxu0 %v11174_v41  ;;  %9217 = vmatprep.subr.bf16.mxu1 %v11496_v2  ;;  %v11192_v2 = vcombine.high %v5729_v13, %v5733_v60 }
 0x76d   :  { %5972 = vmatprep.mubr.bf16.mxu0 %v14823_v22  ;;  %9247 = vmatprep.mubr.bf16.mxu1 %v14823_v22 }
 0x76f   :  { %5943 = vmatpush1.bf16.msra.mxu0 %v11173_v52  ;;  %9218 = vmatpush1.bf16.msra.mxu1 %v11495_v14  ;;  %v5710_v52 = vld [vmem:[#allocation13 + $0x338] sm:$0xff]  ;;  %v8986_v14 = vld [vmem:[#allocation13 + $0xc00] sm:$0xff] }
 0x770   :  { %5944 = vmatprep.subr.bf16.mxu0 %v11182_v48  ;;  %9219 = vmatprep.subr.bf16.mxu1 %v11504_v47  ;;  %v8990_v48 = vld [vmem:[#allocation13 + $0xc20] sm:$0xff]  ;;  %v11191_v47 = vcombine.low %v5729_v13, %v5733_v60  ;;  %v11170_v53 = vcombine.high %v5706_v59, %v5710_v52 }
 0x771   :  { %v11524_v45 = vcombine.high %v8986_v14, %v8990_v48  ;;  %v11523_v34 = vcombine.low %v8986_v14, %v8990_v48  ;;  %v6104_v60 = vld [vmem:[#allocation13 + $0x500] sm:$0xff]  ;;  %v9000_v14 = vld [vmem:[#allocation13 + $0xc70] sm:$0xff] }
 0x773   :  { %5945 = vmatpush1.bf16.msra.mxu0 %v11181_v9  ;;  %9220 = vmatpush1.bf16.msra.mxu1 %v11503_v57  ;;  %v5718_v9 = vld [vmem:[#allocation13 + $0x378] sm:$0xff]  ;;  %v8994_v57 = vld [vmem:[#allocation13 + $0xc40] sm:$0xff] }
 0x774   :  { %5946 = vmatprep.subr.bf16.mxu0 %v11190_v7  ;;  %9221 = vmatprep.subr.bf16.mxu1 %v11512_v30  ;;  %v8998_v7 = vld [vmem:[#allocation13 + $0xc60] sm:$0xff]  ;;  %v11169_v30 = vcombine.low %v5706_v59, %v5710_v52  ;;  %v11178_v21 = vcombine.high %v5714_v38, %v5718_v9  ;;  %v8996_v52 = vld [vmem:[#allocation13 + $0xc50] sm:$0xff] }
 0x775   :  { %v11532_v20 = vcombine.high %v8994_v57, %v8998_v7  ;;  %v11531_v28 = vcombine.low %v8994_v57, %v8998_v7  ;;  %v9008_v57 = vld [vmem:[#allocation13 + $0xcb0] sm:$0xff] }
 0x777   :  { %5947 = vmatpush1.bf16.msra.mxu0 %v11189_v58  ;;  %9222 = vmatpush1.bf16.msra.mxu1 %v11511_v61  ;;  %v5726_v58 = vld [vmem:[#allocation13 + $0x3b8] sm:$0xff]  ;;  %v9002_v61 = vld [vmem:[#allocation13 + $0xc80] sm:$0xff] }
 0x778   :  { %5981 = vmatprep.subr.bf16.mxu0 %v11168_v27  ;;  %9297 = vmatprep.subr.bf16.mxu1 %v11492_v46  ;;  %v9006_v27 = vld [vmem:[#allocation13 + $0xca0] sm:$0xff]  ;;  %v11177_v46 = vcombine.low %v5714_v38, %v5718_v9  ;;  %v11186_v43 = vcombine.high %v5722_v63, %v5726_v58  ;;  %v11185_v24 = vcombine.low %v5722_v63, %v5726_v58  ;;  %v9004_v9 = vld [vmem:[#allocation13 + $0xc90] sm:$0xff] }
 0x779   :  { %v11540_v19 = vcombine.high %v9002_v61, %v9006_v27  ;;  %v6124_v38 = vld [vmem:[#allocation13 + $0x5a0] sm:$0xff]  ;;  %v9012_v58 = vld [vmem:[#allocation13 + $0xcd0] sm:$0xff] }
 0x77a   :  { %11196 = vmatmul.mubr.msk.bf16.vlgmr.msra.gmra.mrb[176].mxu0 %vm2036_vm5, %v14269_v62  ;;  %11519 = vmatmul.mubr.msk.bf16.vlgmr.msra.gmra.mrb[160].mxu1 %vm2036_vm5, %v14282_v26  ;;  %v6132_v63 = vld [vmem:[#allocation13 + $0x5e0] sm:$0xff] }
 0x77b   :  { %5982 = vmatpush1.bf16.msra.mxu0 %v11167_v50  ;;  %9298 = vmatpush1.bf16.msra.mxu1 %v11491_v8  ;;  %v5734_v50 = vld [vmem:[#allocation13 + $0x3f8] sm:$0xff]  ;;  %v9010_v8 = vld [vmem:[#allocation13 + $0xcc0] sm:$0xff] }
 0x77c   :  { %5983 = vmatprep.subr.bf16.mxu0 %v11176_v31  ;;  %9299 = vmatprep.subr.bf16.mxu1 %v11500_v25  ;;  %v9014_v31 = vld [vmem:[#allocation13 + $0xce0] sm:$0xff] }
 0x77d   :  { %6013 = vmatprep.mubr.bf16.mxu0 %v14823_v22  ;;  %9329 = vmatprep.mubr.bf16.mxu1 %v14823_v22  ;;  %v14290_v0 = vpop.f32.mrb[124].mxu0  ;;  %v14292_v6 = vpop.f32.mrb[108].mxu1  ;;  %v11548_v13 = vcombine.high %v9010_v8, %v9014_v31 }
 0x77e   :  { %v14294_v29 = vpop.f32.mrb[125].mxu0  ;;  %v14296_v44 = vpop.f32.mrb[109].mxu1 }
 0x77f   :  { %5984 = vmatpush1.bf16.msra.mxu0 %v11175_v36  ;;  %9300 = vmatpush1.bf16.msra.mxu1 %v11499_v32  ;;  %v4882_v35 = vpop.f32.mrb[126].mxu0  ;;  %v6748_v41 = vpop.f32.mrb[110].mxu1  ;;  %v11539_v36 = vcombine.low %v9002_v61, %v9006_v27  ;;  %v9016_v61 = vld [vmem:[#allocation13 + $0xcf0] sm:$0xff] }
 0x780   :  { %5985 = vmatprep.subr.bf16.mxu0 %v11184_v37  ;;  %9301 = vmatprep.subr.bf16.mxu1 %v11508_v10  ;;  %v4883_v49 = vpop.f32.mrb[127].mxu0  ;;  %v6749_v11 = vpop.f32.mrb[111].mxu1  ;;  %v11194_v10 = vcombine.high %v5730_v12, %v5734_v50  ;;  %v8992_v35 = vld [vmem:[#allocation13 + $0xc30] sm:$0xff]  ;;  %v11193_v41 = vcombine.low %v5730_v12, %v5734_v50 }
 0x781   :  { %v6112_v49 = vld [vmem:[#allocation13 + $0x540] sm:$0xff] }
 0x782   :  { %v6116_v11 = vld [vmem:[#allocation13 + $0x560] sm:$0xff] }
 0x783   :  { %5986 = vmatpush1.bf16.msra.mxu0 %v11183_v1  ;;  %9302 = vmatpush1.bf16.msra.mxu1 %v11507_v18  ;;  %v6108_v1 = vld [vmem:[#allocation13 + $0x520] sm:$0xff]  ;;  %v8988_v18 = vld [vmem:[#allocation13 + $0xc10] sm:$0xff]  ;;  %v11207_v7 = vcombine.low %v6112_v49, %v6116_v11 }
 0x784   :  { %5987 = vmatprep.subr.bf16.mxu0 %v11192_v2  ;;  %9303 = vmatprep.subr.bf16.mxu1 %v11516_v4  ;;  %v11547_v2 = vcombine.low %v9010_v8, %v9014_v31  ;;  %v11200_v4 = vcombine.high %v6104_v60, %v6108_v1  ;;  %v11528_v59 = vcombine.high %v8988_v18, %v8992_v35 }
 0x785   :  { %v11199_v48 = vcombine.low %v6104_v60, %v6108_v1  ;;  %v11552_v31 = vcombine.high %v9012_v58, %v9016_v61 }
 0x787   :  { %5988 = vmatpush1.bf16.msra.mxu0 %v11191_v47  ;;  %9304 = vmatpush1.bf16.msra.mxu1 %v11515_v39  ;;  %v11527_v47 = vcombine.low %v8988_v18, %v8992_v35  ;;  %v11208_v39 = vcombine.high %v6112_v49, %v6116_v11  ;;  %v6113_v18 = vld [vmem:[#allocation13 + $0x548] sm:$0xff]  ;;  %v14327_v49 = vrot.slane %v14165_v15, 1 }
 0x788   :  { %6022 = vmatprep.subr.bf16.mxu0 %v11170_v53  ;;  %9542 = vmatprep.subr.bf16.mxu1 %v11524_v45  ;;  %v11536_v53 = vcombine.high %v8996_v52, %v9000_v14  ;;  %v6120_v45 = vld [vmem:[#allocation13 + $0x580] sm:$0xff]  ;;  %v6117_v35 = vld [vmem:[#allocation13 + $0x568] sm:$0xff] }
 0x789   :  { %v11210_v11 = vcombine.high %v6113_v18, %v6117_v35 }
 0x78a   :  { %11197 = vmatmul.mubr.msk.bf16.vlgmr.msra.gmra.mrb[180].mxu0 %vm2036_vm5, %v14269_v62  ;;  %11521 = vmatmul.mubr.msk.bf16.vlgmr.msra.gmra.mrb[164].mxu1 %vm2036_vm5, %v14282_v26 }
 0x78b   :  { %6023 = vmatpush1.bf16.msra.mxu0 %v11169_v30  ;;  %9543 = vmatpush1.bf16.msra.mxu1 %v11523_v34  ;;  %v11535_v30 = vcombine.low %v8996_v52, %v9000_v14  ;;  %v11216_v34 = vcombine.high %v6120_v45, %v6124_v38  ;;  %v6121_v14 = vld [vmem:[#allocation13 + $0x588] sm:$0xff] }
 0x78c   :  { %6024 = vmatprep.subr.bf16.mxu0 %v11178_v21  ;;  %9544 = vmatprep.subr.bf16.mxu1 %v11532_v20  ;;  %v11544_v21 = vcombine.high %v9004_v9, %v9008_v57  ;;  %v6128_v20 = vld [vmem:[#allocation13 + $0x5c0] sm:$0xff] }
 0x78d   :  { %6054 = vmatprep.mubr.bf16.mxu0 %v14823_v22  ;;  %9574 = vmatprep.mubr.bf16.mxu1 %v14823_v22  ;;  %v14304_v25 = vpop.f32.mrb[128].mxu0  ;;  %v14306_v3 = vpop.f32.mrb[112].mxu1  ;;  %v11224_v8 = vcombine.high %v6128_v20, %v6132_v63  ;;  %v11223_v60 = vcombine.low %v6128_v20, %v6132_v63 }
 0x78e   :  { %v14308_v16 = vpop.f32.mrb[129].mxu0  ;;  %v14310_v23 = vpop.f32.mrb[113].mxu1 }
 0x78f   :  { %6025 = vmatpush1.bf16.msra.mxu0 %v11177_v46  ;;  %9545 = vmatpush1.bf16.msra.mxu1 %v11531_v28  ;;  %v4923_v32 = vpop.f32.mrb[130].mxu0  ;;  %v7026_v37 = vpop.f32.mrb[114].mxu1 }
 0x790   :  { %6026 = vmatprep.subr.bf16.mxu0 %v11186_v43  ;;  %9546 = vmatprep.subr.bf16.mxu1 %v11540_v19  ;;  %v4924_v40 = vpop.f32.mrb[131].mxu0  ;;  %v7027_v56 = vpop.f32.mrb[115].mxu1  ;;  %v11215_v43 = vcombine.low %v6120_v45, %v6124_v38  ;;  %v11543_v19 = vcombine.low %v9004_v9, %v9008_v57  ;;  %v6109_v37 = vld [vmem:[#allocation13 + $0x528] sm:$0xff] }
 0x791   :  { %v11551_v40 = vcombine.low %v9012_v58, %v9016_v61  ;;  %v6129_v57 = vld [vmem:[#allocation13 + $0x5c8] sm:$0xff] }
 0x793   :  { %6027 = vmatpush1.bf16.msra.mxu0 %v11185_v24  ;;  %9547 = vmatpush1.bf16.msra.mxu1 %v11539_v36  ;;  %v6105_v24 = vld [vmem:[#allocation13 + $0x508] sm:$0xff] }
 0x794   :  { %6028 = vmatprep.subr.bf16.mxu0 %v11194_v10  ;;  %9548 = vmatprep.subr.bf16.mxu1 %v11548_v13  ;;  %v9706_v10 = vld [vmem:[#allocation13 + $0xe00] sm:$0xff]  ;;  %v11202_v56 = vcombine.high %v6105_v24, %v6109_v37 }
 0x795   :  { %v9710_v13 = vld [vmem:[#allocation13 + $0xe20] sm:$0xff] }
 0x796   :  { %v11560_v1 = vcombine.high %v9706_v10, %v9710_v13 }
 0x797   :  { %6029 = vmatpush1.bf16.msra.mxu0 %v11193_v41  ;;  %9549 = vmatpush1.bf16.msra.mxu1 %v11547_v2  ;;  %v9714_v41 = vld [vmem:[#allocation13 + $0xe40] sm:$0xff] }
 0x798   :  { %6301 = vmatprep.subr.bf16.mxu0 %v11200_v4  ;;  %9624 = vmatprep.subr.bf16.mxu1 %v11528_v59  ;;  %v9718_v2 = vld [vmem:[#allocation13 + $0xe60] sm:$0xff]  ;;  %v11201_v4 = vcombine.low %v6105_v24, %v6109_v37  ;;  %v11559_v59 = vcombine.low %v9706_v10, %v9710_v13  ;;  %v9708_v37 = vld [vmem:[#allocation13 + $0xe10] sm:$0xff] }
 0x799   :  { %v11568_v52 = vcombine.high %v9714_v41, %v9718_v2  ;;  %v11567_v45 = vcombine.low %v9714_v41, %v9718_v2  ;;  %v9712_v10 = vld [vmem:[#allocation13 + $0xe30] sm:$0xff] }
 0x79a   :  { %11198 = vmatmul.mubr.msk.bf16.vlgmr.msra.gmra.mrb[184].mxu0 %vm2036_vm5, %v14269_v62  ;;  %11555 = vmatmul.mubr.msk.bf16.vlgmr.msra.gmra.mrb[168].mxu1 %vm2036_vm5, %v14279_v33  ;;  %v9720_v41 = vld [vmem:[#allocation13 + $0xe70] sm:$0xff] }
 0x79b   :  { %6302 = vmatpush1.bf16.msra.mxu0 %v11199_v48  ;;  %9625 = vmatpush1.bf16.msra.mxu1 %v11527_v47  ;;  %v6125_v48 = vld [vmem:[#allocation13 + $0x5a8] sm:$0xff]  ;;  %v9722_v47 = vld [vmem:[#allocation13 + $0xe80] sm:$0xff] }
 0x79c   :  { %6303 = vmatprep.subr.bf16.mxu0 %v11208_v39  ;;  %9626 = vmatprep.subr.bf16.mxu1 %v11536_v53  ;;  %v9726_v39 = vld [vmem:[#allocation13 + $0xea0] sm:$0xff]  ;;  %v11209_v53 = vcombine.low %v6113_v18, %v6117_v35  ;;  %v11218_v38 = vcombine.high %v6121_v14, %v6125_v48  ;;  %v11217_v61 = vcombine.low %v6121_v14, %v6125_v48  ;;  %v6118_v18 = vld [vmem:[#allocation13 + $0x570] sm:$0xff] }
 0x79d   :  { %6333 = vmatprep.mubr.bf16.mxu0 %v14823_v22  ;;  %9656 = vmatprep.mubr.bf16.mxu1 %v14823_v22  ;;  %v14318_v62 = vpop.f32.mrb[132].mxu0  ;;  %v14320_v27 = vpop.f32.mrb[116].mxu1  ;;  %v11576_v9 = vcombine.high %v9722_v47, %v9726_v39  ;;  %v9716_v35 = vld [vmem:[#allocation13 + $0xe50] sm:$0xff] }
 0x79e   :  { %v14322_v46 = vpop.f32.mrb[133].mxu0  ;;  %v14324_v28 = vpop.f32.mrb[117].mxu1  ;;  %v6122_v14 = vld [vmem:[#allocation13 + $0x590] sm:$0xff] }
 0x79f   :  { %6304 = vmatpush1.bf16.msra.mxu0 %v11207_v7  ;;  %9627 = vmatpush1.bf16.msra.mxu1 %v11535_v30  ;;  %v4964_v12 = vpop.f32.mrb[134].mxu0  ;;  %v7108_v50 = vpop.f32.mrb[118].mxu1  ;;  %v6133_v7 = vld [vmem:[#allocation13 + $0x5e8] sm:$0xff]  ;;  %v9730_v30 = vld [vmem:[#allocation13 + $0xec0] sm:$0xff]  ;;  %v6126_v48 = vld [vmem:[#allocation13 + $0x5b0] sm:$0xff] }
 0x7a0   :  { %6305 = vmatprep.subr.bf16.mxu0 %v11216_v34  ;;  %9628 = vmatprep.subr.bf16.mxu1 %v11544_v21  ;;  %v4965_v36 = vpop.f32.mrb[135].mxu0  ;;  %v7109_v32 = vpop.f32.mrb[119].mxu1  ;;  %v9734_v34 = vld [vmem:[#allocation13 + $0xee0] sm:$0xff]  ;;  %v11226_v50 = vcombine.high %v6129_v57, %v6133_v7  ;;  %v11225_v13 = vcombine.low %v6129_v57, %v6133_v7  ;;  %v6130_v57 = vld [vmem:[#allocation13 + $0x5d0] sm:$0xff] }
 0x7a1   :  { %v6110_v32 = vld [vmem:[#allocation13 + $0x530] sm:$0xff] }
 0x7a3   :  { %6306 = vmatpush1.bf16.msra.mxu0 %v11215_v43  ;;  %9629 = vmatpush1.bf16.msra.mxu1 %v11543_v19  ;;  %v11575_v43 = vcombine.low %v9722_v47, %v9726_v39  ;;  %v9724_v47 = vld [vmem:[#allocation13 + $0xe90] sm:$0xff] }
 0x7a4   :  { %6307 = vmatprep.subr.bf16.mxu0 %v11224_v8  ;;  %9630 = vmatprep.subr.bf16.mxu1 %v11552_v31  ;;  %v11584_v8 = vcombine.high %v9730_v30, %v9734_v34  ;;  %v6106_v31 = vld [vmem:[#allocation13 + $0x510] sm:$0xff] }
 0x7a5   :  { %v11203_v2 = vcombine.low %v6106_v31, %v6110_v32  ;;  %v9728_v39 = vld [vmem:[#allocation13 + $0xeb0] sm:$0xff] }
 0x7a7   :  { %6308 = vmatpush1.bf16.msra.mxu0 %v11223_v60  ;;  %9631 = vmatpush1.bf16.msra.mxu1 %v11551_v40  ;;  %v11583_v60 = vcombine.low %v9730_v30, %v9734_v34  ;;  %v11204_v40 = vcombine.high %v6106_v31, %v6110_v32  ;;  %v6134_v34 = vld [vmem:[#allocation13 + $0x5f0] sm:$0xff]  ;;  %v11579_v32 = vcombine.low %v9724_v47, %v9728_v39 }
 0x7a8   :  { %6342 = vmatprep.subr.bf16.mxu0 %v11202_v56  ;;  %9902 = vmatprep.subr.bf16.mxu1 %v11560_v1  ;;  %v11564_v56 = vcombine.high %v9708_v37, %v9712_v10  ;;  %v6114_v1 = vld [vmem:[#allocation13 + $0x550] sm:$0xff] }
 0x7aa   :  { %11231 = vmatmul.mubr.msk.bf16.vlgmr.msra.gmra.mrb[188].mxu0 %vm2036_vm5, %v14327_v49  ;;  %11557 = vmatmul.mubr.msk.bf16.vlgmr.msra.gmra.mrb[172].mxu1 %vm2036_vm5, %v14279_v33 }
 0x7ab   :  { %6343 = vmatpush1.bf16.msra.mxu0 %v11201_v4  ;;  %9903 = vmatpush1.bf16.msra.mxu1 %v11559_v59  ;;  %v11563_v4 = vcombine.low %v9708_v37, %v9712_v10  ;;  %v14344_v59 = vrot.slane %v14279_v33, 2 }
 0x7ac   :  { %6344 = vmatprep.subr.bf16.mxu0 %v11210_v11  ;;  %9904 = vmatprep.subr.bf16.mxu1 %v11568_v52  ;;  %v11212_v11 = vcombine.high %v6114_v1, %v6118_v18  ;;  %v11572_v52 = vcombine.high %v9716_v35, %v9720_v41 }
 0x7ad   :  { %6374 = vmatprep.mubr.bf16.mxu0 %v14823_v22  ;;  %v14334_v21 = vpop.f32.mrb[136].mxu0  ;;  %9934 = vmatprep.mubr.bf16.mxu1 %v14823_v22  ;;  %v14337_v20 = vpop.f32.mrb[120].mxu1 }
 0x7ae   :  { %v14339_v63 = vpop.f32.mrb[137].mxu0  ;;  %v14341_v58 = vpop.f32.mrb[121].mxu1 }
 0x7af   :  { %6345 = vmatpush1.bf16.msra.mxu0 %v11209_v53  ;;  %9905 = vmatpush1.bf16.msra.mxu1 %v11567_v45  ;;  %v5005_v19 = vpop.f32.mrb[138].mxu0  ;;  %v7394_v12 = vpop.f32.mrb[122].mxu1  ;;  %v11211_v53 = vcombine.low %v6114_v1, %v6118_v18  ;;  %v11571_v45 = vcombine.low %v9716_v35, %v9720_v41  ;;  %v10078_v1 = vld [vmem:[#allocation13 + $0xf20] sm:$0xff] }
 0x7b0   :  { %6346 = vmatprep.subr.bf16.mxu0 %v11218_v38  ;;  %9906 = vmatprep.subr.bf16.mxu1 %v11576_v9  ;;  %v5006_v24 = vpop.f32.mrb[139].mxu0  ;;  %v7395_v36 = vpop.f32.mrb[123].mxu1  ;;  %v11220_v38 = vcombine.high %v6122_v14, %v6126_v48  ;;  %v11580_v9 = vcombine.high %v9724_v47, %v9728_v39 }
 0x7b1   :  { %v11219_v24 = vcombine.low %v6122_v14, %v6126_v48 }
 0x7b3   :  { %6347 = vmatpush1.bf16.msra.mxu0 %v11217_v61  ;;  %9907 = vmatpush1.bf16.msra.mxu1 %v11575_v43  ;;  %v9732_v61 = vld [vmem:[#allocation13 + $0xed0] sm:$0xff] }
 0x7b4   :  { %6348 = vmatprep.subr.bf16.mxu0 %v11226_v50  ;;  %9908 = vmatprep.subr.bf16.mxu1 %v11584_v8  ;;  %v9736_v43 = vld [vmem:[#allocation13 + $0xef0] sm:$0xff] }
 0x7b5   :  { %v11587_v18 = vcombine.low %v9732_v61, %v9736_v43 }
 0x7b7   :  { %6349 = vmatpush1.bf16.msra.mxu0 %v11225_v13  ;;  %9909 = vmatpush1.bf16.msra.mxu1 %v11583_v60  ;;  %v11228_v13 = vcombine.high %v6130_v57, %v6134_v34  ;;  %v11588_v60 = vcombine.high %v9732_v61, %v9736_v43  ;;  %v6131_v43 = vld [vmem:[#allocation13 + $0x5d8] sm:$0xff] }
 0x7b8   :  { %6383 = vmatprep.subr.bf16.mxu0 %v11204_v40  ;;  %9984 = vmatprep.subr.bf16.mxu1 %v11564_v56  ;;  %v6111_v40 = vld [vmem:[#allocation13 + $0x538] sm:$0xff]  ;;  %v10074_v56 = vld [vmem:[#allocation13 + $0xf00] sm:$0xff] }
 0x7b9   :  { %v11596_v41 = vcombine.high %v10074_v56, %v10078_v1  ;;  %v11595_v48 = vcombine.low %v10074_v56, %v10078_v1 }
 0x7ba   :  { %11232 = vmatmul.mubr.msk.bf16.vlgmr.msra.gmra.mrb[192].mxu0 %vm2036_vm5, %v14327_v49  ;;  %11591 = vmatmul.mubr.msk.bf16.vlgmr.msra.gmra.mrb[176].mxu1 %vm2036_vm5, %v14344_v59 }
 0x7bb   :  { %6384 = vmatpush1.bf16.msra.mxu0 %v11203_v2  ;;  %9985 = vmatpush1.bf16.msra.mxu1 %v11563_v4  ;;  %v6115_v2 = vld [vmem:[#allocation13 + $0x558] sm:$0xff] }
 0x7bc   :  { %6385 = vmatprep.subr.bf16.mxu0 %v11212_v11  ;;  %9986 = vmatprep.subr.bf16.mxu1 %v11572_v52  ;;  %v6119_v4 = vld [vmem:[#allocation13 + $0x578] sm:$0xff]  ;;  %v10082_v11 = vld [vmem:[#allocation13 + $0xf40] sm:$0xff] }
 0x7bd   :  { %v5205_v7 = vpop.f32.mrb[140].mxu0  ;;  %v14350_v30 = vpop.f32.mrb[124].mxu1  ;;  %6415 = vmatprep.mubr.bf16.mxu0 %v14823_v22  ;;  %10016 = vmatprep.mubr.bf16.mxu1 %v14823_v22  ;;  %v10086_v52 = vld [vmem:[#allocation13 + $0xf60] sm:$0xff]  ;;  %v11214_v47 = vcombine.high %v6115_v2, %v6119_v4 }
 0x7be   :  { %v14355_v19 = vadd.f32 %v5205_v7, %v14290_v0  ;;  %v5207_v12 = vpop.f32.mrb[141].mxu0  ;;  %v14357_v50 = vpop.f32.mrb[125].mxu1  ;;  %v6107_v0 = vld [vmem:[#allocation13 + $0x518] sm:$0xff]  ;;  %v11604_v39 = vcombine.high %v10082_v11, %v10086_v52  ;;  %v11603_v7 = vcombine.low %v10082_v11, %v10086_v52  ;;  %v10080_v11 = vld [vmem:[#allocation13 + $0xf30] sm:$0xff] }
 0x7bf   :  { %v14360_v8 = vadd.f32 %v5207_v12, %v14294_v29  ;;  %6386 = vmatpush1.bf16.msra.mxu0 %v11211_v53  ;;  %9987 = vmatpush1.bf16.msra.mxu1 %v11571_v45  ;;  %v5209_v31 = vpop.f32.mrb[142].mxu0  ;;  %v7476_v36 = vpop.f32.mrb[126].mxu1  ;;  %v11227_v29 = vcombine.low %v6130_v57, %v6134_v34  ;;  %v11206_v35 = vcombine.high %v6107_v0, %v6111_v40  ;;  %v6123_v53 = vld [vmem:[#allocation13 + $0x598] sm:$0xff] }
 0x7c0   :  { %v5210_v37 = vpop.f32.mrb[143].mxu0  ;;  %6387 = vmatprep.subr.bf16.mxu0 %v11220_v38  ;;  %9988 = vmatprep.subr.bf16.mxu1 %v11580_v9  ;;  %v7477_v10 = vpop.f32.mrb[127].mxu1  ;;  %v11205_v14 = vcombine.low %v6107_v0, %v6111_v40  ;;  %v6127_v45 = vld [vmem:[#allocation13 + $0x5b8] sm:$0xff]  ;;  %v10090_v38 = vld [vmem:[#allocation13 + $0xf80] sm:$0xff]  ;;  %v11213_v57 = vcombine.low %v6115_v2, %v6119_v4  ;;  %v10076_v4 = vld [vmem:[#allocation13 + $0xf10] sm:$0xff] }
 0x7c1   :  { %v10094_v9 = vld [vmem:[#allocation13 + $0xfa0] sm:$0xff]  ;;  %v11222_v34 = vcombine.high %v6123_v53, %v6127_v45  ;;  %v6135_v31 = vld [vmem:[#allocation13 + $0x5f8] sm:$0xff]  ;;  %v11221_v40 = vcombine.low %v6123_v53, %v6127_v45  ;;  %v10084_v53 = vld [vmem:[#allocation13 + $0xf50] sm:$0xff] }
 0x7c2   :  { %v11612_v61 = vcombine.high %v10090_v38, %v10094_v9  ;;  %v10102_v36 = vld [vmem:[#allocation13 + $0xfe0] sm:$0xff]  ;;  %v11611_v56 = vcombine.low %v10090_v38, %v10094_v9  ;;  %v10088_v45 = vld [vmem:[#allocation13 + $0xf70] sm:$0xff]  ;;  %v11599_v9 = vcombine.low %v10076_v4, %v10080_v11 }
 0x7c3   :  { %6388 = vmatpush1.bf16.msra.mxu0 %v11219_v24  ;;  %9989 = vmatpush1.bf16.msra.mxu1 %v11579_v32  ;;  %v10098_v24 = vld [vmem:[#allocation13 + $0xfc0] sm:$0xff] }
 0x7c4   :  { %6389 = vmatprep.subr.bf16.mxu0 %v11228_v13  ;;  %9990 = vmatprep.subr.bf16.mxu1 %v11588_v60  ;;  %v6076_v2 = vld [vmem:[#allocation13 + $0x420] sm:$0xff]  ;;  %v11619_v52 = vcombine.low %v10098_v24, %v10102_v36 }
 0x7c7   :  { %6390 = vmatpush1.bf16.msra.mxu0 %v11227_v29  ;;  %9991 = vmatpush1.bf16.msra.mxu1 %v11587_v18  ;;  %v11230_v18 = vcombine.high %v6131_v43, %v6135_v31 }
 0x7c8   :  { %6424 = vmatprep.subr.bf16.mxu0 %v11206_v35  ;;  %10270 = vmatprep.subr.bf16.mxu1 %v11596_v41  ;;  %v11620_v35 = vcombine.high %v10098_v24, %v10102_v36  ;;  %v6072_v41 = vld [vmem:[#allocation13 + $0x400] sm:$0xff]  ;;  %v11607_v36 = vcombine.low %v10084_v53, %v10088_v45 }
 0x7c9   :  { %v11235_v38 = vcombine.low %v6072_v41, %v6076_v2 }
 0x7ca   :  { %11233 = vmatmul.mubr.msk.bf16.vlgmr.msra.gmra.mrb[196].mxu0 %vm2036_vm5, %v14327_v49  ;;  %11593 = vmatmul.mubr.msk.bf16.vlgmr.msra.gmra.mrb[180].mxu1 %vm2036_vm5, %v14344_v59 }
 0x7cb   :  { %6425 = vmatpush1.bf16.msra.mxu0 %v11205_v14  ;;  %10271 = vmatpush1.bf16.msra.mxu1 %v11595_v48  ;;  %v11236_v14 = vcombine.high %v6072_v41, %v6076_v2  ;;  %v11600_v48 = vcombine.high %v10076_v4, %v10080_v11 }
 0x7cc   :  { %6426 = vmatprep.subr.bf16.mxu0 %v11214_v47  ;;  %10272 = vmatprep.subr.bf16.mxu1 %v11604_v39  ;;  %v6080_v47 = vld [vmem:[#allocation13 + $0x440] sm:$0xff] }
 0x7cd   :  { %v5246_v12 = vpop.f32.mrb[144].mxu0  ;;  %6456 = vmatprep.mubr.bf16.mxu0 %v14823_v22  ;;  %10302 = vmatprep.mubr.bf16.mxu1 %v14823_v22  ;;  %v14368_v32 = vpop.f32.mrb[128].mxu1  ;;  %v6084_v39 = vld [vmem:[#allocation13 + $0x460] sm:$0xff] }
 0x7ce   :  { %v14371_v37 = vadd.f32 %v5246_v12, %v14304_v25  ;;  %v5248_v10 = vpop.f32.mrb[145].mxu0  ;;  %v14373_v13 = vpop.f32.mrb[129].mxu1  ;;  %v10092_v12 = vld [vmem:[#allocation13 + $0xf90] sm:$0xff]  ;;  %v11243_v24 = vcombine.low %v6080_v47, %v6084_v39 }
 0x7cf   :  { %v14376_v60 = vadd.f32 %v5248_v10, %v14308_v16  ;;  %v5250_v0 = vpop.f32.mrb[146].mxu0  ;;  %6427 = vmatpush1.bf16.msra.mxu0 %v11213_v57  ;;  %10273 = vmatpush1.bf16.msra.mxu1 %v11603_v7  ;;  %v7796_v1 = vpop.f32.mrb[130].mxu1  ;;  %v11229_v16 = vcombine.low %v6131_v43, %v6135_v31  ;;  %v14379_v57 = vrot.slane %v14279_v33, 3  ;;  %v11244_v7 = vcombine.high %v6080_v47, %v6084_v39  ;;  %v6092_v43 = vld [vmem:[#allocation13 + $0x4a0] sm:$0xff]  ;;  %v10096_v31 = vld [vmem:[#allocation13 + $0xfb0] sm:$0xff] }
 0x7d0   :  { %v5251_v29 = vpop.f32.mrb[147].mxu0  ;;  %6428 = vmatprep.subr.bf16.mxu0 %v11222_v34  ;;  %10274 = vmatprep.subr.bf16.mxu1 %v11612_v61  ;;  %v7797_v25 = vpop.f32.mrb[131].mxu1  ;;  %v11608_v34 = vcombine.high %v10084_v53, %v10088_v45  ;;  %v6088_v61 = vld [vmem:[#allocation13 + $0x480] sm:$0xff]  ;;  %v11616_v0 = vcombine.high %v10092_v12, %v10096_v31  ;;  %v6077_v53 = vld [vmem:[#allocation13 + $0x428] sm:$0xff] }
 0x7d1   :  { %v11252_v10 = vcombine.high %v6088_v61, %v6092_v43  ;;  %v6100_v1 = vld [vmem:[#allocation13 + $0x4e0] sm:$0xff]  ;;  %v10100_v29 = vld [vmem:[#allocation13 + $0xfd0] sm:$0xff]  ;;  %v11251_v11 = vcombine.low %v6088_v61, %v6092_v43  ;;  %v6089_v43 = vld [vmem:[#allocation13 + $0x488] sm:$0xff] }
 0x7d3   :  { %6429 = vmatpush1.bf16.msra.mxu0 %v11221_v40  ;;  %10275 = vmatpush1.bf16.msra.mxu1 %v11611_v56  ;;  %v6096_v40 = vld [vmem:[#allocation13 + $0x4c0] sm:$0xff] }
 0x7d4   :  { %6430 = vmatprep.subr.bf16.mxu0 %v11230_v18  ;;  %10276 = vmatprep.subr.bf16.mxu1 %v11620_v35  ;;  %v10104_v18 = vld [vmem:[#allocation13 + $0xff0] sm:$0xff]  ;;  %v11259_v45 = vcombine.low %v6096_v40, %v6100_v1 }
 0x7d5   :  { %v11624_v47 = vcombine.high %v10100_v29, %v10104_v18 }
 0x7d7   :  { %6431 = vmatpush1.bf16.msra.mxu0 %v11229_v16  ;;  %10277 = vmatpush1.bf16.msra.mxu1 %v11619_v52  ;;  %v11615_v16 = vcombine.low %v10092_v12, %v10096_v31  ;;  %v6093_v12 = vld [vmem:[#allocation13 + $0x4a8] sm:$0xff] }
 0x7d8   :  { %6628 = vmatprep.subr.bf16.mxu0 %v11236_v14  ;;  %10352 = vmatprep.subr.bf16.mxu1 %v11600_v48  ;;  %v11260_v48 = vcombine.high %v6096_v40, %v6100_v1 }
 0x7da   :  { %11234 = vmatmul.mubr.msk.bf16.vlgmr.msra.gmra.mrb[200].mxu0 %vm2036_vm5, %v14327_v49  ;;  %11627 = vmatmul.mubr.msk.bf16.vlgmr.msra.gmra.mrb[184].mxu1 %vm2036_vm5, %v14379_v57 }
 0x7db   :  { %6629 = vmatpush1.bf16.msra.mxu0 %v11235_v38  ;;  %10353 = vmatpush1.bf16.msra.mxu1 %v11599_v9  ;;  %v11623_v38 = vcombine.low %v10100_v29, %v10104_v18  ;;  %v6081_v9 = vld [vmem:[#allocation13 + $0x448] sm:$0xff] }
 0x7dc   :  { %6630 = vmatprep.subr.bf16.mxu0 %v11244_v7  ;;  %10354 = vmatprep.subr.bf16.mxu1 %v11608_v34  ;;  %v6085_v7 = vld [vmem:[#allocation13 + $0x468] sm:$0xff] }
 0x7dd   :  { %v5287_v56 = vpop.f32.mrb[148].mxu0  ;;  %6660 = vmatprep.mubr.bf16.mxu0 %v14823_v22  ;;  %10384 = vmatprep.mubr.bf16.mxu1 %v14823_v22  ;;  %v14387_v49 = vpop.f32.mrb[132].mxu1  ;;  %v11246_v61 = vcombine.high %v6081_v9, %v6085_v7  ;;  %v11245_v31 = vcombine.low %v6081_v9, %v6085_v7 }
 0x7de   :  { %v14390_v35 = vadd.f32 %v5287_v56, %v14318_v62  ;;  %v5289_v41 = vpop.f32.mrb[149].mxu0  ;;  %v14392_v25 = vpop.f32.mrb[133].mxu1  ;;  %v6073_v62 = vld [vmem:[#allocation13 + $0x408] sm:$0xff] }
 0x7df   :  { %v14395_v2 = vadd.f32 %v5289_v41, %v14322_v46  ;;  %v5291_v4 = vpop.f32.mrb[150].mxu0  ;;  %6631 = vmatpush1.bf16.msra.mxu0 %v11243_v24  ;;  %10355 = vmatpush1.bf16.msra.mxu1 %v11607_v36  ;;  %v7878_v52 = vpop.f32.mrb[134].mxu1  ;;  %v11238_v46 = vcombine.high %v6073_v62, %v6077_v53  ;;  %v11237_v34 = vcombine.low %v6073_v62, %v6077_v53  ;;  %v6083_v53 = vld [vmem:[#allocation13 + $0x458] sm:$0xff] }
 0x7e0   :  { %v5292_v14 = vpop.f32.mrb[151].mxu0  ;;  %6632 = vmatprep.subr.bf16.mxu0 %v11252_v10  ;;  %10356 = vmatprep.subr.bf16.mxu1 %v11616_v0  ;;  %v7879_v39 = vpop.f32.mrb[135].mxu1  ;;  %v11254_v24 = vcombine.high %v6089_v43, %v6093_v12  ;;  %v6097_v10 = vld [vmem:[#allocation13 + $0x4c8] sm:$0xff] }
 0x7e1   :  { %v6101_v0 = vld [vmem:[#allocation13 + $0x4e8] sm:$0xff]  ;;  %v6079_v39 = vld [vmem:[#allocation13 + $0x438] sm:$0xff] }
 0x7e3   :  { %6633 = vmatpush1.bf16.msra.mxu0 %v11251_v11  ;;  %10357 = vmatpush1.bf16.msra.mxu1 %v11615_v16  ;;  %v11253_v11 = vcombine.low %v6089_v43, %v6093_v12  ;;  %v6103_v43 = vld [vmem:[#allocation13 + $0x4f8] sm:$0xff] }
 0x7e4   :  { %6634 = vmatprep.subr.bf16.mxu0 %v11260_v48  ;;  %10358 = vmatprep.subr.bf16.mxu1 %v11624_v47  ;;  %v11262_v48 = vcombine.high %v6097_v10, %v6101_v0  ;;  %v6075_v47 = vld [vmem:[#allocation13 + $0x418] sm:$0xff] }
 0x7e5   :  { %v11242_v62 = vcombine.high %v6075_v47, %v6079_v39 }
 0x7e7   :  { %6635 = vmatpush1.bf16.msra.mxu0 %v11259_v45  ;;  %10359 = vmatpush1.bf16.msra.mxu1 %v11623_v38  ;;  %v11241_v45 = vcombine.low %v6075_v47, %v6079_v39  ;;  %v6801_v47 = vld [vmem:[#allocation13 + $0x648] sm:$0xff] }
 0x7e8   :  { %6669 = vmatprep.subr.bf16.mxu0 %v11238_v46  ;;  %v6091_v46 = vld [vmem:[#allocation13 + $0x498] sm:$0xff] }
 0x7ea   :  { %11267 = vmatmul.mubr.msk.bf16.vlgmr.msra.gmra.mrb[204].mxu0 %vm2036_vm5, %v14165_v15  ;;  %11629 = vmatmul.mubr.msk.bf16.vlgmr.msra.gmra.mrb[188].mxu1 %vm2036_vm5, %v14379_v57 }
 0x7eb   :  { %6670 = vmatpush1.bf16.msra.mxu0 %v11237_v34  ;;  %6701 = vmatprep.mubr.bf16.mxu0 %v14823_v22 }
 0x7ec   :  { %6671 = vmatprep.subr.bf16.mxu0 %v11246_v61  ;;  %v6099_v61 = vld [vmem:[#allocation13 + $0x4d8] sm:$0xff] }
 0x7ed   :  { %v5328_v36 = vpop.f32.mrb[152].mxu0  ;;  %v8119_v40 = vpop.f32.mrb[136].mxu1 }
 0x7ee   :  { %v14403_v56 = vadd.f32 %v5328_v36, %v14334_v21  ;;  %v5330_v1 = vpop.f32.mrb[153].mxu0  ;;  %v14406_v29 = vadd.f32 %v8119_v40, %v14368_v32  ;;  %v8121_v18 = vpop.f32.mrb[137].mxu1  ;;  %v11261_v32 = vcombine.low %v6097_v10, %v6101_v0 }
 0x7ef   :  { %v14409_v41 = vadd.f32 %v5330_v1, %v14339_v63  ;;  %v5332_v4 = vpop.f32.mrb[154].mxu0  ;;  %6672 = vmatpush1.bf16.msra.mxu0 %v11245_v31  ;;  %v14412_v16 = vadd.f32 %v8121_v18, %v14373_v13  ;;  %v8123_v52 = vpop.f32.mrb[138].mxu1  ;;  %v6087_v63 = vld [vmem:[#allocation13 + $0x478] sm:$0xff] }
 0x7f0   :  { %v5333_v14 = vpop.f32.mrb[155].mxu0  ;;  %6673 = vmatprep.subr.bf16.mxu0 %v11254_v24  ;;  %v8124_v21 = vpop.f32.mrb[139].mxu1  ;;  %v11250_v38 = vcombine.high %v6083_v53, %v6087_v63  ;;  %v6095_v13 = vld [vmem:[#allocation13 + $0x4b8] sm:$0xff]  ;;  %v11249_v9 = vcombine.low %v6083_v53, %v6087_v63  ;;  %v11266_v52 = vcombine.high %v6099_v61, %v6103_v43 }
 0x7f1   :  { %v11258_v7 = vcombine.high %v6091_v46, %v6095_v13  ;;  %v11257_v1 = vcombine.low %v6091_v46, %v6095_v13  ;;  %v6793_v14 = vld [vmem:[#allocation13 + $0x608] sm:$0xff] }
 0x7f2   :  { %v6821_v46 = vld [vmem:[#allocation13 + $0x6e8] sm:$0xff] }
 0x7f3   :  { %6674 = vmatpush1.bf16.msra.mxu0 %v11253_v11 }
 0x7f4   :  { %6675 = vmatprep.subr.bf16.mxu0 %v11262_v48  ;;  %v6797_v48 = vld [vmem:[#allocation13 + $0x628] sm:$0xff] }
 0x7f5   :  { %v11274_v21 = vcombine.high %v6793_v14, %v6797_v48  ;;  %v11273_v39 = vcombine.low %v6793_v14, %v6797_v48 }
 0x7f7   :  { %6676 = vmatpush1.bf16.msra.mxu0 %v11261_v32 }
 0x7f8   :  { %6751 = vmatprep.subr.bf16.mxu0 %v11242_v62  ;;  %v6809_v62 = vld [vmem:[#allocation13 + $0x688] sm:$0xff] }
 0x7fa   :  { %11268 = vmatmul.mubr.msk.bf16.vlgmr.msra.gmra.mrb[208].mxu0 %vm2036_vm5, %v14165_v15 }
 0x7fb   :  { %6752 = vmatpush1.bf16.msra.mxu0 %v11241_v45  ;;  %6783 = vmatprep.mubr.bf16.mxu0 %v14823_v22 }
 0x7fc   :  { %6753 = vmatprep.subr.bf16.mxu0 %v11250_v38  ;;  %v6817_v38 = vld [vmem:[#allocation13 + $0x6c8] sm:$0xff] }
 0x7fd   :  { %v5565_v34 = vpop.f32.mrb[156].mxu0  ;;  %v8201_v12 = vpop.f32.mrb[140].mxu1 }
 0x7fe   :  { %v14418_v31 = vadd.f32 %v5565_v34, %v14355_v19  ;;  %v5567_v24 = vpop.f32.mrb[157].mxu0  ;;  %v14421_v36 = vadd.f32 %v8201_v12, %v14387_v49  ;;  %v8203_v10 = vpop.f32.mrb[141].mxu1  ;;  %v11265_v49 = vcombine.low %v6099_v61, %v6103_v43 }
 0x7ff   :  { %v14424_v0 = vadd.f32 %v5567_v24, %v14360_v8  ;;  %v5569_v40 = vpop.f32.mrb[158].mxu0  ;;  %6754 = vmatpush1.bf16.msra.mxu0 %v11249_v9  ;;  %v14427_v18 = vadd.f32 %v8203_v10, %v14392_v25  ;;  %v8205_v4 = vpop.f32.mrb[142].mxu1  ;;  %v6805_v8 = vld [vmem:[#allocation13 + $0x668] sm:$0xff] }
 0x800   :  { %v5570_v11 = vpop.f32.mrb[159].mxu0  ;;  %6755 = vmatprep.subr.bf16.mxu0 %v11258_v7  ;;  %v8206_v19 = vpop.f32.mrb[143].mxu1  ;;  %v11282_v32 = vcombine.high %v6801_v47, %v6805_v8  ;;  %v6813_v25 = vld [vmem:[#allocation13 + $0x6a8] sm:$0xff]  ;;  %v11281_v53 = vcombine.low %v6801_v47, %v6805_v8  ;;  %v6795_v4 = vld [vmem:[#allocation13 + $0x618] sm:$0xff] }
 0x801   :  { %v11290_v63 = vcombine.high %v6809_v62, %v6813_v25  ;;  %v11289_v12 = vcombine.low %v6809_v62, %v6813_v25  ;;  %v6799_v11 = vld [vmem:[#allocation13 + $0x638] sm:$0xff] }
 0x802   :  { %v6803_v19 = vld [vmem:[#allocation13 + $0x658] sm:$0xff]  ;;  %v11277_v14 = vcombine.low %v6795_v4, %v6799_v11 }
 0x803   :  { %6756 = vmatpush1.bf16.msra.mxu0 %v11257_v1  ;;  %v11298_v1 = vcombine.high %v6817_v38, %v6821_v46 }
 0x804   :  { %6757 = vmatprep.subr.bf16.mxu0 %v11266_v52  ;;  %v11278_v52 = vcombine.high %v6795_v4, %v6799_v11 }
 0x807   :  { %6758 = vmatpush1.bf16.msra.mxu0 %v11265_v49  ;;  %v6811_v49 = vld [vmem:[#allocation13 + $0x698] sm:$0xff] }
 0x808   :  { %7029 = vmatprep.subr.bf16.mxu0 %v11274_v21 }
 0x80a   :  { %11270 = vmatmul.mubr.msk.bf16.vlgmr.msra.gmra.mrb[212].mxu0 %vm2036_vm5, %v14165_v15 }
 0x80b   :  { %7030 = vmatpush1.bf16.msra.mxu0 %v11273_v39  ;;  %7061 = vmatprep.mubr.bf16.mxu0 %v14823_v22  ;;  %v6819_v39 = vld [vmem:[#allocation13 + $0x6d8] sm:$0xff] }
 0x80c   :  { %7031 = vmatprep.subr.bf16.mxu0 %v11282_v32  ;;  %v6823_v32 = vld [vmem:[#allocation13 + $0x6f8] sm:$0xff] }
 0x80d   :  { %v5606_v45 = vpop.f32.mrb[160].mxu0  ;;  %v8479_v13 = vpop.f32.mrb[144].mxu1 }
 0x80e   :  { %v14433_v9 = vadd.f32 %v5606_v45, %v14371_v37  ;;  %v5608_v7 = vpop.f32.mrb[161].mxu0  ;;  %v14436_v34 = vadd.f32 %v8479_v13, %v14406_v29  ;;  %v8481_v61 = vpop.f32.mrb[145].mxu1  ;;  %v11297_v29 = vcombine.low %v6817_v38, %v6821_v46 }
 0x80f   :  { %v14439_v15 = vadd.f32 %v5608_v7, %v14376_v60  ;;  %v5610_v43 = vpop.f32.mrb[162].mxu0  ;;  %7032 = vmatpush1.bf16.msra.mxu0 %v11281_v53  ;;  %v14442_v24 = vadd.f32 %v8481_v61, %v14412_v16  ;;  %v8483_v10 = vpop.f32.mrb[146].mxu1  ;;  %v6807_v60 = vld [vmem:[#allocation13 + $0x678] sm:$0xff] }
 0x810   :  { %v5611_v40 = vpop.f32.mrb[163].mxu0  ;;  %7033 = vmatprep.subr.bf16.mxu0 %v11290_v63  ;;  %v8484_v37 = vpop.f32.mrb[147].mxu1  ;;  %v11286_v48 = vcombine.high %v6803_v19, %v6807_v60  ;;  %v6815_v16 = vld [vmem:[#allocation13 + $0x6b8] sm:$0xff]  ;;  %v11285_v21 = vcombine.low %v6803_v19, %v6807_v60  ;;  %v7161_v10 = vld [vmem:[#allocation13 + $0x708] sm:$0xff] }
 0x811   :  { %v11294_v47 = vcombine.high %v6811_v49, %v6815_v16  ;;  %v11293_v13 = vcombine.low %v6811_v49, %v6815_v16  ;;  %v7165_v40 = vld [vmem:[#allocation13 + $0x728] sm:$0xff] }
 0x812   :  { %v7169_v37 = vld [vmem:[#allocation13 + $0x748] sm:$0xff]  ;;  %v11309_v4 = vcombine.low %v7161_v10, %v7165_v40 }
 0x813   :  { %7034 = vmatpush1.bf16.msra.mxu0 %v11289_v12  ;;  %v11302_v12 = vcombine.high %v6819_v39, %v6823_v32 }
 0x814   :  { %7035 = vmatprep.subr.bf16.mxu0 %v11298_v1  ;;  %v11310_v1 = vcombine.high %v7161_v10, %v7165_v40  ;;  %v7179_v40 = vld [vmem:[#allocation13 + $0x798] sm:$0xff] }
 0x817   :  { %7036 = vmatpush1.bf16.msra.mxu0 %v11297_v29  ;;  %v7177_v29 = vld [vmem:[#allocation13 + $0x788] sm:$0xff] }
 0x818   :  { %7111 = vmatprep.subr.bf16.mxu0 %v11278_v52 }
 0x81a   :  { %11304 = vmatmul.mubr.msk.bf16.vlgmr.msra.gmra.mrb[216].mxu0 %vm2036_vm5, %v14179_v5 }
 0x81b   :  { %7112 = vmatpush1.bf16.msra.mxu0 %v11277_v14  ;;  %7143 = vmatprep.mubr.bf16.mxu0 %v14823_v22  ;;  %v7185_v14 = vld [vmem:[#allocation13 + $0x7c8] sm:$0xff] }
 0x81c   :  { %7113 = vmatprep.subr.bf16.mxu0 %v11286_v48  ;;  %v7189_v48 = vld [vmem:[#allocation13 + $0x7e8] sm:$0xff] }
 0x81d   :  { %v5647_v8 = vpop.f32.mrb[164].mxu0  ;;  %v8561_v62 = vpop.f32.mrb[148].mxu1 }
 0x81e   :  { %v14448_v25 = vadd.f32 %v5647_v8, %v14390_v35  ;;  %v5649_v53 = vpop.f32.mrb[165].mxu0  ;;  %v14451_v63 = vadd.f32 %v8561_v62, %v14421_v36  ;;  %v8563_v45 = vpop.f32.mrb[149].mxu1  ;;  %v11301_v36 = vcombine.low %v6819_v39, %v6823_v32 }
 0x81f   :  { %v14454_v38 = vadd.f32 %v5649_v53, %v14395_v2  ;;  %v5651_v46 = vpop.f32.mrb[166].mxu0  ;;  %7114 = vmatpush1.bf16.msra.mxu0 %v11285_v21  ;;  %v14457_v7 = vadd.f32 %v8563_v45, %v14427_v18  ;;  %v8565_v61 = vpop.f32.mrb[150].mxu1  ;;  %v7173_v2 = vld [vmem:[#allocation13 + $0x768] sm:$0xff] }
 0x820   :  { %v5652_v43 = vpop.f32.mrb[167].mxu0  ;;  %7115 = vmatprep.subr.bf16.mxu0 %v11294_v47  ;;  %v8566_v35 = vpop.f32.mrb[151].mxu1  ;;  %v11318_v11 = vcombine.high %v7169_v37, %v7173_v2  ;;  %v7181_v18 = vld [vmem:[#allocation13 + $0x7a8] sm:$0xff]  ;;  %v11317_v52 = vcombine.low %v7169_v37, %v7173_v2  ;;  %v11334_v46 = vcombine.high %v7185_v14, %v7189_v48  ;;  %v7167_v61 = vld [vmem:[#allocation13 + $0x738] sm:$0xff] }
 0x821   :  { %v11326_v19 = vcombine.high %v7177_v29, %v7181_v18  ;;  %v11325_v32 = vcombine.low %v7177_v29, %v7181_v18  ;;  %v7187_v2 = vld [vmem:[#allocation13 + $0x7d8] sm:$0xff] }
 0x823   :  { %7116 = vmatpush1.bf16.msra.mxu0 %v11293_v13  ;;  %v7163_v13 = vld [vmem:[#allocation13 + $0x718] sm:$0xff] }
 0x824   :  { %7117 = vmatprep.subr.bf16.mxu0 %v11302_v12  ;;  %v11314_v43 = vcombine.high %v7163_v13, %v7167_v61  ;;  %v7171_v12 = vld [vmem:[#allocation13 + $0x758] sm:$0xff]  ;;  %v11313_v35 = vcombine.low %v7163_v13, %v7167_v61  ;;  %v7566_v13 = vld [vmem:[#allocation13 + $0x928] sm:$0xff] }
 0x827   :  { %7118 = vmatpush1.bf16.msra.mxu0 %v11301_v36 }
 0x828   :  { %7397 = vmatprep.subr.bf16.mxu0 %v11310_v1 }
 0x82a   :  { %11306 = vmatmul.mubr.msk.bf16.vlgmr.msra.gmra.mrb[220].mxu0 %vm2036_vm5, %v14179_v5 }
 0x82b   :  { %7398 = vmatpush1.bf16.msra.mxu0 %v11309_v4  ;;  %7429 = vmatprep.mubr.bf16.mxu0 %v14823_v22  ;;  %v7191_v4 = vld [vmem:[#allocation13 + $0x7f8] sm:$0xff] }
 0x82c   :  { %7399 = vmatprep.subr.bf16.mxu0 %v11318_v11 }
 0x82d   :  { %v5688_v60 = vpop.f32.mrb[168].mxu0  ;;  %v8847_v49 = vpop.f32.mrb[152].mxu1 }
 0x82e   :  { %v14463_v16 = vadd.f32 %v5688_v60, %v14403_v56  ;;  %v5690_v21 = vpop.f32.mrb[169].mxu0  ;;  %v14466_v47 = vadd.f32 %v8847_v49, %v14436_v34  ;;  %v8849_v8 = vpop.f32.mrb[153].mxu1  ;;  %v11333_v34 = vcombine.low %v7185_v14, %v7189_v48  ;;  %v10468_v60 = vlaneseq }
 0x82f   :  { %v14469_v5 = vadd.f32 %v5690_v21, %v14409_v41  ;;  %v5692_v39 = vpop.f32.mrb[170].mxu0  ;;  %7400 = vmatpush1.bf16.msra.mxu0 %v11317_v52  ;;  %v14472_v62 = vadd.f32 %v8849_v8, %v14442_v24  ;;  %v8851_v53 = vpop.f32.mrb[154].mxu1  ;;  %v7175_v41 = vld [vmem:[#allocation13 + $0x778] sm:$0xff]  ;;  %v12886_v14 = vmov 1966171168  }
 0x830   :  { %v5693_v45 = vpop.f32.mrb[171].mxu0  ;;  %7401 = vmatprep.subr.bf16.mxu0 %v11326_v19  ;;  %v8852_v56 = vpop.f32.mrb[155].mxu1  ;;  %v11322_v10 = vcombine.high %v7171_v12, %v7175_v41  ;;  %v7183_v24 = vld [vmem:[#allocation13 + $0x7b8] sm:$0xff]  ;;  %v11321_v36 = vcombine.low %v7171_v12, %v7175_v41  ;;  %v10535_v48 = vunpack.c.l.s4 %v12886_v14  ;;  %v11338_v53 = vcombine.high %v7187_v2, %v7191_v4  ;;  %v7574_v12 = vld [vmem:[#allocation13 + $0x968] sm:$0xff] }
 0x831   :  { %v11330_v1 = vcombine.high %v7179_v40, %v7183_v24  ;;  %v11329_v8 = vcombine.low %v7179_v40, %v7183_v24  ;;  %v7562_v56 = vld [vmem:[#allocation13 + $0x908] sm:$0xff] }
 0x833   :  { %7402 = vmatpush1.bf16.msra.mxu0 %v11325_v32 }
 0x834   :  { %7403 = vmatprep.subr.bf16.mxu0 %v11334_v46  ;;  %v10536_v46 = vunpack.c.0.s8 %v10535_v48 }
 0x837   :  { %7404 = vmatpush1.bf16.msra.mxu0 %v11333_v34  ;;  %v12609_v34 = vld.sshfl [vmem:[#allocation16] sm:$0xff pattern:$0x75316420] }
 0x838   :  { %7479 = vmatprep.subr.bf16.mxu0 %v11314_v43  ;;  %v11346_v43 = vcombine.high %v7562_v56, %v7566_v13  ;;  %v10548_v41 = vcombine.high %v12609_v34, %v12609_v34 }
 0x83a   :  { %11340 = vmatmul.mubr.msk.bf16.vlgmr.msra.gmra.mrb[224].mxu0 %vm2036_vm5, %v14194_v55 }
 0x83b   :  { %7480 = vmatpush1.bf16.msra.mxu0 %v11313_v35  ;;  %7511 = vmatprep.mubr.bf16.mxu0 %v14823_v22  ;;  %v11345_v35 = vcombine.low %v7562_v56, %v7566_v13  ;;  %v7568_v56 = vld [vmem:[#allocation13 + $0x938] sm:$0xff] }
 0x83c   :  { %7481 = vmatprep.subr.bf16.mxu0 %v11322_v10 }
 0x83d   :  { %v5933_v37 = vpop.f32.mrb[172].mxu0  ;;  %v8929_v11 = vpop.f32.mrb[156].mxu1 }
 0x83e   :  { %v14478_v29 = vadd.f32 %v5933_v37, %v14418_v31  ;;  %v5935_v18 = vpop.f32.mrb[173].mxu0  ;;  %v14481_v52 = vadd.f32 %v8929_v11, %v14451_v63  ;;  %v8931_v19 = vpop.f32.mrb[157].mxu1  ;;  %v14489_v63 = vshrl.u32 %v10468_v60, 7  ;;  %v7586_v11 = vld [vmem:[#allocation13 + $0x9c8] sm:$0xff] }
 0x83f   :  { %v14484_v49 = vadd.f32 %v5935_v18, %v14424_v0  ;;  %v5937_v21 = vpop.f32.mrb[174].mxu0  ;;  %7482 = vmatpush1.bf16.msra.mxu0 %v11321_v36  ;;  %v14487_v39 = vadd.f32 %v8931_v19, %v14457_v7  ;;  %v8933_v32 = vpop.f32.mrb[158].mxu1  ;;  %v11337_v0 = vcombine.low %v7187_v2, %v7191_v4  ;;  %v7570_v7 = vld [vmem:[#allocation13 + $0x948] sm:$0xff] }
 0x840   :  { %v5938_v31 = vpop.f32.mrb[175].mxu0  ;;  %7483 = vmatprep.subr.bf16.mxu0 %v11330_v1  ;;  %v8934_v45 = vpop.f32.mrb[159].mxu1  ;;  %v14492_v61 = vsub.s32 %v10536_v46, %v14489_v63  ;;  %v11354_v10 = vcombine.high %v7570_v7, %v7574_v12  ;;  %v7578_v36 = vld [vmem:[#allocation13 + $0x988] sm:$0xff]  ;;  %v11353_v37 = vcombine.low %v7570_v7, %v7574_v12  ;;  %v7564_v46 = vld [vmem:[#allocation13 + $0x918] sm:$0xff] }
 0x841   :  { %v7582_v1 = vld [vmem:[#allocation13 + $0x9a8] sm:$0xff]  ;;  %v7580_v7 = vld [vmem:[#allocation13 + $0x998] sm:$0xff] }
 0x842   :  { %v14495_v40 = vrot.slane %v10548_v41, %v14492_v61  ;;  %v14498_v24 = vrot.slane %v12609_v34, %v14492_v61  ;;  %v11362_v2 = vcombine.high %v7578_v36, %v7582_v1  ;;  %v7590_v18 = vld [vmem:[#allocation13 + $0x9e8] sm:$0xff]  ;;  %v7576_v34 = vld [vmem:[#allocation13 + $0x978] sm:$0xff] }
 0x843   :  { %7484 = vmatpush1.bf16.msra.mxu0 %v11329_v8  ;;  %v11361_v8 = vcombine.low %v7578_v36, %v7582_v1  ;;  %v11369_v13 = vcombine.low %v7586_v11, %v7590_v18  ;;  %v7584_v12 = vld [vmem:[#allocation13 + $0x9b8] sm:$0xff] }
 0x844   :  { %7485 = vmatprep.subr.bf16.mxu0 %v11338_v53  ;;  %10590 = vmatprep.subr.bf16.mxu1 %v14495_v40  ;;  %v11370_v53 = vcombine.high %v7586_v11, %v7590_v18  ;;  %v7588_v36 = vld [vmem:[#allocation13 + $0x9d8] sm:$0xff] }
 0x845   :  { %10591 = vmatpush1.bf16.xpose.msra.mxu1 %v14498_v24  ;;  %v7592_v1 = vld [vmem:[#allocation13 + $0x9f8] sm:$0xff] }
 0x847   :  { %7486 = vmatpush1.bf16.msra.mxu0 %v11337_v0  ;;  %v7572_v0 = vld [vmem:[#allocation13 + $0x958] sm:$0xff] }
 0x848   :  { %7799 = vmatprep.subr.bf16.mxu0 %v11346_v43  ;;  %v11349_v43 = vcombine.low %v7564_v46, %v7568_v56  ;;  %v11357_v41 = vcombine.low %v7572_v0, %v7576_v34 }
 0x84a   :  { %11342 = vmatmul.mubr.msk.bf16.vlgmr.msra.gmra.mrb[228].mxu0 %vm2036_vm5, %v14194_v55 }
 0x84b   :  { %7800 = vmatpush1.bf16.msra.mxu0 %v11345_v35  ;;  %7831 = vmatprep.mubr.bf16.mxu0 %v14823_v22  ;;  %v11366_v35 = vcombine.high %v7580_v7, %v7584_v12 }
 0x84c   :  { %7801 = vmatprep.subr.bf16.mxu0 %v11354_v10 }
 0x84d   :  { %v5974_v4 = vpop.f32.mrb[176].mxu0  ;;  %v14505_v19 = vpop.f32.mrb[160].mxu1 }
 0x84e   :  { %v14508_v60 = vadd.f32 %v5974_v4, %v14433_v9  ;;  %v5976_v14 = vpop.f32.mrb[177].mxu0  ;;  %v14510_v55 = vpop.f32.mrb[161].mxu1  ;;  %v11350_v9 = vcombine.high %v7564_v46, %v7568_v56  ;;  %v7534_v46 = vld [vmem:[#allocation13 + $0x828] sm:$0xff]  ;;  %v11373_v56 = vcombine.low %v7588_v36, %v7592_v1 }
 0x84f   :  { %v14513_v48 = vadd.f32 %v5976_v14, %v14439_v15  ;;  %v5978_v21 = vpop.f32.mrb[178].mxu0  ;;  %7802 = vmatpush1.bf16.msra.mxu0 %v11353_v37  ;;  %v9253_v32 = vpop.f32.mrb[162].mxu1  ;;  %v11358_v15 = vcombine.high %v7572_v0, %v7576_v34  ;;  %v7546_v34 = vld [vmem:[#allocation13 + $0x888] sm:$0xff] }
 0x850   :  { %v5979_v31 = vpop.f32.mrb[179].mxu0  ;;  %7803 = vmatprep.subr.bf16.mxu0 %v11362_v2  ;;  %v9254_v45 = vpop.f32.mrb[163].mxu1  ;;  %v11365_v21 = vcombine.low %v7580_v7, %v7584_v12 }
 0x851   :  { %v11374_v31 = vcombine.high %v7588_v36, %v7592_v1  ;;  %v7530_v45 = vld [vmem:[#allocation13 + $0x808] sm:$0xff] }
 0x852   :  { %v11381_v0 = vcombine.low %v7530_v45, %v7534_v46 }
 0x853   :  { %7804 = vmatpush1.bf16.msra.mxu0 %v11361_v8 }
 0x854   :  { %7805 = vmatprep.subr.bf16.mxu0 %v11370_v53 }
 0x857   :  { %7806 = vmatpush1.bf16.msra.mxu0 %v11369_v13  ;;  %v7538_v13 = vld [vmem:[#allocation13 + $0x848] sm:$0xff] }
 0x858   :  { %7881 = vmatprep.subr.bf16.mxu0 %v11350_v9  ;;  %v7542_v9 = vld [vmem:[#allocation13 + $0x868] sm:$0xff] }
 0x85a   :  { %11376 = vmatmul.mubr.msk.bf16.vlgmr.msra.gmra.mrb[232].mxu0 %vm2036_vm5, %v14215_v54 }
 0x85b   :  { %7882 = vmatpush1.bf16.msra.mxu0 %v11349_v43  ;;  %7913 = vmatprep.mubr.bf16.mxu0 %v14823_v22  ;;  %v7550_v43 = vld [vmem:[#allocation13 + $0x8a8] sm:$0xff] }
 0x85c   :  { %7883 = vmatprep.subr.bf16.mxu0 %v11358_v15  ;;  %v11389_v15 = vcombine.low %v7538_v13, %v7542_v9  ;;  %v11398_v7 = vcombine.high %v7546_v34, %v7550_v43 }
 0x85d   :  { %v6015_v10 = vpop.f32.mrb[180].mxu0  ;;  %v14518_v37 = vpop.f32.mrb[164].mxu1 }
 0x85e   :  { %v14521_v2 = vadd.f32 %v6015_v10, %v14448_v25  ;;  %v6017_v4 = vpop.f32.mrb[181].mxu0  ;;  %v14523_v11 = vpop.f32.mrb[165].mxu1  ;;  %v11382_v25 = vcombine.high %v7530_v45, %v7534_v46  ;;  %v7532_v46 = vld [vmem:[#allocation13 + $0x818] sm:$0xff] }
 0x85f   :  { %v14526_v18 = vadd.f32 %v6017_v4, %v14454_v38  ;;  %v6019_v14 = vpop.f32.mrb[182].mxu0  ;;  %7884 = vmatpush1.bf16.msra.mxu0 %v11357_v41  ;;  %v9335_v8 = vpop.f32.mrb[166].mxu1  ;;  %v11390_v38 = vcombine.high %v7538_v13, %v7542_v9  ;;  %v7554_v41 = vld [vmem:[#allocation13 + $0x8c8] sm:$0xff]  ;;  %v7540_v13 = vld [vmem:[#allocation13 + $0x858] sm:$0xff] }
 0x860   :  { %v6020_v32 = vpop.f32.mrb[183].mxu0  ;;  %7885 = vmatprep.subr.bf16.mxu0 %v11366_v35  ;;  %v9336_v53 = vpop.f32.mrb[167].mxu1  ;;  %v7558_v35 = vld [vmem:[#allocation13 + $0x8e8] sm:$0xff]  ;;  %v11397_v8 = vcombine.low %v7546_v34, %v7550_v43 }
 0x861   :  { %v11406_v45 = vcombine.high %v7554_v41, %v7558_v35 }
 0x863   :  { %7886 = vmatpush1.bf16.msra.mxu0 %v11365_v21 }
 0x864   :  { %7887 = vmatprep.subr.bf16.mxu0 %v11374_v31 }
 0x867   :  { %7888 = vmatpush1.bf16.msra.mxu0 %v11373_v56  ;;  %v7536_v56 = vld [vmem:[#allocation13 + $0x838] sm:$0xff] }
 0x868   :  { %8126 = vmatprep.subr.bf16.mxu0 %v11382_v25  ;;  %v11386_v25 = vcombine.high %v7532_v46, %v7536_v56  ;;  %v11385_v9 = vcombine.low %v7532_v46, %v7536_v56  ;;  %v8250_v46 = vld [vmem:[#allocation13 + $0xa08] sm:$0xff] }
 0x869   :  { %v8254_v56 = vld [vmem:[#allocation13 + $0xa28] sm:$0xff] }
 0x86a   :  { %11378 = vmatmul.mubr.msk.bf16.vlgmr.msra.gmra.mrb[236].mxu0 %vm2036_vm5, %v14215_v54 }
 0x86b   :  { %8127 = vmatpush1.bf16.msra.mxu0 %v11381_v0  ;;  %8158 = vmatprep.mubr.bf16.mxu0 %v14823_v22 }
 0x86c   :  { %8128 = vmatprep.subr.bf16.mxu0 %v11390_v38  ;;  %v7548_v38 = vld [vmem:[#allocation13 + $0x898] sm:$0xff] }
 0x86d   :  { %v6056_v12 = vpop.f32.mrb[184].mxu0  ;;  %v9576_v10 = vpop.f32.mrb[168].mxu1 }
 0x86e   :  { %v14532_v36 = vadd.f32 %v6056_v12, %v14463_v16  ;;  %v6058_v1 = vpop.f32.mrb[185].mxu0  ;;  %v14535_v4 = vadd.f32 %v9576_v10, %v14505_v19  ;;  %v9578_v14 = vpop.f32.mrb[169].mxu1  ;;  %v11405_v19 = vcombine.low %v7554_v41, %v7558_v35  ;;  %v7560_v12 = vld [vmem:[#allocation13 + $0x8f8] sm:$0xff] }
 0x86f   :  { %v14538_v54 = vadd.f32 %v6058_v1, %v14469_v5  ;;  %v6060_v21 = vpop.f32.mrb[186].mxu0  ;;  %8129 = vmatpush1.bf16.msra.mxu0 %v11389_v15  ;;  %v14541_v32 = vadd.f32 %v9578_v14, %v14510_v55  ;;  %v9580_v31 = vpop.f32.mrb[170].mxu1  ;;  %v7544_v5 = vld [vmem:[#allocation13 + $0x878] sm:$0xff] }
 0x870   :  { %v6061_v53 = vpop.f32.mrb[187].mxu0  ;;  %8130 = vmatprep.subr.bf16.mxu0 %v11398_v7  ;;  %v9581_v16 = vpop.f32.mrb[171].mxu1  ;;  %v11394_v0 = vcombine.high %v7540_v13, %v7544_v5  ;;  %v7552_v55 = vld [vmem:[#allocation13 + $0x8b8] sm:$0xff]  ;;  %v11393_v34 = vcombine.low %v7540_v13, %v7544_v5  ;;  %v8262_v13 = vld [vmem:[#allocation13 + $0xa68] sm:$0xff]  ;;  %v11417_v5 = vcombine.low %v8250_v46, %v8254_v56 }
 0x871   :  { %v11402_v43 = vcombine.high %v7548_v38, %v7552_v55  ;;  %v7556_v7 = vld [vmem:[#allocation13 + $0x8d8] sm:$0xff]  ;;  %v11401_v21 = vcombine.low %v7548_v38, %v7552_v55 }
 0x873   :  { %8131 = vmatpush1.bf16.msra.mxu0 %v11397_v8 }
 0x874   :  { %8132 = vmatprep.subr.bf16.mxu0 %v11406_v45  ;;  %v11410_v45 = vcombine.high %v7556_v7, %v7560_v12 }
 0x877   :  { %8133 = vmatpush1.bf16.msra.mxu0 %v11405_v19  ;;  %v11409_v19 = vcombine.low %v7556_v7, %v7560_v12  ;;  %v8274_v7 = vld [vmem:[#allocation13 + $0xac8] sm:$0xff] }
 0x878   :  { %8208 = vmatprep.subr.bf16.mxu0 %v11386_v25  ;;  %v11418_v25 = vcombine.high %v8250_v46, %v8254_v56  ;;  %v8278_v12 = vld [vmem:[#allocation13 + $0xae8] sm:$0xff]  ;;  %v8252_v56 = vld [vmem:[#allocation13 + $0xa18] sm:$0xff] }
 0x879   :  { %v11442_v46 = vcombine.high %v8274_v7, %v8278_v12 }
 0x87a   :  { %11412 = vmatmul.mubr.msk.bf16.vlgmr.msra.gmra.mrb[240].mxu0 %vm2036_vm5, %v14210_v17 }
 0x87b   :  { %8209 = vmatpush1.bf16.msra.mxu0 %v11385_v9  ;;  %8240 = vmatprep.mubr.bf16.mxu0 %v14823_v22 }
 0x87c   :  { %8210 = vmatprep.subr.bf16.mxu0 %v11394_v0  ;;  %v8266_v0 = vld [vmem:[#allocation13 + $0xa88] sm:$0xff] }
 0x87d   :  { %v14546_v15 = vpop.f32.mrb[188].mxu0  ;;  %v9658_v41 = vpop.f32.mrb[172].mxu1 }
 0x87e   :  { %v14548_v35 = vpop.f32.mrb[189].mxu0  ;;  %v14551_v10 = vadd.f32 %v9658_v41, %v14518_v37  ;;  %v9660_v1 = vpop.f32.mrb[173].mxu1  ;;  %v8258_v37 = vld [vmem:[#allocation13 + $0xa48] sm:$0xff] }
 0x87f   :  { %v6339_v14 = vpop.f32.mrb[190].mxu0  ;;  %8211 = vmatpush1.bf16.msra.mxu0 %v11393_v34  ;;  %v14554_v8 = vadd.f32 %v9660_v1, %v14523_v11  ;;  %v9662_v31 = vpop.f32.mrb[174].mxu1  ;;  %v11426_v9 = vcombine.high %v8258_v37, %v8262_v13  ;;  %v8270_v11 = vld [vmem:[#allocation13 + $0xaa8] sm:$0xff]  ;;  %v11425_v38 = vcombine.low %v8258_v37, %v8262_v13  ;;  %v8264_v13 = vld [vmem:[#allocation13 + $0xa78] sm:$0xff] }
 0x880   :  { %v6340_v53 = vpop.f32.mrb[191].mxu0  ;;  %8212 = vmatprep.subr.bf16.mxu0 %v11402_v43  ;;  %v9663_v16 = vpop.f32.mrb[175].mxu1  ;;  %v11434_v55 = vcombine.high %v8266_v0, %v8270_v11  ;;  %v11433_v31 = vcombine.low %v8266_v0, %v8270_v11 }
 0x883   :  { %8213 = vmatpush1.bf16.msra.mxu0 %v11401_v21 }
 0x884   :  { %8214 = vmatprep.subr.bf16.mxu0 %v11410_v45 }
 0x887   :  { %8215 = vmatpush1.bf16.msra.mxu0 %v11409_v19  ;;  %v8256_v19 = vld [vmem:[#allocation13 + $0xa38] sm:$0xff] }
 0x888   :  { %8486 = vmatprep.subr.bf16.mxu0 %v11418_v25  ;;  %v11441_v25 = vcombine.low %v8274_v7, %v8278_v12  ;;  %v11422_v37 = vcombine.high %v8252_v56, %v8256_v19  ;;  %v8276_v7 = vld [vmem:[#allocation13 + $0xad8] sm:$0xff] }
 0x889   :  { %v8280_v12 = vld [vmem:[#allocation13 + $0xaf8] sm:$0xff] }
 0x88a   :  { %11414 = vmatmul.mubr.msk.bf16.vlgmr.msra.gmra.mrb[244].mxu0 %vm2036_vm5, %v14210_v17 }
 0x88b   :  { %8487 = vmatpush1.bf16.msra.mxu0 %v11417_v5  ;;  %8518 = vmatprep.mubr.bf16.mxu0 %v14823_v22  ;;  %v11421_v5 = vcombine.low %v8252_v56, %v8256_v19 }
 0x88c   :  { %8488 = vmatprep.subr.bf16.mxu0 %v11426_v9 }
 0x88d   :  { %v14559_v34 = vpop.f32.mrb[192].mxu0  ;;  %v9936_v43 = vpop.f32.mrb[176].mxu1 }
 0x88e   :  { %v14561_v41 = vpop.f32.mrb[193].mxu0  ;;  %v14564_v1 = vadd.f32 %v9936_v43, %v14535_v4  ;;  %v9938_v14 = vpop.f32.mrb[177].mxu1  ;;  %v8260_v4 = vld [vmem:[#allocation13 + $0xa58] sm:$0xff] }
 0x88f   :  { %v6380_v21 = vpop.f32.mrb[194].mxu0  ;;  %8489 = vmatpush1.bf16.msra.mxu0 %v11425_v38  ;;  %v14567_v17 = vadd.f32 %v9938_v14, %v14541_v32  ;;  %v9940_v53 = vpop.f32.mrb[178].mxu1  ;;  %v11430_v9 = vcombine.high %v8260_v4, %v8264_v13  ;;  %v8268_v32 = vld [vmem:[#allocation13 + $0xa98] sm:$0xff]  ;;  %v11429_v0 = vcombine.low %v8260_v4, %v8264_v13  ;;  %v8618_v13 = vld [vmem:[#allocation13 + $0xb08] sm:$0xff] }
 0x890   :  { %v6381_v45 = vpop.f32.mrb[195].mxu0  ;;  %8490 = vmatprep.subr.bf16.mxu0 %v11434_v55  ;;  %v9941_v16 = vpop.f32.mrb[179].mxu1  ;;  %v8272_v38 = vld [vmem:[#allocation13 + $0xab8] sm:$0xff] }
 0x891   :  { %v11438_v11 = vcombine.high %v8268_v32, %v8272_v38  ;;  %v11437_v19 = vcombine.low %v8268_v32, %v8272_v38  ;;  %v8630_v38 = vld [vmem:[#allocation13 + $0xb68] sm:$0xff] }
 0x893   :  { %8491 = vmatpush1.bf16.msra.mxu0 %v11433_v31 }
 0x894   :  { %8492 = vmatprep.subr.bf16.mxu0 %v11442_v46 }
 0x897   :  { %8493 = vmatpush1.bf16.msra.mxu0 %v11441_v25 }
 0x898   :  { %8568 = vmatprep.subr.bf16.mxu0 %v11422_v37 }
 0x89a   :  { %11448 = vmatmul.mubr.msk.bf16.vlgmr.msra.gmra.mrb[248].mxu0 %vm2036_vm5, %v14245_v42 }
 0x89b   :  { %8569 = vmatpush1.bf16.msra.mxu0 %v11421_v5  ;;  %8600 = vmatprep.mubr.bf16.mxu0 %v14823_v22  ;;  %v8622_v5 = vld [vmem:[#allocation13 + $0xb28] sm:$0xff] }
 0x89c   :  { %8570 = vmatprep.subr.bf16.mxu0 %v11430_v9 }
 0x89d   :  { %v6417_v55 = vpop.f32.mrb[196].mxu0  ;;  %v10018_v43 = vpop.f32.mrb[180].mxu1 }
 0x89e   :  { %v6745_v14 = vadd.f32 %v14292_v6, %v6417_v55  ;;  %v14574_v21 = vadd.f32 %v10018_v43, %v14551_v10  ;;  %v6419_v31 = vpop.f32.mrb[197].mxu0  ;;  %v10020_v53 = vpop.f32.mrb[181].mxu1  ;;  %v11446_v6 = vcombine.high %v8276_v7, %v8280_v12  ;;  %v8634_v43 = vld [vmem:[#allocation13 + $0xb88] sm:$0xff] }
 0x89f   :  { %v6747_v45 = vadd.f32 %v14296_v44, %v6419_v31  ;;  %v14578_v16 = vadd.f32 %v10020_v53, %v14554_v8  ;;  %v6421_v46 = vpop.f32.mrb[198].mxu0  ;;  %8571 = vmatpush1.bf16.msra.mxu0 %v11429_v0  ;;  %v10022_v56 = vpop.f32.mrb[182].mxu1  ;;  %v11445_v8 = vcombine.low %v8276_v7, %v8280_v12  ;;  %v11454_v0 = vcombine.high %v8618_v13, %v8622_v5 }
 0x8a0   :  { %v7156_v25 = vadd.f32 %v14320_v27, %v6745_v14  ;;  %v6422_v37 = vpop.f32.mrb[199].mxu0  ;;  %v10023_v4 = vpop.f32.mrb[183].mxu1  ;;  %8572 = vmatprep.subr.bf16.mxu0 %v11438_v11  ;;  %v8626_v27 = vld [vmem:[#allocation13 + $0xb48] sm:$0xff] }
 0x8a1   :  { %v7157_v10 = vadd.f32 %v14324_v28, %v6747_v45  ;;  %v11453_v28 = vcombine.low %v8618_v13, %v8622_v5  ;;  %v11462_v55 = vcombine.high %v8626_v27, %v8630_v38  ;;  %v8646_v14 = vld [vmem:[#allocation13 + $0xbe8] sm:$0xff]  ;;  %v8624_v13 = vld [vmem:[#allocation13 + $0xb38] sm:$0xff] }
 0x8a2   :  { %v7524_v9 = vadd.f32 %v14350_v30, %v7156_v25  ;;  %v8638_v30 = vld [vmem:[#allocation13 + $0xba8] sm:$0xff] }
 0x8a3   :  { %v7525_v44 = vadd.f32 %v14357_v50, %v7157_v10  ;;  %8573 = vmatpush1.bf16.msra.mxu0 %v11437_v19  ;;  %v11461_v50 = vcombine.low %v8626_v27, %v8630_v38  ;;  %v11469_v19 = vcombine.low %v8634_v43, %v8638_v30  ;;  %v8640_v27 = vld [vmem:[#allocation13 + $0xbb8] sm:$0xff] }
 0x8a4   :  { %8574 = vmatprep.subr.bf16.mxu0 %v11446_v6  ;;  %v14585_v32 = vadd.f32 %v7524_v9, %v14521_v2  ;;  %v11470_v2 = vcombine.high %v8634_v43, %v8638_v30  ;;  %v8628_v9 = vld [vmem:[#allocation13 + $0xb58] sm:$0xff] }
 0x8a5   :  { %v14588_v11 = vadd.f32 %v7525_v44, %v14526_v18  ;;  %v8642_v18 = vld [vmem:[#allocation13 + $0xbc8] sm:$0xff]  ;;  %v8632_v44 = vld [vmem:[#allocation13 + $0xb78] sm:$0xff] }
 0x8a6   :  { %v11478_v6 = vcombine.high %v8642_v18, %v8646_v14  ;;  %v11477_v5 = vcombine.low %v8642_v18, %v8646_v14  ;;  %v8644_v43 = vld [vmem:[#allocation13 + $0xbd8] sm:$0xff] }
 0x8a7   :  { %8575 = vmatpush1.bf16.msra.mxu0 %v11445_v8  ;;  %v8648_v30 = vld [vmem:[#allocation13 + $0xbf8] sm:$0xff] }
 0x8a8   :  { %8854 = vmatprep.subr.bf16.mxu0 %v11454_v0  ;;  %v8636_v0 = vld [vmem:[#allocation13 + $0xb98] sm:$0xff] }
 0x8a9   :  { %v11474_v38 = vcombine.high %v8636_v0, %v8640_v27 }
 0x8aa   :  { %11450 = vmatmul.mubr.msk.bf16.vlgmr.msra.gmra.mrb[252].mxu0 %vm2036_vm5, %v14245_v42 }
 0x8ab   :  { %8855 = vmatpush1.bf16.msra.mxu0 %v11453_v28  ;;  %8886 = vmatprep.mubr.bf16.mxu0 %v14823_v22 }
 0x8ac   :  { %8856 = vmatprep.subr.bf16.mxu0 %v11462_v55 }
 0x8ad   :  { %v14593_v7 = vpop.f32.mrb[200].mxu0  ;;  %v10304_v12 = vpop.f32.mrb[184].mxu1 }
 0x8ae   :  { %v10434_v31 = vadd.f32 %v10304_v12, %v14564_v1  ;;  %v14596_v53 = vpop.f32.mrb[201].mxu0  ;;  %v10306_v45 = vpop.f32.mrb[185].mxu1  ;;  %v8620_v1 = vld [vmem:[#allocation13 + $0xb18] sm:$0xff] }
 0x8af   :  { %v10435_v46 = vadd.f32 %v10306_v45, %v14567_v17  ;;  %v6462_v56 = vpop.f32.mrb[202].mxu0  ;;  %8857 = vmatpush1.bf16.msra.mxu0 %v11461_v50  ;;  %v10308_v42 = vpop.f32.mrb[186].mxu1  ;;  %v11458_v17 = vcombine.high %v8620_v1, %v8624_v13  ;;  %v11457_v8 = vcombine.low %v8620_v1, %v8624_v13  ;;  %v9019_v1 = vld [vmem:[#allocation13 + $0xd08] sm:$0xff]  ;;  %v10474_v13 = vsub.s32 1, %v14489_v63 }
 0x8b0   :  { %v14600_v25 = vadd.f32 %v10434_v31, %v14466_v47  ;;  %v6463_v37 = vpop.f32.mrb[203].mxu0  ;;  %v10309_v4 = vpop.f32.mrb[187].mxu1  ;;  %8858 = vmatprep.subr.bf16.mxu0 %v11470_v2  ;;  %v11466_v47 = vcombine.high %v8628_v9, %v8632_v44  ;;  %v11473_v56 = vcombine.low %v8636_v0, %v8640_v27  ;;  %v9031_v0 = vld [vmem:[#allocation13 + $0xd68] sm:$0xff] }
 0x8b1   :  { %v14603_v10 = vadd.f32 %v10435_v46, %v14472_v62  ;;  %v11465_v62 = vcombine.low %v8628_v9, %v8632_v44 }
 0x8b3   :  { %8859 = vmatpush1.bf16.msra.mxu0 %v11469_v19 }
 0x8b4   :  { %8860 = vmatprep.subr.bf16.mxu0 %v11478_v6 }
 0x8b7   :  { %8861 = vmatpush1.bf16.msra.mxu0 %v11477_v5 }
 0x8b8   :  { %8936 = vmatprep.subr.bf16.mxu0 %v11458_v17 }
 0x8ba   :  { %11484 = vmatmul.mubr.msk.bf16.vlgmr.msra.gmra.mrb[0].mxu0 %vm2036_vm5, %v14260_v51 }
 0x8bb   :  { %8937 = vmatpush1.bf16.msra.mxu0 %v11457_v8  ;;  %8968 = vmatprep.mubr.bf16.mxu0 %v14823_v22 }
 0x8bc   :  { %8938 = vmatprep.subr.bf16.mxu0 %v11466_v47  ;;  %v9027_v47 = vld [vmem:[#allocation13 + $0xd48] sm:$0xff] }
 0x8bd   :  { %v6662_v28 = vpop.f32.mrb[204].mxu0  ;;  %v10386_v55 = vpop.f32.mrb[188].mxu1 }
 0x8be   :  { %v6663_v50 = vadd.f32 %v6662_v28, %v14546_v15  ;;  %v10438_v2 = vadd.f32 %v10386_v55, %v14574_v21  ;;  %v6664_v12 = vpop.f32.mrb[205].mxu0  ;;  %v10388_v18 = vpop.f32.mrb[189].mxu1  ;;  %v11482_v15 = vcombine.high %v8644_v43, %v8648_v30  ;;  %v10470_v21 = vsub.s32 0, %v14489_v63  ;;  %v9035_v28 = vld [vmem:[#allocation13 + $0xd88] sm:$0xff] }
 0x8bf   :  { %v6665_v14 = vadd.f32 %v6664_v12, %v14548_v35  ;;  %v10439_v31 = vadd.f32 %v10388_v18, %v14578_v16  ;;  %v6666_v45 = vpop.f32.mrb[206].mxu0  ;;  %8939 = vmatpush1.bf16.msra.mxu0 %v11465_v62  ;;  %v10390_v46 = vpop.f32.mrb[190].mxu1  ;;  %v9023_v16 = vld [vmem:[#allocation13 + $0xd28] sm:$0xff]  ;;  %v11498_v62 = vcombine.high %v9027_v47, %v9031_v0 }
 0x8c0   :  { %v7152_v42 = vadd.f32 %v14306_v3, %v6663_v50  ;;  %v10454_v19 = vadd.f32 %v10438_v2, %v14481_v52  ;;  %v6667_v37 = vpop.f32.mrb[207].mxu0  ;;  %v10391_v4 = vpop.f32.mrb[191].mxu1  ;;  %8940 = vmatprep.subr.bf16.mxu0 %v11474_v38  ;;  %v14622_v52 = vld [vmem:[#allocation14] sm:$0xff]  ;;  %v11490_v44 = vcombine.high %v9019_v1, %v9023_v16  ;;  %v9039_v55 = vld [vmem:[#allocation13 + $0xda8] sm:$0xff] }
 0x8c1   :  { %v7153_v6 = vadd.f32 %v14310_v23, %v6665_v14  ;;  %v10455_v35 = vadd.f32 %v10439_v31, %v14487_v39  ;;  %v11481_v23 = vcombine.low %v8644_v43, %v8648_v30  ;;  %v10471_v8 = vrot.slane %v14622_v52, %v10470_v21  ;;  %v9047_v2 = vld [vmem:[#allocation13 + $0xde8] sm:$0xff]  ;;  %v9029_v4 = vld [vmem:[#allocation13 + $0xd58] sm:$0xff] }
 0x8c2   :  { %v7520_v5 = vadd.f32 %v14337_v20, %v7152_v42  ;;  %v14620_v3 = vadd.f32 %v10454_v19, %v14585_v32  ;;  %v10475_v32 = vrot.slane %v14622_v52, %v10474_v13  ;;  %v11497_v43 = vcombine.low %v9027_v47, %v9031_v0  ;;  %v9025_v42 = vld [vmem:[#allocation13 + $0xd38] sm:$0xff]  ;;  %v8987_v47 = vld [vmem:[#allocation13 + $0xc08] sm:$0xff] }
 0x8c3   :  { %v7521_v17 = vadd.f32 %v14341_v58, %v7153_v6  ;;  %v14626_v9 = vadd.f32 %v10455_v35, %v14588_v11  ;;  %8941 = vmatpush1.bf16.msra.mxu0 %v11473_v56  ;;  %v11489_v58 = vcombine.low %v9019_v1, %v9023_v16  ;;  %v11506_v30 = vcombine.high %v9035_v28, %v9039_v55  ;;  %v9021_v56 = vld [vmem:[#allocation13 + $0xd18] sm:$0xff]  ;;  %v8991_v0 = vld [vmem:[#allocation13 + $0xc28] sm:$0xff] }
 0x8c4   :  { %v10442_v39 = vadd.f32 %v7520_v5, %v14478_v29  ;;  %8942 = vmatprep.subr.bf16.mxu0 %v11482_v15  ;;  %v11505_v31 = vcombine.low %v9035_v28, %v9039_v55  ;;  %v11494_v37 = vcombine.high %v9021_v56, %v9025_v42  ;;  %v11493_v15 = vcombine.low %v9021_v56, %v9025_v42  ;;  %v9041_v6 = vld [vmem:[#allocation13 + $0xdb8] sm:$0xff] }
 0x8c5   :  { %v10443_v20 = vadd.f32 %v7521_v17, %v14484_v49  ;;  %v9045_v13 = vld [vmem:[#allocation13 + $0xdd8] sm:$0xff] }
 0x8c6   :  { %v10458_v27 = vadd.f32 %v14600_v25, %v10442_v39  ;;  %v9049_v5 = vld [vmem:[#allocation13 + $0xdf8] sm:$0xff] }
 0x8c7   :  { %8943 = vmatpush1.bf16.msra.mxu0 %v11481_v23  ;;  %v10459_v11 = vadd.f32 %v14603_v10, %v10443_v20  ;;  %v9043_v10 = vld [vmem:[#allocation13 + $0xdc8] sm:$0xff]  ;;  %v8997_v42 = vld [vmem:[#allocation13 + $0xc58] sm:$0xff] }
 0x8c8   :  { %9256 = vmatprep.subr.bf16.mxu0 %v11490_v44  ;;  %v10508_v38 = vadd.f32 %v10471_v8, %v10458_v27  ;;  %v11514_v46 = vcombine.high %v9043_v10, %v9047_v2  ;;  %v11513_v19 = vcombine.low %v9043_v10, %v9047_v2  ;;  %v11517_v27 = vcombine.low %v9045_v13, %v9049_v5 }
 0x8c9   :  { %v10509_v29 = vadd.f32 %v10475_v32, %v10459_v11  ;;  %v11518_v32 = vcombine.high %v9045_v13, %v9049_v5  ;;  %v8995_v11 = vld [vmem:[#allocation13 + $0xc48] sm:$0xff] }
 0x8ca   :  { %11486 = vmatmul.mubr.msk.bf16.vlgmr.msra.gmra.mrb[4].mxu0 %vm2036_vm5, %v14260_v51  ;;  %v10516_v25 = vpack.c.bf16 %v10508_v38, %v10508_v38 }
 0x8cb   :  { %9257 = vmatpush1.bf16.msra.mxu0 %v11489_v58  ;;  %v10517_v49 = vpack.c.bf16 %v10509_v29, %v10509_v29  ;;  %9288 = vmatprep.mubr.bf16.mxu0 %v14823_v22  ;;  %v11526_v58 = vcombine.high %v8987_v47, %v8991_v0  ;;  %v9007_v29 = vld [vmem:[#allocation13 + $0xca8] sm:$0xff] }
 0x8cc   :  { %9258 = vmatprep.subr.bf16.mxu0 %v11498_v62  ;;  %v8999_v62 = vld [vmem:[#allocation13 + $0xc68] sm:$0xff] }
 0x8cd   :  { %v6703_v50 = vpop.f32.mrb[208].mxu0  ;;  %10622 = vmatprep.mubr.bf16.mxu1 %v10517_v49  ;;  %v11534_v38 = vcombine.high %v8995_v11, %v8999_v62  ;;  %v11533_v28 = vcombine.low %v8995_v11, %v8999_v62  ;;  %v9727_v11 = vld [vmem:[#allocation13 + $0xea8] sm:$0xff] }
 0x8ce   :  { %v14638_v12 = vadd.f32 %v6703_v50, %v14559_v34  ;;  %v6705_v18 = vpop.f32.mrb[209].mxu0  ;;  %10623 = vmatmul.mubr.bf16.vlgmr.msra.gmra.mrb[192].mxu1 %v10516_v25  ;;  %v9033_v34 = vld [vmem:[#allocation13 + $0xd78] sm:$0xff]  ;;  %v9015_v25 = vld [vmem:[#allocation13 + $0xce8] sm:$0xff] }
 0x8cf   :  { %v14641_v14 = vadd.f32 %v6705_v18, %v14561_v41  ;;  %v6707_v51 = vpop.f32.mrb[210].mxu0  ;;  %9259 = vmatpush1.bf16.msra.mxu0 %v11497_v43  ;;  %v11502_v21 = vcombine.high %v9029_v4, %v9033_v34  ;;  %v9037_v41 = vld [vmem:[#allocation13 + $0xd98] sm:$0xff]  ;;  %v11501_v35 = vcombine.low %v9029_v4, %v9033_v34  ;;  %v9011_v43 = vld [vmem:[#allocation13 + $0xcc8] sm:$0xff] }
 0x8d0   :  { %v6708_v45 = vpop.f32.mrb[211].mxu0  ;;  %9260 = vmatprep.subr.bf16.mxu0 %v11506_v30  ;;  %v11510_v1 = vcombine.high %v9037_v41, %v9041_v6  ;;  %v11509_v8 = vcombine.low %v9037_v41, %v9041_v6  ;;  %v11550_v51 = vcombine.high %v9011_v43, %v9015_v25  ;;  %v9009_v4 = vld [vmem:[#allocation13 + $0xcb8] sm:$0xff] }
 0x8d1   :  { %v8993_v45 = vld [vmem:[#allocation13 + $0xc38] sm:$0xff] }
 0x8d2   :  { %v9013_v41 = vld [vmem:[#allocation13 + $0xcd8] sm:$0xff] }
 0x8d3   :  { %9261 = vmatpush1.bf16.msra.mxu0 %v11505_v31  ;;  %v8989_v31 = vld [vmem:[#allocation13 + $0xc18] sm:$0xff] }
 0x8d4   :  { %9262 = vmatprep.subr.bf16.mxu0 %v11514_v46  ;;  %v11549_v46 = vcombine.low %v9011_v43, %v9015_v25  ;;  %v11530_v56 = vcombine.high %v8989_v31, %v8993_v45  ;;  %v9017_v6 = vld [vmem:[#allocation13 + $0xcf8] sm:$0xff] }
 0x8d7   :  { %9263 = vmatpush1.bf16.msra.mxu0 %v11513_v19  ;;  %v9001_v19 = vld [vmem:[#allocation13 + $0xc78] sm:$0xff] }
 0x8d8   :  { %9338 = vmatprep.subr.bf16.mxu0 %v11494_v37  ;;  %v11538_v37 = vcombine.high %v8997_v42, %v9001_v19  ;;  %v11537_v34 = vcombine.low %v8997_v42, %v9001_v19  ;;  %v9729_v42 = vld [vmem:[#allocation13 + $0xeb8] sm:$0xff] }
 0x8da   :  { %11520 = vmatmul.mubr.msk.bf16.vlgmr.msra.gmra.mrb[8].mxu0 %vm2036_vm5, %v14282_v26 }
 0x8db   :  { %9339 = vmatpush1.bf16.msra.mxu0 %v11493_v15  ;;  %9370 = vmatprep.mubr.bf16.mxu0 %v14823_v22 }
 0x8dc   :  { %9340 = vmatprep.subr.bf16.mxu0 %v11502_v21 }
 0x8dd   :  { %v6785_v16 = vpop.f32.mrb[212].mxu0 }
 0x8de   :  { %v14647_v17 = vadd.f32 %v6785_v16, %v14593_v7  ;;  %v6787_v23 = vpop.f32.mrb[213].mxu0  ;;  %v11525_v7 = vcombine.low %v8987_v47, %v8991_v0  ;;  %v9715_v0 = vld [vmem:[#allocation13 + $0xe48] sm:$0xff] }
 0x8df   :  { %v14650_v39 = vadd.f32 %v6787_v23, %v14596_v53  ;;  %v6789_v44 = vpop.f32.mrb[214].mxu0  ;;  %9341 = vmatpush1.bf16.msra.mxu0 %v11501_v35  ;;  %v9003_v53 = vld [vmem:[#allocation13 + $0xc88] sm:$0xff] }
 0x8e0   :  { %v6790_v20 = vpop.f32.mrb[215].mxu0  ;;  %9342 = vmatprep.subr.bf16.mxu0 %v11510_v1  ;;  %v11542_v55 = vcombine.high %v9003_v53, %v9007_v29  ;;  %v11541_v18 = vcombine.low %v9003_v53, %v9007_v29  ;;  %v11554_v44 = vcombine.high %v9013_v41, %v9017_v6  ;;  %v9731_v53 = vld [vmem:[#allocation13 + $0xec8] sm:$0xff] }
 0x8e1   :  { %v9711_v20 = vld [vmem:[#allocation13 + $0xe28] sm:$0xff] }
 0x8e2   :  { %v9735_v29 = vld [vmem:[#allocation13 + $0xee8] sm:$0xff] }
 0x8e3   :  { %9343 = vmatpush1.bf16.msra.mxu0 %v11509_v8  ;;  %v9707_v8 = vld [vmem:[#allocation13 + $0xe08] sm:$0xff] }
 0x8e4   :  { %9344 = vmatprep.subr.bf16.mxu0 %v11518_v32  ;;  %v11553_v32 = vcombine.low %v9013_v41, %v9017_v6  ;;  %v11562_v47 = vcombine.high %v9707_v8, %v9711_v20 }
 0x8e7   :  { %9345 = vmatpush1.bf16.msra.mxu0 %v11517_v27  ;;  %v9719_v27 = vld [vmem:[#allocation13 + $0xe68] sm:$0xff] }
 0x8e8   :  { %9583 = vmatprep.subr.bf16.mxu0 %v11526_v58  ;;  %v11570_v58 = vcombine.high %v9715_v0, %v9719_v27  ;;  %v11569_v62 = vcombine.low %v9715_v0, %v9719_v27  ;;  %v10095_v0 = vld [vmem:[#allocation13 + $0xfa8] sm:$0xff] }
 0x8ea   :  { %11522 = vmatmul.mubr.msk.bf16.vlgmr.msra.gmra.mrb[12].mxu0 %vm2036_vm5, %v14282_v26 }
 0x8eb   :  { %9584 = vmatpush1.bf16.msra.mxu0 %v11525_v7  ;;  %9615 = vmatprep.mubr.bf16.mxu0 %v14823_v22 }
 0x8ec   :  { %9585 = vmatprep.subr.bf16.mxu0 %v11534_v38 }
 0x8ed   :  { %v7063_v49 = vpop.f32.mrb[216].mxu0 }
 0x8ee   :  { %v14656_v30 = vadd.f32 %v7063_v49, %v14638_v12  ;;  %v7065_v50 = vpop.f32.mrb[217].mxu0  ;;  %v11529_v12 = vcombine.low %v8989_v31, %v8993_v45  ;;  %v11585_v31 = vcombine.low %v9731_v53, %v9735_v29  ;;  %v9717_v45 = vld [vmem:[#allocation13 + $0xe58] sm:$0xff] }
 0x8ef   :  { %v14659_v10 = vadd.f32 %v7065_v50, %v14641_v14  ;;  %v7067_v2 = vpop.f32.mrb[218].mxu0  ;;  %9586 = vmatpush1.bf16.msra.mxu0 %v11533_v28  ;;  %v9005_v14 = vld [vmem:[#allocation13 + $0xc98] sm:$0xff] }
 0x8f0   :  { %v7068_v26 = vpop.f32.mrb[219].mxu0  ;;  %9587 = vmatprep.subr.bf16.mxu0 %v11542_v55  ;;  %v11546_v15 = vcombine.high %v9005_v14, %v9009_v4  ;;  %v11545_v5 = vcombine.low %v9005_v14, %v9009_v4  ;;  %v11586_v2 = vcombine.high %v9731_v53, %v9735_v29  ;;  %v9737_v14 = vld [vmem:[#allocation13 + $0xef8] sm:$0xff] }
 0x8f1   :  { %v9709_v26 = vld [vmem:[#allocation13 + $0xe18] sm:$0xff] }
 0x8f2   :  { %v10077_v29 = vld [vmem:[#allocation13 + $0xf18] sm:$0xff] }
 0x8f3   :  { %9588 = vmatpush1.bf16.msra.mxu0 %v11541_v18 }
 0x8f4   :  { %9589 = vmatprep.subr.bf16.mxu0 %v11550_v51  ;;  %v9713_v51 = vld [vmem:[#allocation13 + $0xe38] sm:$0xff] }
 0x8f7   :  { %9590 = vmatpush1.bf16.msra.mxu0 %v11549_v46  ;;  %v11565_v46 = vcombine.low %v9709_v26, %v9713_v51 }
 0x8f8   :  { %9665 = vmatprep.subr.bf16.mxu0 %v11530_v56 }
 0x8fa   :  { %11556 = vmatmul.mubr.msk.bf16.vlgmr.msra.gmra.mrb[16].mxu0 %vm2036_vm5, %v14279_v33 }
 0x8fb   :  { %9666 = vmatpush1.bf16.msra.mxu0 %v11529_v12  ;;  %9697 = vmatprep.mubr.bf16.mxu0 %v14823_v22 }
 0x8fc   :  { %9667 = vmatprep.subr.bf16.mxu0 %v11538_v37  ;;  %v9733_v37 = vld [vmem:[#allocation13 + $0xed8] sm:$0xff] }
 0x8fd   :  { %v7145_v21 = vpop.f32.mrb[220].mxu0 }
 0x8fe   :  { %v14665_v35 = vadd.f32 %v7145_v21, %v14647_v17  ;;  %v7147_v1 = vpop.f32.mrb[221].mxu0  ;;  %v11561_v17 = vcombine.low %v9707_v8, %v9711_v20  ;;  %v11589_v8 = vcombine.low %v9733_v37, %v9737_v14  ;;  %v10083_v20 = vld [vmem:[#allocation13 + $0xf48] sm:$0xff] }
 0x8ff   :  { %v14668_v16 = vadd.f32 %v7147_v1, %v14650_v39  ;;  %v7149_v13 = vpop.f32.mrb[222].mxu0  ;;  %9668 = vmatpush1.bf16.msra.mxu0 %v11537_v34  ;;  %v9723_v39 = vld [vmem:[#allocation13 + $0xe88] sm:$0xff] }
 0x900   :  { %v7150_v23 = vpop.f32.mrb[223].mxu0  ;;  %9669 = vmatprep.subr.bf16.mxu0 %v11546_v15  ;;  %v11578_v7 = vcombine.high %v9723_v39, %v9727_v11  ;;  %v11577_v25 = vcombine.low %v9723_v39, %v9727_v11  ;;  %v11590_v13 = vcombine.high %v9733_v37, %v9737_v14  ;;  %v10103_v39 = vld [vmem:[#allocation13 + $0xfe8] sm:$0xff] }
 0x901   :  { %v10075_v23 = vld [vmem:[#allocation13 + $0xf08] sm:$0xff] }
 0x903   :  { %9670 = vmatpush1.bf16.msra.mxu0 %v11545_v5 }
 0x904   :  { %9671 = vmatprep.subr.bf16.mxu0 %v11554_v44  ;;  %v10079_v44 = vld [vmem:[#allocation13 + $0xf28] sm:$0xff] }
 0x907   :  { %9672 = vmatpush1.bf16.msra.mxu0 %v11553_v32  ;;  %v11597_v32 = vcombine.low %v10075_v23, %v10079_v44 }
 0x908   :  { %9943 = vmatprep.subr.bf16.mxu0 %v11562_v47 }
 0x90a   :  { %11558 = vmatmul.mubr.msk.bf16.vlgmr.msra.gmra.mrb[20].mxu0 %vm2036_vm5, %v14279_v33 }
 0x90b   :  { %9944 = vmatpush1.bf16.msra.mxu0 %v11561_v17  ;;  %9975 = vmatprep.mubr.bf16.mxu0 %v14823_v22 }
 0x90c   :  { %9945 = vmatprep.subr.bf16.mxu0 %v11570_v58  ;;  %v10099_v58 = vld [vmem:[#allocation13 + $0xfc8] sm:$0xff] }
 0x90d   :  { %v7431_v38 = vpop.f32.mrb[224].mxu0  ;;  %v11622_v53 = vcombine.high %v10099_v58, %v10103_v39 }
 0x90e   :  { %v7522_v28 = vadd.f32 %v7431_v38, %v14656_v30  ;;  %v7433_v55 = vpop.f32.mrb[225].mxu0  ;;  %v11566_v30 = vcombine.high %v9709_v26, %v9713_v51  ;;  %v10097_v26 = vld [vmem:[#allocation13 + $0xfb8] sm:$0xff] }
 0x90f   :  { %v7523_v49 = vadd.f32 %v7433_v55, %v14659_v10  ;;  %v7435_v43 = vpop.f32.mrb[226].mxu0  ;;  %9946 = vmatpush1.bf16.msra.mxu0 %v11569_v62  ;;  %v9721_v10 = vld [vmem:[#allocation13 + $0xe78] sm:$0xff] }
 0x910   :  { %v14676_v50 = vadd.f32 %v7522_v28, %v14508_v60  ;;  %v7436_v33 = vpop.f32.mrb[227].mxu0  ;;  %9947 = vmatprep.subr.bf16.mxu0 %v11578_v7  ;;  %v11574_v56 = vcombine.high %v9717_v45, %v9721_v10  ;;  %v9725_v60 = vld [vmem:[#allocation13 + $0xe98] sm:$0xff] }
 0x911   :  { %v14679_v18 = vadd.f32 %v7523_v49, %v14513_v48  ;;  %v11573_v48 = vcombine.low %v9717_v45, %v9721_v10  ;;  %v11582_v19 = vcombine.high %v9725_v60, %v9729_v42  ;;  %v11581_v41 = vcombine.low %v9725_v60, %v9729_v42  ;;  %v10081_v28 = vld [vmem:[#allocation13 + $0xf38] sm:$0xff] }
 0x912   :  { %v11602_v55 = vcombine.high %v10077_v29, %v10081_v28  ;;  %v10085_v49 = vld [vmem:[#allocation13 + $0xf58] sm:$0xff] }
 0x913   :  { %9948 = vmatpush1.bf16.msra.mxu0 %v11577_v25  ;;  %v10089_v43 = vld [vmem:[#allocation13 + $0xf78] sm:$0xff]  ;;  %v11601_v25 = vcombine.low %v10077_v29, %v10081_v28  ;;  %v12608_v29 = vld [vmem:[#allocation16] sm:$0xff] }
 0x914   :  { %9949 = vmatprep.subr.bf16.mxu0 %v11586_v2  ;;  %v11610_v33 = vcombine.high %v10085_v49, %v10089_v43  ;;  %v10093_v2 = vld [vmem:[#allocation13 + $0xf98] sm:$0xff]  ;;  %v11609_v51 = vcombine.low %v10085_v49, %v10089_v43  ;;  %v10533_v28 = vcombine.high %v12608_v29, %v12608_v29 }
 0x915   :  { %v10101_v45 = vld [vmem:[#allocation13 + $0xfd8] sm:$0xff]  ;;  %v11617_v60 = vcombine.low %v10093_v2, %v10097_v26 }
 0x916   :  { %v10105_v10 = vld [vmem:[#allocation13 + $0xff8] sm:$0xff] }
 0x917   :  { %9950 = vmatpush1.bf16.msra.mxu0 %v11585_v31  ;;  %v11618_v31 = vcombine.high %v10093_v2, %v10097_v26 }
 0x918   :  { %10025 = vmatprep.subr.bf16.mxu0 %v11566_v30 }
 0x91a   :  { %11592 = vmatmul.mubr.msk.bf16.vlgmr.msra.gmra.mrb[24].mxu0 %vm2036_vm5, %v14344_v59 }
 0x91b   :  { %10026 = vmatpush1.bf16.msra.mxu0 %v11565_v46  ;;  %10057 = vmatprep.mubr.bf16.mxu0 %v14823_v22 }
 0x91c   :  { %10027 = vmatprep.subr.bf16.mxu0 %v11574_v56 }
 0x91d   :  { %v7513_v12 = vpop.f32.mrb[228].mxu0 }
 0x91e   :  { %v7526_v4 = vadd.f32 %v7513_v12, %v14665_v35  ;;  %v7515_v34 = vpop.f32.mrb[229].mxu0  ;;  %v11598_v35 = vcombine.high %v10075_v23, %v10079_v44 }
 0x91f   :  { %v7527_v15 = vadd.f32 %v7515_v34, %v14668_v16  ;;  %v7517_v21 = vpop.f32.mrb[230].mxu0  ;;  %10028 = vmatpush1.bf16.msra.mxu0 %v11573_v48  ;;  %v10087_v16 = vld [vmem:[#allocation13 + $0xf68] sm:$0xff]  ;;  %v11626_v48 = vcombine.high %v10101_v45, %v10105_v10 }
 0x920   :  { %v14687_v6 = vadd.f32 %v7526_v4, %v14532_v36  ;;  %v7518_v1 = vpop.f32.mrb[231].mxu0  ;;  %10029 = vmatprep.subr.bf16.mxu0 %v11582_v19  ;;  %v11606_v47 = vcombine.high %v10083_v20, %v10087_v16  ;;  %v10091_v36 = vld [vmem:[#allocation13 + $0xf88] sm:$0xff]  ;;  %v11625_v19 = vcombine.low %v10101_v45, %v10105_v10 }
 0x921   :  { %v14690_v5 = vadd.f32 %v7527_v15, %v14538_v54  ;;  %v11605_v54 = vcombine.low %v10083_v20, %v10087_v16  ;;  %v11614_v27 = vcombine.high %v10091_v36, %v10095_v0  ;;  %v11613_v7 = vcombine.low %v10091_v36, %v10095_v0 }
 0x923   :  { %10030 = vmatpush1.bf16.msra.mxu0 %v11581_v41 }
 0x924   :  { %10031 = vmatprep.subr.bf16.mxu0 %v11590_v13 }
 0x927   :  { %10032 = vmatpush1.bf16.msra.mxu0 %v11589_v8 }
 0x928   :  { %10311 = vmatprep.subr.bf16.mxu0 %v11598_v35 }
 0x92a   :  { %11594 = vmatmul.mubr.msk.bf16.vlgmr.msra.gmra.mrb[28].mxu0 %vm2036_vm5, %v14344_v59  ;;  %v11621_v59 = vcombine.low %v10099_v58, %v10103_v39 }
 0x92b   :  { %10312 = vmatpush1.bf16.msra.mxu0 %v11597_v32  ;;  %10343 = vmatprep.mubr.bf16.mxu0 %v14823_v22 }
 0x92c   :  { %10313 = vmatprep.subr.bf16.mxu0 %v11606_v47 }
 0x92d   :  { %v7833_v17 = vpop.f32.mrb[232].mxu0 }
 0x92e   :  { %v7835_v11 = vpop.f32.mrb[233].mxu0 }
 0x92f   :  { %v7837_v62 = vpop.f32.mrb[234].mxu0  ;;  %10314 = vmatpush1.bf16.msra.mxu0 %v11605_v54 }
 0x930   :  { %v7838_v38 = vpop.f32.mrb[235].mxu0  ;;  %10315 = vmatprep.subr.bf16.mxu0 %v11614_v27 }
 0x931   :  { %v10580_v38 = vcombine.high %v14495_v40, %v14495_v40 }
 0x933   :  { %10316 = vmatpush1.bf16.msra.mxu0 %v11613_v7  ;;  %10630 = vmatprep.subr.bf16.mxu1 %v10580_v38 }
 0x934   :  { %10317 = vmatprep.subr.bf16.mxu0 %v11622_v53  ;;  %v10578_v53 = vcombine.high %v14498_v24, %v14498_v24 }
 0x936   :  { %10631 = vmatpush1.bf16.xpose.msra.mxu1 %v10578_v53 }
 0x937   :  { %10318 = vmatpush1.bf16.msra.mxu0 %v11621_v59  ;;  %v10547_v59 = vrot.slane %v10533_v28, %v14492_v61 }
 0x938   :  { %10393 = vmatprep.subr.bf16.mxu0 %v11602_v55 }
 0x93a   :  { %11628 = vmatmul.mubr.msk.bf16.vlgmr.msra.gmra.mrb[32].mxu0 %vm2036_vm5, %v14379_v57 }
 0x93b   :  { %10394 = vmatpush1.bf16.msra.mxu0 %v11601_v25  ;;  %10425 = vmatprep.mubr.bf16.mxu0 %v14823_v22  ;;  %v10549_v25 = vcombine.high %v10547_v59, %v10547_v59 }
 0x93c   :  { %10395 = vmatprep.subr.bf16.mxu0 %v11610_v33 }
 0x93d   :  { %v7915_v30 = vpop.f32.mrb[236].mxu0  ;;  %v14710_v40 = vrot.slane %v10549_v25, %v14492_v61 }
 0x93e   :  { %v7917_v46 = vpop.f32.mrb[237].mxu0 }
 0x93f   :  { %v7919_v56 = vpop.f32.mrb[238].mxu0  ;;  %10396 = vmatpush1.bf16.msra.mxu0 %v11609_v51  ;;  %10670 = vmatprep.subr.bf16.mxu1 %v14710_v40 }
 0x940   :  { %v7920_v42 = vpop.f32.mrb[239].mxu0  ;;  %10397 = vmatprep.subr.bf16.mxu0 %v11618_v31 }
 0x943   :  { %10398 = vmatpush1.bf16.msra.mxu0 %v11617_v60 }
 0x944   :  { %10399 = vmatprep.subr.bf16.mxu0 %v11626_v48 }
 0x947   :  { %10400 = vmatpush1.bf16.msra.mxu0 %v11625_v19 }
 0x94a   :  { %11630 = vmatmul.mubr.msk.bf16.vlgmr.msra.gmra.mrb[36].mxu0 %vm2036_vm5, %v14379_v57 }
 0x94d   :  { %v8160_v22 = vpop.f32.mrb[240].mxu0 }
 0x94e   :  { %v8161_v12 = vadd.f32 %v8160_v22, %v7833_v17  ;;  %v8162_v37 = vpop.f32.mrb[241].mxu0 }
 0x94f   :  { %v8163_v14 = vadd.f32 %v8162_v37, %v7835_v11  ;;  %v8164_v4 = vpop.f32.mrb[242].mxu0 }
 0x950   :  { %v8165_v34 = vpop.f32.mrb[243].mxu0 }
 0x95d   :  { %v8242_v15 = vpop.f32.mrb[244].mxu0 }
 0x95e   :  { %v8243_v21 = vadd.f32 %v8242_v15, %v7915_v30  ;;  %v8244_v41 = vpop.f32.mrb[245].mxu0 }
 0x95f   :  { %v8245_v1 = vadd.f32 %v8244_v41, %v7917_v46  ;;  %v8246_v13 = vpop.f32.mrb[246].mxu0 }
 0x960   :  { %v8247_v23 = vpop.f32.mrb[247].mxu0 }
 0x96d   :  { %v8520_v44 = vpop.f32.mrb[248].mxu0 }
 0x96e   :  { %v8611_v8 = vadd.f32 %v8520_v44, %v8161_v12  ;;  %v8522_v35 = vpop.f32.mrb[249].mxu0 }
 0x96f   :  { %v8612_v20 = vadd.f32 %v8522_v35, %v8163_v14  ;;  %v8524_v16 = vpop.f32.mrb[250].mxu0 }
 0x970   :  { %v8525_v32 = vpop.f32.mrb[251].mxu0 }
 0x97d   :  { %v8602_v47 = vpop.f32.mrb[252].mxu0 }
 0x97e   :  { %v8615_v57 = vadd.f32 %v8602_v47, %v8243_v21  ;;  %v8604_v36 = vpop.f32.mrb[253].mxu0 }
 0x97f   :  { %v8616_v0 = vadd.f32 %v8604_v36, %v8245_v1  ;;  %v8606_v54 = vpop.f32.mrb[254].mxu0  ;;  %v10478_v36 = vsub.s32 2, %v14489_v63 }
 0x980   :  { %v8607_v27 = vpop.f32.mrb[255].mxu0  ;;  %v10482_v54 = vsub.s32 3, %v14489_v63 }
 0x981   :  { %v10490_v27 = vsub.s32 5, %v14489_v63  ;;  %v10479_v53 = vrot.slane %v14622_v52, %v10478_v36 }
 0x98d   :  { %v8888_v17 = vpop.f32.mrb[0].mxu0 }
 0x98e   :  { %v8979_v58 = vadd.f32 %v8888_v17, %v8611_v8  ;;  %v8890_v39 = vpop.f32.mrb[1].mxu0 }
 0x98f   :  { %v8980_v11 = vadd.f32 %v8890_v39, %v8612_v20  ;;  %v8892_v62 = vpop.f32.mrb[2].mxu0 }
 0x990   :  { %v8893_v7 = vpop.f32.mrb[3].mxu0 }
 0x99d   :  { %v8970_v55 = vpop.f32.mrb[4].mxu0 }
 0x99e   :  { %v14705_v49 = vadd.f32 %v8970_v55, %v8615_v57  ;;  %v8972_v43 = vpop.f32.mrb[5].mxu0  ;;  %v10483_v55 = vrot.slane %v14622_v52, %v10482_v54 }
 0x99f   :  { %v14707_v33 = vadd.f32 %v8972_v43, %v8616_v0  ;;  %v8974_v2 = vpop.f32.mrb[6].mxu0  ;;  %v10491_v43 = vrot.slane %v14622_v52, %v10490_v27 }
 0x9a0   :  { %v8975_v26 = vpop.f32.mrb[7].mxu0 }
 0x9ad   :  { %v9290_v24 = vpop.f32.mrb[8].mxu0 }
 0x9ae   :  { %v9292_v51 = vpop.f32.mrb[9].mxu0 }
 0x9af   :  { %v9294_v31 = vpop.f32.mrb[10].mxu0 }
 0x9b0   :  { %v9295_v30 = vpop.f32.mrb[11].mxu0 }
 0x9b1   :  { %v10563_v30 = vrot.slane %v10547_v59, %v14492_v61 }
 0x9bd   :  { %v9372_v45 = vpop.f32.mrb[12].mxu0 }
 0x9be   :  { %v9374_v10 = vpop.f32.mrb[13].mxu0 }
 0x9bf   :  { %v9376_v46 = vpop.f32.mrb[14].mxu0 }
 0x9c0   :  { %v9377_v56 = vpop.f32.mrb[15].mxu0 }
 0x9cd   :  { %v9617_v60 = vpop.f32.mrb[16].mxu0 }
 0x9ce   :  { %v9618_v42 = vadd.f32 %v9617_v60, %v9290_v24  ;;  %v9619_v48 = vpop.f32.mrb[17].mxu0 }
 0x9cf   :  { %v9620_v19 = vadd.f32 %v9619_v48, %v9292_v51  ;;  %v9621_v22 = vpop.f32.mrb[18].mxu0  ;;  %v10513_v51 = vadd.f32 %v10491_v43, %v14626_v9  ;;  %v10498_v9 = vsub.s32 7, %v14489_v63 }
 0x9d0   :  { %v9622_v12 = vpop.f32.mrb[19].mxu0 }
 0x9dd   :  { %v9699_v37 = vpop.f32.mrb[20].mxu0 }
 0x9de   :  { %v9700_v14 = vadd.f32 %v9699_v37, %v9372_v45  ;;  %v9701_v4 = vpop.f32.mrb[21].mxu0  ;;  %v10579_v37 = vcombine.high %v10563_v30, %v10563_v30 }
 0x9df   :  { %v9702_v34 = vadd.f32 %v9701_v4, %v9374_v10  ;;  %v9703_v15 = vpop.f32.mrb[22].mxu0  ;;  %v10521_v10 = vpack.c.bf16 %v10513_v51, %v10513_v51  ;;  %v10494_v4 = vsub.s32 6, %v14489_v63 }
 0x9e0   :  { %v9704_v21 = vpop.f32.mrb[23].mxu0 }
 0x9ed   :  { %v9977_v41 = vpop.f32.mrb[24].mxu0 }
 0x9ee   :  { %v10068_v1 = vadd.f32 %v9977_v41, %v9618_v42  ;;  %v9979_v13 = vpop.f32.mrb[25].mxu0 }
 0x9ef   :  { %v10069_v23 = vadd.f32 %v9979_v13, %v9620_v19  ;;  %v9981_v44 = vpop.f32.mrb[26].mxu0  ;;  %v10499_v19 = vrot.slane %v14622_v52, %v10498_v9 }
 0x9f0   :  { %v9982_v8 = vpop.f32.mrb[27].mxu0 }
 0x9fd   :  { %v10059_v35 = vpop.f32.mrb[28].mxu0 }
 0x9fe   :  { %v10072_v20 = vadd.f32 %v10059_v35, %v9700_v14  ;;  %v10061_v16 = vpop.f32.mrb[29].mxu0 }
 0x9ff   :  { %v10073_v32 = vadd.f32 %v10061_v16, %v9702_v34  ;;  %v10063_v47 = vpop.f32.mrb[30].mxu0 }
 0xa00   :  { %v10064_v57 = vpop.f32.mrb[31].mxu0 }
 0xa0d   :  { %v10345_v0 = vpop.f32.mrb[32].mxu0 }
 0xa0e   :  { %v10436_v17 = vadd.f32 %v10345_v0, %v10068_v1  ;;  %v10347_v39 = vpop.f32.mrb[33].mxu0 }
 0xa0f   :  { %v10437_v62 = vadd.f32 %v10347_v39, %v10069_v23  ;;  %v10349_v7 = vpop.f32.mrb[34].mxu0 }
 0xa10   :  { %v10452_v38 = vadd.f32 %v10436_v17, %v8979_v58  ;;  %v10350_v29 = vpop.f32.mrb[35].mxu0  ;;  %v10486_v58 = vsub.s32 4, %v14489_v63 }
 0xa11   :  { %v10453_v28 = vadd.f32 %v10437_v62, %v8980_v11  ;;  %v10581_v11 = vcombine.high %v14710_v40, %v14710_v40 }
 0xa12   :  { %v10460_v25 = vadd.f32 %v10452_v38, %v14676_v50  ;;  %v10487_v50 = vrot.slane %v14622_v52, %v10486_v58 }
 0xa13   :  { %v10461_v2 = vadd.f32 %v10453_v28, %v14679_v18 }
 0xa14   :  { %v10510_v26 = vadd.f32 %v10479_v53, %v10460_v25  ;;  %v10512_v60 = vadd.f32 %v10487_v50, %v14620_v3  ;;  %v10495_v3 = vrot.slane %v14622_v52, %v10494_v4 }
 0xa15   :  { %v10511_v24 = vadd.f32 %v10483_v55, %v10461_v2 }
 0xa16   :  { %v10518_v45 = vpack.c.bf16 %v10510_v26, %v10510_v26  ;;  %v10520_v14 = vpack.c.bf16 %v10512_v60, %v10512_v60 }
 0xa17   :  { %v10519_v31 = vpack.c.bf16 %v10511_v24, %v10511_v24 }
 0xa19   :  { %10662 = vmatprep.mubr.bf16.mxu1 %v10519_v31 }
 0xa1a   :  { %10663 = vmatmul.mubr.bf16.vlgmr.msra.gmra.mrb[192].mxu1 %v10518_v45 }
 0xa1b   :  { %10702 = vmatprep.mubr.bf16.mxu1 %v10521_v10  ;;  %10671 = vmatpush1.bf16.xpose.msra.mxu1 %v10563_v30 }
 0xa1c   :  { %10710 = vmatprep.subr.bf16.mxu1 %v10581_v11 }
 0xa1d   :  { %v10427_v18 = vpop.f32.mrb[36].mxu0 }
 0xa1e   :  { %v10440_v46 = vadd.f32 %v10427_v18, %v10072_v20  ;;  %v10429_v56 = vpop.f32.mrb[37].mxu0 }
 0xa1f   :  { %v10441_v61 = vadd.f32 %v10429_v56, %v10073_v32  ;;  %v10431_v59 = vpop.f32.mrb[38].mxu0 }
 0xa20   :  { %v10456_v42 = vadd.f32 %v10440_v46, %v14705_v49  ;;  %v10432_v40 = vpop.f32.mrb[39].mxu0 }
 0xa21   :  { %v10457_v48 = vadd.f32 %v10441_v61, %v14707_v33  ;;  %v11631_v33 = vld [vmem:[#allocation17] ss:$0 sm:$0xff] }
 0xa22   :  { %v10464_v22 = vadd.f32 %v10456_v42, %v14687_v6 }
 0xa23   :  { %v10465_v12 = vadd.f32 %v10457_v48, %v14690_v5 }
 0xa24   :  { %v10514_v49 = vadd.f32 %v10495_v3, %v10464_v22 }
 0xa25   :  { %v10515_v34 = vadd.f32 %v10499_v19, %v10465_v12 }
 0xa26   :  { %10703 = vmatmul.mubr.bf16.vlgmr.msra.gmra.mrb[192].mxu1 %v10520_v14  ;;  %v10522_v21 = vpack.c.bf16 %v10514_v49, %v10514_v49 }
 0xa27   :  { %v10523_v15 = vpack.c.bf16 %v10515_v34, %v10515_v34  ;;  %10711 = vmatpush1.bf16.xpose.msra.mxu1 %v10579_v37 }
 0xa29   :  { %10742 = vmatprep.mubr.bf16.mxu1 %v10523_v15 }
 0xa32   :  { %10743 = vmatmul.mubr.bf16.vlgmr.msra.gmra.mrb[192].mxu1 %v10522_v21 }
 0xb05   :  { %v10744_v6 = vpop.f32.mrb[192].mxu1 }
 0xb06   :  { %v12260_v5 = vadd.f32 %v11631_v33, %v10744_v6  ;;  %v10746_v41 = vpop.f32.mrb[193].mxu1 }
 0xb07   :  { %v10747_v1 = vpop.f32.mrb[194].mxu1 }
 0xb08   :  { %v10748_v63 = vpop.f32.mrb[195].mxu1  ;;  %10751 = vst.msk [vmem:[#allocation19] sm:$0x3] %vm10750_vm13, %v12260_v5 }
 0xb09   :  { %12841 = shalt.err (!%p12838_p0)
}
 0xb0a   :  { %s12842_s8 = scalar_lea.hbm %s14759_s11, 32 }
 0xb0b   :  { %p12843_p1 = scmp.ne.s32.totalorder %s14759_s11, %s12842_s8  ;;  %p12846_p2 = scmp.lt.u32.totalorder %s12842_s8, %s14759_s11 }
 0xb0d   :  { %p12848_p3 = pnand %p12846_p2, %p12843_p1 }
 0xb0f   :  { %12851 = shalt.err (!%p12848_p3)
}
 0xb10   :  { %10761 = dma.vmem_to_hbm [thread:$0]  %s10759_s17, 32, %s14759_s11, [#allocation4]  }
 0xb11   :  { %12864 = dma.done.wait [#allocation4], 32  }
 0xb12   :  { %12865 = vsyncadd [#allocation4], 4294967264 }
 0xb13   :  { %10765 = vsyncpa [#allocation3], 1 }
 0xb14   :  { %10766 = vsyncpa [#allocation6], 1 }
 0xb15   :  { %10767 = vsyncpa [#allocation9], 1 }
 0xb16   :  { %10768 = vsyncpa [#allocation12], 1 }
 0xb17   :  { %10769 = vsyncpa [#allocation15], 1 }
 0xb18   :  { %10770 = vsyncpa [#allocation18], 1 }
 0xb19   :  { %10771 = vsyncpa [#allocation4], 1 }

</bundles_post_ra>
